<compile_context>
chip_gen: v6e
topology: v6e:2x2x1
jax: 0.10.0
libtpu: 0.0.40
codegen_flags: <defaults>
</compile_context>

<pallas_src>
import jax
import jax.numpy as jnp
from jax.experimental import pallas as pl
from jax.experimental.pallas import tpu as pltpu

KH, KW, CIN, COUT = 7, 3, 3, 4        # fused-conv geometry (kh, kw, in, out)


def _fused_conv_kernel(wc_ref, base_ref, x_ref, out_ref):
    # wc_ref:   SMEM (KH*KW*CIN*COUT,)   fused weights, flat order (kh, kw, ic, oc)
    # base_ref: VMEM (COUT, 1, Wo)       (fused bias | bb) + other per (chan, col)
    # x_ref:    VMEM (1, CIN, H, W)      one NCHW batch element
    # out_ref:  VMEM (1, COUT, Ho, Wo)   one NCHW output batch element
    x = x_ref[0]                                        # (CIN, H, W)
    _, H, W = x.shape
    Ho = H - (KH - 1)

    # conva's width padding (0,1), done in-register (no wrapper HBM pass).
    zcol = jnp.zeros((CIN, H, 1), x.dtype)
    xp = jnp.concatenate([zcol, x, zcol], axis=2)       # (CIN, H, W+2)

    # Fused conv as per-tap scalar FMAs on the VPU.  Tap slices are hoisted
    # across the 4 output channels (63 slices, 252 FMAs total).
    accs = [jnp.zeros((Ho, W), jnp.float32) for _ in range(COUT)]
    for kh in range(KH):
        for kw in range(KW):
            for ic in range(CIN):
                tap = xp[ic, kh:kh + Ho, kw:kw + W]     # (Ho, W)
                flat = ((kh * KW + kw) * CIN + ic) * COUT
                for oc in range(COUT):
                    accs[oc] = accs[oc] + wc_ref[flat + oc] * tap

    interior = jnp.stack(accs, axis=0)                  # (COUT, Ho, W)
    # Edge output columns get zero conv contribution (convb sees only its own
    # zero padding of var1 there); base already carries bb + other for them.
    zedge = jnp.zeros((COUT, Ho, 1), jnp.float32)
    conv_full = jnp.concatenate([zedge, interior, zedge], axis=2)   # (COUT, Ho, Wo)

    out_ref[0] = (conv_full + base_ref[...]).astype(out_ref.dtype)


def init_params(key):
    """Deterministic Conv2d-style init (uniform +-1/sqrt(fan_in))."""
    k1, k2, k3, k4 = jax.random.split(key, 4)
    bound_a = 1.0 / (3 * 1 * 3) ** 0.5
    wa = jax.random.uniform(k1, (8, 3, 1, 3), jnp.float32, -bound_a, bound_a)
    ba = jax.random.uniform(k2, (8,), jnp.float32, -bound_a, bound_a)
    bound_b = 1.0 / (8 * 7 * 1) ** 0.5
    wb = jax.random.uniform(k3, (4, 8, 7, 1), jnp.float32, -bound_b, bound_b)
    bb = jax.random.uniform(k4, (4,), jnp.float32, -bound_b, bound_b)
    return dict(wa=wa, ba=ba, wb=wb, bb=bb)


@jax.jit
def _forward_impl(x_nchw, wa, ba, wb, bb, other):
    B, Cin, H, W = x_nchw.shape
    Ho, Wo = H - (KH - 1), W + 2

    # ---- algebraic fusion of the two linear convs (tiny tensors, fused by XLA)
    wb2 = wb[:, :, :, 0]                                # (4, 8, 7)  oc, m, kh
    wa2 = wa[:, :, 0, :]                                # (8, 3, 3)  m, ic, kw
    wc = jnp.einsum('omh,miw->oihw', wb2, wa2)          # (4, 3, 7, 3) oc, ic, kh, kw
    bias_int = bb + jnp.einsum('omh,m->o', wb2, ba)     # (4,)
    # flat order (kh, kw, ic, oc) for static SMEM indexing inside the kernel
    wc_flat = jnp.transpose(wc, (2, 3, 1, 0)).reshape(-1)

    # ---- additive term: fused bias on interior cols, bb on edge cols, + other
    base = bias_int[:, None] + other[None, :]           # (4, Wo)
    base = base.at[:, 0].set(bb + other[0])
    base = base.at[:, Wo - 1].set(bb + other[Wo - 1])
    base3 = base[:, None, :]                            # (4, 1, Wo)

    return pl.pallas_call(
        _fused_conv_kernel,
        out_shape=jax.ShapeDtypeStruct((B, COUT, Ho, Wo), jnp.float32),
        grid=(B,),
        in_specs=[
            pl.BlockSpec(memory_space=pltpu.MemorySpace.SMEM),        # wc_flat
            pl.BlockSpec((COUT, 1, Wo), lambda b: (0, 0, 0)),         # base (resident)
            pl.BlockSpec((1, Cin, H, W), lambda b: (b, 0, 0, 0)),     # x, one batch/step
        ],
        out_specs=pl.BlockSpec((1, COUT, Ho, Wo), lambda b: (b, 0, 0, 0)),
        compiler_params=pltpu.CompilerParams(
            dimension_semantics=("parallel",)),          # use both TCs on v7x
    )(wc_flat, base3, x_nchw)


def model_forward(x_nchw, params, other=None, *, other_key=None):
    """Pallas implementation of Model.forward. x_nchw: (B, 3, H, W) float32."""
    B, _, H, W = x_nchw.shape
    Wo = W + 2
    if other is None:
        # torch.randn([var2.shape[0]]) -> deterministic stand-in
        other = jax.random.normal(other_key, (B,), jnp.float32)
    assert other.shape == (B,) and Wo == B, \
        "torch broadcast of (B,) against NCHW width requires B == W_out"
    return _forward_impl(x_nchw, params['wa'], params['ba'],
                         params['wb'], params['bb'], other)


def reference_forward(x_nchw, params, other):
    """Pure-JAX reference (mirrors torch semantics exactly)."""
    var1 = jax.lax.conv_general_dilated(
        x_nchw, params['wa'], (1, 1), [(0, 0), (1, 1)],
        dimension_numbers=('NCHW', 'OIHW', 'NCHW')) + params['ba'][None, :, None, None]
    var2 = jax.lax.conv_general_dilated(
        var1, params['wb'], (1, 1), [(0, 0), (1, 1)],
        dimension_numbers=('NCHW', 'OIHW', 'NCHW')) + params['bb'][None, :, None, None]
    return var2 + other  # (B,) broadcasts along last (width) axis


if __name__ == "__main__":
    key = jax.random.PRNGKey(0)
    kx, kp, ko = jax.random.split(key, 3)

    # Small shapes consistent with the module: B == W+2 so `+ other` is legal.
    B, C, H, W = 8, 3, 16, 6
    x = jax.random.normal(kx, (B, C, H, W), jnp.float32)
    params = init_params(kp)
    other = jax.random.normal(ko, (B,), jnp.float32)

    out = model_forward(x, params, other=other)
    out = jax.block_until_ready(out)

    ref = reference_forward(x, params, other)
    assert out.shape == (B, 4, H - 6, W + 2), out.shape
    assert jnp.allclose(out, ref, atol=1e-4, rtol=1e-4), \
        float(jnp.max(jnp.abs(out - ref)))

    print("KERNEL_OK")
</pallas_src>

<mosaic_0001>
module attributes {stable_mosaic.version = 11 : i64} {
  func.func @_fused_conv_kernel(%arg0: i32, %arg1: memref<252xf32, #tpu.memory_space<smem>>, %arg2: memref<4x1x8xf32, #tpu.memory_space<vmem>>, %arg3: memref<1x3x16x6xf32, #tpu.memory_space<vmem>>, %arg4: memref<1x4x10x8xf32, #tpu.memory_space<vmem>>) attributes {dimension_semantics = [#tpu.dimension_semantics<parallel>], iteration_bounds = array<i64: 8>, scalar_prefetch = 0 : i64, scratch_operands = 0 : i64, tpu.core_type = #tpu.core_type<tc>, window_params = [{transform_indices = @transform_0, window_bounds = array<i64: 252>}, {pipeline_mode = #tpu.pipeline_mode<synchronous>, transform_indices = @transform_1, window_bounds = array<i64: 4, 1, 8>}, {transform_indices = @transform_2, window_bounds = array<i64: 1, 3, 16, 6>}, {transform_indices = @transform_3, window_bounds = array<i64: 1, 4, 10, 8>}]} {
    %c0 = arith.constant 0 : index
    %c0_0 = arith.constant 0 : index
    %c0_1 = arith.constant 0 : index
    %c0_2 = arith.constant 0 : index
    %0 = vector.load %arg3[%c0, %c0_0, %c0_1, %c0_2] : memref<1x3x16x6xf32, #tpu.memory_space<vmem>>, vector<1x3x16x6xf32>
    %1 = vector.shape_cast %0 : vector<1x3x16x6xf32> to vector<3x16x6xf32>
    %cst = arith.constant 0.000000e+00 : f32
    %2 = vector.broadcast %cst : f32 to vector<3x16x1xf32>
    %3 = tpu.concatenate %2, %1, %2 in 2 : vector<3x16x1xf32>, vector<3x16x6xf32>, vector<3x16x1xf32> -> vector<3x16x8xf32>
    %cst_3 = arith.constant 0.000000e+00 : f32
    %4 = vector.broadcast %cst_3 : f32 to vector<10x6xf32>
    %cst_4 = arith.constant 0.000000e+00 : f32
    %5 = vector.broadcast %cst_4 : f32 to vector<10x6xf32>
    %cst_5 = arith.constant 0.000000e+00 : f32
    %6 = vector.broadcast %cst_5 : f32 to vector<10x6xf32>
    %cst_6 = arith.constant 0.000000e+00 : f32
    %7 = vector.broadcast %cst_6 : f32 to vector<10x6xf32>
    %8 = vector.extract_strided_slice %3 {offsets = [0, 0, 0], sizes = [1, 10, 6], strides = [1, 1, 1]} : vector<3x16x8xf32> to vector<1x10x6xf32>
    %9 = vector.shape_cast %8 : vector<1x10x6xf32> to vector<10x6xf32>
    %c0_7 = arith.constant 0 : index
    %10 = memref.load %arg1[%c0_7] : memref<252xf32, #tpu.memory_space<smem>>
    %11 = vector.broadcast %10 : f32 to vector<10x6xf32>
    %12 = arith.mulf %11, %9 : vector<10x6xf32>
    %13 = arith.addf %4, %12 : vector<10x6xf32>
    %c1 = arith.constant 1 : index
    %14 = memref.load %arg1[%c1] : memref<252xf32, #tpu.memory_space<smem>>
    %15 = vector.broadcast %14 : f32 to vector<10x6xf32>
    %16 = arith.mulf %15, %9 : vector<10x6xf32>
    %17 = arith.addf %5, %16 : vector<10x6xf32>
    %c2 = arith.constant 2 : index
    %18 = memref.load %arg1[%c2] : memref<252xf32, #tpu.memory_space<smem>>
    %19 = vector.broadcast %18 : f32 to vector<10x6xf32>
    %20 = arith.mulf %19, %9 : vector<10x6xf32>
    %21 = arith.addf %6, %20 : vector<10x6xf32>
    %c3 = arith.constant 3 : index
    %22 = memref.load %arg1[%c3] : memref<252xf32, #tpu.memory_space<smem>>
    %23 = vector.broadcast %22 : f32 to vector<10x6xf32>
    %24 = arith.mulf %23, %9 : vector<10x6xf32>
    %25 = arith.addf %7, %24 : vector<10x6xf32>
    %26 = vector.extract_strided_slice %3 {offsets = [1, 0, 0], sizes = [1, 10, 6], strides = [1, 1, 1]} : vector<3x16x8xf32> to vector<1x10x6xf32>
    %27 = vector.shape_cast %26 : vector<1x10x6xf32> to vector<10x6xf32>
    %c4 = arith.constant 4 : index
    %28 = memref.load %arg1[%c4] : memref<252xf32, #tpu.memory_space<smem>>
    %29 = vector.broadcast %28 : f32 to vector<10x6xf32>
    %30 = arith.mulf %29, %27 : vector<10x6xf32>
    %31 = arith.addf %13, %30 : vector<10x6xf32>
    %c5 = arith.constant 5 : index
    %32 = memref.load %arg1[%c5] : memref<252xf32, #tpu.memory_space<smem>>
    %33 = vector.broadcast %32 : f32 to vector<10x6xf32>
    %34 = arith.mulf %33, %27 : vector<10x6xf32>
    %35 = arith.addf %17, %34 : vector<10x6xf32>
    %c6 = arith.constant 6 : index
    %36 = memref.load %arg1[%c6] : memref<252xf32, #tpu.memory_space<smem>>
    %37 = vector.broadcast %36 : f32 to vector<10x6xf32>
    %38 = arith.mulf %37, %27 : vector<10x6xf32>
    %39 = arith.addf %21, %38 : vector<10x6xf32>
    %c7 = arith.constant 7 : index
    %40 = memref.load %arg1[%c7] : memref<252xf32, #tpu.memory_space<smem>>
    %41 = vector.broadcast %40 : f32 to vector<10x6xf32>
    %42 = arith.mulf %41, %27 : vector<10x6xf32>
    %43 = arith.addf %25, %42 : vector<10x6xf32>
    %44 = vector.extract_strided_slice %3 {offsets = [2, 0, 0], sizes = [1, 10, 6], strides = [1, 1, 1]} : vector<3x16x8xf32> to vector<1x10x6xf32>
    %45 = vector.shape_cast %44 : vector<1x10x6xf32> to vector<10x6xf32>
    %c8 = arith.constant 8 : index
    %46 = memref.load %arg1[%c8] : memref<252xf32, #tpu.memory_space<smem>>
    %47 = vector.broadcast %46 : f32 to vector<10x6xf32>
    %48 = arith.mulf %47, %45 : vector<10x6xf32>
    %49 = arith.addf %31, %48 : vector<10x6xf32>
    %c9 = arith.constant 9 : index
    %50 = memref.load %arg1[%c9] : memref<252xf32, #tpu.memory_space<smem>>
    %51 = vector.broadcast %50 : f32 to vector<10x6xf32>
    %52 = arith.mulf %51, %45 : vector<10x6xf32>
    %53 = arith.addf %35, %52 : vector<10x6xf32>
    %c10 = arith.constant 10 : index
    %54 = memref.load %arg1[%c10] : memref<252xf32, #tpu.memory_space<smem>>
    %55 = vector.broadcast %54 : f32 to vector<10x6xf32>
    %56 = arith.mulf %55, %45 : vector<10x6xf32>
    %57 = arith.addf %39, %56 : vector<10x6xf32>
    %c11 = arith.constant 11 : index
    %58 = memref.load %arg1[%c11] : memref<252xf32, #tpu.memory_space<smem>>
    %59 = vector.broadcast %58 : f32 to vector<10x6xf32>
    %60 = arith.mulf %59, %45 : vector<10x6xf32>
    %61 = arith.addf %43, %60 : vector<10x6xf32>
    %62 = vector.extract_strided_slice %3 {offsets = [0, 0, 1], sizes = [1, 10, 6], strides = [1, 1, 1]} : vector<3x16x8xf32> to vector<1x10x6xf32>
    %63 = vector.shape_cast %62 : vector<1x10x6xf32> to vector<10x6xf32>
    %c12 = arith.constant 12 : index
    %64 = memref.load %arg1[%c12] : memref<252xf32, #tpu.memory_space<smem>>
    %65 = vector.broadcast %64 : f32 to vector<10x6xf32>
    %66 = arith.mulf %65, %63 : vector<10x6xf32>
    %67 = arith.addf %49, %66 : vector<10x6xf32>
    %c13 = arith.constant 13 : index
    %68 = memref.load %arg1[%c13] : memref<252xf32, #tpu.memory_space<smem>>
    %69 = vector.broadcast %68 : f32 to vector<10x6xf32>
    %70 = arith.mulf %69, %63 : vector<10x6xf32>
    %71 = arith.addf %53, %70 : vector<10x6xf32>
    %c14 = arith.constant 14 : index
    %72 = memref.load %arg1[%c14] : memref<252xf32, #tpu.memory_space<smem>>
    %73 = vector.broadcast %72 : f32 to vector<10x6xf32>
    %74 = arith.mulf %73, %63 : vector<10x6xf32>
    %75 = arith.addf %57, %74 : vector<10x6xf32>
    %c15 = arith.constant 15 : index
    %76 = memref.load %arg1[%c15] : memref<252xf32, #tpu.memory_space<smem>>
    %77 = vector.broadcast %76 : f32 to vector<10x6xf32>
    %78 = arith.mulf %77, %63 : vector<10x6xf32>
    %79 = arith.addf %61, %78 : vector<10x6xf32>
    %80 = vector.extract_strided_slice %3 {offsets = [1, 0, 1], sizes = [1, 10, 6], strides = [1, 1, 1]} : vector<3x16x8xf32> to vector<1x10x6xf32>
    %81 = vector.shape_cast %80 : vector<1x10x6xf32> to vector<10x6xf32>
    %c16 = arith.constant 16 : index
    %82 = memref.load %arg1[%c16] : memref<252xf32, #tpu.memory_space<smem>>
    %83 = vector.broadcast %82 : f32 to vector<10x6xf32>
    %84 = arith.mulf %83, %81 : vector<10x6xf32>
    %85 = arith.addf %67, %84 : vector<10x6xf32>
    %c17 = arith.constant 17 : index
    %86 = memref.load %arg1[%c17] : memref<252xf32, #tpu.memory_space<smem>>
    %87 = vector.broadcast %86 : f32 to vector<10x6xf32>
    %88 = arith.mulf %87, %81 : vector<10x6xf32>
    %89 = arith.addf %71, %88 : vector<10x6xf32>
    %c18 = arith.constant 18 : index
    %90 = memref.load %arg1[%c18] : memref<252xf32, #tpu.memory_space<smem>>
    %91 = vector.broadcast %90 : f32 to vector<10x6xf32>
    %92 = arith.mulf %91, %81 : vector<10x6xf32>
    %93 = arith.addf %75, %92 : vector<10x6xf32>
    %c19 = arith.constant 19 : index
    %94 = memref.load %arg1[%c19] : memref<252xf32, #tpu.memory_space<smem>>
    %95 = vector.broadcast %94 : f32 to vector<10x6xf32>
    %96 = arith.mulf %95, %81 : vector<10x6xf32>
    %97 = arith.addf %79, %96 : vector<10x6xf32>
    %98 = vector.extract_strided_slice %3 {offsets = [2, 0, 1], sizes = [1, 10, 6], strides = [1, 1, 1]} : vector<3x16x8xf32> to vector<1x10x6xf32>
    %99 = vector.shape_cast %98 : vector<1x10x6xf32> to vector<10x6xf32>
    %c20 = arith.constant 20 : index
    %100 = memref.load %arg1[%c20] : memref<252xf32, #tpu.memory_space<smem>>
    %101 = vector.broadcast %100 : f32 to vector<10x6xf32>
    %102 = arith.mulf %101, %99 : vector<10x6xf32>
    %103 = arith.addf %85, %102 : vector<10x6xf32>
    %c21 = arith.constant 21 : index
    %104 = memref.load %arg1[%c21] : memref<252xf32, #tpu.memory_space<smem>>
    %105 = vector.broadcast %104 : f32 to vector<10x6xf32>
    %106 = arith.mulf %105, %99 : vector<10x6xf32>
    %107 = arith.addf %89, %106 : vector<10x6xf32>
    %c22 = arith.constant 22 : index
    %108 = memref.load %arg1[%c22] : memref<252xf32, #tpu.memory_space<smem>>
    %109 = vector.broadcast %108 : f32 to vector<10x6xf32>
    %110 = arith.mulf %109, %99 : vector<10x6xf32>
    %111 = arith.addf %93, %110 : vector<10x6xf32>
    %c23 = arith.constant 23 : index
    %112 = memref.load %arg1[%c23] : memref<252xf32, #tpu.memory_space<smem>>
    %113 = vector.broadcast %112 : f32 to vector<10x6xf32>
    %114 = arith.mulf %113, %99 : vector<10x6xf32>
    %115 = arith.addf %97, %114 : vector<10x6xf32>
    %116 = vector.extract_strided_slice %3 {offsets = [0, 0, 2], sizes = [1, 10, 6], strides = [1, 1, 1]} : vector<3x16x8xf32> to vector<1x10x6xf32>
    %117 = vector.shape_cast %116 : vector<1x10x6xf32> to vector<10x6xf32>
    %c24 = arith.constant 24 : index
    %118 = memref.load %arg1[%c24] : memref<252xf32, #tpu.memory_space<smem>>
    %119 = vector.broadcast %118 : f32 to vector<10x6xf32>
    %120 = arith.mulf %119, %117 : vector<10x6xf32>
    %121 = arith.addf %103, %120 : vector<10x6xf32>
    %c25 = arith.constant 25 : index
    %122 = memref.load %arg1[%c25] : memref<252xf32, #tpu.memory_space<smem>>
    %123 = vector.broadcast %122 : f32 to vector<10x6xf32>
    %124 = arith.mulf %123, %117 : vector<10x6xf32>
    %125 = arith.addf %107, %124 : vector<10x6xf32>
    %c26 = arith.constant 26 : index
    %126 = memref.load %arg1[%c26] : memref<252xf32, #tpu.memory_space<smem>>
    %127 = vector.broadcast %126 : f32 to vector<10x6xf32>
    %128 = arith.mulf %127, %117 : vector<10x6xf32>
    %129 = arith.addf %111, %128 : vector<10x6xf32>
    %c27 = arith.constant 27 : index
    %130 = memref.load %arg1[%c27] : memref<252xf32, #tpu.memory_space<smem>>
    %131 = vector.broadcast %130 : f32 to vector<10x6xf32>
    %132 = arith.mulf %131, %117 : vector<10x6xf32>
    %133 = arith.addf %115, %132 : vector<10x6xf32>
    %134 = vector.extract_strided_slice %3 {offsets = [1, 0, 2], sizes = [1, 10, 6], strides = [1, 1, 1]} : vector<3x16x8xf32> to vector<1x10x6xf32>
    %135 = vector.shape_cast %134 : vector<1x10x6xf32> to vector<10x6xf32>
    %c28 = arith.constant 28 : index
    %136 = memref.load %arg1[%c28] : memref<252xf32, #tpu.memory_space<smem>>
    %137 = vector.broadcast %136 : f32 to vector<10x6xf32>
    %138 = arith.mulf %137, %135 : vector<10x6xf32>
    %139 = arith.addf %121, %138 : vector<10x6xf32>
    %c29 = arith.constant 29 : index
    %140 = memref.load %arg1[%c29] : memref<252xf32, #tpu.memory_space<smem>>
    %141 = vector.broadcast %140 : f32 to vector<10x6xf32>
    %142 = arith.mulf %141, %135 : vector<10x6xf32>
    %143 = arith.addf %125, %142 : vector<10x6xf32>
    %c30 = arith.constant 30 : index
    %144 = memref.load %arg1[%c30] : memref<252xf32, #tpu.memory_space<smem>>
    %145 = vector.broadcast %144 : f32 to vector<10x6xf32>
    %146 = arith.mulf %145, %135 : vector<10x6xf32>
    %147 = arith.addf %129, %146 : vector<10x6xf32>
    %c31 = arith.constant 31 : index
    %148 = memref.load %arg1[%c31] : memref<252xf32, #tpu.memory_space<smem>>
    %149 = vector.broadcast %148 : f32 to vector<10x6xf32>
    %150 = arith.mulf %149, %135 : vector<10x6xf32>
    %151 = arith.addf %133, %150 : vector<10x6xf32>
    %152 = vector.extract_strided_slice %3 {offsets = [2, 0, 2], sizes = [1, 10, 6], strides = [1, 1, 1]} : vector<3x16x8xf32> to vector<1x10x6xf32>
    %153 = vector.shape_cast %152 : vector<1x10x6xf32> to vector<10x6xf32>
    %c32 = arith.constant 32 : index
    %154 = memref.load %arg1[%c32] : memref<252xf32, #tpu.memory_space<smem>>
    %155 = vector.broadcast %154 : f32 to vector<10x6xf32>
    %156 = arith.mulf %155, %153 : vector<10x6xf32>
    %157 = arith.addf %139, %156 : vector<10x6xf32>
    %c33 = arith.constant 33 : index
    %158 = memref.load %arg1[%c33] : memref<252xf32, #tpu.memory_space<smem>>
    %159 = vector.broadcast %158 : f32 to vector<10x6xf32>
    %160 = arith.mulf %159, %153 : vector<10x6xf32>
    %161 = arith.addf %143, %160 : vector<10x6xf32>
    %c34 = arith.constant 34 : index
    %162 = memref.load %arg1[%c34] : memref<252xf32, #tpu.memory_space<smem>>
    %163 = vector.broadcast %162 : f32 to vector<10x6xf32>
    %164 = arith.mulf %163, %153 : vector<10x6xf32>
    %165 = arith.addf %147, %164 : vector<10x6xf32>
    %c35 = arith.constant 35 : index
    %166 = memref.load %arg1[%c35] : memref<252xf32, #tpu.memory_space<smem>>
    %167 = vector.broadcast %166 : f32 to vector<10x6xf32>
    %168 = arith.mulf %167, %153 : vector<10x6xf32>
    %169 = arith.addf %151, %168 : vector<10x6xf32>
    %170 = vector.extract_strided_slice %3 {offsets = [0, 1, 0], sizes = [1, 10, 6], strides = [1, 1, 1]} : vector<3x16x8xf32> to vector<1x10x6xf32>
    %171 = vector.shape_cast %170 : vector<1x10x6xf32> to vector<10x6xf32>
    %c36 = arith.constant 36 : index
    %172 = memref.load %arg1[%c36] : memref<252xf32, #tpu.memory_space<smem>>
    %173 = vector.broadcast %172 : f32 to vector<10x6xf32>
    %174 = arith.mulf %173, %171 : vector<10x6xf32>
    %175 = arith.addf %157, %174 : vector<10x6xf32>
    %c37 = arith.constant 37 : index
    %176 = memref.load %arg1[%c37] : memref<252xf32, #tpu.memory_space<smem>>
    %177 = vector.broadcast %176 : f32 to vector<10x6xf32>
    %178 = arith.mulf %177, %171 : vector<10x6xf32>
    %179 = arith.addf %161, %178 : vector<10x6xf32>
    %c38 = arith.constant 38 : index
    %180 = memref.load %arg1[%c38] : memref<252xf32, #tpu.memory_space<smem>>
    %181 = vector.broadcast %180 : f32 to vector<10x6xf32>
    %182 = arith.mulf %181, %171 : vector<10x6xf32>
    %183 = arith.addf %165, %182 : vector<10x6xf32>
    %c39 = arith.constant 39 : index
    %184 = memref.load %arg1[%c39] : memref<252xf32, #tpu.memory_space<smem>>
    %185 = vector.broadcast %184 : f32 to vector<10x6xf32>
    %186 = arith.mulf %185, %171 : vector<10x6xf32>
    %187 = arith.addf %169, %186 : vector<10x6xf32>
    %188 = vector.extract_strided_slice %3 {offsets = [1, 1, 0], sizes = [1, 10, 6], strides = [1, 1, 1]} : vector<3x16x8xf32> to vector<1x10x6xf32>
    %189 = vector.shape_cast %188 : vector<1x10x6xf32> to vector<10x6xf32>
    %c40 = arith.constant 40 : index
    %190 = memref.load %arg1[%c40] : memref<252xf32, #tpu.memory_space<smem>>
    %191 = vector.broadcast %190 : f32 to vector<10x6xf32>
    %192 = arith.mulf %191, %189 : vector<10x6xf32>
    %193 = arith.addf %175, %192 : vector<10x6xf32>
    %c41 = arith.constant 41 : index
    %194 = memref.load %arg1[%c41] : memref<252xf32, #tpu.memory_space<smem>>
    %195 = vector.broadcast %194 : f32 to vector<10x6xf32>
    %196 = arith.mulf %195, %189 : vector<10x6xf32>
    %197 = arith.addf %179, %196 : vector<10x6xf32>
    %c42 = arith.constant 42 : index
    %198 = memref.load %arg1[%c42] : memref<252xf32, #tpu.memory_space<smem>>
    %199 = vector.broadcast %198 : f32 to vector<10x6xf32>
    %200 = arith.mulf %199, %189 : vector<10x6xf32>
    %201 = arith.addf %183, %200 : vector<10x6xf32>
    %c43 = arith.constant 43 : index
    %202 = memref.load %arg1[%c43] : memref<252xf32, #tpu.memory_space<smem>>
    %203 = vector.broadcast %202 : f32 to vector<10x6xf32>
    %204 = arith.mulf %203, %189 : vector<10x6xf32>
    %205 = arith.addf %187, %204 : vector<10x6xf32>
    %206 = vector.extract_strided_slice %3 {offsets = [2, 1, 0], sizes = [1, 10, 6], strides = [1, 1, 1]} : vector<3x16x8xf32> to vector<1x10x6xf32>
    %207 = vector.shape_cast %206 : vector<1x10x6xf32> to vector<10x6xf32>
    %c44 = arith.constant 44 : index
    %208 = memref.load %arg1[%c44] : memref<252xf32, #tpu.memory_space<smem>>
    %209 = vector.broadcast %208 : f32 to vector<10x6xf32>
    %210 = arith.mulf %209, %207 : vector<10x6xf32>
    %211 = arith.addf %193, %210 : vector<10x6xf32>
    %c45 = arith.constant 45 : index
    %212 = memref.load %arg1[%c45] : memref<252xf32, #tpu.memory_space<smem>>
    %213 = vector.broadcast %212 : f32 to vector<10x6xf32>
    %214 = arith.mulf %213, %207 : vector<10x6xf32>
    %215 = arith.addf %197, %214 : vector<10x6xf32>
    %c46 = arith.constant 46 : index
    %216 = memref.load %arg1[%c46] : memref<252xf32, #tpu.memory_space<smem>>
    %217 = vector.broadcast %216 : f32 to vector<10x6xf32>
    %218 = arith.mulf %217, %207 : vector<10x6xf32>
    %219 = arith.addf %201, %218 : vector<10x6xf32>
    %c47 = arith.constant 47 : index
    %220 = memref.load %arg1[%c47] : memref<252xf32, #tpu.memory_space<smem>>
    %221 = vector.broadcast %220 : f32 to vector<10x6xf32>
    %222 = arith.mulf %221, %207 : vector<10x6xf32>
    %223 = arith.addf %205, %222 : vector<10x6xf32>
    %224 = vector.extract_strided_slice %3 {offsets = [0, 1, 1], sizes = [1, 10, 6], strides = [1, 1, 1]} : vector<3x16x8xf32> to vector<1x10x6xf32>
    %225 = vector.shape_cast %224 : vector<1x10x6xf32> to vector<10x6xf32>
    %c48 = arith.constant 48 : index
    %226 = memref.load %arg1[%c48] : memref<252xf32, #tpu.memory_space<smem>>
    %227 = vector.broadcast %226 : f32 to vector<10x6xf32>
    %228 = arith.mulf %227, %225 : vector<10x6xf32>
    %229 = arith.addf %211, %228 : vector<10x6xf32>
    %c49 = arith.constant 49 : index
    %230 = memref.load %arg1[%c49] : memref<252xf32, #tpu.memory_space<smem>>
    %231 = vector.broadcast %230 : f32 to vector<10x6xf32>
    %232 = arith.mulf %231, %225 : vector<10x6xf32>
    %233 = arith.addf %215, %232 : vector<10x6xf32>
    %c50 = arith.constant 50 : index
    %234 = memref.load %arg1[%c50] : memref<252xf32, #tpu.memory_space<smem>>
    %235 = vector.broadcast %234 : f32 to vector<10x6xf32>
    %236 = arith.mulf %235, %225 : vector<10x6xf32>
    %237 = arith.addf %219, %236 : vector<10x6xf32>
    %c51 = arith.constant 51 : index
    %238 = memref.load %arg1[%c51] : memref<252xf32, #tpu.memory_space<smem>>
    %239 = vector.broadcast %238 : f32 to vector<10x6xf32>
    %240 = arith.mulf %239, %225 : vector<10x6xf32>
    %241 = arith.addf %223, %240 : vector<10x6xf32>
    %242 = vector.extract_strided_slice %3 {offsets = [1, 1, 1], sizes = [1, 10, 6], strides = [1, 1, 1]} : vector<3x16x8xf32> to vector<1x10x6xf32>
    %243 = vector.shape_cast %242 : vector<1x10x6xf32> to vector<10x6xf32>
    %c52 = arith.constant 52 : index
    %244 = memref.load %arg1[%c52] : memref<252xf32, #tpu.memory_space<smem>>
    %245 = vector.broadcast %244 : f32 to vector<10x6xf32>
    %246 = arith.mulf %245, %243 : vector<10x6xf32>
    %247 = arith.addf %229, %246 : vector<10x6xf32>
    %c53 = arith.constant 53 : index
    %248 = memref.load %arg1[%c53] : memref<252xf32, #tpu.memory_space<smem>>
    %249 = vector.broadcast %248 : f32 to vector<10x6xf32>
    %250 = arith.mulf %249, %243 : vector<10x6xf32>
    %251 = arith.addf %233, %250 : vector<10x6xf32>
    %c54 = arith.constant 54 : index
    %252 = memref.load %arg1[%c54] : memref<252xf32, #tpu.memory_space<smem>>
    %253 = vector.broadcast %252 : f32 to vector<10x6xf32>
    %254 = arith.mulf %253, %243 : vector<10x6xf32>
    %255 = arith.addf %237, %254 : vector<10x6xf32>
    %c55 = arith.constant 55 : index
    %256 = memref.load %arg1[%c55] : memref<252xf32, #tpu.memory_space<smem>>
    %257 = vector.broadcast %256 : f32 to vector<10x6xf32>
    %258 = arith.mulf %257, %243 : vector<10x6xf32>
    %259 = arith.addf %241, %258 : vector<10x6xf32>
    %260 = vector.extract_strided_slice %3 {offsets = [2, 1, 1], sizes = [1, 10, 6], strides = [1, 1, 1]} : vector<3x16x8xf32> to vector<1x10x6xf32>
    %261 = vector.shape_cast %260 : vector<1x10x6xf32> to vector<10x6xf32>
    %c56 = arith.constant 56 : index
    %262 = memref.load %arg1[%c56] : memref<252xf32, #tpu.memory_space<smem>>
    %263 = vector.broadcast %262 : f32 to vector<10x6xf32>
    %264 = arith.mulf %263, %261 : vector<10x6xf32>
    %265 = arith.addf %247, %264 : vector<10x6xf32>
    %c57 = arith.constant 57 : index
    %266 = memref.load %arg1[%c57] : memref<252xf32, #tpu.memory_space<smem>>
    %267 = vector.broadcast %266 : f32 to vector<10x6xf32>
    %268 = arith.mulf %267, %261 : vector<10x6xf32>
    %269 = arith.addf %251, %268 : vector<10x6xf32>
    %c58 = arith.constant 58 : index
    %270 = memref.load %arg1[%c58] : memref<252xf32, #tpu.memory_space<smem>>
    %271 = vector.broadcast %270 : f32 to vector<10x6xf32>
    %272 = arith.mulf %271, %261 : vector<10x6xf32>
    %273 = arith.addf %255, %272 : vector<10x6xf32>
    %c59 = arith.constant 59 : index
    %274 = memref.load %arg1[%c59] : memref<252xf32, #tpu.memory_space<smem>>
    %275 = vector.broadcast %274 : f32 to vector<10x6xf32>
    %276 = arith.mulf %275, %261 : vector<10x6xf32>
    %277 = arith.addf %259, %276 : vector<10x6xf32>
    %278 = vector.extract_strided_slice %3 {offsets = [0, 1, 2], sizes = [1, 10, 6], strides = [1, 1, 1]} : vector<3x16x8xf32> to vector<1x10x6xf32>
    %279 = vector.shape_cast %278 : vector<1x10x6xf32> to vector<10x6xf32>
    %c60 = arith.constant 60 : index
    %280 = memref.load %arg1[%c60] : memref<252xf32, #tpu.memory_space<smem>>
    %281 = vector.broadcast %280 : f32 to vector<10x6xf32>
    %282 = arith.mulf %281, %279 : vector<10x6xf32>
    %283 = arith.addf %265, %282 : vector<10x6xf32>
    %c61 = arith.constant 61 : index
    %284 = memref.load %arg1[%c61] : memref<252xf32, #tpu.memory_space<smem>>
    %285 = vector.broadcast %284 : f32 to vector<10x6xf32>
    %286 = arith.mulf %285, %279 : vector<10x6xf32>
    %287 = arith.addf %269, %286 : vector<10x6xf32>
    %c62 = arith.constant 62 : index
    %288 = memref.load %arg1[%c62] : memref<252xf32, #tpu.memory_space<smem>>
    %289 = vector.broadcast %288 : f32 to vector<10x6xf32>
    %290 = arith.mulf %289, %279 : vector<10x6xf32>
    %291 = arith.addf %273, %290 : vector<10x6xf32>
    %c63 = arith.constant 63 : index
    %292 = memref.load %arg1[%c63] : memref<252xf32, #tpu.memory_space<smem>>
    %293 = vector.broadcast %292 : f32 to vector<10x6xf32>
    %294 = arith.mulf %293, %279 : vector<10x6xf32>
    %295 = arith.addf %277, %294 : vector<10x6xf32>
    %296 = vector.extract_strided_slice %3 {offsets = [1, 1, 2], sizes = [1, 10, 6], strides = [1, 1, 1]} : vector<3x16x8xf32> to vector<1x10x6xf32>
    %297 = vector.shape_cast %296 : vector<1x10x6xf32> to vector<10x6xf32>
    %c64 = arith.constant 64 : index
    %298 = memref.load %arg1[%c64] : memref<252xf32, #tpu.memory_space<smem>>
    %299 = vector.broadcast %298 : f32 to vector<10x6xf32>
    %300 = arith.mulf %299, %297 : vector<10x6xf32>
    %301 = arith.addf %283, %300 : vector<10x6xf32>
    %c65 = arith.constant 65 : index
    %302 = memref.load %arg1[%c65] : memref<252xf32, #tpu.memory_space<smem>>
    %303 = vector.broadcast %302 : f32 to vector<10x6xf32>
    %304 = arith.mulf %303, %297 : vector<10x6xf32>
    %305 = arith.addf %287, %304 : vector<10x6xf32>
    %c66 = arith.constant 66 : index
    %306 = memref.load %arg1[%c66] : memref<252xf32, #tpu.memory_space<smem>>
    %307 = vector.broadcast %306 : f32 to vector<10x6xf32>
    %308 = arith.mulf %307, %297 : vector<10x6xf32>
    %309 = arith.addf %291, %308 : vector<10x6xf32>
    %c67 = arith.constant 67 : index
    %310 = memref.load %arg1[%c67] : memref<252xf32, #tpu.memory_space<smem>>
    %311 = vector.broadcast %310 : f32 to vector<10x6xf32>
    %312 = arith.mulf %311, %297 : vector<10x6xf32>
    %313 = arith.addf %295, %312 : vector<10x6xf32>
    %314 = vector.extract_strided_slice %3 {offsets = [2, 1, 2], sizes = [1, 10, 6], strides = [1, 1, 1]} : vector<3x16x8xf32> to vector<1x10x6xf32>
    %315 = vector.shape_cast %314 : vector<1x10x6xf32> to vector<10x6xf32>
    %c68 = arith.constant 68 : index
    %316 = memref.load %arg1[%c68] : memref<252xf32, #tpu.memory_space<smem>>
    %317 = vector.broadcast %316 : f32 to vector<10x6xf32>
    %318 = arith.mulf %317, %315 : vector<10x6xf32>
    %319 = arith.addf %301, %318 : vector<10x6xf32>
    %c69 = arith.constant 69 : index
    %320 = memref.load %arg1[%c69] : memref<252xf32, #tpu.memory_space<smem>>
    %321 = vector.broadcast %320 : f32 to vector<10x6xf32>
    %322 = arith.mulf %321, %315 : vector<10x6xf32>
    %323 = arith.addf %305, %322 : vector<10x6xf32>
    %c70 = arith.constant 70 : index
    %324 = memref.load %arg1[%c70] : memref<252xf32, #tpu.memory_space<smem>>
    %325 = vector.broadcast %324 : f32 to vector<10x6xf32>
    %326 = arith.mulf %325, %315 : vector<10x6xf32>
    %327 = arith.addf %309, %326 : vector<10x6xf32>
    %c71 = arith.constant 71 : index
    %328 = memref.load %arg1[%c71] : memref<252xf32, #tpu.memory_space<smem>>
    %329 = vector.broadcast %328 : f32 to vector<10x6xf32>
    %330 = arith.mulf %329, %315 : vector<10x6xf32>
    %331 = arith.addf %313, %330 : vector<10x6xf32>
    %332 = vector.extract_strided_slice %3 {offsets = [0, 2, 0], sizes = [1, 10, 6], strides = [1, 1, 1]} : vector<3x16x8xf32> to vector<1x10x6xf32>
    %333 = vector.shape_cast %332 : vector<1x10x6xf32> to vector<10x6xf32>
    %c72 = arith.constant 72 : index
    %334 = memref.load %arg1[%c72] : memref<252xf32, #tpu.memory_space<smem>>
    %335 = vector.broadcast %334 : f32 to vector<10x6xf32>
    %336 = arith.mulf %335, %333 : vector<10x6xf32>
    %337 = arith.addf %319, %336 : vector<10x6xf32>
    %c73 = arith.constant 73 : index
    %338 = memref.load %arg1[%c73] : memref<252xf32, #tpu.memory_space<smem>>
    %339 = vector.broadcast %338 : f32 to vector<10x6xf32>
    %340 = arith.mulf %339, %333 : vector<10x6xf32>
    %341 = arith.addf %323, %340 : vector<10x6xf32>
    %c74 = arith.constant 74 : index
    %342 = memref.load %arg1[%c74] : memref<252xf32, #tpu.memory_space<smem>>
    %343 = vector.broadcast %342 : f32 to vector<10x6xf32>
    %344 = arith.mulf %343, %333 : vector<10x6xf32>
    %345 = arith.addf %327, %344 : vector<10x6xf32>
    %c75 = arith.constant 75 : index
    %346 = memref.load %arg1[%c75] : memref<252xf32, #tpu.memory_space<smem>>
    %347 = vector.broadcast %346 : f32 to vector<10x6xf32>
    %348 = arith.mulf %347, %333 : vector<10x6xf32>
    %349 = arith.addf %331, %348 : vector<10x6xf32>
    %350 = vector.extract_strided_slice %3 {offsets = [1, 2, 0], sizes = [1, 10, 6], strides = [1, 1, 1]} : vector<3x16x8xf32> to vector<1x10x6xf32>
    %351 = vector.shape_cast %350 : vector<1x10x6xf32> to vector<10x6xf32>
    %c76 = arith.constant 76 : index
    %352 = memref.load %arg1[%c76] : memref<252xf32, #tpu.memory_space<smem>>
    %353 = vector.broadcast %352 : f32 to vector<10x6xf32>
    %354 = arith.mulf %353, %351 : vector<10x6xf32>
    %355 = arith.addf %337, %354 : vector<10x6xf32>
    %c77 = arith.constant 77 : index
    %356 = memref.load %arg1[%c77] : memref<252xf32, #tpu.memory_space<smem>>
    %357 = vector.broadcast %356 : f32 to vector<10x6xf32>
    %358 = arith.mulf %357, %351 : vector<10x6xf32>
    %359 = arith.addf %341, %358 : vector<10x6xf32>
    %c78 = arith.constant 78 : index
    %360 = memref.load %arg1[%c78] : memref<252xf32, #tpu.memory_space<smem>>
    %361 = vector.broadcast %360 : f32 to vector<10x6xf32>
    %362 = arith.mulf %361, %351 : vector<10x6xf32>
    %363 = arith.addf %345, %362 : vector<10x6xf32>
    %c79 = arith.constant 79 : index
    %364 = memref.load %arg1[%c79] : memref<252xf32, #tpu.memory_space<smem>>
    %365 = vector.broadcast %364 : f32 to vector<10x6xf32>
    %366 = arith.mulf %365, %351 : vector<10x6xf32>
    %367 = arith.addf %349, %366 : vector<10x6xf32>
    %368 = vector.extract_strided_slice %3 {offsets = [2, 2, 0], sizes = [1, 10, 6], strides = [1, 1, 1]} : vector<3x16x8xf32> to vector<1x10x6xf32>
    %369 = vector.shape_cast %368 : vector<1x10x6xf32> to vector<10x6xf32>
    %c80 = arith.constant 80 : index
    %370 = memref.load %arg1[%c80] : memref<252xf32, #tpu.memory_space<smem>>
    %371 = vector.broadcast %370 : f32 to vector<10x6xf32>
    %372 = arith.mulf %371, %369 : vector<10x6xf32>
    %373 = arith.addf %355, %372 : vector<10x6xf32>
    %c81 = arith.constant 81 : index
    %374 = memref.load %arg1[%c81] : memref<252xf32, #tpu.memory_space<smem>>
    %375 = vector.broadcast %374 : f32 to vector<10x6xf32>
    %376 = arith.mulf %375, %369 : vector<10x6xf32>
    %377 = arith.addf %359, %376 : vector<10x6xf32>
    %c82 = arith.constant 82 : index
    %378 = memref.load %arg1[%c82] : memref<252xf32, #tpu.memory_space<smem>>
    %379 = vector.broadcast %378 : f32 to vector<10x6xf32>
    %380 = arith.mulf %379, %369 : vector<10x6xf32>
    %381 = arith.addf %363, %380 : vector<10x6xf32>
    %c83 = arith.constant 83 : index
    %382 = memref.load %arg1[%c83] : memref<252xf32, #tpu.memory_space<smem>>
    %383 = vector.broadcast %382 : f32 to vector<10x6xf32>
    %384 = arith.mulf %383, %369 : vector<10x6xf32>
    %385 = arith.addf %367, %384 : vector<10x6xf32>
    %386 = vector.extract_strided_slice %3 {offsets = [0, 2, 1], sizes = [1, 10, 6], strides = [1, 1, 1]} : vector<3x16x8xf32> to vector<1x10x6xf32>
    %387 = vector.shape_cast %386 : vector<1x10x6xf32> to vector<10x6xf32>
    %c84 = arith.constant 84 : index
    %388 = memref.load %arg1[%c84] : memref<252xf32, #tpu.memory_space<smem>>
    %389 = vector.broadcast %388 : f32 to vector<10x6xf32>
    %390 = arith.mulf %389, %387 : vector<10x6xf32>
    %391 = arith.addf %373, %390 : vector<10x6xf32>
    %c85 = arith.constant 85 : index
    %392 = memref.load %arg1[%c85] : memref<252xf32, #tpu.memory_space<smem>>
    %393 = vector.broadcast %392 : f32 to vector<10x6xf32>
    %394 = arith.mulf %393, %387 : vector<10x6xf32>
    %395 = arith.addf %377, %394 : vector<10x6xf32>
    %c86 = arith.constant 86 : index
    %396 = memref.load %arg1[%c86] : memref<252xf32, #tpu.memory_space<smem>>
    %397 = vector.broadcast %396 : f32 to vector<10x6xf32>
    %398 = arith.mulf %397, %387 : vector<10x6xf32>
    %399 = arith.addf %381, %398 : vector<10x6xf32>
    %c87 = arith.constant 87 : index
    %400 = memref.load %arg1[%c87] : memref<252xf32, #tpu.memory_space<smem>>
    %401 = vector.broadcast %400 : f32 to vector<10x6xf32>
    %402 = arith.mulf %401, %387 : vector<10x6xf32>
    %403 = arith.addf %385, %402 : vector<10x6xf32>
    %404 = vector.extract_strided_slice %3 {offsets = [1, 2, 1], sizes = [1, 10, 6], strides = [1, 1, 1]} : vector<3x16x8xf32> to vector<1x10x6xf32>
    %405 = vector.shape_cast %404 : vector<1x10x6xf32> to vector<10x6xf32>
    %c88 = arith.constant 88 : index
    %406 = memref.load %arg1[%c88] : memref<252xf32, #tpu.memory_space<smem>>
    %407 = vector.broadcast %406 : f32 to vector<10x6xf32>
    %408 = arith.mulf %407, %405 : vector<10x6xf32>
    %409 = arith.addf %391, %408 : vector<10x6xf32>
    %c89 = arith.constant 89 : index
    %410 = memref.load %arg1[%c89] : memref<252xf32, #tpu.memory_space<smem>>
    %411 = vector.broadcast %410 : f32 to vector<10x6xf32>
    %412 = arith.mulf %411, %405 : vector<10x6xf32>
    %413 = arith.addf %395, %412 : vector<10x6xf32>
    %c90 = arith.constant 90 : index
    %414 = memref.load %arg1[%c90] : memref<252xf32, #tpu.memory_space<smem>>
    %415 = vector.broadcast %414 : f32 to vector<10x6xf32>
    %416 = arith.mulf %415, %405 : vector<10x6xf32>
    %417 = arith.addf %399, %416 : vector<10x6xf32>
    %c91 = arith.constant 91 : index
    %418 = memref.load %arg1[%c91] : memref<252xf32, #tpu.memory_space<smem>>
    %419 = vector.broadcast %418 : f32 to vector<10x6xf32>
    %420 = arith.mulf %419, %405 : vector<10x6xf32>
    %421 = arith.addf %403, %420 : vector<10x6xf32>
    %422 = vector.extract_strided_slice %3 {offsets = [2, 2, 1], sizes = [1, 10, 6], strides = [1, 1, 1]} : vector<3x16x8xf32> to vector<1x10x6xf32>
    %423 = vector.shape_cast %422 : vector<1x10x6xf32> to vector<10x6xf32>
    %c92 = arith.constant 92 : index
    %424 = memref.load %arg1[%c92] : memref<252xf32, #tpu.memory_space<smem>>
    %425 = vector.broadcast %424 : f32 to vector<10x6xf32>
    %426 = arith.mulf %425, %423 : vector<10x6xf32>
    %427 = arith.addf %409, %426 : vector<10x6xf32>
    %c93 = arith.constant 93 : index
    %428 = memref.load %arg1[%c93] : memref<252xf32, #tpu.memory_space<smem>>
    %429 = vector.broadcast %428 : f32 to vector<10x6xf32>
    %430 = arith.mulf %429, %423 : vector<10x6xf32>
    %431 = arith.addf %413, %430 : vector<10x6xf32>
    %c94 = arith.constant 94 : index
    %432 = memref.load %arg1[%c94] : memref<252xf32, #tpu.memory_space<smem>>
    %433 = vector.broadcast %432 : f32 to vector<10x6xf32>
    %434 = arith.mulf %433, %423 : vector<10x6xf32>
    %435 = arith.addf %417, %434 : vector<10x6xf32>
    %c95 = arith.constant 95 : index
    %436 = memref.load %arg1[%c95] : memref<252xf32, #tpu.memory_space<smem>>
    %437 = vector.broadcast %436 : f32 to vector<10x6xf32>
    %438 = arith.mulf %437, %423 : vector<10x6xf32>
    %439 = arith.addf %421, %438 : vector<10x6xf32>
    %440 = vector.extract_strided_slice %3 {offsets = [0, 2, 2], sizes = [1, 10, 6], strides = [1, 1, 1]} : vector<3x16x8xf32> to vector<1x10x6xf32>
    %441 = vector.shape_cast %440 : vector<1x10x6xf32> to vector<10x6xf32>
    %c96 = arith.constant 96 : index
    %442 = memref.load %arg1[%c96] : memref<252xf32, #tpu.memory_space<smem>>
    %443 = vector.broadcast %442 : f32 to vector<10x6xf32>
    %444 = arith.mulf %443, %441 : vector<10x6xf32>
    %445 = arith.addf %427, %444 : vector<10x6xf32>
    %c97 = arith.constant 97 : index
    %446 = memref.load %arg1[%c97] : memref<252xf32, #tpu.memory_space<smem>>
    %447 = vector.broadcast %446 : f32 to vector<10x6xf32>
    %448 = arith.mulf %447, %441 : vector<10x6xf32>
    %449 = arith.addf %431, %448 : vector<10x6xf32>
    %c98 = arith.constant 98 : index
    %450 = memref.load %arg1[%c98] : memref<252xf32, #tpu.memory_space<smem>>
    %451 = vector.broadcast %450 : f32 to vector<10x6xf32>
    %452 = arith.mulf %451, %441 : vector<10x6xf32>
    %453 = arith.addf %435, %452 : vector<10x6xf32>
    %c99 = arith.constant 99 : index
    %454 = memref.load %arg1[%c99] : memref<252xf32, #tpu.memory_space<smem>>
    %455 = vector.broadcast %454 : f32 to vector<10x6xf32>
    %456 = arith.mulf %455, %441 : vector<10x6xf32>
    %457 = arith.addf %439, %456 : vector<10x6xf32>
    %458 = vector.extract_strided_slice %3 {offsets = [1, 2, 2], sizes = [1, 10, 6], strides = [1, 1, 1]} : vector<3x16x8xf32> to vector<1x10x6xf32>
    %459 = vector.shape_cast %458 : vector<1x10x6xf32> to vector<10x6xf32>
    %c100 = arith.constant 100 : index
    %460 = memref.load %arg1[%c100] : memref<252xf32, #tpu.memory_space<smem>>
    %461 = vector.broadcast %460 : f32 to vector<10x6xf32>
    %462 = arith.mulf %461, %459 : vector<10x6xf32>
    %463 = arith.addf %445, %462 : vector<10x6xf32>
    %c101 = arith.constant 101 : index
    %464 = memref.load %arg1[%c101] : memref<252xf32, #tpu.memory_space<smem>>
    %465 = vector.broadcast %464 : f32 to vector<10x6xf32>
    %466 = arith.mulf %465, %459 : vector<10x6xf32>
    %467 = arith.addf %449, %466 : vector<10x6xf32>
    %c102 = arith.constant 102 : index
    %468 = memref.load %arg1[%c102] : memref<252xf32, #tpu.memory_space<smem>>
    %469 = vector.broadcast %468 : f32 to vector<10x6xf32>
    %470 = arith.mulf %469, %459 : vector<10x6xf32>
    %471 = arith.addf %453, %470 : vector<10x6xf32>
    %c103 = arith.constant 103 : index
    %472 = memref.load %arg1[%c103] : memref<252xf32, #tpu.memory_space<smem>>
    %473 = vector.broadcast %472 : f32 to vector<10x6xf32>
    %474 = arith.mulf %473, %459 : vector<10x6xf32>
    %475 = arith.addf %457, %474 : vector<10x6xf32>
    %476 = vector.extract_strided_slice %3 {offsets = [2, 2, 2], sizes = [1, 10, 6], strides = [1, 1, 1]} : vector<3x16x8xf32> to vector<1x10x6xf32>
    %477 = vector.shape_cast %476 : vector<1x10x6xf32> to vector<10x6xf32>
    %c104 = arith.constant 104 : index
    %478 = memref.load %arg1[%c104] : memref<252xf32, #tpu.memory_space<smem>>
    %479 = vector.broadcast %478 : f32 to vector<10x6xf32>
    %480 = arith.mulf %479, %477 : vector<10x6xf32>
    %481 = arith.addf %463, %480 : vector<10x6xf32>
    %c105 = arith.constant 105 : index
    %482 = memref.load %arg1[%c105] : memref<252xf32, #tpu.memory_space<smem>>
    %483 = vector.broadcast %482 : f32 to vector<10x6xf32>
    %484 = arith.mulf %483, %477 : vector<10x6xf32>
    %485 = arith.addf %467, %484 : vector<10x6xf32>
    %c106 = arith.constant 106 : index
    %486 = memref.load %arg1[%c106] : memref<252xf32, #tpu.memory_space<smem>>
    %487 = vector.broadcast %486 : f32 to vector<10x6xf32>
    %488 = arith.mulf %487, %477 : vector<10x6xf32>
    %489 = arith.addf %471, %488 : vector<10x6xf32>
    %c107 = arith.constant 107 : index
    %490 = memref.load %arg1[%c107] : memref<252xf32, #tpu.memory_space<smem>>
    %491 = vector.broadcast %490 : f32 to vector<10x6xf32>
    %492 = arith.mulf %491, %477 : vector<10x6xf32>
    %493 = arith.addf %475, %492 : vector<10x6xf32>
    %494 = vector.extract_strided_slice %3 {offsets = [0, 3, 0], sizes = [1, 10, 6], strides = [1, 1, 1]} : vector<3x16x8xf32> to vector<1x10x6xf32>
    %495 = vector.shape_cast %494 : vector<1x10x6xf32> to vector<10x6xf32>
    %c108 = arith.constant 108 : index
    %496 = memref.load %arg1[%c108] : memref<252xf32, #tpu.memory_space<smem>>
    %497 = vector.broadcast %496 : f32 to vector<10x6xf32>
    %498 = arith.mulf %497, %495 : vector<10x6xf32>
    %499 = arith.addf %481, %498 : vector<10x6xf32>
    %c109 = arith.constant 109 : index
    %500 = memref.load %arg1[%c109] : memref<252xf32, #tpu.memory_space<smem>>
    %501 = vector.broadcast %500 : f32 to vector<10x6xf32>
    %502 = arith.mulf %501, %495 : vector<10x6xf32>
    %503 = arith.addf %485, %502 : vector<10x6xf32>
    %c110 = arith.constant 110 : index
    %504 = memref.load %arg1[%c110] : memref<252xf32, #tpu.memory_space<smem>>
    %505 = vector.broadcast %504 : f32 to vector<10x6xf32>
    %506 = arith.mulf %505, %495 : vector<10x6xf32>
    %507 = arith.addf %489, %506 : vector<10x6xf32>
    %c111 = arith.constant 111 : index
    %508 = memref.load %arg1[%c111] : memref<252xf32, #tpu.memory_space<smem>>
    %509 = vector.broadcast %508 : f32 to vector<10x6xf32>
    %510 = arith.mulf %509, %495 : vector<10x6xf32>
    %511 = arith.addf %493, %510 : vector<10x6xf32>
    %512 = vector.extract_strided_slice %3 {offsets = [1, 3, 0], sizes = [1, 10, 6], strides = [1, 1, 1]} : vector<3x16x8xf32> to vector<1x10x6xf32>
    %513 = vector.shape_cast %512 : vector<1x10x6xf32> to vector<10x6xf32>
    %c112 = arith.constant 112 : index
    %514 = memref.load %arg1[%c112] : memref<252xf32, #tpu.memory_space<smem>>
    %515 = vector.broadcast %514 : f32 to vector<10x6xf32>
    %516 = arith.mulf %515, %513 : vector<10x6xf32>
    %517 = arith.addf %499, %516 : vector<10x6xf32>
    %c113 = arith.constant 113 : index
    %518 = memref.load %arg1[%c113] : memref<252xf32, #tpu.memory_space<smem>>
    %519 = vector.broadcast %518 : f32 to vector<10x6xf32>
    %520 = arith.mulf %519, %513 : vector<10x6xf32>
    %521 = arith.addf %503, %520 : vector<10x6xf32>
    %c114 = arith.constant 114 : index
    %522 = memref.load %arg1[%c114] : memref<252xf32, #tpu.memory_space<smem>>
    %523 = vector.broadcast %522 : f32 to vector<10x6xf32>
    %524 = arith.mulf %523, %513 : vector<10x6xf32>
    %525 = arith.addf %507, %524 : vector<10x6xf32>
    %c115 = arith.constant 115 : index
    %526 = memref.load %arg1[%c115] : memref<252xf32, #tpu.memory_space<smem>>
    %527 = vector.broadcast %526 : f32 to vector<10x6xf32>
    %528 = arith.mulf %527, %513 : vector<10x6xf32>
    %529 = arith.addf %511, %528 : vector<10x6xf32>
    %530 = vector.extract_strided_slice %3 {offsets = [2, 3, 0], sizes = [1, 10, 6], strides = [1, 1, 1]} : vector<3x16x8xf32> to vector<1x10x6xf32>
    %531 = vector.shape_cast %530 : vector<1x10x6xf32> to vector<10x6xf32>
    %c116 = arith.constant 116 : index
    %532 = memref.load %arg1[%c116] : memref<252xf32, #tpu.memory_space<smem>>
    %533 = vector.broadcast %532 : f32 to vector<10x6xf32>
    %534 = arith.mulf %533, %531 : vector<10x6xf32>
    %535 = arith.addf %517, %534 : vector<10x6xf32>
    %c117 = arith.constant 117 : index
    %536 = memref.load %arg1[%c117] : memref<252xf32, #tpu.memory_space<smem>>
    %537 = vector.broadcast %536 : f32 to vector<10x6xf32>
    %538 = arith.mulf %537, %531 : vector<10x6xf32>
    %539 = arith.addf %521, %538 : vector<10x6xf32>
    %c118 = arith.constant 118 : index
    %540 = memref.load %arg1[%c118] : memref<252xf32, #tpu.memory_space<smem>>
    %541 = vector.broadcast %540 : f32 to vector<10x6xf32>
    %542 = arith.mulf %541, %531 : vector<10x6xf32>
    %543 = arith.addf %525, %542 : vector<10x6xf32>
    %c119 = arith.constant 119 : index
    %544 = memref.load %arg1[%c119] : memref<252xf32, #tpu.memory_space<smem>>
    %545 = vector.broadcast %544 : f32 to vector<10x6xf32>
    %546 = arith.mulf %545, %531 : vector<10x6xf32>
    %547 = arith.addf %529, %546 : vector<10x6xf32>
    %548 = vector.extract_strided_slice %3 {offsets = [0, 3, 1], sizes = [1, 10, 6], strides = [1, 1, 1]} : vector<3x16x8xf32> to vector<1x10x6xf32>
    %549 = vector.shape_cast %548 : vector<1x10x6xf32> to vector<10x6xf32>
    %c120 = arith.constant 120 : index
    %550 = memref.load %arg1[%c120] : memref<252xf32, #tpu.memory_space<smem>>
    %551 = vector.broadcast %550 : f32 to vector<10x6xf32>
    %552 = arith.mulf %551, %549 : vector<10x6xf32>
    %553 = arith.addf %535, %552 : vector<10x6xf32>
    %c121 = arith.constant 121 : index
    %554 = memref.load %arg1[%c121] : memref<252xf32, #tpu.memory_space<smem>>
    %555 = vector.broadcast %554 : f32 to vector<10x6xf32>
    %556 = arith.mulf %555, %549 : vector<10x6xf32>
    %557 = arith.addf %539, %556 : vector<10x6xf32>
    %c122 = arith.constant 122 : index
    %558 = memref.load %arg1[%c122] : memref<252xf32, #tpu.memory_space<smem>>
    %559 = vector.broadcast %558 : f32 to vector<10x6xf32>
    %560 = arith.mulf %559, %549 : vector<10x6xf32>
    %561 = arith.addf %543, %560 : vector<10x6xf32>
    %c123 = arith.constant 123 : index
    %562 = memref.load %arg1[%c123] : memref<252xf32, #tpu.memory_space<smem>>
    %563 = vector.broadcast %562 : f32 to vector<10x6xf32>
    %564 = arith.mulf %563, %549 : vector<10x6xf32>
    %565 = arith.addf %547, %564 : vector<10x6xf32>
    %566 = vector.extract_strided_slice %3 {offsets = [1, 3, 1], sizes = [1, 10, 6], strides = [1, 1, 1]} : vector<3x16x8xf32> to vector<1x10x6xf32>
    %567 = vector.shape_cast %566 : vector<1x10x6xf32> to vector<10x6xf32>
    %c124 = arith.constant 124 : index
    %568 = memref.load %arg1[%c124] : memref<252xf32, #tpu.memory_space<smem>>
    %569 = vector.broadcast %568 : f32 to vector<10x6xf32>
    %570 = arith.mulf %569, %567 : vector<10x6xf32>
    %571 = arith.addf %553, %570 : vector<10x6xf32>
    %c125 = arith.constant 125 : index
    %572 = memref.load %arg1[%c125] : memref<252xf32, #tpu.memory_space<smem>>
    %573 = vector.broadcast %572 : f32 to vector<10x6xf32>
    %574 = arith.mulf %573, %567 : vector<10x6xf32>
    %575 = arith.addf %557, %574 : vector<10x6xf32>
    %c126 = arith.constant 126 : index
    %576 = memref.load %arg1[%c126] : memref<252xf32, #tpu.memory_space<smem>>
    %577 = vector.broadcast %576 : f32 to vector<10x6xf32>
    %578 = arith.mulf %577, %567 : vector<10x6xf32>
    %579 = arith.addf %561, %578 : vector<10x6xf32>
    %c127 = arith.constant 127 : index
    %580 = memref.load %arg1[%c127] : memref<252xf32, #tpu.memory_space<smem>>
    %581 = vector.broadcast %580 : f32 to vector<10x6xf32>
    %582 = arith.mulf %581, %567 : vector<10x6xf32>
    %583 = arith.addf %565, %582 : vector<10x6xf32>
    %584 = vector.extract_strided_slice %3 {offsets = [2, 3, 1], sizes = [1, 10, 6], strides = [1, 1, 1]} : vector<3x16x8xf32> to vector<1x10x6xf32>
    %585 = vector.shape_cast %584 : vector<1x10x6xf32> to vector<10x6xf32>
    %c128 = arith.constant 128 : index
    %586 = memref.load %arg1[%c128] : memref<252xf32, #tpu.memory_space<smem>>
    %587 = vector.broadcast %586 : f32 to vector<10x6xf32>
    %588 = arith.mulf %587, %585 : vector<10x6xf32>
    %589 = arith.addf %571, %588 : vector<10x6xf32>
    %c129 = arith.constant 129 : index
    %590 = memref.load %arg1[%c129] : memref<252xf32, #tpu.memory_space<smem>>
    %591 = vector.broadcast %590 : f32 to vector<10x6xf32>
    %592 = arith.mulf %591, %585 : vector<10x6xf32>
    %593 = arith.addf %575, %592 : vector<10x6xf32>
    %c130 = arith.constant 130 : index
    %594 = memref.load %arg1[%c130] : memref<252xf32, #tpu.memory_space<smem>>
    %595 = vector.broadcast %594 : f32 to vector<10x6xf32>
    %596 = arith.mulf %595, %585 : vector<10x6xf32>
    %597 = arith.addf %579, %596 : vector<10x6xf32>
    %c131 = arith.constant 131 : index
    %598 = memref.load %arg1[%c131] : memref<252xf32, #tpu.memory_space<smem>>
    %599 = vector.broadcast %598 : f32 to vector<10x6xf32>
    %600 = arith.mulf %599, %585 : vector<10x6xf32>
    %601 = arith.addf %583, %600 : vector<10x6xf32>
    %602 = vector.extract_strided_slice %3 {offsets = [0, 3, 2], sizes = [1, 10, 6], strides = [1, 1, 1]} : vector<3x16x8xf32> to vector<1x10x6xf32>
    %603 = vector.shape_cast %602 : vector<1x10x6xf32> to vector<10x6xf32>
    %c132 = arith.constant 132 : index
    %604 = memref.load %arg1[%c132] : memref<252xf32, #tpu.memory_space<smem>>
    %605 = vector.broadcast %604 : f32 to vector<10x6xf32>
    %606 = arith.mulf %605, %603 : vector<10x6xf32>
    %607 = arith.addf %589, %606 : vector<10x6xf32>
    %c133 = arith.constant 133 : index
    %608 = memref.load %arg1[%c133] : memref<252xf32, #tpu.memory_space<smem>>
    %609 = vector.broadcast %608 : f32 to vector<10x6xf32>
    %610 = arith.mulf %609, %603 : vector<10x6xf32>
    %611 = arith.addf %593, %610 : vector<10x6xf32>
    %c134 = arith.constant 134 : index
    %612 = memref.load %arg1[%c134] : memref<252xf32, #tpu.memory_space<smem>>
    %613 = vector.broadcast %612 : f32 to vector<10x6xf32>
    %614 = arith.mulf %613, %603 : vector<10x6xf32>
    %615 = arith.addf %597, %614 : vector<10x6xf32>
    %c135 = arith.constant 135 : index
    %616 = memref.load %arg1[%c135] : memref<252xf32, #tpu.memory_space<smem>>
    %617 = vector.broadcast %616 : f32 to vector<10x6xf32>
    %618 = arith.mulf %617, %603 : vector<10x6xf32>
    %619 = arith.addf %601, %618 : vector<10x6xf32>
    %620 = vector.extract_strided_slice %3 {offsets = [1, 3, 2], sizes = [1, 10, 6], strides = [1, 1, 1]} : vector<3x16x8xf32> to vector<1x10x6xf32>
    %621 = vector.shape_cast %620 : vector<1x10x6xf32> to vector<10x6xf32>
    %c136 = arith.constant 136 : index
    %622 = memref.load %arg1[%c136] : memref<252xf32, #tpu.memory_space<smem>>
    %623 = vector.broadcast %622 : f32 to vector<10x6xf32>
    %624 = arith.mulf %623, %621 : vector<10x6xf32>
    %625 = arith.addf %607, %624 : vector<10x6xf32>
    %c137 = arith.constant 137 : index
    %626 = memref.load %arg1[%c137] : memref<252xf32, #tpu.memory_space<smem>>
    %627 = vector.broadcast %626 : f32 to vector<10x6xf32>
    %628 = arith.mulf %627, %621 : vector<10x6xf32>
    %629 = arith.addf %611, %628 : vector<10x6xf32>
    %c138 = arith.constant 138 : index
    %630 = memref.load %arg1[%c138] : memref<252xf32, #tpu.memory_space<smem>>
    %631 = vector.broadcast %630 : f32 to vector<10x6xf32>
    %632 = arith.mulf %631, %621 : vector<10x6xf32>
    %633 = arith.addf %615, %632 : vector<10x6xf32>
    %c139 = arith.constant 139 : index
    %634 = memref.load %arg1[%c139] : memref<252xf32, #tpu.memory_space<smem>>
    %635 = vector.broadcast %634 : f32 to vector<10x6xf32>
    %636 = arith.mulf %635, %621 : vector<10x6xf32>
    %637 = arith.addf %619, %636 : vector<10x6xf32>
    %638 = vector.extract_strided_slice %3 {offsets = [2, 3, 2], sizes = [1, 10, 6], strides = [1, 1, 1]} : vector<3x16x8xf32> to vector<1x10x6xf32>
    %639 = vector.shape_cast %638 : vector<1x10x6xf32> to vector<10x6xf32>
    %c140 = arith.constant 140 : index
    %640 = memref.load %arg1[%c140] : memref<252xf32, #tpu.memory_space<smem>>
    %641 = vector.broadcast %640 : f32 to vector<10x6xf32>
    %642 = arith.mulf %641, %639 : vector<10x6xf32>
    %643 = arith.addf %625, %642 : vector<10x6xf32>
    %c141 = arith.constant 141 : index
    %644 = memref.load %arg1[%c141] : memref<252xf32, #tpu.memory_space<smem>>
    %645 = vector.broadcast %644 : f32 to vector<10x6xf32>
    %646 = arith.mulf %645, %639 : vector<10x6xf32>
    %647 = arith.addf %629, %646 : vector<10x6xf32>
    %c142 = arith.constant 142 : index
    %648 = memref.load %arg1[%c142] : memref<252xf32, #tpu.memory_space<smem>>
    %649 = vector.broadcast %648 : f32 to vector<10x6xf32>
    %650 = arith.mulf %649, %639 : vector<10x6xf32>
    %651 = arith.addf %633, %650 : vector<10x6xf32>
    %c143 = arith.constant 143 : index
    %652 = memref.load %arg1[%c143] : memref<252xf32, #tpu.memory_space<smem>>
    %653 = vector.broadcast %652 : f32 to vector<10x6xf32>
    %654 = arith.mulf %653, %639 : vector<10x6xf32>
    %655 = arith.addf %637, %654 : vector<10x6xf32>
    %656 = vector.extract_strided_slice %3 {offsets = [0, 4, 0], sizes = [1, 10, 6], strides = [1, 1, 1]} : vector<3x16x8xf32> to vector<1x10x6xf32>
    %657 = vector.shape_cast %656 : vector<1x10x6xf32> to vector<10x6xf32>
    %c144 = arith.constant 144 : index
    %658 = memref.load %arg1[%c144] : memref<252xf32, #tpu.memory_space<smem>>
    %659 = vector.broadcast %658 : f32 to vector<10x6xf32>
    %660 = arith.mulf %659, %657 : vector<10x6xf32>
    %661 = arith.addf %643, %660 : vector<10x6xf32>
    %c145 = arith.constant 145 : index
    %662 = memref.load %arg1[%c145] : memref<252xf32, #tpu.memory_space<smem>>
    %663 = vector.broadcast %662 : f32 to vector<10x6xf32>
    %664 = arith.mulf %663, %657 : vector<10x6xf32>
    %665 = arith.addf %647, %664 : vector<10x6xf32>
    %c146 = arith.constant 146 : index
    %666 = memref.load %arg1[%c146] : memref<252xf32, #tpu.memory_space<smem>>
    %667 = vector.broadcast %666 : f32 to vector<10x6xf32>
    %668 = arith.mulf %667, %657 : vector<10x6xf32>
    %669 = arith.addf %651, %668 : vector<10x6xf32>
    %c147 = arith.constant 147 : index
    %670 = memref.load %arg1[%c147] : memref<252xf32, #tpu.memory_space<smem>>
    %671 = vector.broadcast %670 : f32 to vector<10x6xf32>
    %672 = arith.mulf %671, %657 : vector<10x6xf32>
    %673 = arith.addf %655, %672 : vector<10x6xf32>
    %674 = vector.extract_strided_slice %3 {offsets = [1, 4, 0], sizes = [1, 10, 6], strides = [1, 1, 1]} : vector<3x16x8xf32> to vector<1x10x6xf32>
    %675 = vector.shape_cast %674 : vector<1x10x6xf32> to vector<10x6xf32>
    %c148 = arith.constant 148 : index
    %676 = memref.load %arg1[%c148] : memref<252xf32, #tpu.memory_space<smem>>
    %677 = vector.broadcast %676 : f32 to vector<10x6xf32>
    %678 = arith.mulf %677, %675 : vector<10x6xf32>
    %679 = arith.addf %661, %678 : vector<10x6xf32>
    %c149 = arith.constant 149 : index
    %680 = memref.load %arg1[%c149] : memref<252xf32, #tpu.memory_space<smem>>
    %681 = vector.broadcast %680 : f32 to vector<10x6xf32>
    %682 = arith.mulf %681, %675 : vector<10x6xf32>
    %683 = arith.addf %665, %682 : vector<10x6xf32>
    %c150 = arith.constant 150 : index
    %684 = memref.load %arg1[%c150] : memref<252xf32, #tpu.memory_space<smem>>
    %685 = vector.broadcast %684 : f32 to vector<10x6xf32>
    %686 = arith.mulf %685, %675 : vector<10x6xf32>
    %687 = arith.addf %669, %686 : vector<10x6xf32>
    %c151 = arith.constant 151 : index
    %688 = memref.load %arg1[%c151] : memref<252xf32, #tpu.memory_space<smem>>
    %689 = vector.broadcast %688 : f32 to vector<10x6xf32>
    %690 = arith.mulf %689, %675 : vector<10x6xf32>
    %691 = arith.addf %673, %690 : vector<10x6xf32>
    %692 = vector.extract_strided_slice %3 {offsets = [2, 4, 0], sizes = [1, 10, 6], strides = [1, 1, 1]} : vector<3x16x8xf32> to vector<1x10x6xf32>
    %693 = vector.shape_cast %692 : vector<1x10x6xf32> to vector<10x6xf32>
    %c152 = arith.constant 152 : index
    %694 = memref.load %arg1[%c152] : memref<252xf32, #tpu.memory_space<smem>>
    %695 = vector.broadcast %694 : f32 to vector<10x6xf32>
    %696 = arith.mulf %695, %693 : vector<10x6xf32>
    %697 = arith.addf %679, %696 : vector<10x6xf32>
    %c153 = arith.constant 153 : index
    %698 = memref.load %arg1[%c153] : memref<252xf32, #tpu.memory_space<smem>>
    %699 = vector.broadcast %698 : f32 to vector<10x6xf32>
    %700 = arith.mulf %699, %693 : vector<10x6xf32>
    %701 = arith.addf %683, %700 : vector<10x6xf32>
    %c154 = arith.constant 154 : index
    %702 = memref.load %arg1[%c154] : memref<252xf32, #tpu.memory_space<smem>>
    %703 = vector.broadcast %702 : f32 to vector<10x6xf32>
    %704 = arith.mulf %703, %693 : vector<10x6xf32>
    %705 = arith.addf %687, %704 : vector<10x6xf32>
    %c155 = arith.constant 155 : index
    %706 = memref.load %arg1[%c155] : memref<252xf32, #tpu.memory_space<smem>>
    %707 = vector.broadcast %706 : f32 to vector<10x6xf32>
    %708 = arith.mulf %707, %693 : vector<10x6xf32>
    %709 = arith.addf %691, %708 : vector<10x6xf32>
    %710 = vector.extract_strided_slice %3 {offsets = [0, 4, 1], sizes = [1, 10, 6], strides = [1, 1, 1]} : vector<3x16x8xf32> to vector<1x10x6xf32>
    %711 = vector.shape_cast %710 : vector<1x10x6xf32> to vector<10x6xf32>
    %c156 = arith.constant 156 : index
    %712 = memref.load %arg1[%c156] : memref<252xf32, #tpu.memory_space<smem>>
    %713 = vector.broadcast %712 : f32 to vector<10x6xf32>
    %714 = arith.mulf %713, %711 : vector<10x6xf32>
    %715 = arith.addf %697, %714 : vector<10x6xf32>
    %c157 = arith.constant 157 : index
    %716 = memref.load %arg1[%c157] : memref<252xf32, #tpu.memory_space<smem>>
    %717 = vector.broadcast %716 : f32 to vector<10x6xf32>
    %718 = arith.mulf %717, %711 : vector<10x6xf32>
    %719 = arith.addf %701, %718 : vector<10x6xf32>
    %c158 = arith.constant 158 : index
    %720 = memref.load %arg1[%c158] : memref<252xf32, #tpu.memory_space<smem>>
    %721 = vector.broadcast %720 : f32 to vector<10x6xf32>
    %722 = arith.mulf %721, %711 : vector<10x6xf32>
    %723 = arith.addf %705, %722 : vector<10x6xf32>
    %c159 = arith.constant 159 : index
    %724 = memref.load %arg1[%c159] : memref<252xf32, #tpu.memory_space<smem>>
    %725 = vector.broadcast %724 : f32 to vector<10x6xf32>
    %726 = arith.mulf %725, %711 : vector<10x6xf32>
    %727 = arith.addf %709, %726 : vector<10x6xf32>
    %728 = vector.extract_strided_slice %3 {offsets = [1, 4, 1], sizes = [1, 10, 6], strides = [1, 1, 1]} : vector<3x16x8xf32> to vector<1x10x6xf32>
    %729 = vector.shape_cast %728 : vector<1x10x6xf32> to vector<10x6xf32>
    %c160 = arith.constant 160 : index
    %730 = memref.load %arg1[%c160] : memref<252xf32, #tpu.memory_space<smem>>
    %731 = vector.broadcast %730 : f32 to vector<10x6xf32>
    %732 = arith.mulf %731, %729 : vector<10x6xf32>
    %733 = arith.addf %715, %732 : vector<10x6xf32>
    %c161 = arith.constant 161 : index
    %734 = memref.load %arg1[%c161] : memref<252xf32, #tpu.memory_space<smem>>
    %735 = vector.broadcast %734 : f32 to vector<10x6xf32>
    %736 = arith.mulf %735, %729 : vector<10x6xf32>
    %737 = arith.addf %719, %736 : vector<10x6xf32>
    %c162 = arith.constant 162 : index
    %738 = memref.load %arg1[%c162] : memref<252xf32, #tpu.memory_space<smem>>
    %739 = vector.broadcast %738 : f32 to vector<10x6xf32>
    %740 = arith.mulf %739, %729 : vector<10x6xf32>
    %741 = arith.addf %723, %740 : vector<10x6xf32>
    %c163 = arith.constant 163 : index
    %742 = memref.load %arg1[%c163] : memref<252xf32, #tpu.memory_space<smem>>
    %743 = vector.broadcast %742 : f32 to vector<10x6xf32>
    %744 = arith.mulf %743, %729 : vector<10x6xf32>
    %745 = arith.addf %727, %744 : vector<10x6xf32>
    %746 = vector.extract_strided_slice %3 {offsets = [2, 4, 1], sizes = [1, 10, 6], strides = [1, 1, 1]} : vector<3x16x8xf32> to vector<1x10x6xf32>
    %747 = vector.shape_cast %746 : vector<1x10x6xf32> to vector<10x6xf32>
    %c164 = arith.constant 164 : index
    %748 = memref.load %arg1[%c164] : memref<252xf32, #tpu.memory_space<smem>>
    %749 = vector.broadcast %748 : f32 to vector<10x6xf32>
    %750 = arith.mulf %749, %747 : vector<10x6xf32>
    %751 = arith.addf %733, %750 : vector<10x6xf32>
    %c165 = arith.constant 165 : index
    %752 = memref.load %arg1[%c165] : memref<252xf32, #tpu.memory_space<smem>>
    %753 = vector.broadcast %752 : f32 to vector<10x6xf32>
    %754 = arith.mulf %753, %747 : vector<10x6xf32>
    %755 = arith.addf %737, %754 : vector<10x6xf32>
    %c166 = arith.constant 166 : index
    %756 = memref.load %arg1[%c166] : memref<252xf32, #tpu.memory_space<smem>>
    %757 = vector.broadcast %756 : f32 to vector<10x6xf32>
    %758 = arith.mulf %757, %747 : vector<10x6xf32>
    %759 = arith.addf %741, %758 : vector<10x6xf32>
    %c167 = arith.constant 167 : index
    %760 = memref.load %arg1[%c167] : memref<252xf32, #tpu.memory_space<smem>>
    %761 = vector.broadcast %760 : f32 to vector<10x6xf32>
    %762 = arith.mulf %761, %747 : vector<10x6xf32>
    %763 = arith.addf %745, %762 : vector<10x6xf32>
    %764 = vector.extract_strided_slice %3 {offsets = [0, 4, 2], sizes = [1, 10, 6], strides = [1, 1, 1]} : vector<3x16x8xf32> to vector<1x10x6xf32>
    %765 = vector.shape_cast %764 : vector<1x10x6xf32> to vector<10x6xf32>
    %c168 = arith.constant 168 : index
    %766 = memref.load %arg1[%c168] : memref<252xf32, #tpu.memory_space<smem>>
    %767 = vector.broadcast %766 : f32 to vector<10x6xf32>
    %768 = arith.mulf %767, %765 : vector<10x6xf32>
    %769 = arith.addf %751, %768 : vector<10x6xf32>
    %c169 = arith.constant 169 : index
    %770 = memref.load %arg1[%c169] : memref<252xf32, #tpu.memory_space<smem>>
    %771 = vector.broadcast %770 : f32 to vector<10x6xf32>
    %772 = arith.mulf %771, %765 : vector<10x6xf32>
    %773 = arith.addf %755, %772 : vector<10x6xf32>
    %c170 = arith.constant 170 : index
    %774 = memref.load %arg1[%c170] : memref<252xf32, #tpu.memory_space<smem>>
    %775 = vector.broadcast %774 : f32 to vector<10x6xf32>
    %776 = arith.mulf %775, %765 : vector<10x6xf32>
    %777 = arith.addf %759, %776 : vector<10x6xf32>
    %c171 = arith.constant 171 : index
    %778 = memref.load %arg1[%c171] : memref<252xf32, #tpu.memory_space<smem>>
    %779 = vector.broadcast %778 : f32 to vector<10x6xf32>
    %780 = arith.mulf %779, %765 : vector<10x6xf32>
    %781 = arith.addf %763, %780 : vector<10x6xf32>
    %782 = vector.extract_strided_slice %3 {offsets = [1, 4, 2], sizes = [1, 10, 6], strides = [1, 1, 1]} : vector<3x16x8xf32> to vector<1x10x6xf32>
    %783 = vector.shape_cast %782 : vector<1x10x6xf32> to vector<10x6xf32>
    %c172 = arith.constant 172 : index
    %784 = memref.load %arg1[%c172] : memref<252xf32, #tpu.memory_space<smem>>
    %785 = vector.broadcast %784 : f32 to vector<10x6xf32>
    %786 = arith.mulf %785, %783 : vector<10x6xf32>
    %787 = arith.addf %769, %786 : vector<10x6xf32>
    %c173 = arith.constant 173 : index
    %788 = memref.load %arg1[%c173] : memref<252xf32, #tpu.memory_space<smem>>
    %789 = vector.broadcast %788 : f32 to vector<10x6xf32>
    %790 = arith.mulf %789, %783 : vector<10x6xf32>
    %791 = arith.addf %773, %790 : vector<10x6xf32>
    %c174 = arith.constant 174 : index
    %792 = memref.load %arg1[%c174] : memref<252xf32, #tpu.memory_space<smem>>
    %793 = vector.broadcast %792 : f32 to vector<10x6xf32>
    %794 = arith.mulf %793, %783 : vector<10x6xf32>
    %795 = arith.addf %777, %794 : vector<10x6xf32>
    %c175 = arith.constant 175 : index
    %796 = memref.load %arg1[%c175] : memref<252xf32, #tpu.memory_space<smem>>
    %797 = vector.broadcast %796 : f32 to vector<10x6xf32>
    %798 = arith.mulf %797, %783 : vector<10x6xf32>
    %799 = arith.addf %781, %798 : vector<10x6xf32>
    %800 = vector.extract_strided_slice %3 {offsets = [2, 4, 2], sizes = [1, 10, 6], strides = [1, 1, 1]} : vector<3x16x8xf32> to vector<1x10x6xf32>
    %801 = vector.shape_cast %800 : vector<1x10x6xf32> to vector<10x6xf32>
    %c176 = arith.constant 176 : index
    %802 = memref.load %arg1[%c176] : memref<252xf32, #tpu.memory_space<smem>>
    %803 = vector.broadcast %802 : f32 to vector<10x6xf32>
    %804 = arith.mulf %803, %801 : vector<10x6xf32>
    %805 = arith.addf %787, %804 : vector<10x6xf32>
    %c177 = arith.constant 177 : index
    %806 = memref.load %arg1[%c177] : memref<252xf32, #tpu.memory_space<smem>>
    %807 = vector.broadcast %806 : f32 to vector<10x6xf32>
    %808 = arith.mulf %807, %801 : vector<10x6xf32>
    %809 = arith.addf %791, %808 : vector<10x6xf32>
    %c178 = arith.constant 178 : index
    %810 = memref.load %arg1[%c178] : memref<252xf32, #tpu.memory_space<smem>>
    %811 = vector.broadcast %810 : f32 to vector<10x6xf32>
    %812 = arith.mulf %811, %801 : vector<10x6xf32>
    %813 = arith.addf %795, %812 : vector<10x6xf32>
    %c179 = arith.constant 179 : index
    %814 = memref.load %arg1[%c179] : memref<252xf32, #tpu.memory_space<smem>>
    %815 = vector.broadcast %814 : f32 to vector<10x6xf32>
    %816 = arith.mulf %815, %801 : vector<10x6xf32>
    %817 = arith.addf %799, %816 : vector<10x6xf32>
    %818 = vector.extract_strided_slice %3 {offsets = [0, 5, 0], sizes = [1, 10, 6], strides = [1, 1, 1]} : vector<3x16x8xf32> to vector<1x10x6xf32>
    %819 = vector.shape_cast %818 : vector<1x10x6xf32> to vector<10x6xf32>
    %c180 = arith.constant 180 : index
    %820 = memref.load %arg1[%c180] : memref<252xf32, #tpu.memory_space<smem>>
    %821 = vector.broadcast %820 : f32 to vector<10x6xf32>
    %822 = arith.mulf %821, %819 : vector<10x6xf32>
    %823 = arith.addf %805, %822 : vector<10x6xf32>
    %c181 = arith.constant 181 : index
    %824 = memref.load %arg1[%c181] : memref<252xf32, #tpu.memory_space<smem>>
    %825 = vector.broadcast %824 : f32 to vector<10x6xf32>
    %826 = arith.mulf %825, %819 : vector<10x6xf32>
    %827 = arith.addf %809, %826 : vector<10x6xf32>
    %c182 = arith.constant 182 : index
    %828 = memref.load %arg1[%c182] : memref<252xf32, #tpu.memory_space<smem>>
    %829 = vector.broadcast %828 : f32 to vector<10x6xf32>
    %830 = arith.mulf %829, %819 : vector<10x6xf32>
    %831 = arith.addf %813, %830 : vector<10x6xf32>
    %c183 = arith.constant 183 : index
    %832 = memref.load %arg1[%c183] : memref<252xf32, #tpu.memory_space<smem>>
    %833 = vector.broadcast %832 : f32 to vector<10x6xf32>
    %834 = arith.mulf %833, %819 : vector<10x6xf32>
    %835 = arith.addf %817, %834 : vector<10x6xf32>
    %836 = vector.extract_strided_slice %3 {offsets = [1, 5, 0], sizes = [1, 10, 6], strides = [1, 1, 1]} : vector<3x16x8xf32> to vector<1x10x6xf32>
    %837 = vector.shape_cast %836 : vector<1x10x6xf32> to vector<10x6xf32>
    %c184 = arith.constant 184 : index
    %838 = memref.load %arg1[%c184] : memref<252xf32, #tpu.memory_space<smem>>
    %839 = vector.broadcast %838 : f32 to vector<10x6xf32>
    %840 = arith.mulf %839, %837 : vector<10x6xf32>
    %841 = arith.addf %823, %840 : vector<10x6xf32>
    %c185 = arith.constant 185 : index
    %842 = memref.load %arg1[%c185] : memref<252xf32, #tpu.memory_space<smem>>
    %843 = vector.broadcast %842 : f32 to vector<10x6xf32>
    %844 = arith.mulf %843, %837 : vector<10x6xf32>
    %845 = arith.addf %827, %844 : vector<10x6xf32>
    %c186 = arith.constant 186 : index
    %846 = memref.load %arg1[%c186] : memref<252xf32, #tpu.memory_space<smem>>
    %847 = vector.broadcast %846 : f32 to vector<10x6xf32>
    %848 = arith.mulf %847, %837 : vector<10x6xf32>
    %849 = arith.addf %831, %848 : vector<10x6xf32>
    %c187 = arith.constant 187 : index
    %850 = memref.load %arg1[%c187] : memref<252xf32, #tpu.memory_space<smem>>
    %851 = vector.broadcast %850 : f32 to vector<10x6xf32>
    %852 = arith.mulf %851, %837 : vector<10x6xf32>
    %853 = arith.addf %835, %852 : vector<10x6xf32>
    %854 = vector.extract_strided_slice %3 {offsets = [2, 5, 0], sizes = [1, 10, 6], strides = [1, 1, 1]} : vector<3x16x8xf32> to vector<1x10x6xf32>
    %855 = vector.shape_cast %854 : vector<1x10x6xf32> to vector<10x6xf32>
    %c188 = arith.constant 188 : index
    %856 = memref.load %arg1[%c188] : memref<252xf32, #tpu.memory_space<smem>>
    %857 = vector.broadcast %856 : f32 to vector<10x6xf32>
    %858 = arith.mulf %857, %855 : vector<10x6xf32>
    %859 = arith.addf %841, %858 : vector<10x6xf32>
    %c189 = arith.constant 189 : index
    %860 = memref.load %arg1[%c189] : memref<252xf32, #tpu.memory_space<smem>>
    %861 = vector.broadcast %860 : f32 to vector<10x6xf32>
    %862 = arith.mulf %861, %855 : vector<10x6xf32>
    %863 = arith.addf %845, %862 : vector<10x6xf32>
    %c190 = arith.constant 190 : index
    %864 = memref.load %arg1[%c190] : memref<252xf32, #tpu.memory_space<smem>>
    %865 = vector.broadcast %864 : f32 to vector<10x6xf32>
    %866 = arith.mulf %865, %855 : vector<10x6xf32>
    %867 = arith.addf %849, %866 : vector<10x6xf32>
    %c191 = arith.constant 191 : index
    %868 = memref.load %arg1[%c191] : memref<252xf32, #tpu.memory_space<smem>>
    %869 = vector.broadcast %868 : f32 to vector<10x6xf32>
    %870 = arith.mulf %869, %855 : vector<10x6xf32>
    %871 = arith.addf %853, %870 : vector<10x6xf32>
    %872 = vector.extract_strided_slice %3 {offsets = [0, 5, 1], sizes = [1, 10, 6], strides = [1, 1, 1]} : vector<3x16x8xf32> to vector<1x10x6xf32>
    %873 = vector.shape_cast %872 : vector<1x10x6xf32> to vector<10x6xf32>
    %c192 = arith.constant 192 : index
    %874 = memref.load %arg1[%c192] : memref<252xf32, #tpu.memory_space<smem>>
    %875 = vector.broadcast %874 : f32 to vector<10x6xf32>
    %876 = arith.mulf %875, %873 : vector<10x6xf32>
    %877 = arith.addf %859, %876 : vector<10x6xf32>
    %c193 = arith.constant 193 : index
    %878 = memref.load %arg1[%c193] : memref<252xf32, #tpu.memory_space<smem>>
    %879 = vector.broadcast %878 : f32 to vector<10x6xf32>
    %880 = arith.mulf %879, %873 : vector<10x6xf32>
    %881 = arith.addf %863, %880 : vector<10x6xf32>
    %c194 = arith.constant 194 : index
    %882 = memref.load %arg1[%c194] : memref<252xf32, #tpu.memory_space<smem>>
    %883 = vector.broadcast %882 : f32 to vector<10x6xf32>
    %884 = arith.mulf %883, %873 : vector<10x6xf32>
    %885 = arith.addf %867, %884 : vector<10x6xf32>
    %c195 = arith.constant 195 : index
    %886 = memref.load %arg1[%c195] : memref<252xf32, #tpu.memory_space<smem>>
    %887 = vector.broadcast %886 : f32 to vector<10x6xf32>
    %888 = arith.mulf %887, %873 : vector<10x6xf32>
    %889 = arith.addf %871, %888 : vector<10x6xf32>
    %890 = vector.extract_strided_slice %3 {offsets = [1, 5, 1], sizes = [1, 10, 6], strides = [1, 1, 1]} : vector<3x16x8xf32> to vector<1x10x6xf32>
    %891 = vector.shape_cast %890 : vector<1x10x6xf32> to vector<10x6xf32>
    %c196 = arith.constant 196 : index
    %892 = memref.load %arg1[%c196] : memref<252xf32, #tpu.memory_space<smem>>
    %893 = vector.broadcast %892 : f32 to vector<10x6xf32>
    %894 = arith.mulf %893, %891 : vector<10x6xf32>
    %895 = arith.addf %877, %894 : vector<10x6xf32>
    %c197 = arith.constant 197 : index
    %896 = memref.load %arg1[%c197] : memref<252xf32, #tpu.memory_space<smem>>
    %897 = vector.broadcast %896 : f32 to vector<10x6xf32>
    %898 = arith.mulf %897, %891 : vector<10x6xf32>
    %899 = arith.addf %881, %898 : vector<10x6xf32>
    %c198 = arith.constant 198 : index
    %900 = memref.load %arg1[%c198] : memref<252xf32, #tpu.memory_space<smem>>
    %901 = vector.broadcast %900 : f32 to vector<10x6xf32>
    %902 = arith.mulf %901, %891 : vector<10x6xf32>
    %903 = arith.addf %885, %902 : vector<10x6xf32>
    %c199 = arith.constant 199 : index
    %904 = memref.load %arg1[%c199] : memref<252xf32, #tpu.memory_space<smem>>
    %905 = vector.broadcast %904 : f32 to vector<10x6xf32>
    %906 = arith.mulf %905, %891 : vector<10x6xf32>
    %907 = arith.addf %889, %906 : vector<10x6xf32>
    %908 = vector.extract_strided_slice %3 {offsets = [2, 5, 1], sizes = [1, 10, 6], strides = [1, 1, 1]} : vector<3x16x8xf32> to vector<1x10x6xf32>
    %909 = vector.shape_cast %908 : vector<1x10x6xf32> to vector<10x6xf32>
    %c200 = arith.constant 200 : index
    %910 = memref.load %arg1[%c200] : memref<252xf32, #tpu.memory_space<smem>>
    %911 = vector.broadcast %910 : f32 to vector<10x6xf32>
    %912 = arith.mulf %911, %909 : vector<10x6xf32>
    %913 = arith.addf %895, %912 : vector<10x6xf32>
    %c201 = arith.constant 201 : index
    %914 = memref.load %arg1[%c201] : memref<252xf32, #tpu.memory_space<smem>>
    %915 = vector.broadcast %914 : f32 to vector<10x6xf32>
    %916 = arith.mulf %915, %909 : vector<10x6xf32>
    %917 = arith.addf %899, %916 : vector<10x6xf32>
    %c202 = arith.constant 202 : index
    %918 = memref.load %arg1[%c202] : memref<252xf32, #tpu.memory_space<smem>>
    %919 = vector.broadcast %918 : f32 to vector<10x6xf32>
    %920 = arith.mulf %919, %909 : vector<10x6xf32>
    %921 = arith.addf %903, %920 : vector<10x6xf32>
    %c203 = arith.constant 203 : index
    %922 = memref.load %arg1[%c203] : memref<252xf32, #tpu.memory_space<smem>>
    %923 = vector.broadcast %922 : f32 to vector<10x6xf32>
    %924 = arith.mulf %923, %909 : vector<10x6xf32>
    %925 = arith.addf %907, %924 : vector<10x6xf32>
    %926 = vector.extract_strided_slice %3 {offsets = [0, 5, 2], sizes = [1, 10, 6], strides = [1, 1, 1]} : vector<3x16x8xf32> to vector<1x10x6xf32>
    %927 = vector.shape_cast %926 : vector<1x10x6xf32> to vector<10x6xf32>
    %c204 = arith.constant 204 : index
    %928 = memref.load %arg1[%c204] : memref<252xf32, #tpu.memory_space<smem>>
    %929 = vector.broadcast %928 : f32 to vector<10x6xf32>
    %930 = arith.mulf %929, %927 : vector<10x6xf32>
    %931 = arith.addf %913, %930 : vector<10x6xf32>
    %c205 = arith.constant 205 : index
    %932 = memref.load %arg1[%c205] : memref<252xf32, #tpu.memory_space<smem>>
    %933 = vector.broadcast %932 : f32 to vector<10x6xf32>
    %934 = arith.mulf %933, %927 : vector<10x6xf32>
    %935 = arith.addf %917, %934 : vector<10x6xf32>
    %c206 = arith.constant 206 : index
    %936 = memref.load %arg1[%c206] : memref<252xf32, #tpu.memory_space<smem>>
    %937 = vector.broadcast %936 : f32 to vector<10x6xf32>
    %938 = arith.mulf %937, %927 : vector<10x6xf32>
    %939 = arith.addf %921, %938 : vector<10x6xf32>
    %c207 = arith.constant 207 : index
    %940 = memref.load %arg1[%c207] : memref<252xf32, #tpu.memory_space<smem>>
    %941 = vector.broadcast %940 : f32 to vector<10x6xf32>
    %942 = arith.mulf %941, %927 : vector<10x6xf32>
    %943 = arith.addf %925, %942 : vector<10x6xf32>
    %944 = vector.extract_strided_slice %3 {offsets = [1, 5, 2], sizes = [1, 10, 6], strides = [1, 1, 1]} : vector<3x16x8xf32> to vector<1x10x6xf32>
    %945 = vector.shape_cast %944 : vector<1x10x6xf32> to vector<10x6xf32>
    %c208 = arith.constant 208 : index
    %946 = memref.load %arg1[%c208] : memref<252xf32, #tpu.memory_space<smem>>
    %947 = vector.broadcast %946 : f32 to vector<10x6xf32>
    %948 = arith.mulf %947, %945 : vector<10x6xf32>
    %949 = arith.addf %931, %948 : vector<10x6xf32>
    %c209 = arith.constant 209 : index
    %950 = memref.load %arg1[%c209] : memref<252xf32, #tpu.memory_space<smem>>
    %951 = vector.broadcast %950 : f32 to vector<10x6xf32>
    %952 = arith.mulf %951, %945 : vector<10x6xf32>
    %953 = arith.addf %935, %952 : vector<10x6xf32>
    %c210 = arith.constant 210 : index
    %954 = memref.load %arg1[%c210] : memref<252xf32, #tpu.memory_space<smem>>
    %955 = vector.broadcast %954 : f32 to vector<10x6xf32>
    %956 = arith.mulf %955, %945 : vector<10x6xf32>
    %957 = arith.addf %939, %956 : vector<10x6xf32>
    %c211 = arith.constant 211 : index
    %958 = memref.load %arg1[%c211] : memref<252xf32, #tpu.memory_space<smem>>
    %959 = vector.broadcast %958 : f32 to vector<10x6xf32>
    %960 = arith.mulf %959, %945 : vector<10x6xf32>
    %961 = arith.addf %943, %960 : vector<10x6xf32>
    %962 = vector.extract_strided_slice %3 {offsets = [2, 5, 2], sizes = [1, 10, 6], strides = [1, 1, 1]} : vector<3x16x8xf32> to vector<1x10x6xf32>
    %963 = vector.shape_cast %962 : vector<1x10x6xf32> to vector<10x6xf32>
    %c212 = arith.constant 212 : index
    %964 = memref.load %arg1[%c212] : memref<252xf32, #tpu.memory_space<smem>>
    %965 = vector.broadcast %964 : f32 to vector<10x6xf32>
    %966 = arith.mulf %965, %963 : vector<10x6xf32>
    %967 = arith.addf %949, %966 : vector<10x6xf32>
    %c213 = arith.constant 213 : index
    %968 = memref.load %arg1[%c213] : memref<252xf32, #tpu.memory_space<smem>>
    %969 = vector.broadcast %968 : f32 to vector<10x6xf32>
    %970 = arith.mulf %969, %963 : vector<10x6xf32>
    %971 = arith.addf %953, %970 : vector<10x6xf32>
    %c214 = arith.constant 214 : index
    %972 = memref.load %arg1[%c214] : memref<252xf32, #tpu.memory_space<smem>>
    %973 = vector.broadcast %972 : f32 to vector<10x6xf32>
    %974 = arith.mulf %973, %963 : vector<10x6xf32>
    %975 = arith.addf %957, %974 : vector<10x6xf32>
    %c215 = arith.constant 215 : index
    %976 = memref.load %arg1[%c215] : memref<252xf32, #tpu.memory_space<smem>>
    %977 = vector.broadcast %976 : f32 to vector<10x6xf32>
    %978 = arith.mulf %977, %963 : vector<10x6xf32>
    %979 = arith.addf %961, %978 : vector<10x6xf32>
    %980 = vector.extract_strided_slice %3 {offsets = [0, 6, 0], sizes = [1, 10, 6], strides = [1, 1, 1]} : vector<3x16x8xf32> to vector<1x10x6xf32>
    %981 = vector.shape_cast %980 : vector<1x10x6xf32> to vector<10x6xf32>
    %c216 = arith.constant 216 : index
    %982 = memref.load %arg1[%c216] : memref<252xf32, #tpu.memory_space<smem>>
    %983 = vector.broadcast %982 : f32 to vector<10x6xf32>
    %984 = arith.mulf %983, %981 : vector<10x6xf32>
    %985 = arith.addf %967, %984 : vector<10x6xf32>
    %c217 = arith.constant 217 : index
    %986 = memref.load %arg1[%c217] : memref<252xf32, #tpu.memory_space<smem>>
    %987 = vector.broadcast %986 : f32 to vector<10x6xf32>
    %988 = arith.mulf %987, %981 : vector<10x6xf32>
    %989 = arith.addf %971, %988 : vector<10x6xf32>
    %c218 = arith.constant 218 : index
    %990 = memref.load %arg1[%c218] : memref<252xf32, #tpu.memory_space<smem>>
    %991 = vector.broadcast %990 : f32 to vector<10x6xf32>
    %992 = arith.mulf %991, %981 : vector<10x6xf32>
    %993 = arith.addf %975, %992 : vector<10x6xf32>
    %c219 = arith.constant 219 : index
    %994 = memref.load %arg1[%c219] : memref<252xf32, #tpu.memory_space<smem>>
    %995 = vector.broadcast %994 : f32 to vector<10x6xf32>
    %996 = arith.mulf %995, %981 : vector<10x6xf32>
    %997 = arith.addf %979, %996 : vector<10x6xf32>
    %998 = vector.extract_strided_slice %3 {offsets = [1, 6, 0], sizes = [1, 10, 6], strides = [1, 1, 1]} : vector<3x16x8xf32> to vector<1x10x6xf32>
    %999 = vector.shape_cast %998 : vector<1x10x6xf32> to vector<10x6xf32>
    %c220 = arith.constant 220 : index
    %1000 = memref.load %arg1[%c220] : memref<252xf32, #tpu.memory_space<smem>>
    %1001 = vector.broadcast %1000 : f32 to vector<10x6xf32>
    %1002 = arith.mulf %1001, %999 : vector<10x6xf32>
    %1003 = arith.addf %985, %1002 : vector<10x6xf32>
    %c221 = arith.constant 221 : index
    %1004 = memref.load %arg1[%c221] : memref<252xf32, #tpu.memory_space<smem>>
    %1005 = vector.broadcast %1004 : f32 to vector<10x6xf32>
    %1006 = arith.mulf %1005, %999 : vector<10x6xf32>
    %1007 = arith.addf %989, %1006 : vector<10x6xf32>
    %c222 = arith.constant 222 : index
    %1008 = memref.load %arg1[%c222] : memref<252xf32, #tpu.memory_space<smem>>
    %1009 = vector.broadcast %1008 : f32 to vector<10x6xf32>
    %1010 = arith.mulf %1009, %999 : vector<10x6xf32>
    %1011 = arith.addf %993, %1010 : vector<10x6xf32>
    %c223 = arith.constant 223 : index
    %1012 = memref.load %arg1[%c223] : memref<252xf32, #tpu.memory_space<smem>>
    %1013 = vector.broadcast %1012 : f32 to vector<10x6xf32>
    %1014 = arith.mulf %1013, %999 : vector<10x6xf32>
    %1015 = arith.addf %997, %1014 : vector<10x6xf32>
    %1016 = vector.extract_strided_slice %3 {offsets = [2, 6, 0], sizes = [1, 10, 6], strides = [1, 1, 1]} : vector<3x16x8xf32> to vector<1x10x6xf32>
    %1017 = vector.shape_cast %1016 : vector<1x10x6xf32> to vector<10x6xf32>
    %c224 = arith.constant 224 : index
    %1018 = memref.load %arg1[%c224] : memref<252xf32, #tpu.memory_space<smem>>
    %1019 = vector.broadcast %1018 : f32 to vector<10x6xf32>
    %1020 = arith.mulf %1019, %1017 : vector<10x6xf32>
    %1021 = arith.addf %1003, %1020 : vector<10x6xf32>
    %c225 = arith.constant 225 : index
    %1022 = memref.load %arg1[%c225] : memref<252xf32, #tpu.memory_space<smem>>
    %1023 = vector.broadcast %1022 : f32 to vector<10x6xf32>
    %1024 = arith.mulf %1023, %1017 : vector<10x6xf32>
    %1025 = arith.addf %1007, %1024 : vector<10x6xf32>
    %c226 = arith.constant 226 : index
    %1026 = memref.load %arg1[%c226] : memref<252xf32, #tpu.memory_space<smem>>
    %1027 = vector.broadcast %1026 : f32 to vector<10x6xf32>
    %1028 = arith.mulf %1027, %1017 : vector<10x6xf32>
    %1029 = arith.addf %1011, %1028 : vector<10x6xf32>
    %c227 = arith.constant 227 : index
    %1030 = memref.load %arg1[%c227] : memref<252xf32, #tpu.memory_space<smem>>
    %1031 = vector.broadcast %1030 : f32 to vector<10x6xf32>
    %1032 = arith.mulf %1031, %1017 : vector<10x6xf32>
    %1033 = arith.addf %1015, %1032 : vector<10x6xf32>
    %1034 = vector.extract_strided_slice %3 {offsets = [0, 6, 1], sizes = [1, 10, 6], strides = [1, 1, 1]} : vector<3x16x8xf32> to vector<1x10x6xf32>
    %1035 = vector.shape_cast %1034 : vector<1x10x6xf32> to vector<10x6xf32>
    %c228 = arith.constant 228 : index
    %1036 = memref.load %arg1[%c228] : memref<252xf32, #tpu.memory_space<smem>>
    %1037 = vector.broadcast %1036 : f32 to vector<10x6xf32>
    %1038 = arith.mulf %1037, %1035 : vector<10x6xf32>
    %1039 = arith.addf %1021, %1038 : vector<10x6xf32>
    %c229 = arith.constant 229 : index
    %1040 = memref.load %arg1[%c229] : memref<252xf32, #tpu.memory_space<smem>>
    %1041 = vector.broadcast %1040 : f32 to vector<10x6xf32>
    %1042 = arith.mulf %1041, %1035 : vector<10x6xf32>
    %1043 = arith.addf %1025, %1042 : vector<10x6xf32>
    %c230 = arith.constant 230 : index
    %1044 = memref.load %arg1[%c230] : memref<252xf32, #tpu.memory_space<smem>>
    %1045 = vector.broadcast %1044 : f32 to vector<10x6xf32>
    %1046 = arith.mulf %1045, %1035 : vector<10x6xf32>
    %1047 = arith.addf %1029, %1046 : vector<10x6xf32>
    %c231 = arith.constant 231 : index
    %1048 = memref.load %arg1[%c231] : memref<252xf32, #tpu.memory_space<smem>>
    %1049 = vector.broadcast %1048 : f32 to vector<10x6xf32>
    %1050 = arith.mulf %1049, %1035 : vector<10x6xf32>
    %1051 = arith.addf %1033, %1050 : vector<10x6xf32>
    %1052 = vector.extract_strided_slice %3 {offsets = [1, 6, 1], sizes = [1, 10, 6], strides = [1, 1, 1]} : vector<3x16x8xf32> to vector<1x10x6xf32>
    %1053 = vector.shape_cast %1052 : vector<1x10x6xf32> to vector<10x6xf32>
    %c232 = arith.constant 232 : index
    %1054 = memref.load %arg1[%c232] : memref<252xf32, #tpu.memory_space<smem>>
    %1055 = vector.broadcast %1054 : f32 to vector<10x6xf32>
    %1056 = arith.mulf %1055, %1053 : vector<10x6xf32>
    %1057 = arith.addf %1039, %1056 : vector<10x6xf32>
    %c233 = arith.constant 233 : index
    %1058 = memref.load %arg1[%c233] : memref<252xf32, #tpu.memory_space<smem>>
    %1059 = vector.broadcast %1058 : f32 to vector<10x6xf32>
    %1060 = arith.mulf %1059, %1053 : vector<10x6xf32>
    %1061 = arith.addf %1043, %1060 : vector<10x6xf32>
    %c234 = arith.constant 234 : index
    %1062 = memref.load %arg1[%c234] : memref<252xf32, #tpu.memory_space<smem>>
    %1063 = vector.broadcast %1062 : f32 to vector<10x6xf32>
    %1064 = arith.mulf %1063, %1053 : vector<10x6xf32>
    %1065 = arith.addf %1047, %1064 : vector<10x6xf32>
    %c235 = arith.constant 235 : index
    %1066 = memref.load %arg1[%c235] : memref<252xf32, #tpu.memory_space<smem>>
    %1067 = vector.broadcast %1066 : f32 to vector<10x6xf32>
    %1068 = arith.mulf %1067, %1053 : vector<10x6xf32>
    %1069 = arith.addf %1051, %1068 : vector<10x6xf32>
    %1070 = vector.extract_strided_slice %3 {offsets = [2, 6, 1], sizes = [1, 10, 6], strides = [1, 1, 1]} : vector<3x16x8xf32> to vector<1x10x6xf32>
    %1071 = vector.shape_cast %1070 : vector<1x10x6xf32> to vector<10x6xf32>
    %c236 = arith.constant 236 : index
    %1072 = memref.load %arg1[%c236] : memref<252xf32, #tpu.memory_space<smem>>
    %1073 = vector.broadcast %1072 : f32 to vector<10x6xf32>
    %1074 = arith.mulf %1073, %1071 : vector<10x6xf32>
    %1075 = arith.addf %1057, %1074 : vector<10x6xf32>
    %c237 = arith.constant 237 : index
    %1076 = memref.load %arg1[%c237] : memref<252xf32, #tpu.memory_space<smem>>
    %1077 = vector.broadcast %1076 : f32 to vector<10x6xf32>
    %1078 = arith.mulf %1077, %1071 : vector<10x6xf32>
    %1079 = arith.addf %1061, %1078 : vector<10x6xf32>
    %c238 = arith.constant 238 : index
    %1080 = memref.load %arg1[%c238] : memref<252xf32, #tpu.memory_space<smem>>
    %1081 = vector.broadcast %1080 : f32 to vector<10x6xf32>
    %1082 = arith.mulf %1081, %1071 : vector<10x6xf32>
    %1083 = arith.addf %1065, %1082 : vector<10x6xf32>
    %c239 = arith.constant 239 : index
    %1084 = memref.load %arg1[%c239] : memref<252xf32, #tpu.memory_space<smem>>
    %1085 = vector.broadcast %1084 : f32 to vector<10x6xf32>
    %1086 = arith.mulf %1085, %1071 : vector<10x6xf32>
    %1087 = arith.addf %1069, %1086 : vector<10x6xf32>
    %1088 = vector.extract_strided_slice %3 {offsets = [0, 6, 2], sizes = [1, 10, 6], strides = [1, 1, 1]} : vector<3x16x8xf32> to vector<1x10x6xf32>
    %1089 = vector.shape_cast %1088 : vector<1x10x6xf32> to vector<10x6xf32>
    %c240 = arith.constant 240 : index
    %1090 = memref.load %arg1[%c240] : memref<252xf32, #tpu.memory_space<smem>>
    %1091 = vector.broadcast %1090 : f32 to vector<10x6xf32>
    %1092 = arith.mulf %1091, %1089 : vector<10x6xf32>
    %1093 = arith.addf %1075, %1092 : vector<10x6xf32>
    %c241 = arith.constant 241 : index
    %1094 = memref.load %arg1[%c241] : memref<252xf32, #tpu.memory_space<smem>>
    %1095 = vector.broadcast %1094 : f32 to vector<10x6xf32>
    %1096 = arith.mulf %1095, %1089 : vector<10x6xf32>
    %1097 = arith.addf %1079, %1096 : vector<10x6xf32>
    %c242 = arith.constant 242 : index
    %1098 = memref.load %arg1[%c242] : memref<252xf32, #tpu.memory_space<smem>>
    %1099 = vector.broadcast %1098 : f32 to vector<10x6xf32>
    %1100 = arith.mulf %1099, %1089 : vector<10x6xf32>
    %1101 = arith.addf %1083, %1100 : vector<10x6xf32>
    %c243 = arith.constant 243 : index
    %1102 = memref.load %arg1[%c243] : memref<252xf32, #tpu.memory_space<smem>>
    %1103 = vector.broadcast %1102 : f32 to vector<10x6xf32>
    %1104 = arith.mulf %1103, %1089 : vector<10x6xf32>
    %1105 = arith.addf %1087, %1104 : vector<10x6xf32>
    %1106 = vector.extract_strided_slice %3 {offsets = [1, 6, 2], sizes = [1, 10, 6], strides = [1, 1, 1]} : vector<3x16x8xf32> to vector<1x10x6xf32>
    %1107 = vector.shape_cast %1106 : vector<1x10x6xf32> to vector<10x6xf32>
    %c244 = arith.constant 244 : index
    %1108 = memref.load %arg1[%c244] : memref<252xf32, #tpu.memory_space<smem>>
    %1109 = vector.broadcast %1108 : f32 to vector<10x6xf32>
    %1110 = arith.mulf %1109, %1107 : vector<10x6xf32>
    %1111 = arith.addf %1093, %1110 : vector<10x6xf32>
    %c245 = arith.constant 245 : index
    %1112 = memref.load %arg1[%c245] : memref<252xf32, #tpu.memory_space<smem>>
    %1113 = vector.broadcast %1112 : f32 to vector<10x6xf32>
    %1114 = arith.mulf %1113, %1107 : vector<10x6xf32>
    %1115 = arith.addf %1097, %1114 : vector<10x6xf32>
    %c246 = arith.constant 246 : index
    %1116 = memref.load %arg1[%c246] : memref<252xf32, #tpu.memory_space<smem>>
    %1117 = vector.broadcast %1116 : f32 to vector<10x6xf32>
    %1118 = arith.mulf %1117, %1107 : vector<10x6xf32>
    %1119 = arith.addf %1101, %1118 : vector<10x6xf32>
    %c247 = arith.constant 247 : index
    %1120 = memref.load %arg1[%c247] : memref<252xf32, #tpu.memory_space<smem>>
    %1121 = vector.broadcast %1120 : f32 to vector<10x6xf32>
    %1122 = arith.mulf %1121, %1107 : vector<10x6xf32>
    %1123 = arith.addf %1105, %1122 : vector<10x6xf32>
    %1124 = vector.extract_strided_slice %3 {offsets = [2, 6, 2], sizes = [1, 10, 6], strides = [1, 1, 1]} : vector<3x16x8xf32> to vector<1x10x6xf32>
    %1125 = vector.shape_cast %1124 : vector<1x10x6xf32> to vector<10x6xf32>
    %c248 = arith.constant 248 : index
    %1126 = memref.load %arg1[%c248] : memref<252xf32, #tpu.memory_space<smem>>
    %1127 = vector.broadcast %1126 : f32 to vector<10x6xf32>
    %1128 = arith.mulf %1127, %1125 : vector<10x6xf32>
    %1129 = arith.addf %1111, %1128 : vector<10x6xf32>
    %c249 = arith.constant 249 : index
    %1130 = memref.load %arg1[%c249] : memref<252xf32, #tpu.memory_space<smem>>
    %1131 = vector.broadcast %1130 : f32 to vector<10x6xf32>
    %1132 = arith.mulf %1131, %1125 : vector<10x6xf32>
    %1133 = arith.addf %1115, %1132 : vector<10x6xf32>
    %c250 = arith.constant 250 : index
    %1134 = memref.load %arg1[%c250] : memref<252xf32, #tpu.memory_space<smem>>
    %1135 = vector.broadcast %1134 : f32 to vector<10x6xf32>
    %1136 = arith.mulf %1135, %1125 : vector<10x6xf32>
    %1137 = arith.addf %1119, %1136 : vector<10x6xf32>
    %c251 = arith.constant 251 : index
    %1138 = memref.load %arg1[%c251] : memref<252xf32, #tpu.memory_space<smem>>
    %1139 = vector.broadcast %1138 : f32 to vector<10x6xf32>
    %1140 = arith.mulf %1139, %1125 : vector<10x6xf32>
    %1141 = arith.addf %1123, %1140 : vector<10x6xf32>
    %1142 = vector.shape_cast %1129 : vector<10x6xf32> to vector<1x10x6xf32>
    %1143 = vector.shape_cast %1133 : vector<10x6xf32> to vector<1x10x6xf32>
    %1144 = vector.shape_cast %1137 : vector<10x6xf32> to vector<1x10x6xf32>
    %1145 = vector.shape_cast %1141 : vector<10x6xf32> to vector<1x10x6xf32>
    %1146 = tpu.concatenate %1142, %1143, %1144, %1145 in 0 : vector<1x10x6xf32>, vector<1x10x6xf32>, vector<1x10x6xf32>, vector<1x10x6xf32> -> vector<4x10x6xf32>
    %cst_8 = arith.constant 0.000000e+00 : f32
    %1147 = vector.broadcast %cst_8 : f32 to vector<4x10x1xf32>
    %1148 = tpu.concatenate %1147, %1146, %1147 in 2 : vector<4x10x1xf32>, vector<4x10x6xf32>, vector<4x10x1xf32> -> vector<4x10x8xf32>
    %c0_9 = arith.constant 0 : index
    %c0_10 = arith.constant 0 : index
    %c0_11 = arith.constant 0 : index
    %1149 = vector.load %arg2[%c0_9, %c0_10, %c0_11] : memref<4x1x8xf32, #tpu.memory_space<vmem>>, vector<4x1x8xf32>
    %1150 = vector.broadcast %1149 : vector<4x1x8xf32> to vector<4x10x8xf32>
    %1151 = arith.addf %1148, %1150 : vector<4x10x8xf32>
    %c0_12 = arith.constant 0 : index
    %c0_13 = arith.constant 0 : index
    %c0_14 = arith.constant 0 : index
    %c0_15 = arith.constant 0 : index
    %1152 = vector.load %arg4[%c0_12, %c0_13, %c0_14, %c0_15] : memref<1x4x10x8xf32, #tpu.memory_space<vmem>>, vector<1x4x10x8xf32>
    %1153 = vector.shape_cast %1152 : vector<1x4x10x8xf32> to vector<4x10x8xf32>
    %1154 = vector.shape_cast %1151 : vector<4x10x8xf32> to vector<1x4x10x8xf32>
    tpu.vector_store %arg4[%c0_12, %c0_13, %c0_14, %c0_15], %1154 {strides = array<i32>} : memref<1x4x10x8xf32, #tpu.memory_space<vmem>>, vector<1x4x10x8xf32>,
    return
  }
  func.func @transform_0(%arg0: i32) -> i32 {
    %c0_i32 = arith.constant 0 : i32
    %c0_i32_0 = arith.constant 0 : i32
    return %c0_i32 : i32
  }
  func.func @transform_1(%arg0: i32) -> (i32, i32, i32) {
    %c0_i32 = arith.constant 0 : i32
    %c0_i32_0 = arith.constant 0 : i32
    %c0_i32_1 = arith.constant 0 : i32
    %c0_i32_2 = arith.constant 0 : i32
    return %c0_i32, %c0_i32_0, %c0_i32_1 : i32, i32, i32
  }
  func.func @transform_2(%arg0: i32) -> (i32, i32, i32, i32) {
    %c0_i32 = arith.constant 0 : i32
    %c0_i32_0 = arith.constant 0 : i32
    %c0_i32_1 = arith.constant 0 : i32
    %c0_i32_2 = arith.constant 0 : i32
    return %arg0, %c0_i32, %c0_i32_0, %c0_i32_1 : i32, i32, i32, i32
  }
  func.func @transform_3(%arg0: i32) -> (i32, i32, i32, i32) {
    %c0_i32 = arith.constant 0 : i32
    %c0_i32_0 = arith.constant 0 : i32
    %c0_i32_1 = arith.constant 0 : i32
    %c0_i32_2 = arith.constant 0 : i32
    return %arg0, %c0_i32, %c0_i32_0, %c0_i32_1 : i32, i32, i32, i32
  }
}

</mosaic_0001>

<bundles_post_ra>
// kernel: _forward_impl.1
= control target key start
LH: loop header
LB: loop body
LE: loop exit
PB: predicated region body
PF: predicated region fallthrough
CT: control target
= control target key end

     0   :  { %s8592_s0 = inlined_call_operand.vmem [shape: f32[252], index: 0, kind: input, shape index: {}]   ;;  %s8593_s1 = inlined_call_operand.vmem [shape: f32[4,1,8], index: 1, kind: input, shape index: {}]   ;;  %s8594_s2 = inlined_call_operand.vmem [shape: f32[8,3,16,6], index: 2, kind: input, shape index: {}]   ;;  %s8595_s3 = inlined_call_operand.vmem [shape: f32[8,4,10,8], index: 3, kind: output, shape index: {}]  }
   0x1   :  { %8691 = sst [smem:[#allocation208_spill]] %s8592_s0 }
   0x2   :  { %8692 = sst [smem:[#allocation209_spill]] %s8593_s1 }
   0x3   :  { %8693 = sst [smem:[#allocation210_spill]] %s8594_s2 }
   0x4   :  { %8694 = sst [smem:[#allocation211_spill]] %s8595_s3 }
   0x5   :  { %8 = vsyncpa [#allocation3], 0  ;;  %s4530_s12 = smov 0  }
   0x6 LB: > { %8695 = sst [smem:[#allocation5_spill]] %s4504_s12  ;;  %s4188_s13 = sadd.s32 4294967295, %s4504_s12   ;;  %s4504_s12 = sphi %s4530_s12, %s14_s12  }
   0x7   : > { %p4190_p0 = scmp.ge.s32.totalorder %s4504_s12, 1  ;;  %p113_p1 = scmp.lt.s32.totalorder %s4504_s12, 9 }
   0x8   : > { %s8696_s0 = sld [smem:[#allocation208_spill]]  ;;  %p4465_p3 = scmp.eq.s32.totalorder %s4188_s13, 0 }
   0x9   : > { %p4541_p2 = pnand %p4190_p0, %p113_p1 }
   0xb   : > { %p4461_p4 = pneg %p4541_p2 }
   0xd   : > { %p4462_p5 = pnand %p4465_p3, %p4461_p4 }
   0xe   : > { %s126_s16 = sshll.u32 %s8696_s0, 4  ;;  %s127_s16 = int_to_ptr.vmem [resolvable:$true] %s126_s16 }
   0xf   : > { %s4479_s18 = scalar_lea.vmem %s127_s16, 32  ;;  %p4481_p7 = pneg %p4462_p5 }
  0x10   : > { %p4480_p6 = scmp.ne.s32.totalorder %s127_s16, %s4479_s18  ;;  %p4487_p10 = scmp.lt.s32.totalorder %s127_s16, %s127_s16 }
  0x11   : > { %p4488_p11 = scmp.lt.s32.totalorder %s4479_s18, %s4479_s18 }
  0x12   : > { %p4482_p8 = pnand %p4481_p7, %p4480_p6 }
  0x13   : > { %p4489_p12 = por %p4488_p11, %p4487_p10 }
  0x14   : > { %p4483_p9 = pneg %p4482_p8 }
  0x16   : > { %p4490_p13 = pnand %p4489_p12, %p4483_p9 }
  0x18   : > { %4493 = shalt.err (!%p4490_p13)
}
  0x19   : > { %s4506_s19 = smov [#allocation2]   ;;  %150 = sbr.rel (%p4541_p2) target bundleno = 1104 (0x450), region = 32 }
  0x1a   : > { %4464 = dma.vmem_to_smem (!%p4462_p5), %s127_s16, 32, %s4506_s19, [#allocation3]  }
  0x1e   : > { %4499 = dma.done.wait (%p4465_p3), [#allocation3], 32  }
  0x1f   : > { %4501 = vsyncadd (%p4465_p3), [#allocation3], 4294967264 }
  0x20   : > { %156 = sfence }
  0x21   : > { %p175_p0 = scmp.lt.s32.totalorder %s4188_s13, 7  ;;  %s8699_s2 = sld [smem:[#allocation210_spill]]  ;;  %vm215_vm0 = vcmask 7168   ;;  %vm222_vm1 = vcmask 56320   ;;  %vm643_vm2 = vcmask 1046528   ;;  %vm1208_vm3 = vcmask 1045504  }
  0x22   : > { %s8596_s24 = smov 1   ;;  %s4209_s25 = sld [smem:[#allocation2 + $0xc]]  ;;  %vm1773_vm4 = vcmask 1044480   ;;  %vm2338_vm5 = vcmask 1043456   ;;  %vm2903_vm6 = vcmask 1042432   ;;  %vm3468_vm7 = vcmask 1041408  }
  0x23   : > { %s9601_s13 = smov (!%p175_p0, %s4188_s13), 7  ;;  %s4210_s26 = sld [smem:[#allocation2 + $0xd]]  ;;  %vm4111_vm8 = vcmask 64512   ;;  %vm4113_vm9 = vcmask 58368  }
  0x24   : > { %8698 = sst [smem:[#allocation6_spill]] %s9601_s13  ;;  %s4456_s20 = smul.u32 48, %s9601_s13 }
  0x25   : > { %s4211_s27 = sld [smem:[#allocation2 + $0xe]]  ;;  %s8601_s29 = smov 127  }
  0x26   : > { %s4212_s28 = sld [smem:[#allocation2 + $0xf]]  ;;  %s8598_s17 = smov 126  }
  0x27   : > { %s179_s23 = scalar_lea.vmem %s8699_s2, %s4456_s20  ;;  %s4574_s30 = sld [smem:[#allocation2 + $0x10]] }
  0x28   : > { %v187_v0 = vld [vmem:[%s179_s23 + $0x10] sm:$0xff]  ;;  %v185_v1 = vld [vmem:[%s179_s23] sm:$0xff]  ;;  %v188_v2 = vld [vmem:[%s179_s23 + $0x18] sm:$0xff]  ;;  %v302_v7 = vstv %s4209_s25  ;;  %s4214_s4 = sld [smem:[#allocation2 + $0x11]]  ;;  %s8782_s1 = smov 127  }
  0x29   : > { %201 = vrot.lane.b32.xlu1 %v187_v0, %s8596_s24  ;;  %197 = vrot.lane.b32.xlu0 %v185_v1, %s8596_s24  ;;  %v186_v3 = vld [vmem:[%s179_s23 + $0x8] sm:$0xff]  ;;  %v189_v5 = vld [vmem:[%s179_s23 + $0x20] sm:$0xff]  ;;  %s4215_s5 = sld [smem:[#allocation2 + $0x12]] }
  0x2a   : > { %v190_v4 = vld [vmem:[%s179_s23 + $0x28] sm:$0xff]  ;;  %v316_v12 = vstv %s4210_s26  ;;  %s4216_s6 = sld [smem:[#allocation2 + $0x13]] }
  0x2b   : > { %v330_v18 = vstv %s4211_s27  ;;  %s4217_s7 = sld [smem:[#allocation2 + $0x14]] }
  0x2c   : > { %v344_v21 = vstv %s4212_s28  ;;  %s4218_s8 = sld [smem:[#allocation2 + $0x15]] }
  0x2d   : > { %203 = vrot.lane.b32.xlu1 %v188_v2, %s8596_s24  ;;  %199 = vrot.lane.b32.xlu0 %v186_v3, %s8596_s24  ;;  %v358_v24 = vstv %s4574_s30  ;;  %s4219_s9 = sld [smem:[#allocation2 + $0x16]] }
  0x2e   : > { %v372_v32 = vstv %s4214_s4  ;;  %s4220_s10 = sld [smem:[#allocation2 + $0x17]] }
  0x2f   : > { %v386_v35 = vstv %s4215_s5  ;;  %s4221_s11 = sld [smem:[#allocation2 + $0x18]] }
  0x30   : > { %v400_v39 = vstv %s4216_s6  ;;  %s4222_s14 = sld [smem:[#allocation2 + $0x19]] }
  0x31   : > { %207 = vrot.lane.b32.xlu1 %v190_v4, %s8596_s24  ;;  %205 = vrot.lane.b32.xlu0 %v189_v5, %s8596_s24  ;;  %v414_v42 = vstv %s4217_s7  ;;  %s4223_s15 = sld [smem:[#allocation2 + $0x1a]] }
  0x32   : > { %v428_v48 = vstv %s4218_s8  ;;  %s4224_s16 = sld [smem:[#allocation2 + $0x1b]] }
  0x33   : > { %v442_v53 = vstv %s4219_s9  ;;  %s4225_s18 = sld [smem:[#allocation2 + $0x1c]] }
  0x34   : > { %v456_v56 = vstv %s4220_s10  ;;  %s4226_s19 = sld [smem:[#allocation2 + $0x1d]] }
  0x35   : > { %v470_v59 = vstv %s4221_s11  ;;  %s4227_s20 = sld [smem:[#allocation2 + $0x1e]] }
  0x36   : > { %v484_v62 = vstv %s4222_s14  ;;  %s4228_s21 = sld [smem:[#allocation2 + $0x1f]] }
  0x37   : > { %v498_v1 = vstv %s4223_s15  ;;  %s4229_s22 = sld [smem:[#allocation2 + $0x20]] }
  0x38   : > { %v512_v4 = vstv %s4224_s16  ;;  %s4230_s23 = sld [smem:[#allocation2 + $0x21]] }
  0x39   : > { %s4231_s25 = sld [smem:[#allocation2 + $0x22]] }
  0x3a   : > { %s4245_s26 = sld [smem:[#allocation2 + $0x30]] }
  0x3b   : > { %s4232_s27 = sld [smem:[#allocation2 + $0x23]] }
  0x3c   : > { %s4246_s28 = sld [smem:[#allocation2 + $0x31]] }
  0x3d   : > { %s4247_s30 = sld [smem:[#allocation2 + $0x32]] }
  0x3e   : > { %s4248_s4 = sld [smem:[#allocation2 + $0x33]] }
  0x3f   : > { %s4249_s5 = sld [smem:[#allocation2 + $0x34]] }
  0x40   : > { %s4250_s6 = sld [smem:[#allocation2 + $0x35]] }
  0x41   : > { %s4251_s7 = sld [smem:[#allocation2 + $0x36]] }
  0x42   : > { %s4252_s8 = sld [smem:[#allocation2 + $0x37]] }
  0x43   : > { %s4253_s9 = sld [smem:[#allocation2 + $0x38]] }
  0x44   : > { %s4254_s10 = sld [smem:[#allocation2 + $0x39]] }
  0x45   : > { %s4719_s11 = sld [smem:[#allocation2 + $0x3a]] }
  0x46   : > { %s4728_s14 = sld [smem:[#allocation2 + $0x3b]] }
  0x47   : > { %s4257_s15 = sld [smem:[#allocation2 + $0x3c]] }
  0x48   : > { %s4258_s16 = sld [smem:[#allocation2 + $0x3d]] }
  0x49   : > { %s5268_s24 = sld [smem:[#allocation2 + $0x7f]] }
  0x4a   : > { %s5272_s0 = sld [smem:[#allocation2 + $0x2d]] }
  0x4b   : > { %s5279_s2 = sld [smem:[#allocation2 + $0x48]] }
  0x4c   : > { %s5291_s12 = sld [smem:[#allocation2 + $0x2e]] }
  0x4d   : > { %s5311_s3 = sld [smem:[#allocation2 + $0x2f]] }
  0x4e   : > { %s5320_s13 = sld [smem:[#allocation2 + $0x4a]] }
  0x54   : > { %8783 = sst [smem:[#allocation89_spill]] %s5320_s13 }
  0x55   : > { %s5392_s13 = sld [smem:[#allocation2 + $0x4f]] }
  0x9b   : > { %v198_v6 = vpop.permute.xlu0 %197  ;;  %v202_v17 = vpop.permute.xlu1 %201 }
  0x9c   : > { %v216_v8 = vsel %vm215_vm0, 0.0, %v198_v6  ;;  %v218_v22 = vsel %vm215_vm0, 0.0, %v202_v17 }
  0x9d   : > { %v4566_v9 = vsel %vm222_vm1, %v216_v8, 0.0  ;;  %v4589_v27 = vsel %vm222_vm1, %v218_v22, 0.0 }
  0x9e   : > { %8700 = vst [vmem:[#allocation7_spill] sm:$0xff] %v4566_v9  ;;  %v303_v10 = vmul.f32 %v302_v7, %v4566_v9  ;;  %v317_v15 = vmul.f32 %v316_v12, %v4566_v9  ;;  %v331_v19 = vmul.f32 %v330_v18, %v4566_v9  ;;  %v345_v25 = vmul.f32 %v344_v21, %v4566_v9 }
  0x9f   : > { %v200_v11 = vpop.permute.xlu0 %199  ;;  %v204_v23 = vpop.permute.xlu1 %203  ;;  %8702 = vst [vmem:[#allocation9_spill] sm:$0xff] %v4589_v27  ;;  %v359_v29 = vmul.f32 %v358_v24, %v4589_v27  ;;  %v373_v34 = vmul.f32 %v372_v32, %v4589_v27  ;;  %v387_v37 = vmul.f32 %v386_v35, %v4589_v27  ;;  %v401_v43 = vmul.f32 %v400_v39, %v4589_v27 }
  0xa0   : > { %v217_v13 = vsel %vm215_vm0, 0.0, %v200_v11  ;;  %307 = vrot.lane.b32.xlu0 %v303_v10, %s8601_s29  ;;  %v219_v28 = vsel %vm215_vm0, 0.0, %v204_v23  ;;  %v471_v61 = vmul.f32 %v470_v59, %v4566_v9  ;;  %v485_v0 = vmul.f32 %v484_v62, %v4566_v9 }
  0xa1   : > { %v4572_v14 = vsel %vm222_vm1, %v217_v13, 0.0  ;;  %v4597_v31 = vsel %vm222_vm1, %v219_v28, 0.0  ;;  %v499_v3 = vmul.f32 %v498_v1, %v4566_v9  ;;  %v513_v6 = vmul.f32 %v512_v4, %v4566_v9 }
  0xa2   : > { %8701 = vst [vmem:[#allocation8_spill] sm:$0xff] %v4572_v14  ;;  %v304_v16 = vmul.f32 %v302_v7, %v4572_v14  ;;  %v318_v20 = vmul.f32 %v316_v12, %v4572_v14  ;;  %v332_v26 = vmul.f32 %v330_v18, %v4572_v14  ;;  %v346_v30 = vmul.f32 %v344_v21, %v4572_v14 }
  0xa3   : > { %8703 = vst [vmem:[#allocation10_spill] sm:$0xff] %v4597_v31  ;;  %v360_v33 = vmul.f32 %v358_v24, %v4597_v31  ;;  %v206_v36 = vpop.permute.xlu0 %205  ;;  %v374_v38 = vmul.f32 %v372_v32, %v4597_v31  ;;  %v208_v41 = vpop.permute.xlu1 %207  ;;  %v388_v44 = vmul.f32 %v386_v35, %v4597_v31  ;;  %v402_v49 = vmul.f32 %v400_v39, %v4597_v31 }
  0xa4   : > { %321 = vrot.lane.b32.xlu0 %v317_v15, %s8601_s29  ;;  %309 = vrot.lane.b32.xlu1 %v304_v16, %s8601_s29  ;;  %v220_v40 = vsel %vm215_vm0, 0.0, %v206_v36  ;;  %v221_v46 = vsel %vm215_vm0, 0.0, %v208_v41  ;;  %v472_v63 = vmul.f32 %v470_v59, %v4572_v14  ;;  %v486_v2 = vmul.f32 %v484_v62, %v4572_v14 }
  0xa5   : > { %v4613_v45 = vsel %vm222_vm1, %v220_v40, 0.0  ;;  %v4621_v50 = vsel %vm222_vm1, %v221_v46, 0.0  ;;  %v500_v5 = vmul.f32 %v498_v1, %v4572_v14  ;;  %v526_v7 = vstv %s4225_s18  ;;  %s4259_s18 = sld [smem:[#allocation2 + $0x3e]] }
  0xa6   : > { %v415_v47 = vmul.f32 %v414_v42, %v4613_v45  ;;  %v416_v51 = vmul.f32 %v414_v42, %v4621_v50  ;;  %v429_v52 = vmul.f32 %v428_v48, %v4613_v45  ;;  %v430_v54 = vmul.f32 %v428_v48, %v4621_v50 }
  0xa7   : > { %v443_v55 = vmul.f32 %v442_v53, %v4613_v45  ;;  %v444_v57 = vmul.f32 %v442_v53, %v4621_v50  ;;  %v457_v58 = vmul.f32 %v456_v56, %v4613_v45  ;;  %v458_v60 = vmul.f32 %v456_v56, %v4621_v50 }
  0xa8   : > { %335 = vrot.lane.b32.xlu0 %v331_v19, %s8601_s29  ;;  %323 = vrot.lane.b32.xlu1 %v318_v20, %s8601_s29  ;;  %v514_v8 = vmul.f32 %v512_v4, %v4572_v14  ;;  %v527_v10 = vmul.f32 %v526_v7, %v4589_v27  ;;  %v540_v11 = vstv %s4226_s19  ;;  %v528_v12 = vmul.f32 %v526_v7, %v4597_v31  ;;  %s4777_s19 = sld [smem:[#allocation2 + $0x3f]] }
  0xa9   : > { %v541_v13 = vmul.f32 %v540_v11, %v4589_v27  ;;  %v554_v15 = vstv %s4227_s20  ;;  %v542_v16 = vmul.f32 %v540_v11, %v4597_v31  ;;  %v568_v18 = vstv %s4228_s21  ;;  %s4783_s20 = sld [smem:[#allocation2 + $0x40]] }
  0xaa   : > { %v555_v17 = vmul.f32 %v554_v15, %v4589_v27  ;;  %v556_v19 = vmul.f32 %v554_v15, %v4597_v31  ;;  %v569_v20 = vmul.f32 %v568_v18, %v4589_v27  ;;  %v582_v21 = vstv %s4229_s22  ;;  %s4790_s21 = sld [smem:[#allocation2 + $0x41]] }
  0xab   : > { %v570_v22 = vmul.f32 %v568_v18, %v4597_v31  ;;  %v583_v23 = vmul.f32 %v582_v21, %v4613_v45  ;;  %v596_v24 = vstv %s4230_s23  ;;  %v610_v28 = vstv %s4231_s25  ;;  %s4807_s22 = sld [smem:[#allocation2 + $0x42]] }
  0xac   : > { %349 = vrot.lane.b32.xlu0 %v345_v25, %s8601_s29  ;;  %337 = vrot.lane.b32.xlu1 %v332_v26, %s8601_s29  ;;  %v584_v25 = vmul.f32 %v582_v21, %v4621_v50  ;;  %v597_v26 = vmul.f32 %v596_v24, %v4613_v45  ;;  %v795_v32 = vstv %s4245_s26  ;;  %v612_v36 = vmul.f32 %v610_v28, %v4621_v50  ;;  %s4815_s23 = sld [smem:[#allocation2 + $0x43]] }
  0xad   : > { %v796_v35 = vmul.f32 %v795_v32, %v4566_v9  ;;  %v863_v56 = vstv %s4249_s5  ;;  %v931_v21 = vstv %s4253_s9  ;;  %s4827_s25 = sld [smem:[#allocation2 + $0x44]] }
  0xae   : > { %v864_v59 = vmul.f32 %v863_v56, %v4589_v27  ;;  %s4266_s26 = sld [smem:[#allocation2 + $0x45]] }
  0xaf   : > { %v800_v41 = vrot.slane %v796_v35, 1  ;;  %v965_v35 = vstv %s4719_s11  ;;  %s4900_s5 = sld [smem:[#allocation2 + $0x56]] }
  0xb0   : > { %363 = vrot.lane.b32.xlu0 %v359_v29, %s8601_s29  ;;  %351 = vrot.lane.b32.xlu1 %v346_v30, %s8601_s29  ;;  %v598_v29 = vmul.f32 %v596_v24, %v4621_v50  ;;  %v611_v30 = vmul.f32 %v610_v28, %v4613_v45  ;;  %v868_v1 = vrot.slane %v864_v59, 1  ;;  %v932_v28 = vmul.f32 %v931_v21, %v4613_v45  ;;  %s4938_s9 = sld [smem:[#allocation2 + $0x5a]] }
  0xb1   : > { %v999_v59 = vstv %s4257_s15  ;;  %s4963_s11 = sld [smem:[#allocation2 + $0x5c]] }
  0xb2   : > { %s4985_s15 = sld [smem:[#allocation2 + $0x5e]] }
  0xb4   : > { %377 = vrot.lane.b32.xlu0 %v373_v34, %s8601_s29  ;;  %365 = vrot.lane.b32.xlu1 %v360_v33, %s8601_s29  ;;  %v624_v33 = vstv %s4232_s27  ;;  %v797_v34 = vmul.f32 %v795_v32, %v4572_v14  ;;  %s4850_s27 = sld [smem:[#allocation2 + $0x46]] }
  0xb6   : > { %v801_v39 = vrot.slane %v797_v34, 1 }
  0xb8   : > { %391 = vrot.lane.b32.xlu0 %v387_v37, %s8601_s29  ;;  %379 = vrot.lane.b32.xlu1 %v374_v38, %s8601_s29  ;;  %v625_v37 = vmul.f32 %v624_v33, %v4613_v45  ;;  %v812_v38 = vstv %s4246_s28  ;;  %v802_v46 = vsel %vm643_vm2, %v800_v41, %v801_v39  ;;  %s4861_s28 = sld [smem:[#allocation2 + $0x47]] }
  0xb9   : > { %v814_v40 = vmul.f32 %v812_v38, %v4572_v14  ;;  %v813_v42 = vmul.f32 %v812_v38, %v4566_v9 }
  0xbc   : > { %405 = vrot.lane.b32.xlu0 %v401_v43, %s8601_s29  ;;  %393 = vrot.lane.b32.xlu1 %v388_v44, %s8601_s29  ;;  %v626_v43 = vmul.f32 %v624_v33, %v4621_v50  ;;  %v829_v44 = vstv %s4247_s30  ;;  %s4281_s30 = sld [smem:[#allocation2 + $0x54]] }
  0xbd   : > { %v831_v48 = vmul.f32 %v829_v44, %v4572_v14 }
  0xc0   : > { %407 = vrot.lane.b32.xlu1 %v402_v49, %s8601_s29  ;;  %419 = vrot.lane.b32.xlu0 %v415_v47, %s8601_s29  ;;  %v818_v47 = vrot.slane %v814_v40, 1  ;;  %v817_v49 = vrot.slane %v813_v42, 1  ;;  %v966_v42 = vmul.f32 %v965_v35, %v4613_v45 }
  0xc2   : > { %v819_v53 = vsel %vm643_vm2, %v817_v49, %v818_v47 }
  0xc4   : > { %421 = vrot.lane.b32.xlu1 %v416_v51, %s8601_s29  ;;  %433 = vrot.lane.b32.xlu0 %v429_v52, %s8601_s29  ;;  %v830_v51 = vmul.f32 %v829_v44, %v4566_v9  ;;  %v846_v52 = vstv %s4248_s4  ;;  %s4282_s4 = sld [smem:[#allocation2 + $0x55]] }
  0xc8   : > { %435 = vrot.lane.b32.xlu1 %v430_v54, %s8601_s29  ;;  %447 = vrot.lane.b32.xlu0 %v443_v55, %s8601_s29  ;;  %v835_v54 = vrot.slane %v831_v48, 1  ;;  %v848_v55 = vmul.f32 %v846_v52, %v4572_v14  ;;  %v967_v48 = vmul.f32 %v965_v35, %v4621_v50 }
  0xca   : > { %v852_v62 = vrot.slane %v848_v55, 1  ;;  %v971_v55 = vrot.slane %v967_v48, 1 }
  0xcc   : > { %449 = vrot.lane.b32.xlu1 %v444_v57, %s8601_s29  ;;  %461 = vrot.lane.b32.xlu0 %v457_v58, %s8601_s29  ;;  %v834_v57 = vrot.slane %v830_v51, 1  ;;  %v847_v58 = vmul.f32 %v846_v52, %v4566_v9 }
  0xd0   : > { %463 = vrot.lane.b32.xlu1 %v458_v60, %s8601_s29  ;;  %475 = vrot.lane.b32.xlu0 %v471_v61, %s8598_s17  ;;  %v865_v60 = vmul.f32 %v863_v56, %v4597_v31  ;;  %v836_v61 = vsel %vm643_vm2, %v834_v57, %v835_v54 }
  0xd4   : > { %477 = vrot.lane.b32.xlu1 %v472_v63, %s8598_s17  ;;  %489 = vrot.lane.b32.xlu0 %v485_v0, %s8598_s17  ;;  %v880_v63 = vstv %s4250_s6  ;;  %v851_v0 = vrot.slane %v847_v58, 1  ;;  %s4907_s6 = sld [smem:[#allocation2 + $0x57]] }
  0xd5   : > { %v881_v4 = vmul.f32 %v880_v63, %v4589_v27 }
  0xd8   : > { %491 = vrot.lane.b32.xlu1 %v486_v2, %s8598_s17  ;;  %503 = vrot.lane.b32.xlu0 %v499_v3, %s8598_s17  ;;  %v869_v2 = vrot.slane %v865_v60, 1  ;;  %v853_v3 = vsel %vm643_vm2, %v851_v0, %v852_v62  ;;  %v1000_v0 = vmul.f32 %v999_v59, %v4566_v9 }
  0xda   : > { %v870_v7 = vsel %vm643_vm2, %v868_v1, %v869_v2 }
  0xdc   : > { %505 = vrot.lane.b32.xlu1 %v500_v5, %s8598_s17  ;;  %517 = vrot.lane.b32.xlu0 %v513_v6, %s8598_s17  ;;  %v882_v5 = vmul.f32 %v880_v63, %v4597_v31  ;;  %v897_v6 = vstv %s4251_s7  ;;  %v1001_v63 = vmul.f32 %v999_v59, %v4572_v14  ;;  %s4917_s7 = sld [smem:[#allocation2 + $0x58]] }
  0xde   : > { %v886_v11 = vrot.slane %v882_v5, 1  ;;  %v1005_v5 = vrot.slane %v1001_v63, 1 }
  0xe0   : > { %519 = vrot.lane.b32.xlu1 %v514_v8, %s8598_s17  ;;  %531 = vrot.lane.b32.xlu0 %v527_v10, %s8598_s17  ;;  %v914_v8 = vstv %s4252_s8  ;;  %v885_v10 = vrot.slane %v881_v4, 1  ;;  %s4929_s8 = sld [smem:[#allocation2 + $0x59]] }
  0xe2   : > { %v887_v18 = vsel %vm643_vm2, %v885_v10, %v886_v11 }
  0xe4   : > { %533 = vrot.lane.b32.xlu1 %v528_v12, %s8598_s17  ;;  %545 = vrot.lane.b32.xlu0 %v541_v13, %s8598_s17  ;;  %v898_v12 = vmul.f32 %v897_v6, %v4589_v27  ;;  %v899_v13 = vmul.f32 %v897_v6, %v4597_v31 }
  0xe8   : > { %547 = vrot.lane.b32.xlu1 %v542_v16, %s8598_s17  ;;  %559 = vrot.lane.b32.xlu0 %v555_v17, %s8598_s17  ;;  %v915_v16 = vmul.f32 %v914_v8, %v4589_v27  ;;  %v916_v17 = vmul.f32 %v914_v8, %v4597_v31 }
  0xea   : > { %v919_v24 = vrot.slane %v915_v16, 1 }
  0xec   : > { %561 = vrot.lane.b32.xlu1 %v556_v19, %s8598_s17  ;;  %573 = vrot.lane.b32.xlu0 %v569_v20, %s8598_s17  ;;  %v902_v19 = vrot.slane %v898_v12, 1  ;;  %v903_v20 = vrot.slane %v899_v13, 1  ;;  %v1033_v12 = vstv %s4259_s18  ;;  %s4293_s18 = sld [smem:[#allocation2 + $0x60]] }
  0xf0   : > { %575 = vrot.lane.b32.xlu1 %v570_v22, %s8598_s17  ;;  %587 = vrot.lane.b32.xlu0 %v583_v23, %s8598_s17 }
  0xf4   : > { %589 = vrot.lane.b32.xlu1 %v584_v25, %s8598_s17  ;;  %601 = vrot.lane.b32.xlu0 %v597_v26, %s8598_s17  ;;  %v920_v25 = vrot.slane %v916_v17, 1  ;;  %v904_v26 = vsel %vm643_vm2, %v902_v19, %v903_v20  ;;  %v1035_v17 = vmul.f32 %v1033_v12, %v4572_v14  ;;  %v1034_v19 = vmul.f32 %v1033_v12, %v4566_v9 }
  0xf6   : > { %v921_v34 = vsel %vm643_vm2, %v919_v24, %v920_v25  ;;  %v1050_v24 = vstv %s4777_s19  ;;  %s4294_s19 = sld [smem:[#allocation2 + $0x61]] }
  0xf8   : > { %603 = vrot.lane.b32.xlu1 %v598_v29, %s8598_s17  ;;  %615 = vrot.lane.b32.xlu0 %v611_v30, %s8598_s17  ;;  %v933_v29 = vmul.f32 %v931_v21, %v4621_v50  ;;  %v948_v30 = vstv %s4254_s10  ;;  %s4949_s10 = sld [smem:[#allocation2 + $0x5b]] }
  0xf9   : > { %v949_v38 = vmul.f32 %v948_v30, %v4613_v45 }
  0xfc   : > { %617 = vrot.lane.b32.xlu1 %v612_v36, %s8598_s17  ;;  %629 = vrot.lane.b32.xlu0 %v625_v37, %s8598_s17  ;;  %v936_v36 = vrot.slane %v932_v28, 1  ;;  %v937_v37 = vrot.slane %v933_v29, 1  ;;  %v1052_v28 = vmul.f32 %v1050_v24, %v4572_v14  ;;  %v1067_v29 = vstv %s4783_s20  ;;  %s4295_s20 = sld [smem:[#allocation2 + $0x62]] }
  0xfe   : > { %v938_v44 = vsel %vm643_vm2, %v936_v36, %v937_v37 }
 0x100   : > { %631 = vrot.lane.b32.xlu1 %v626_v43, %s8598_s17  ;;  %803 = vrot.lane.b32.xlu0 %v802_v46, %s8601_s29  ;;  %v982_v43 = vstv %s4728_s14  ;;  %v953_v46 = vrot.slane %v949_v38, 1  ;;  %s4290_s14 = sld [smem:[#allocation2 + $0x5d]] }
 0x101   : > { %v983_v52 = vmul.f32 %v982_v43, %v4613_v45  ;;  %v984_v56 = vmul.f32 %v982_v43, %v4621_v50  ;;  %v1069_v43 = vmul.f32 %v1067_v29, %v4597_v31 }
 0x104   : > { %805 = vrot.lane.b32.xlu1 %v801_v39, %s8601_s29  ;;  %820 = vrot.lane.b32.xlu0 %v819_v53, %s8601_s29  ;;  %v950_v39 = vmul.f32 %v948_v30, %v4621_v50  ;;  %v1038_v30 = vrot.slane %v1034_v19, 1 }
 0x108   : > { %822 = vrot.lane.b32.xlu1 %v818_v47, %s8601_s29  ;;  %837 = vrot.lane.b32.xlu0 %v836_v61, %s8601_s29  ;;  %v954_v47 = vrot.slane %v950_v39, 1  ;;  %v987_v61 = vrot.slane %v983_v52, 1  ;;  %v1056_v39 = vrot.slane %v1052_v28, 1 }
 0x10a   : > { %v955_v53 = vsel %vm643_vm2, %v953_v46, %v954_v47 }
 0x10c   : > { %839 = vrot.lane.b32.xlu1 %v835_v54, %s8601_s29  ;;  %854 = vrot.lane.b32.xlu0 %v853_v3, %s8601_s29  ;;  %v970_v54 = vrot.slane %v966_v42, 1  ;;  %v1016_v3 = vstv %s4258_s16  ;;  %v1068_v42 = vmul.f32 %v1067_v29, %v4589_v27  ;;  %s4996_s16 = sld [smem:[#allocation2 + $0x5f]] }
 0x10d   : > { %v1018_v6 = vmul.f32 %v1016_v3, %v4572_v14  ;;  %v1017_v8 = vmul.f32 %v1016_v3, %v4566_v9 }
 0x10e   : > { %v972_v60 = vsel %vm643_vm2, %v970_v54, %v971_v55  ;;  %v1073_v54 = vrot.slane %v1069_v43, 1 }
 0x10f   : > { %v1022_v16 = vrot.slane %v1018_v6, 1 }
 0x110   : > { %856 = vrot.lane.b32.xlu1 %v852_v62, %s8601_s29  ;;  %871 = vrot.lane.b32.xlu0 %v870_v7, %s8601_s29  ;;  %v988_v62 = vrot.slane %v984_v56, 1  ;;  %v1004_v7 = vrot.slane %v1000_v0, 1  ;;  %v1101_v56 = vstv %s4807_s22  ;;  %s5048_s22 = sld [smem:[#allocation2 + $0x64]] }
 0x111   : > { %v1102_v3 = vmul.f32 %v1101_v56, %v4589_v27 }
 0x112   : > { %v4715_v15 = vpop.permute.xlu0 %307  ;;  %v989_v4 = vsel %vm643_vm2, %v987_v61, %v988_v62  ;;  %v1006_v13 = vsel %vm643_vm2, %v1004_v7, %v1005_v5 }
 0x114   : > { %873 = vrot.lane.b32.xlu1 %v869_v2, %s8601_s29  ;;  %888 = vrot.lane.b32.xlu0 %v887_v18, %s8601_s29  ;;  %v1021_v18 = vrot.slane %v1017_v8, 1  ;;  %v1135_v8 = vstv %s4827_s25  ;;  %s5069_s25 = sld [smem:[#allocation2 + $0x66]] }
 0x115   : > { %v1137_v29 = vmul.f32 %v1135_v8, %v4621_v50 }
 0x116   : > { %v4724_v22 = vpop.permute.xlu1 %309  ;;  %v4726_v23 = vpop.permute.xlu0 %321 }
 0x117   : > { %v1141_v43 = vrot.slane %v1137_v29, 1 }
 0x118   : > { %890 = vrot.lane.b32.xlu1 %v886_v11, %s8601_s29  ;;  %905 = vrot.lane.b32.xlu0 %v904_v26, %s8601_s29  ;;  %v1039_v26 = vrot.slane %v1035_v17, 1 }
 0x11a   : > { %v4735_v32 = vpop.permute.xlu1 %323  ;;  %v4737_v33 = vpop.permute.xlu0 %335  ;;  %v1040_v38 = vsel %vm643_vm2, %v1038_v30, %v1039_v26  ;;  %v1152_v30 = vstv %s4266_s26  ;;  %s5082_s26 = sld [smem:[#allocation2 + $0x67]] }
 0x11c   : > { %907 = vrot.lane.b32.xlu1 %v903_v20, %s8601_s29  ;;  %922 = vrot.lane.b32.xlu0 %v921_v34, %s8601_s29  ;;  %v1051_v34 = vmul.f32 %v1050_v24, %v4566_v9  ;;  %v1136_v24 = vmul.f32 %v1135_v8, %v4613_v45 }
 0x11e   : > { %v4745_v40 = vpop.permute.xlu1 %337  ;;  %v4747_v41 = vpop.permute.xlu0 %349 }
 0x120   : > { %924 = vrot.lane.b32.xlu1 %v920_v25, %s8601_s29  ;;  %939 = vrot.lane.b32.xlu0 %v938_v44, %s8601_s29  ;;  %v1023_v25 = vsel %vm643_vm2, %v1021_v18, %v1022_v16  ;;  %v1055_v44 = vrot.slane %v1051_v34, 1 }
 0x122   : > { %v4755_v49 = vpop.permute.xlu1 %351  ;;  %v4757_v51 = vpop.permute.xlu0 %363  ;;  %v1057_v52 = vsel %vm643_vm2, %v1055_v44, %v1056_v39  ;;  %v1153_v44 = vmul.f32 %v1152_v30, %v4613_v45 }
 0x124   : > { %941 = vrot.lane.b32.xlu1 %v937_v37, %s8601_s29  ;;  %956 = vrot.lane.b32.xlu0 %v955_v53, %s8601_s29  ;;  %v1084_v37 = vstv %s4790_s21  ;;  %v1072_v53 = vrot.slane %v1068_v42, 1  ;;  %s5044_s21 = sld [smem:[#allocation2 + $0x63]] }
 0x125   : > { %v1085_v48 = vmul.f32 %v1084_v37, %v4589_v27 }
 0x126   : > { %v4764_v57 = vpop.permute.xlu1 %365  ;;  %v4766_v58 = vpop.permute.xlu0 %377  ;;  %v1074_v63 = vsel %vm643_vm2, %v1072_v53, %v1073_v54 }
 0x127   : > { %v1089_v61 = vrot.slane %v1085_v48, 1  ;;  %v1154_v48 = vmul.f32 %v1152_v30, %v4621_v50 }
 0x128   : > { %958 = vrot.lane.b32.xlu1 %v954_v47, %s8601_s29  ;;  %973 = vrot.lane.b32.xlu0 %v972_v60, %s8601_s29 }
 0x12a   : > { %v4773_v1 = vpop.permute.xlu1 %379  ;;  %v4775_v2 = vpop.permute.xlu0 %391 }
 0x12c   : > { %975 = vrot.lane.b32.xlu1 %v971_v55, %s8601_s29  ;;  %990 = vrot.lane.b32.xlu0 %v989_v4, %s8601_s29  ;;  %v1086_v55 = vmul.f32 %v1084_v37, %v4597_v31  ;;  %v1103_v4 = vmul.f32 %v1101_v56, %v4597_v31 }
 0x12e   : > { %v4786_v10 = vpop.permute.xlu1 %393  ;;  %v4788_v11 = vpop.permute.xlu0 %405  ;;  %v1090_v0 = vrot.slane %v1086_v55, 1  ;;  %v1186_v55 = vstv %s4861_s28  ;;  %s4302_s28 = sld [smem:[#allocation2 + $0x69]] }
 0x130   : > { %992 = vrot.lane.b32.xlu1 %v988_v62, %s8601_s29  ;;  %1007 = vrot.lane.b32.xlu0 %v1006_v13, %s8598_s17  ;;  %v1118_v62 = vstv %s4815_s23  ;;  %v1091_v12 = vsel %vm643_vm2, %v1089_v61, %v1090_v0  ;;  %v1106_v13 = vrot.slane %v1102_v3, 1  ;;  %v1157_v61 = vrot.slane %v1153_v44, 1  ;;  %s5061_s23 = sld [smem:[#allocation2 + $0x65]] }
 0x131   : > { %v1119_v7 = vmul.f32 %v1118_v62, %v4589_v27  ;;  %v1120_v17 = vmul.f32 %v1118_v62, %v4597_v31  ;;  %v1158_v62 = vrot.slane %v1154_v48, 1 }
 0x132   : > { %v4797_v20 = vpop.permute.xlu1 %407  ;;  %v4799_v21 = vpop.permute.xlu0 %419 }
 0x133   : > { %v1124_v28 = vrot.slane %v1120_v17, 1 }
 0x134   : > { %1009 = vrot.lane.b32.xlu1 %v1005_v5, %s8598_s17  ;;  %1024 = vrot.lane.b32.xlu0 %v1023_v25, %s8598_s17 }
 0x136   : > { %v4810_v35 = vpop.permute.xlu1 %421  ;;  %v4812_v36 = vpop.permute.xlu0 %433 }
 0x138   : > { %1026 = vrot.lane.b32.xlu1 %v1022_v16, %s8598_s17  ;;  %1041 = vrot.lane.b32.xlu0 %v1040_v38, %s8598_s17  ;;  %v1107_v16 = vrot.slane %v1103_v4, 1  ;;  %v1140_v38 = vrot.slane %v1136_v24, 1  ;;  %v1187_v4 = vmul.f32 %v1186_v55, %v4613_v45  ;;  %v1360_v24 = vstv %s4281_s30  ;;  %s5117_s30 = sld [smem:[#allocation2 + $0x6a]] }
 0x139   : > { %v1362_v29 = vmul.f32 %v1360_v24, %v4572_v14  ;;  %v1361_v30 = vmul.f32 %v1360_v24, %v4566_v9 }
 0x13a   : > { %v4822_v46 = vpop.permute.xlu1 %435  ;;  %v4824_v47 = vpop.permute.xlu0 %447  ;;  %v1108_v25 = vsel %vm643_vm2, %v1106_v13, %v1107_v16  ;;  %v1142_v56 = vsel %vm643_vm2, %v1140_v38, %v1141_v43  ;;  %v1188_v13 = vmul.f32 %v1186_v55, %v4621_v50 }
 0x13b   : > { %v1366_v44 = vrot.slane %v1362_v29, 2 }
 0x13c   : > { %1043 = vrot.lane.b32.xlu1 %v1039_v26, %s8598_s17  ;;  %1058 = vrot.lane.b32.xlu0 %v1057_v52, %s8598_s17  ;;  %v1123_v26 = vrot.slane %v1119_v7, 1  ;;  %v1159_v7 = vsel %vm643_vm2, %v1157_v61, %v1158_v62 }
 0x13e   : > { %v4834_v59 = vpop.permute.xlu1 %449  ;;  %v4836_v60 = vpop.permute.xlu0 %461  ;;  %v1125_v42 = vsel %vm643_vm2, %v1123_v26, %v1124_v28  ;;  %v1191_v26 = vrot.slane %v1187_v4, 1 }
 0x13f   : > { %8704 = vst [vmem:[#allocation11_spill] sm:$0xff] %v4836_v60 }
 0x140   : > { %1060 = vrot.lane.b32.xlu1 %v1056_v39, %s8598_s17  ;;  %1075 = vrot.lane.b32.xlu0 %v1074_v63, %s8598_s17  ;;  %v1169_v39 = vstv %s4850_s27  ;;  %s5094_s27 = sld [smem:[#allocation2 + $0x68]] }
 0x141   : > { %v1171_v63 = vmul.f32 %v1169_v39, %v4621_v50 }
 0x142   : > { %v4844_v5 = vpop.permute.xlu1 %463  ;;  %v4846_v6 = vpop.permute.xlu0 %475 }
 0x143   : > { %8705 = vst [vmem:[#allocation12_spill] sm:$0xff] %v4844_v5  ;;  %8706 = vst [vmem:[#allocation13_spill] sm:$0xff] %v4846_v6 }
 0x144   : > { %1077 = vrot.lane.b32.xlu1 %v1073_v54, %s8598_s17  ;;  %1092 = vrot.lane.b32.xlu0 %v1091_v12, %s8598_s17  ;;  %v1170_v54 = vmul.f32 %v1169_v39, %v4613_v45  ;;  %v1175_v12 = vrot.slane %v1171_v63, 1 }
 0x146   : > { %v4856_v18 = vpop.permute.xlu1 %477  ;;  %v4858_v19 = vpop.permute.xlu0 %489  ;;  %v1174_v8 = vrot.slane %v1170_v54, 1  ;;  %v1365_v54 = vrot.slane %v1361_v30, 2 }
 0x147   : > { %8707 = vst [vmem:[#allocation14_spill] sm:$0xff] %v4856_v18  ;;  %8708 = vst [vmem:[#allocation15_spill] sm:$0xff] %v4858_v19 }
 0x148   : > { %1094 = vrot.lane.b32.xlu1 %v1090_v0, %s8598_s17  ;;  %1109 = vrot.lane.b32.xlu0 %v1108_v25, %s8598_s17  ;;  %v1176_v25 = vsel %vm643_vm2, %v1174_v8, %v1175_v12  ;;  %v1367_v63 = vsel %vm1208_vm3, %v1365_v54, %v1366_v44 }
 0x14a   : > { %v4867_v34 = vpop.permute.xlu1 %491  ;;  %v4869_v37 = vpop.permute.xlu0 %503 }
 0x14b   : > { %8709 = vst [vmem:[#allocation16_spill] sm:$0xff] %v4867_v34  ;;  %8710 = vst [vmem:[#allocation17_spill] sm:$0xff] %v4869_v37 }
 0x14c   : > { %1111 = vrot.lane.b32.xlu1 %v1107_v16, %s8598_s17  ;;  %1126 = vrot.lane.b32.xlu0 %v1125_v42, %s8598_s17  ;;  %v1377_v42 = vstv %s4282_s4  ;;  %s5128_s4 = sld [smem:[#allocation2 + $0x6b]] }
 0x14d   : > { %v1379_v48 = vmul.f32 %v1377_v42, %v4572_v14  ;;  %v1378_v55 = vmul.f32 %v1377_v42, %v4566_v9  ;;  %v1428_v42 = vstv %s4917_s7  ;;  %s5154_s7 = sld [smem:[#allocation2 + $0x4]] }
 0x14e   : > { %v4877_v52 = vpop.permute.xlu1 %505  ;;  %v4879_v53 = vpop.permute.xlu0 %517 }
 0x14f   : > { %8711 = vst [vmem:[#allocation18_spill] sm:$0xff] %v4877_v52  ;;  %8712 = vst [vmem:[#allocation19_spill] sm:$0xff] %v4879_v53  ;;  %v1383_v4 = vrot.slane %v1379_v48, 2  ;;  %v1382_v8 = vrot.slane %v1378_v55, 2 }
 0x150   : > { %1128 = vrot.lane.b32.xlu1 %v1124_v28, %s8598_s17  ;;  %1143 = vrot.lane.b32.xlu0 %v1142_v56, %s8598_s17  ;;  %v1192_v28 = vrot.slane %v1188_v13, 1  ;;  %v1411_v13 = vstv %s4907_s6  ;;  %s5152_s6 = sld [smem:[#allocation2 + $0x78]] }
 0x151   : > { %v1384_v29 = vsel %vm1208_vm3, %v1382_v8, %v1383_v4  ;;  %v1445_v8 = vstv %s4929_s8  ;;  %s5158_s8 = sld [smem:[#allocation2 + $0x8]] }
 0x152   : > { %v4887_v0 = vpop.permute.xlu1 %519  ;;  %v4889_v3 = vpop.permute.xlu0 %531 }
 0x153   : > { %8713 = vst [vmem:[#allocation20_spill] sm:$0xff] %v4887_v0  ;;  %8714 = vst [vmem:[#allocation21_spill] sm:$0xff] %v4889_v3 }
 0x154   : > { %1145 = vrot.lane.b32.xlu1 %v1141_v43, %s8598_s17  ;;  %1160 = vrot.lane.b32.xlu0 %v1159_v7, %s8598_s17  ;;  %v1193_v43 = vsel %vm643_vm2, %v1191_v26, %v1192_v28  ;;  %v1413_v26 = vmul.f32 %v1411_v13, %v4572_v14 }
 0x156   : > { %v4896_v16 = vpop.permute.xlu1 %533  ;;  %v4898_v17 = vpop.permute.xlu0 %545  ;;  %v1417_v55 = vrot.slane %v1413_v26, 2 }
 0x157   : > { %8715 = vst [vmem:[#allocation22_spill] sm:$0xff] %v4896_v16  ;;  %8716 = vst [vmem:[#allocation23_spill] sm:$0xff] %v4898_v17  ;;  %8761 = sst [smem:[#allocation68_spill]] %s5158_s8 }
 0x158   : > { %1162 = vrot.lane.b32.xlu1 %v1158_v62, %s8598_s17  ;;  %1177 = vrot.lane.b32.xlu0 %v1176_v25, %s8598_s17  ;;  %v1394_v62 = vstv %s4900_s5  ;;  %s5144_s5 = sld [smem:[#allocation2]] }
 0x159   : > { %v1396_v7 = vmul.f32 %v1394_v62, %v4572_v14  ;;  %s5324_s8 = sld [smem:[#allocation2 + $0x4b]] }
 0x15a   : > { %v4909_v38 = vpop.permute.xlu1 %547  ;;  %v4911_v39 = vpop.permute.xlu0 %559 }
 0x15b   : > { %8717 = vst [vmem:[#allocation24_spill] sm:$0xff] %v4909_v38  ;;  %8718 = vst [vmem:[#allocation25_spill] sm:$0xff] %v4911_v39  ;;  %v1400_v30 = vrot.slane %v1396_v7, 2 }
 0x15c   : > { %1179 = vrot.lane.b32.xlu1 %v1175_v12, %s8598_s17  ;;  %1194 = vrot.lane.b32.xlu0 %v1193_v43, %s8598_s17  ;;  %v1395_v12 = vmul.f32 %v1394_v62, %v4566_v9 }
 0x15e   : > { %v4920_v56 = vpop.permute.xlu1 %561  ;;  %v4922_v61 = vpop.permute.xlu0 %573  ;;  %v1399_v43 = vrot.slane %v1395_v12, 2 }
 0x15f   : > { %8719 = vst [vmem:[#allocation26_spill] sm:$0xff] %v4920_v56  ;;  %8720 = vst [vmem:[#allocation27_spill] sm:$0xff] %v4922_v61 }
 0x160   : > { %1196 = vrot.lane.b32.xlu1 %v1192_v28, %s8598_s17  ;;  %1368 = vrot.lane.b32.xlu0 %v1367_v63, %s8601_s29  ;;  %v1412_v28 = vmul.f32 %v1411_v13, %v4566_v9  ;;  %v1401_v62 = vsel %vm1208_vm3, %v1399_v43, %v1400_v30  ;;  %v1429_v63 = vmul.f32 %v1428_v42, %v4589_v27 }
 0x162   : > { %v4933_v24 = vpop.permute.xlu1 %575  ;;  %v4935_v25 = vpop.permute.xlu0 %587  ;;  %v1416_v7 = vrot.slane %v1412_v28, 2  ;;  %v1433_v43 = vrot.slane %v1429_v63, 2 }
 0x163   : > { %8721 = vst [vmem:[#allocation28_spill] sm:$0xff] %v4933_v24  ;;  %8722 = vst [vmem:[#allocation29_spill] sm:$0xff] %v4935_v25 }
 0x164   : > { %1370 = vrot.lane.b32.xlu1 %v1366_v44, %s8601_s29  ;;  %1385 = vrot.lane.b32.xlu0 %v1384_v29, %s8601_s29  ;;  %v1430_v44 = vmul.f32 %v1428_v42, %v4597_v31  ;;  %v1418_v26 = vsel %vm1208_vm3, %v1416_v7, %v1417_v55  ;;  %v1462_v29 = vstv %s4938_s9  ;;  %v1446_v42 = vmul.f32 %v1445_v8, %v4589_v27  ;;  %s5162_s9 = sld [smem:[#allocation2 + $0x1]] }
 0x165   : > { %v1463_v7 = vmul.f32 %v1462_v29, %v4589_v27  ;;  %v1464_v61 = vmul.f32 %v1462_v29, %v4597_v31 }
 0x166   : > { %v4945_v48 = vpop.permute.xlu1 %589  ;;  %v4947_v54 = vpop.permute.xlu0 %601  ;;  %v1434_v24 = vrot.slane %v1430_v44, 2  ;;  %v1450_v63 = vrot.slane %v1446_v42, 2 }
 0x167   : > { %8723 = vst [vmem:[#allocation30_spill] sm:$0xff] %v4945_v48  ;;  %8724 = vst [vmem:[#allocation31_spill] sm:$0xff] %v4947_v54  ;;  %v1467_v42 = vrot.slane %v1463_v7, 2 }
 0x168   : > { %1387 = vrot.lane.b32.xlu1 %v1383_v4, %s8601_s29  ;;  %1402 = vrot.lane.b32.xlu0 %v1401_v62, %s8601_s29  ;;  %v1447_v4 = vmul.f32 %v1445_v8, %v4597_v31 }
 0x16a   : > { %v4957_v12 = vpop.permute.xlu1 %603  ;;  %v4959_v13 = vpop.permute.xlu0 %615  ;;  %v1451_v44 = vrot.slane %v1447_v4, 2  ;;  %v1468_v4 = vrot.slane %v1464_v61, 2  ;;  %v8803_v16 = vstv %s5162_s9 }
 0x16b   : > { %8725 = vst [vmem:[#allocation32_spill] sm:$0xff] %v4957_v12  ;;  %8726 = vst [vmem:[#allocation33_spill] sm:$0xff] %v4959_v13  ;;  %v1479_v13 = vstv %s4949_s10  ;;  %v1435_v12 = vsel %vm1208_vm3, %v1433_v43, %v1434_v24  ;;  %s5169_s10 = sld [smem:[#allocation2 + $0x79]] }
 0x16c   : > { %1404 = vrot.lane.b32.xlu1 %v1400_v30, %s8601_s29  ;;  %1419 = vrot.lane.b32.xlu0 %v1418_v26, %s8601_s29  ;;  %v1480_v26 = vmul.f32 %v1479_v13, %v4589_v27  ;;  %v1452_v43 = vsel %vm1208_vm3, %v1450_v63, %v1451_v44  ;;  %v1481_v29 = vmul.f32 %v1479_v13, %v4597_v31 }
 0x16e   : > { %v4969_v28 = vpop.permute.xlu1 %617  ;;  %v4971_v62 = vpop.permute.xlu0 %629  ;;  %v1484_v63 = vrot.slane %v1480_v26, 2  ;;  %v1485_v7 = vrot.slane %v1481_v29, 2  ;;  %v1547_v29 = vstv %s4996_s16  ;;  %s5186_s16 = sld [smem:[#allocation2 + $0x7a]] }
 0x16f   : > { %8727 = vst [vmem:[#allocation34_spill] sm:$0xff] %v4969_v28  ;;  %8728 = vst [vmem:[#allocation35_spill] sm:$0xff] %v4971_v62  ;;  %v1496_v62 = vstv %s4963_s11  ;;  %s5171_s11 = sld [smem:[#allocation2 + $0x5]] }
 0x170   : > { %1421 = vrot.lane.b32.xlu1 %v1417_v55, %s8601_s29  ;;  %1436 = vrot.lane.b32.xlu0 %v1435_v12, %s8601_s29  ;;  %v1498_v61 = vmul.f32 %v1496_v62, %v4621_v50  ;;  %v1486_v28 = vsel %vm1208_vm3, %v1484_v63, %v1485_v7 }
 0x172   : > { %v4979_v30 = vpop.permute.xlu1 %631  ;;  %v4981_v8 = vpop.permute.xlu0 %803  ;;  %v1502_v54 = vrot.slane %v1498_v61, 2 }
 0x173   : > { %8729 = vst [vmem:[#allocation36_spill] sm:$0xff] %v4979_v30  ;;  %8730 = vst [vmem:[#allocation37_spill] sm:$0xff] %v4981_v8  ;;  %v1497_v8 = vmul.f32 %v1496_v62, %v4613_v45  ;;  %v1469_v30 = vsel %vm1208_vm3, %v1467_v42, %v1468_v4 }
 0x174   : > { %1438 = vrot.lane.b32.xlu1 %v1434_v24, %s8601_s29  ;;  %1453 = vrot.lane.b32.xlu0 %v1452_v43, %s8601_s29  ;;  %v1513_v24 = vstv %s4290_s14  ;;  %s5175_s14 = sld [smem:[#allocation2 + $0x9]] }
 0x175   : > { %v1514_v26 = vmul.f32 %v1513_v24, %v4613_v45  ;;  %v1515_v42 = vmul.f32 %v1513_v24, %v4621_v50  ;;  %v1548_v24 = vmul.f32 %v1547_v29, %v4613_v45 }
 0x176   : > { %v4991_v55 = vpop.permute.xlu1 %805  ;;  %v4993_v12 = vpop.permute.xlu0 %820 }
 0x177   : > { %8731 = vst [vmem:[#allocation38_spill] sm:$0xff] %v4991_v55  ;;  %8732 = vst [vmem:[#allocation39_spill] sm:$0xff] %v4993_v12  ;;  %v1501_v12 = vrot.slane %v1497_v8, 2  ;;  %v1530_v55 = vstv %s4985_s15  ;;  %v1518_v63 = vrot.slane %v1514_v26, 2  ;;  %v1519_v61 = vrot.slane %v1515_v42, 2  ;;  %s5179_s15 = sld [smem:[#allocation2 + $0x2]] }
 0x178   : > { %1455 = vrot.lane.b32.xlu1 %v1451_v44, %s8601_s29  ;;  %1470 = vrot.lane.b32.xlu0 %v1469_v30, %s8601_s29  ;;  %v1531_v30 = vmul.f32 %v1530_v55, %v4613_v45  ;;  %v1564_v26 = vstv %s4293_s18  ;;  %s5188_s18 = sld [smem:[#allocation2 + $0x6]] }
 0x179   : > { %v1503_v8 = vsel %vm1208_vm3, %v1501_v12, %v1502_v54  ;;  %v1549_v12 = vmul.f32 %v1547_v29, %v4621_v50 }
 0x17a   : > { %v5002_v13 = vpop.permute.xlu1 %822  ;;  %v5004_v43 = vpop.permute.xlu0 %837 }
 0x17b   : > { %8733 = vst [vmem:[#allocation40_spill] sm:$0xff] %v5002_v13  ;;  %8734 = vst [vmem:[#allocation41_spill] sm:$0xff] %v5004_v43  ;;  %v1532_v43 = vmul.f32 %v1530_v55, %v4621_v50 }
 0x17c   : > { %1472 = vrot.lane.b32.xlu1 %v1468_v4, %s8601_s29  ;;  %1487 = vrot.lane.b32.xlu0 %v1486_v28, %s8601_s29 }
 0x17d   : > { %v1536_v13 = vrot.slane %v1532_v43, 2 }
 0x17e   : > { %v5012_v62 = vpop.permute.xlu1 %839  ;;  %v5014_v44 = vpop.permute.xlu0 %854 }
 0x17f   : > { %8735 = vst [vmem:[#allocation42_spill] sm:$0xff] %v5012_v62  ;;  %8736 = vst [vmem:[#allocation43_spill] sm:$0xff] %v5014_v44  ;;  %v1520_v44 = vsel %vm1208_vm3, %v1518_v63, %v1519_v61  ;;  %v1535_v62 = vrot.slane %v1531_v30, 2  ;;  %v1566_v63 = vmul.f32 %v1564_v26, %v4572_v14  ;;  %v1581_v30 = vstv %s4294_s19  ;;  %s5192_s19 = sld [smem:[#allocation2 + $0xa]] }
 0x180   : > { %1489 = vrot.lane.b32.xlu1 %v1485_v7, %s8601_s29  ;;  %1504 = vrot.lane.b32.xlu0 %v1503_v8, %s8601_s29  ;;  %v1552_v8 = vrot.slane %v1548_v24, 2  ;;  %v1583_v24 = vmul.f32 %v1581_v30, %v4572_v14 }
 0x181   : > { %v1537_v42 = vsel %vm1208_vm3, %v1535_v62, %v1536_v13  ;;  %v1570_v62 = vrot.slane %v1566_v63, 2 }
 0x182   : > { %v5022_v4 = vpop.permute.xlu1 %856  ;;  %v5024_v28 = vpop.permute.xlu0 %871  ;;  %v1587_v63 = vrot.slane %v1583_v24, 2 }
 0x183   : > { %8737 = vst [vmem:[#allocation44_spill] sm:$0xff] %v5022_v4  ;;  %8738 = vst [vmem:[#allocation45_spill] sm:$0xff] %v5024_v28  ;;  %v1553_v28 = vrot.slane %v1549_v12, 2  ;;  %v1582_v12 = vmul.f32 %v1581_v30, %v4566_v9 }
 0x184   : > { %1506 = vrot.lane.b32.xlu1 %v1502_v54, %s8601_s29  ;;  %1521 = vrot.lane.b32.xlu0 %v1520_v44, %s8601_s29  ;;  %v1565_v54 = vmul.f32 %v1564_v26, %v4566_v9 }
 0x185   : > { %v1554_v29 = vsel %vm1208_vm3, %v1552_v8, %v1553_v28  ;;  %8766 = sst [smem:[#allocation73_spill]] %s5192_s19 }
 0x186   : > { %v5031_v55 = vpop.permute.xlu1 %873  ;;  %v5033_v7 = vpop.permute.xlu0 %888  ;;  %s5343_s19 = sld [smem:[#allocation2 + $0x82]] }
 0x187   : > { %8739 = vst [vmem:[#allocation46_spill] sm:$0xff] %v5031_v55  ;;  %8740 = vst [vmem:[#allocation47_spill] sm:$0xff] %v5033_v7 }
 0x188   : > { %1523 = vrot.lane.b32.xlu1 %v1519_v61, %s8601_s29  ;;  %1538 = vrot.lane.b32.xlu0 %v1537_v42, %s8601_s29  ;;  %v1569_v61 = vrot.slane %v1565_v54, 2 }
 0x18a   : > { %v5040_v43 = vpop.permute.xlu1 %890  ;;  %v5042_v44 = vpop.permute.xlu0 %905  ;;  %v1571_v8 = vsel %vm1208_vm3, %v1569_v61, %v1570_v62 }
 0x18b   : > { %8741 = vst [vmem:[#allocation48_spill] sm:$0xff] %v5040_v43  ;;  %8742 = vst [vmem:[#allocation49_spill] sm:$0xff] %v5042_v44  ;;  %v1598_v44 = vstv %s4295_s20  ;;  %s5197_s20 = sld [smem:[#allocation2 + $0x7b]] }
 0x18c   : > { %1540 = vrot.lane.b32.xlu1 %v1536_v13, %s8601_s29  ;;  %1555 = vrot.lane.b32.xlu0 %v1554_v29, %s8601_s29  ;;  %v1600_v43 = vmul.f32 %v1598_v44, %v4572_v14  ;;  %v1586_v13 = vrot.slane %v1582_v12, 2  ;;  %v1599_v54 = vmul.f32 %v1598_v44, %v4566_v9 }
 0x18e   : > { %v5053_v26 = vpop.permute.xlu1 %907  ;;  %v5055_v42 = vpop.permute.xlu0 %922  ;;  %v1588_v24 = vsel %vm1208_vm3, %v1586_v13, %v1587_v63  ;;  %v1604_v61 = vrot.slane %v1600_v43, 2  ;;  %v1603_v12 = vrot.slane %v1599_v54, 2 }
 0x18f   : > { %8743 = vst [vmem:[#allocation50_spill] sm:$0xff] %v5053_v26  ;;  %8744 = vst [vmem:[#allocation51_spill] sm:$0xff] %v5055_v42  ;;  %v1615_v42 = vstv %s5044_s21  ;;  %v1632_v26 = vstv %s5048_s22  ;;  %s5199_s21 = sld [smem:[#allocation2 + $0x3]] }
 0x190   : > { %1557 = vrot.lane.b32.xlu1 %v1553_v28, %s8601_s29  ;;  %1572 = vrot.lane.b32.xlu0 %v1571_v8, %s8598_s17  ;;  %v1617_v28 = vmul.f32 %v1615_v42, %v4572_v14  ;;  %v1616_v44 = vmul.f32 %v1615_v42, %v4566_v9  ;;  %v1605_v43 = vsel %vm1208_vm3, %v1603_v12, %v1604_v61  ;;  %s5208_s22 = sld [smem:[#allocation2 + $0x7c]] }
 0x191   : > { %v1634_v7 = vmul.f32 %v1632_v26, %v4597_v31 }
 0x192   : > { %v5064_v30 = vpop.permute.xlu1 %924  ;;  %v5066_v29 = vpop.permute.xlu0 %939  ;;  %v1621_v13 = vrot.slane %v1617_v28, 2  ;;  %v1620_v42 = vrot.slane %v1616_v44, 2 }
 0x193   : > { %8745 = vst [vmem:[#allocation52_spill] sm:$0xff] %v5064_v30  ;;  %8746 = vst [vmem:[#allocation53_spill] sm:$0xff] %v5066_v29  ;;  %v1633_v30 = vmul.f32 %v1632_v26, %v4589_v27  ;;  %v1638_v28 = vrot.slane %v1634_v7, 2 }
 0x194   : > { %1574 = vrot.lane.b32.xlu1 %v1570_v62, %s8598_s17  ;;  %1589 = vrot.lane.b32.xlu0 %v1588_v24, %s8598_s17  ;;  %v1649_v62 = vstv %s5061_s23  ;;  %v1622_v12 = vsel %vm1208_vm3, %v1620_v42, %v1621_v13  ;;  %s5210_s23 = sld [smem:[#allocation2 + $0x7]] }
 0x195   : > { %v1650_v26 = vmul.f32 %v1649_v62, %v4589_v27 }
 0x196   : > { %v5077_v8 = vpop.permute.xlu1 %941  ;;  %v5079_v29 = vpop.permute.xlu0 %956 }
 0x197   : > { %8747 = vst [vmem:[#allocation54_spill] sm:$0xff] %v5077_v8  ;;  %8748 = vst [vmem:[#allocation55_spill] sm:$0xff] %v5079_v29  ;;  %v1637_v29 = vrot.slane %v1633_v30, 2  ;;  %v1666_v8 = vstv %s5069_s25  ;;  %v1654_v42 = vrot.slane %v1650_v26, 2  ;;  %s5214_s25 = sld [smem:[#allocation2 + $0xb]] }
 0x198   : > { %1591 = vrot.lane.b32.xlu1 %v1587_v63, %s8598_s17  ;;  %1606 = vrot.lane.b32.xlu0 %v1605_v43, %s8598_s17  ;;  %v1651_v63 = vmul.f32 %v1649_v62, %v4597_v31  ;;  %v1667_v30 = vmul.f32 %v1666_v8, %v4589_v27  ;;  %v1668_v55 = vmul.f32 %v1666_v8, %v4597_v31 }
 0x19a   : > { %v5089_v54 = vpop.permute.xlu1 %958  ;;  %v5091_v24 = vpop.permute.xlu0 %973  ;;  %v1655_v7 = vrot.slane %v1651_v63, 2  ;;  %v1671_v26 = vrot.slane %v1667_v30, 2  ;;  %v1672_v63 = vrot.slane %v1668_v55, 2 }
 0x19b   : > { %8749 = vst [vmem:[#allocation56_spill] sm:$0xff] %v5089_v54  ;;  %8750 = vst [vmem:[#allocation57_spill] sm:$0xff] %v5091_v24  ;;  %v1683_v24 = vstv %s5082_s26  ;;  %v1639_v54 = vsel %vm1208_vm3, %v1637_v29, %v1638_v28  ;;  %s5217_s26 = sld [smem:[#allocation2 + $0x24]] }
 0x19c   : > { %1608 = vrot.lane.b32.xlu1 %v1604_v61, %s8598_s17  ;;  %1623 = vrot.lane.b32.xlu0 %v1622_v12, %s8598_s17  ;;  %v1684_v12 = vmul.f32 %v1683_v24, %v4589_v27  ;;  %v1656_v29 = vsel %vm1208_vm3, %v1654_v42, %v1655_v7  ;;  %v1685_v8 = vmul.f32 %v1683_v24, %v4597_v31  ;;  %v1717_v24 = vstv %s4302_s28  ;;  %s5230_s28 = sld [smem:[#allocation2 + $0x7d]] }
 0x19d   : > { %v8820_v37 = vstv %s5214_s25  ;;  %s5716_s25 = sld [smem:[#allocation2 + $0x8c]] }
 0x19e   : > { %v5101_v44 = vpop.permute.xlu1 %975  ;;  %v5103_v43 = vpop.permute.xlu0 %990  ;;  %v1688_v42 = vrot.slane %v1684_v12, 2  ;;  %v1689_v30 = vrot.slane %v1685_v8, 2  ;;  %v1718_v12 = vmul.f32 %v1717_v24, %v4613_v45 }
 0x19f   : > { %8751 = vst [vmem:[#allocation58_spill] sm:$0xff] %v5101_v44  ;;  %8752 = vst [vmem:[#allocation59_spill] sm:$0xff] %v5103_v43  ;;  %v1700_v43 = vstv %s5094_s27  ;;  %s5224_s27 = sld [smem:[#allocation2 + $0x28]] }
 0x1a0   : > { %1625 = vrot.lane.b32.xlu1 %v1621_v13, %s8598_s17  ;;  %1640 = vrot.lane.b32.xlu0 %v1639_v54, %s8598_s17  ;;  %v1702_v55 = vmul.f32 %v1700_v43, %v4621_v50  ;;  %v1690_v44 = vsel %vm1208_vm3, %v1688_v42, %v1689_v30  ;;  %v1722_v42 = vrot.slane %v1718_v12, 2 }
 0x1a2   : > { %v5111_v61 = vpop.permute.xlu1 %992  ;;  %v5113_v62 = vpop.permute.xlu0 %1007  ;;  %v1706_v4 = vrot.slane %v1702_v55, 2 }
 0x1a3   : > { %8753 = vst [vmem:[#allocation60_spill] sm:$0xff] %v5111_v61  ;;  %8754 = vst [vmem:[#allocation61_spill] sm:$0xff] %v5113_v62  ;;  %v1701_v62 = vmul.f32 %v1700_v43, %v4613_v45  ;;  %v1673_v61 = vsel %vm1208_vm3, %v1671_v26, %v1672_v63  ;;  %v1719_v26 = vmul.f32 %v1717_v24, %v4621_v50 }
 0x1a4   : > { %1642 = vrot.lane.b32.xlu1 %v1638_v28, %s8598_s17  ;;  %1657 = vrot.lane.b32.xlu0 %v1656_v29, %s8598_s17 }
 0x1a5   : > { %v1723_v55 = vrot.slane %v1719_v26, 2 }
 0x1a6   : > { %v5123_v13 = vpop.permute.xlu1 %1009  ;;  %v5125_v54 = vpop.permute.xlu0 %1024 }
 0x1a7   : > { %8755 = vst [vmem:[#allocation62_spill] sm:$0xff] %v5123_v13  ;;  %8756 = vst [vmem:[#allocation63_spill] sm:$0xff] %v5125_v54  ;;  %v1705_v54 = vrot.slane %v1701_v62, 2  ;;  %v1734_v13 = vstv %s5117_s30  ;;  %v1751_v62 = vstv %s5128_s4  ;;  %s5232_s30 = sld [smem:[#allocation2 + $0x25]] }
 0x1a8   : > { %1659 = vrot.lane.b32.xlu1 %v1655_v7, %s8598_s17  ;;  %1674 = vrot.lane.b32.xlu0 %v1673_v61, %s8598_s17  ;;  %v1735_v61 = vmul.f32 %v1734_v13, %v4613_v45  ;;  %s5236_s4 = sld [smem:[#allocation2 + $0x26]] }
 0x1a9   : > { %v1707_v8 = vsel %vm1208_vm3, %v1705_v54, %v1706_v4 }
 0x1aa   : > { %v5134_v28 = vpop.permute.xlu1 %1026  ;;  %v5136_v29 = vpop.permute.xlu0 %1041  ;;  %v1739_v54 = vrot.slane %v1735_v61, 2 }
 0x1ab   : > { %8757 = vst [vmem:[#allocation64_spill] sm:$0xff] %v5134_v28  ;;  %8758 = vst [vmem:[#allocation65_spill] sm:$0xff] %v5136_v29 }
 0x1ac   : > { %1676 = vrot.lane.b32.xlu1 %v1672_v63, %s8598_s17  ;;  %1691 = vrot.lane.b32.xlu0 %v1690_v44, %s8598_s17  ;;  %v1736_v63 = vmul.f32 %v1734_v13, %v4621_v50  ;;  %v1724_v13 = vsel %vm1208_vm3, %v1722_v42, %v1723_v55 }
 0x1ad   : > { %8771 = sst [smem:[#allocation78_spill]] %s5232_s30 }
 0x1ae   : > { %v5146_v43 = vpop.permute.xlu1 %1043  ;;  %v5148_v7 = vpop.permute.xlu0 %1058  ;;  %v1740_v12 = vrot.slane %v1736_v63, 2  ;;  %s5359_s30 = sld [smem:[#allocation2 + $0x4d]] }
 0x1af   : > { %8759 = vst [vmem:[#allocation66_spill] sm:$0xff] %v5146_v43  ;;  %8760 = vst [vmem:[#allocation67_spill] sm:$0xff] %v5148_v7  ;;  %v1752_v7 = vmul.f32 %v1751_v62, %v4613_v45  ;;  %v2095_v43 = vstv %s5343_s19  ;;  %s8836_s19 = smov 126  }
 0x1b0   : > { %1693 = vrot.lane.b32.xlu1 %v1689_v30, %s8598_s17  ;;  %1708 = vrot.lane.b32.xlu0 %v1707_v8, %s8598_s17  ;;  %v1753_v30 = vmul.f32 %v1751_v62, %v4621_v50  ;;  %v1741_v61 = vsel %vm1208_vm3, %v1739_v54, %v1740_v12  ;;  %v2096_v56 = vmul.f32 %v2095_v43, %v4613_v45 }
 0x1b1   : > { %v1756_v62 = vrot.slane %v1752_v7, 2  ;;  %v1942_v7 = vstv %s5169_s10  ;;  %s5247_s10 = sld [smem:[#allocation2 + $0x29]] }
 0x1b2   : > { %v5164_v44 = vpop.permute.xlu1 %1060  ;;  %v5166_v24 = vpop.permute.xlu0 %1075  ;;  %v1757_v42 = vrot.slane %v1753_v30, 2 }
 0x1b3   : > { %8762 = vst [vmem:[#allocation69_spill] sm:$0xff] %v5164_v44  ;;  %8763 = vst [vmem:[#allocation70_spill] sm:$0xff] %v5166_v24  ;;  %v1925_v24 = vstv %s5152_s6  ;;  %s5245_s6 = sld [smem:[#allocation2 + $0x7e]] }
 0x1b4   : > { %1710 = vrot.lane.b32.xlu1 %v1706_v4, %s8598_s17  ;;  %1725 = vrot.lane.b32.xlu0 %v1724_v13, %s8598_s17  ;;  %v1927_v4 = vmul.f32 %v1925_v24, %v4572_v14  ;;  %v1926_v63 = vmul.f32 %v1925_v24, %v4566_v9  ;;  %v1758_v54 = vsel %vm1208_vm3, %v1756_v62, %v1757_v42 }
 0x1b5   : > { %v1943_v24 = vmul.f32 %v1942_v7, %v4566_v9 }
 0x1b6   : > { %v5181_v26 = vpop.permute.xlu1 %1077  ;;  %v5183_v8 = vpop.permute.xlu0 %1092  ;;  %v1931_v30 = vrot.slane %v1927_v4, 3  ;;  %v1959_v4 = vstv %s5186_s16  ;;  %s5252_s16 = sld [smem:[#allocation2 + $0x2a]] }
 0x1b7   : > { %8764 = vst [vmem:[#allocation71_spill] sm:$0xff] %v5181_v26  ;;  %8765 = vst [vmem:[#allocation72_spill] sm:$0xff] %v5183_v8  ;;  %v1944_v26 = vmul.f32 %v1942_v7, %v4572_v14  ;;  %v1960_v7 = vmul.f32 %v1959_v4, %v4566_v9 }
 0x1b8   : > { %1727 = vrot.lane.b32.xlu1 %v1723_v55, %s8598_s17  ;;  %1742 = vrot.lane.b32.xlu0 %v1741_v61, %s8598_s17  ;;  %v1930_v55 = vrot.slane %v1926_v63, 3  ;;  %v1947_v63 = vrot.slane %v1943_v24, 3 }
 0x1ba   : > { %v5201_v13 = vpop.permute.xlu1 %1094  ;;  %v5203_v8 = vpop.permute.xlu0 %1109 }
 0x1bb   : > { %8767 = vst [vmem:[#allocation74_spill] sm:$0xff] %v5201_v13  ;;  %8768 = vst [vmem:[#allocation75_spill] sm:$0xff] %v5203_v8  ;;  %v1961_v8 = vmul.f32 %v1959_v4, %v4572_v14  ;;  %v1964_v4 = vrot.slane %v1960_v7, 3  ;;  %v2010_v7 = vstv %s5230_s28  ;;  %s5288_s28 = sld [smem:[#allocation2 + $0x80]] }
 0x1bc   : > { %1744 = vrot.lane.b32.xlu1 %v1740_v12, %s8598_s17  ;;  %1759 = vrot.lane.b32.xlu0 %v1758_v54, %s8598_s17  ;;  %v1932_v12 = vsel %vm1773_vm4, %v1930_v55, %v1931_v30  ;;  %v1948_v54 = vrot.slane %v1944_v26, 3 }
 0x1be   : > { %v5219_v61 = vpop.permute.xlu1 %1111  ;;  %v5221_v62 = vpop.permute.xlu0 %1126 }
 0x1bf   : > { %8769 = vst [vmem:[#allocation76_spill] sm:$0xff] %v5219_v61  ;;  %8770 = vst [vmem:[#allocation77_spill] sm:$0xff] %v5221_v62  ;;  %v1976_v61 = vstv %s5197_s20  ;;  %v1965_v62 = vrot.slane %v1961_v8, 3  ;;  %s5254_s20 = sld [smem:[#allocation2 + $0x27]] }
 0x1c0   : > { %1761 = vrot.lane.b32.xlu1 %v1757_v42, %s8598_s17  ;;  %1933 = vrot.lane.b32.xlu0 %v1932_v12, %s8601_s29  ;;  %v1978_v26 = vmul.f32 %v1976_v61, %v4572_v14  ;;  %v1949_v42 = vsel %vm1773_vm4, %v1947_v63, %v1948_v54  ;;  %v1993_v12 = vstv %s5208_s22  ;;  %v1977_v24 = vmul.f32 %v1976_v61, %v4566_v9  ;;  %s5261_s22 = sld [smem:[#allocation2 + $0x2b]] }
 0x1c1   : > { %s5270_s17 = sld [smem:[#allocation2 + $0x2c]] }
 0x1c2   : > { %v5238_v13 = vpop.permute.xlu1 %1128  ;;  %v5240_v55 = vpop.permute.xlu0 %1143  ;;  %v1982_v63 = vrot.slane %v1978_v26, 3  ;;  %v1981_v61 = vrot.slane %v1977_v24, 3 }
 0x1c3   : > { %8772 = vst [vmem:[#allocation79_spill] sm:$0xff] %v5238_v13  ;;  %8773 = vst [vmem:[#allocation80_spill] sm:$0xff] %v5240_v55  ;;  %v1994_v55 = vmul.f32 %v1993_v12, %v4589_v27 }
 0x1c4   : > { %1935 = vrot.lane.b32.xlu1 %v1931_v30, %s8601_s29  ;;  %1950 = vrot.lane.b32.xlu0 %v1949_v42, %s8601_s29  ;;  %v1966_v30 = vsel %vm1773_vm4, %v1964_v4, %v1965_v62  ;;  %v1995_v42 = vmul.f32 %v1993_v12, %v4597_v31  ;;  %v1983_v12 = vsel %vm1773_vm4, %v1981_v61, %v1982_v63 }
 0x1c5   : > { %8774 = sst [smem:[#allocation81_spill]] %s5254_s20 }
 0x1c6   : > { %v5256_v13 = vpop.permute.xlu1 %1145  ;;  %v5258_v8 = vpop.permute.xlu0 %1160  ;;  %v1999_v24 = vrot.slane %v1995_v42, 3  ;;  %s5376_s20 = sld [smem:[#allocation2 + $0x4e]] }
 0x1c7   : > { %8775 = vst [vmem:[#allocation82_spill] sm:$0xff] %v5256_v13  ;;  %8776 = vst [vmem:[#allocation83_spill] sm:$0xff] %v5258_v8  ;;  %v5283_v8 = vmul.f32 %v2010_v7, %v4597_v31  ;;  %v2027_v13 = vstv %s5245_s6  ;;  %s5303_s6 = sld [smem:[#allocation2 + $0x81]] }
 0x1c8   : > { %1952 = vrot.lane.b32.xlu1 %v1948_v54, %s8601_s29  ;;  %1967 = vrot.lane.b32.xlu0 %v1966_v30, %s8601_s29  ;;  %v1998_v54 = vrot.slane %v1994_v55, 3  ;;  %v2011_v30 = vmul.f32 %v2010_v7, %v4589_v27 }
 0x1ca   : > { %v5274_v26 = vpop.permute.xlu1 %1162  ;;  %v5276_v4 = vpop.permute.xlu0 %1177  ;;  %v2000_v42 = vsel %vm1773_vm4, %v1998_v54, %v1999_v24  ;;  %v2015_v55 = vrot.slane %v2011_v30, 3 }
 0x1cb   : > { %8777 = vst [vmem:[#allocation84_spill] sm:$0xff] %v5274_v26  ;;  %8778 = vst [vmem:[#allocation85_spill] sm:$0xff] %v5276_v4 }
 0x1cc   : > { %1969 = vrot.lane.b32.xlu1 %v1965_v62, %s8601_s29  ;;  %1984 = vrot.lane.b32.xlu0 %v1983_v12, %s8601_s29  ;;  %v2028_v62 = vmul.f32 %v2027_v13, %v4589_v27  ;;  %v5301_v12 = vmul.f32 %v2027_v13, %v4597_v31  ;;  %s5306_s29 = sld [smem:[#allocation2 + $0x49]]  ;;  %v2044_v13 = vstv %s5268_s24 }
 0x1cd   : > { %s5332_s24 = sld [smem:[#allocation2 + $0x4c]]  ;;  %v2045_v54 = vmul.f32 %v2044_v13, %v4589_v27  ;;  %v5337_v44 = vmul.f32 %v2044_v13, %v4597_v31 }
 0x1ce   : > { %v5295_v61 = vpop.permute.xlu1 %1179  ;;  %v5297_v7 = vpop.permute.xlu0 %1194  ;;  %v2033_v26 = vrot.slane %v5301_v12, 3 }
 0x1cf   : > { %8779 = vst [vmem:[#allocation86_spill] sm:$0xff] %v5295_v61  ;;  %8780 = vst [vmem:[#allocation87_spill] sm:$0xff] %v5297_v7  ;;  %v2016_v61 = vrot.slane %v5283_v8, 3 }
 0x1d0   : > { %1986 = vrot.lane.b32.xlu1 %v1982_v63, %s8782_s1  ;;  %2001 = vrot.lane.b32.xlu0 %v2000_v42, %s8782_s1  ;;  %v2032_v42 = vrot.slane %v2028_v62, 3  ;;  %v2061_v62 = vstv %s5288_s28  ;;  %s5357_s28 = sld [smem:[#allocation2 + $0x84]] }
 0x1d1   : > { %v2017_v30 = vsel %vm1773_vm4, %v2015_v55, %v2016_v61  ;;  %v2049_v55 = vrot.slane %v2045_v54, 3  ;;  %v5364_v4 = vmul.f32 %v2061_v62, %v4621_v50 }
 0x1d2   : > { %8781 = sst [smem:[#allocation88_spill]] %s5306_s29  ;;  %v5326_v8 = vpop.permute.xlu1 %1196  ;;  %v5328_v63 = vpop.permute.xlu0 %1368 }
 0x1d3   : > { %8784 = vst [vmem:[#allocation90_spill] sm:$0xff] %v5326_v8  ;;  %8785 = vst [vmem:[#allocation91_spill] sm:$0xff] %v5328_v63  ;;  %v2050_v63 = vrot.slane %v5337_v44, 3  ;;  %v2062_v8 = vmul.f32 %v2061_v62, %v4613_v45  ;;  %v2067_v44 = vrot.slane %v5364_v4, 3  ;;  %s8790_s29 = sld [smem:[#allocation68_spill]] }
 0x1d4   : > { %2003 = vrot.lane.b32.xlu1 %v1999_v24, %s8782_s1  ;;  %2018 = vrot.lane.b32.xlu0 %v2017_v30, %s8782_s1  ;;  %v2034_v24 = vsel %vm1773_vm4, %v2032_v42, %v2033_v26  ;;  %v2078_v30 = vstv %s5303_s6  ;;  %s5370_s6 = sld [smem:[#allocation2 + $0x83]] }
 0x1d5   : > { %v5386_v54 = vmul.f32 %v2078_v30, %v4621_v50  ;;  %v2051_v7 = vsel %vm1773_vm4, %v2049_v55, %v2050_v63  ;;  %v2066_v42 = vrot.slane %v2062_v8, 3 }
 0x1d6   : > { %v5351_v29 = vpop.permute.xlu1 %1370  ;;  %v5353_v13 = vpop.permute.xlu0 %1385  ;;  %v2129_v39 = vstv %s5357_s28  ;;  %s6080_s28 = sld [smem:[#allocation2 + $0xa1]] }
 0x1d7   : > { %8786 = vst [vmem:[#allocation92_spill] sm:$0xff] %v5351_v29  ;;  %8787 = vst [vmem:[#allocation93_spill] sm:$0xff] %v5353_v13  ;;  %v8792_v29 = vstv %s5154_s7  ;;  %s5468_s7 = sld [smem:[#allocation2 + $0x51]] }
 0x1d8   : > { %2020 = vrot.lane.b32.xlu1 %v2016_v61, %s8782_s1  ;;  %2035 = vrot.lane.b32.xlu0 %v2034_v24, %s8782_s1  ;;  %v2079_v24 = vmul.f32 %v2078_v30, %v4613_v45  ;;  %v255_v8 = vmul.f32 %v8792_v29, %v4589_v27  ;;  %v8793_v4 = vmov %v8792_v29 }
 0x1d9   : > { %v256_v55 = vmul.f32 %v8793_v4, %v4597_v31  ;;  %v2084_v4 = vrot.slane %v5386_v54, 3  ;;  %v8801_v54 = vstv %s5175_s14 }
 0x1da   : > { %v5380_v12 = vpop.permute.xlu1 %1387  ;;  %v5382_v61 = vpop.permute.xlu0 %1402  ;;  %v2083_v29 = vrot.slane %v2079_v24, 3  ;;  %v285_v24 = vmul.f32 %v8801_v54, %v4613_v45  ;;  %v2100_v54 = vrot.slane %v2096_v56, 3 }
 0x1db   : > { %8788 = vst [vmem:[#allocation94_spill] sm:$0xff] %v5380_v12  ;;  %8789 = vst [vmem:[#allocation95_spill] sm:$0xff] %v5382_v61  ;;  %v8791_v12 = vstv %s5144_s5  ;;  %s5433_s5 = sld [smem:[#allocation2 + $0x50]] }
 0x1dc   : > { %2037 = vrot.lane.b32.xlu1 %v2033_v26, %s8782_s1  ;;  %2052 = vrot.lane.b32.xlu0 %v2051_v7, %s8782_s1  ;;  %v231_v30 = vmul.f32 %v8791_v12, %v4566_v9  ;;  %v8794_v62 = vmov %v8791_v12  ;;  %v8795_v26 = vstv %s5162_s9  ;;  %v8796_v7 = vstv %s5171_s11  ;;  %s8807_s9 = sld [smem:[#allocation73_spill]] }
 0x1dd   : > { %v232_v61 = vmul.f32 %v8794_v62, %v4572_v14  ;;  %v237_v13 = vmul.f32 %v8795_v26, %v4566_v9  ;;  %v261_v28 = vmul.f32 %v8796_v7, %v4589_v27  ;;  %v2068_v62 = vsel %vm1773_vm4, %v2066_v42, %v2067_v44 }
 0x1de   : > { %v5415_v48 = vpop.permute.xlu1 %1404  ;;  %v5417_v12 = vpop.permute.xlu0 %1419  ;;  %v5423_v26 = vmul.f32 %v2095_v43, %v4621_v50  ;;  %v8799_v7 = vstv %s8790_s29  ;;  %v2112_v42 = vstv %s5370_s6  ;;  %v8802_v43 = vstv %s5171_s11  ;;  %s5453_s29 = sld [smem:[#allocation2 + $0x85]] }
 0x1df   : > { %8797 = vst [vmem:[#allocation96_spill] sm:$0xff] %v5415_v48  ;;  %8798 = vst [vmem:[#allocation97_spill] sm:$0xff] %v5417_v12  ;;  %v279_v38 = vmul.f32 %v8799_v7, %v4613_v45  ;;  %v8800_v48 = vmov %v8799_v7  ;;  %v262_v17 = vmul.f32 %v8802_v43, %v4597_v31  ;;  %v238_v7 = vmul.f32 %v8803_v16, %v4572_v14  ;;  %s5496_s11 = sld [smem:[#allocation2 + $0x86]] }
 0x1e0   : > { %v280_v25 = vmul.f32 %v8800_v48, %v4621_v50  ;;  %2054 = vrot.lane.b32.xlu1 %v2050_v63, %s8782_s1  ;;  %2069 = vrot.lane.b32.xlu0 %v2068_v62, %s8782_s1  ;;  %v257_v12 = vadd.f32 %v255_v8, %v231_v30  ;;  %v258_v3 = vadd.f32 %v256_v55, %v232_v61  ;;  %v2101_v16 = vrot.slane %v5423_v26, 3  ;;  %s6110_s6 = sld [smem:[#allocation2 + $0x6e]] }
 0x1e1   : > { %v263_v0 = vadd.f32 %v261_v28, %v237_v13  ;;  %v2085_v62 = vsel %vm1773_vm4, %v2083_v29, %v2084_v4  ;;  %v2113_v30 = vmul.f32 %v2112_v42, %v4613_v45  ;;  %v5458_v28 = vmul.f32 %v2112_v42, %v4621_v50 }
 0x1e2   : > { %v5448_v53 = vpop.permute.xlu1 %1421  ;;  %v5450_v63 = vpop.permute.xlu0 %1436  ;;  %v5460_v13 = vadd.f32 %v279_v38, %v257_v12  ;;  %v5462_v61 = vadd.f32 %v280_v25, %v258_v3  ;;  %v8806_v8 = vstv %s5175_s14  ;;  %v264_v26 = vadd.f32 %v262_v17, %v238_v7  ;;  %s5532_s14 = sld [smem:[#allocation2 + $0x87]] }
 0x1e3   : > { %8804 = vst [vmem:[#allocation98_spill] sm:$0xff] %v5448_v53  ;;  %8805 = vst [vmem:[#allocation99_spill] sm:$0xff] %v5450_v63  ;;  %v286_v55 = vmul.f32 %v8806_v8, %v4621_v50  ;;  %v5472_v56 = vadd.f32 %v285_v24, %v263_v0  ;;  %v8808_v38 = vstv %s5179_s15  ;;  %v8809_v25 = vstv %s5188_s18  ;;  %s5539_s15 = sld [smem:[#allocation2 + $0x88]] }
 0x1e4   : > { %2071 = vrot.lane.b32.xlu1 %v2067_v44, %s8782_s1  ;;  %2086 = vrot.lane.b32.xlu0 %v2085_v62, %s8782_s1  ;;  %v243_v3 = vmul.f32 %v8808_v38, %v4566_v9  ;;  %v267_v12 = vmul.f32 %v8809_v25, %v4589_v27  ;;  %v8810_v42 = vmov %v8809_v25  ;;  %v8811_v44 = vmov %v8808_v38  ;;  %s8828_s18 = sld [smem:[#allocation78_spill]] }
 0x1e5   : > { %v268_v43 = vmul.f32 %v8810_v42, %v4597_v31  ;;  %v244_v8 = vmul.f32 %v8811_v44, %v4572_v14  ;;  %v8812_v62 = vstv %s5199_s21  ;;  %v8813_v24 = vstv %s5210_s23 }
 0x1e6   : > { %v249_v0 = vmul.f32 %v8812_v62, %v4566_v9  ;;  %v273_v17 = vmul.f32 %v8813_v24, %v4589_v27  ;;  %v5492_v7 = vpop.permute.xlu1 %1438  ;;  %v5494_v38 = vpop.permute.xlu0 %1453  ;;  %v2102_v25 = vsel %vm1773_vm4, %v2100_v54, %v2101_v16  ;;  %v2117_v42 = vrot.slane %v2113_v30, 3 }
 0x1e7   : > { %8814 = vst [vmem:[#allocation100_spill] sm:$0xff] %v5492_v7  ;;  %8815 = vst [vmem:[#allocation101_spill] sm:$0xff] %v5494_v38  ;;  %v2118_v44 = vrot.slane %v5458_v28, 3  ;;  %v5501_v29 = vmul.f32 %v2129_v39, %v4572_v14  ;;  %v8816_v62 = vstv %s8807_s9  ;;  %v8817_v48 = vstv %s5210_s23  ;;  %s8865_s23 = sld [smem:[#allocation81_spill]] }
 0x1e8   : > { %v291_v24 = vmul.f32 %v8816_v62, %v4613_v45  ;;  %v274_v7 = vmul.f32 %v8817_v48, %v4597_v31  ;;  %v8818_v53 = vstv %s5199_s21  ;;  %2088 = vrot.lane.b32.xlu1 %v2084_v4, %s8782_s1  ;;  %2103 = vrot.lane.b32.xlu0 %v2102_v25, %s8782_s1  ;;  %v5515_v54 = vadd.f32 %v286_v55, %v264_v26  ;;  %s5592_s21 = sld [smem:[#allocation2 + $0x89]] }
 0x1e9   : > { %v250_v38 = vmul.f32 %v8818_v53, %v4572_v14  ;;  %v269_v30 = vadd.f32 %v267_v12, %v243_v3  ;;  %v8819_v28 = vmov %v8816_v62  ;;  %v2130_v62 = vmul.f32 %v2129_v39, %v4566_v9  ;;  %s6159_s9 = sld [smem:[#allocation2 + $0xa3]] }
 0x1ea   : > { %v292_v52 = vmul.f32 %v8819_v28, %v4621_v50  ;;  %v270_v48 = vadd.f32 %v268_v43, %v244_v8  ;;  %v297_v53 = vmul.f32 %v8820_v37, %v4613_v45  ;;  %v8821_v63 = vmov %v8820_v37  ;;  %v5527_v34 = vpop.permute.xlu1 %1455  ;;  %v5529_v55 = vpop.permute.xlu0 %1470 }
 0x1eb   : > { %v298_v4 = vmul.f32 %v8821_v63, %v4621_v50  ;;  %8822 = vst [vmem:[#allocation102_spill] sm:$0xff] %v5527_v34  ;;  %8823 = vst [vmem:[#allocation103_spill] sm:$0xff] %v5529_v55  ;;  %v2146_v26 = vstv %s5453_s29  ;;  %v275_v3 = vadd.f32 %v273_v17, %v249_v0  ;;  %v2119_v12 = vsel %vm1773_vm4, %v2117_v42, %v2118_v44  ;;  %s6140_s29 = sld [smem:[#allocation2 + $0x6f]] }
 0x1ec   : > { %v2135_v39 = vrot.slane %v5501_v29, 3  ;;  %v5537_v43 = vmul.f32 %v2146_v26, %v4572_v14  ;;  %v276_v37 = vadd.f32 %v274_v7, %v250_v38  ;;  %v8824_v63 = vstv %s5217_s26  ;;  %2105 = vrot.lane.b32.xlu1 %v2101_v16, %s8782_s1  ;;  %2120 = vrot.lane.b32.xlu0 %v2119_v12, %s8782_s1  ;;  %s8902_s26 = sld [smem:[#allocation88_spill]] }
 0x1ed   : > { %v639_v8 = vmul.f32 %v8824_v63, %v4566_v9  ;;  %v8825_v25 = vmov %v8824_v63  ;;  %v5552_v29 = vadd.f32 %v291_v24, %v269_v30  ;;  %v8827_v17 = vstv %s5224_s27  ;;  %s8904_s27 = sld [smem:[#allocation89_spill]] }
 0x1ee   : > { %v5547_v28 = vmul.f32 %v8825_v25, %v4572_v14  ;;  %v5557_v42 = vmul.f32 %v8827_v17, %v4589_v27  ;;  %v2134_v7 = vrot.slane %v2130_v62, 3  ;;  %v2147_v38 = vmul.f32 %v2146_v26, %v4566_v9  ;;  %v5566_v16 = vpop.permute.xlu1 %1472  ;;  %v5568_v24 = vpop.permute.xlu0 %1487 }
 0x1ef   : > { %v5560_v63 = vadd.f32 %v292_v52, %v270_v48  ;;  %v5562_v25 = vadd.f32 %v297_v53, %v275_v3  ;;  %v5564_v0 = vadd.f32 %v298_v4, %v276_v37  ;;  %8829 = vst [vmem:[#allocation105_spill] sm:$0xff] %v5566_v16  ;;  %8830 = vst [vmem:[#allocation106_spill] sm:$0xff] %v5568_v24  ;;  %v2163_v30 = vstv %s5496_s11  ;;  %s6170_s11 = sld [smem:[#allocation2 + $0x74]] }
 0x1f0   : > { %8826 = vst [vmem:[#allocation104_spill] sm:$0xff] %v5547_v28  ;;  %v8831_v12 = vmov %v8827_v17  ;;  %v2136_v62 = vsel %vm1773_vm4, %v2134_v7, %v2135_v39  ;;  %v2152_v52 = vrot.slane %v5537_v43, 3  ;;  %v5579_v48 = vmul.f32 %v2163_v30, %v4572_v14  ;;  %2122 = vrot.lane.b32.xlu1 %v2118_v44, %s8782_s1 }
 0x1f1   : > { %v5574_v17 = vmul.f32 %v8831_v12, %v4597_v31  ;;  %v644_v53 = vrot.slane %v639_v8, 1  ;;  %v8833_v26 = vstv %s5270_s17  ;;  %2137 = vrot.lane.b32.xlu0 %v2136_v62, %s8836_s19  ;;  %v696_v43 = vrot.slane %v5557_v42, 1  ;;  %s5617_s17 = sld [smem:[#allocation2 + $0x8a]] }
 0x1f2   : > { %v744_v3 = vmul.f32 %v8833_v26, %v4613_v45  ;;  %v8834_v37 = vmov %v8833_v26  ;;  %v8837_v8 = vstv %s8828_s18  ;;  %v2151_v4 = vrot.slane %v2147_v38, 3  ;;  %v5612_v42 = vpop.permute.xlu1 %1489  ;;  %v5614_v24 = vpop.permute.xlu0 %1504  ;;  %s6235_s18 = sld [smem:[#allocation2 + $0xa5]] }
 0x1f3   : > { %8832 = vst [vmem:[#allocation107_spill] sm:$0xff] %v5574_v17  ;;  %v5588_v12 = vmul.f32 %v8834_v37, %v4621_v50  ;;  %v5598_v7 = vmul.f32 %v8837_v8, %v4572_v14  ;;  %v2164_v26 = vmul.f32 %v2163_v30, %v4566_v9  ;;  %v8839_v37 = vmov %v8837_v8  ;;  %8843 = vst [vmem:[#allocation111_spill] sm:$0xff] %v5612_v42 }
 0x1f4   : > { %v653_v16 = vmul.f32 %v8839_v37, %v4566_v9  ;;  %v8840_v44 = vstv %s5247_s10  ;;  %8844 = vst [vmem:[#allocation112_spill] sm:$0xff] %v5614_v24  ;;  %v2180_v8 = vstv %s5532_s14  ;;  %v2153_v38 = vsel %vm1773_vm4, %v2151_v4, %v2152_v52  ;;  %2139 = vrot.lane.b32.xlu1 %v2135_v39, %s8836_s19  ;;  %s5905_s10 = sld [smem:[#allocation2 + $0x53]] }
 0x1f5   : > { %8835 = vst [vmem:[#allocation108_spill] sm:$0xff] %v5588_v12  ;;  %8838 = vst [vmem:[#allocation109_spill] sm:$0xff] %v5598_v7  ;;  %v705_v62 = vmul.f32 %v8840_v44, %v4589_v27  ;;  %v8841_v34 = vmov %v8840_v44  ;;  %v2169_v30 = vrot.slane %v5579_v48, 3  ;;  %v5622_v37 = vmul.f32 %v2180_v8, %v4572_v14  ;;  %2154 = vrot.lane.b32.xlu0 %v2153_v38, %s8836_s19  ;;  %s6187_s14 = sld [smem:[#allocation2 + $0xa4]] }
 0x1f6   : > { %v5610_v55 = vmul.f32 %v8841_v34, %v4597_v31  ;;  %v2197_v19 = vstv %s5539_s15  ;;  %v748_v18 = vrot.slane %v744_v3, 1  ;;  %v8845_v34 = vstv %s5272_s0  ;;  %v5645_v39 = vpop.permute.xlu1 %1506  ;;  %v5647_v38 = vpop.permute.xlu0 %1521  ;;  %s5655_s0 = sld [smem:[#allocation2 + $0x8b]] }
 0x1f7   : > { %v757_v6 = vmul.f32 %v8845_v34, %v4613_v45  ;;  %v8846_v42 = vmov %v8845_v34  ;;  %v2168_v5 = vrot.slane %v2164_v26, 3  ;;  %v2181_v44 = vmul.f32 %v2180_v8, %v4566_v9  ;;  %8850 = vst [vmem:[#allocation115_spill] sm:$0xff] %v5645_v39  ;;  %8851 = vst [vmem:[#allocation116_spill] sm:$0xff] %v5647_v38  ;;  %s6212_s15 = sld [smem:[#allocation2 + $0x71]] }
 0x1f8   : > { %8842 = vst [vmem:[#allocation110_spill] sm:$0xff] %v5610_v55  ;;  %v5632_v24 = vmul.f32 %v8846_v42, %v4621_v50  ;;  %v8848_v3 = vrot.slane %v5547_v28, 1  ;;  %v709_v42 = vrot.slane %v705_v62, 1  ;;  %v2198_v48 = vmul.f32 %v2197_v19, %v4589_v27  ;;  %2156 = vrot.lane.b32.xlu1 %v2152_v52, %s8836_s19 }
 0x1f9   : > { %v657_v4 = vrot.slane %v653_v16, 1  ;;  %v2170_v26 = vsel %vm1773_vm4, %v2168_v5, %v2169_v30  ;;  %v2186_v8 = vrot.slane %v5622_v37, 3  ;;  %v5653_v28 = vmul.f32 %v2197_v19, %v4597_v31 }
 0x1fa   : > { %8847 = vst [vmem:[#allocation113_spill] sm:$0xff] %v5632_v24  ;;  %v5642_v34 = vsel %vm643_vm2, %v644_v53, %v8848_v3  ;;  %v761_v53 = vrot.slane %v757_v6, 1  ;;  %v8852_v3 = vstv %s5236_s4  ;;  %2171 = vrot.lane.b32.xlu0 %v2170_v26, %s8836_s19  ;;  %v2214_v5 = vstv %s5592_s21  ;;  %v5689_v38 = vpop.permute.xlu1 %1523  ;;  %s6240_s21 = sld [smem:[#allocation2 + $0x75]] }
 0x1fb   : > { %8849 = vst [vmem:[#allocation114_spill] sm:$0xff] %v5642_v34  ;;  %v5661_v60 = vmul.f32 %v8852_v3, %v4572_v14  ;;  %v8854_v16 = vrot.slane %v5574_v17, 1  ;;  %v8856_v37 = vrot.slane %v5588_v12, 1  ;;  %v8858_v62 = vrot.slane %v5598_v7, 1  ;;  %8863 = vst [vmem:[#allocation122_spill] sm:$0xff] %v5689_v38 }
 0x1fc   : > { %v2185_v52 = vrot.slane %v2181_v44, 3  ;;  %v8860_v26 = vrot.slane %v5610_v55, 1  ;;  %2173 = vrot.lane.b32.xlu1 %v2169_v30, %s8836_s19  ;;  %v2248_v7 = vstv %s5655_s0  ;;  %s6258_s0 = sld [smem:[#allocation2 + $0x73]] }
 0x1fd   : > { %8853 = vst [vmem:[#allocation117_spill] sm:$0xff] %v5661_v60  ;;  %v5669_v19 = vsel %vm643_vm2, %v696_v43, %v8854_v16  ;;  %v5674_v6 = vsel %vm643_vm2, %v748_v18, %v8856_v37  ;;  %v5679_v3 = vsel %vm643_vm2, %v657_v4, %v8858_v62  ;;  %v8862_v43 = vstv %s5236_s4  ;;  %v5691_v18 = vpop.permute.xlu0 %1538  ;;  %s5899_s4 = sld [smem:[#allocation2 + $0x52]] }
 0x1fe   : > { %8855 = vst [vmem:[#allocation118_spill] sm:$0xff] %v5669_v19  ;;  %8857 = vst [vmem:[#allocation119_spill] sm:$0xff] %v5674_v6  ;;  %v5684_v39 = vsel %vm643_vm2, %v709_v42, %v8860_v26  ;;  %v666_v16 = vmul.f32 %v8862_v43, %v4566_v9  ;;  %v2202_v37 = vrot.slane %v2198_v48, 3  ;;  %v2231_v4 = vstv %s5617_s17  ;;  %v5737_v55 = vpop.permute.xlu1 %1540  ;;  %s6251_s17 = sld [smem:[#allocation2 + $0x72]] }
 0x1ff   : > { %8859 = vst [vmem:[#allocation120_spill] sm:$0xff] %v5679_v3  ;;  %8861 = vst [vmem:[#allocation121_spill] sm:$0xff] %v5684_v39  ;;  %v2187_v44 = vsel %vm1773_vm4, %v2185_v52, %v2186_v8  ;;  %v2203_v62 = vrot.slane %v5653_v28, 3  ;;  %v2215_v42 = vmul.f32 %v2214_v5, %v4589_v27  ;;  %v5698_v26 = vmul.f32 %v2214_v5, %v4597_v31 }
 0x200   : > { %8864 = vst [vmem:[#allocation123_spill] sm:$0xff] %v5691_v18  ;;  %v8866_v43 = vrot.slane %v5632_v24, 1  ;;  %v8868_v48 = vstv %s5252_s16  ;;  %2188 = vrot.lane.b32.xlu0 %v2187_v44, %s8836_s19  ;;  %v8871_v28 = vstv %s5291_s12  ;;  %v670_v30 = vrot.slane %v666_v16, 1  ;;  %8878 = vst [vmem:[#allocation128_spill] sm:$0xff] %v5737_v55  ;;  %s5748_s12 = sld [smem:[#allocation2 + $0x8d]]  ;;  %2190 = vrot.lane.b32.xlu1 %v2186_v8, %s8836_s19 }
 0x201   : > { %v718_v12 = vmul.f32 %v8868_v48, %v4589_v27  ;;  %v8869_v52 = vmov %v8868_v48  ;;  %v8872_v5 = vmov %v8871_v28  ;;  %v8874_v48 = vstv %s8865_s23  ;;  %v5739_v39 = vpop.permute.xlu0 %1555  ;;  %s6035_s16 = sld [smem:[#allocation2 + $0x9f]] }
 0x202   : > { %v5703_v38 = vsel %vm643_vm2, %v761_v53, %v8866_v43  ;;  %v5712_v6 = vmul.f32 %v8869_v52, %v4597_v31  ;;  %v770_v53 = vmul.f32 %v8871_v28, %v4613_v45  ;;  %v5724_v43 = vmul.f32 %v8872_v5, %v4621_v50  ;;  %8879 = vst [vmem:[#allocation129_spill] sm:$0xff] %v5739_v39  ;;  %v5768_v39 = vpop.permute.xlu1 %1557  ;;  %s6277_s23 = sld [smem:[#allocation2 + $0xa6]] }
 0x203   : > { %8867 = vst [vmem:[#allocation124_spill] sm:$0xff] %v5703_v38  ;;  %v679_v18 = vmul.f32 %v8874_v48, %v4566_v9  ;;  %v8875_v52 = vmov %v8874_v48  ;;  %v8877_v44 = vstv %s5261_s22  ;;  %v2232_v28 = vmul.f32 %v2231_v4, %v4589_v27  ;;  %8885 = vst [vmem:[#allocation132_spill] sm:$0xff] %v5768_v39 }
 0x204   : > { %8870 = vst [vmem:[#allocation125_spill] sm:$0xff] %v5712_v6  ;;  %8873 = vst [vmem:[#allocation126_spill] sm:$0xff] %v5724_v43  ;;  %v5732_v24 = vmul.f32 %v8875_v52, %v4572_v14  ;;  %v731_v38 = vmul.f32 %v8877_v44, %v4589_v27  ;;  %v5743_v5 = vmul.f32 %v2231_v4, %v4597_v31  ;;  %v2219_v17 = vrot.slane %v2215_v42, 3 }
 0x205   : > { %v2204_v48 = vsel %vm1773_vm4, %v2202_v37, %v2203_v62  ;;  %v2220_v52 = vrot.slane %v5698_v26, 3  ;;  %v8880_v16 = vrot.slane %v5661_v60, 1  ;;  %v722_v55 = vrot.slane %v718_v12, 1  ;;  %2207 = vrot.lane.b32.xlu1 %v2203_v62, %s8836_s19 }
 0x206   : > { %8876 = vst [vmem:[#allocation127_spill] sm:$0xff] %v5732_v24  ;;  %v8882_v4 = vstv %s5261_s22  ;;  %2205 = vrot.lane.b32.xlu0 %v2204_v48, %s8836_s19  ;;  %v774_v37 = vrot.slane %v770_v53, 1  ;;  %v683_v26 = vrot.slane %v679_v18, 1  ;;  %v8884_v12 = vstv %s5311_s3  ;;  %s5795_s3 = sld [smem:[#allocation2 + $0x8e]] }
 0x207   : > { %v5753_v44 = vsel %vm643_vm2, %v670_v30, %v8880_v16  ;;  %v5759_v19 = vmul.f32 %v8882_v4, %v4597_v31  ;;  %v783_v16 = vmul.f32 %v8884_v12, %v4613_v45  ;;  %v5770_v4 = vpop.permute.xlu0 %1572  ;;  %v2236_v60 = vrot.slane %v2232_v28, 3  ;;  %s6055_s22 = sld [smem:[#allocation2 + $0x6c]] }
 0x208   : > { %8881 = vst [vmem:[#allocation130_spill] sm:$0xff] %v5753_v44  ;;  %8886 = vst [vmem:[#allocation133_spill] sm:$0xff] %v5770_v4  ;;  %v2237_v8 = vrot.slane %v5743_v5, 3  ;;  %v2249_v53 = vmul.f32 %v2248_v7, %v4589_v27  ;;  %v735_v48 = vrot.slane %v731_v38, 1  ;;  %v8887_v42 = vmov %v8884_v12 }
 0x209   : > { %8883 = vst [vmem:[#allocation131_spill] sm:$0xff] %v5759_v19  ;;  %v5777_v18 = vmul.f32 %v8887_v42, %v4621_v50  ;;  %v2221_v30 = vsel %vm1773_vm4, %v2219_v17, %v2220_v52  ;;  %v5781_v12 = vmul.f32 %v2248_v7, %v4597_v31  ;;  %v8889_v28 = vstv %s5279_s2  ;;  %2224 = vrot.lane.b32.xlu1 %v2220_v52, %s8836_s19 }
 0x20a   : > { %v5787_v4 = vmul.f32 %v8889_v28, %v4572_v14  ;;  %v8891_v5 = vstv %s5332_s24  ;;  %2222 = vrot.lane.b32.xlu0 %v2221_v30, %s8836_s19  ;;  %v2265_v38 = vstv %s5716_s25  ;;  %v8892_v17 = vrot.slane %v5712_v6, 1  ;;  %s6288_s25 = sld [smem:[#allocation2 + $0x76]] }
 0x20b   : > { %8888 = vst [vmem:[#allocation134_spill] sm:$0xff] %v5777_v18  ;;  %v1257_v44 = vmul.f32 %v8891_v5, %v4589_v27  ;;  %v8894_v42 = vrot.slane %v5724_v43, 1  ;;  %v8896_v5 = vrot.slane %v5732_v24, 1  ;;  %v8898_v30 = vstv %s5332_s24  ;;  %s6066_s24 = sld [smem:[#allocation2 + $0x6d]] }
 0x20c   : > { %8890 = vst [vmem:[#allocation135_spill] sm:$0xff] %v5787_v4  ;;  %v5800_v7 = vsel %vm643_vm2, %v722_v55, %v8892_v17  ;;  %v5815_v39 = vmul.f32 %v8898_v30, %v4597_v31  ;;  %v787_v3 = vrot.slane %v783_v16, 1  ;;  %v8900_v6 = vstv %s5279_s2  ;;  %v5820_v55 = vpop.permute.xlu1 %1574  ;;  %v5822_v17 = vpop.permute.xlu0 %1589  ;;  %s5840_s2 = sld [smem:[#allocation2 + $0x8f]] }
 0x20d   : > { %8893 = vst [vmem:[#allocation136_spill] sm:$0xff] %v5800_v7  ;;  %v5805_v28 = vsel %vm643_vm2, %v774_v37, %v8894_v42  ;;  %v5810_v62 = vsel %vm643_vm2, %v683_v26, %v8896_v5  ;;  %v1204_v34 = vmul.f32 %v8900_v6, %v4566_v9  ;;  %8901 = vst [vmem:[#allocation140_spill] sm:$0xff] %v5820_v55  ;;  %v2253_v42 = vrot.slane %v2249_v53, 3 }
 0x20e   : > { %8895 = vst [vmem:[#allocation137_spill] sm:$0xff] %v5805_v28  ;;  %8897 = vst [vmem:[#allocation138_spill] sm:$0xff] %v5810_v62  ;;  %v2238_v37 = vsel %vm1773_vm4, %v2236_v60, %v2237_v8  ;;  %v2254_v26 = vrot.slane %v5781_v12, 3  ;;  %v2266_v5 = vmul.f32 %v2265_v38, %v4613_v45  ;;  %v5828_v16 = vmul.f32 %v2265_v38, %v4621_v50 }
 0x20f   : > { %8899 = vst [vmem:[#allocation139_spill] sm:$0xff] %v5815_v39  ;;  %8903 = vst [vmem:[#allocation141_spill] sm:$0xff] %v5822_v17  ;;  %v2282_v30 = vstv %s5748_s12  ;;  %v8905_v6 = vrot.slane %v5759_v19, 1  ;;  %v1261_v53 = vrot.slane %v1257_v44, 2  ;;  %2239 = vrot.lane.b32.xlu0 %v2238_v37, %s8836_s19  ;;  %v8907_v38 = vstv %s8902_s26  ;;  %2241 = vrot.lane.b32.xlu1 %v2237_v8, %s8836_s19  ;;  %s6299_s12 = sld [smem:[#allocation2 + $0xa7]] }
 0x210   : > { %v5846_v19 = vmul.f32 %v8907_v38, %v4572_v14  ;;  %v1209_v52 = vrot.slane %v1204_v34, 2  ;;  %v8912_v44 = vstv %s8904_s27  ;;  %v5861_v43 = vpop.permute.xlu1 %1591  ;;  %v5863_v12 = vpop.permute.xlu0 %1606  ;;  %v2283_v38 = vmul.f32 %v2282_v30, %v4613_v45 }
 0x211   : > { %v5834_v55 = vsel %vm643_vm2, %v735_v48, %v8905_v6  ;;  %v8909_v48 = vstv %s5359_s30  ;;  %v5859_v37 = vmul.f32 %v8912_v44, %v4572_v14  ;;  %8914 = vst [vmem:[#allocation146_spill] sm:$0xff] %v5861_v43  ;;  %8915 = vst [vmem:[#allocation147_spill] sm:$0xff] %v5863_v12  ;;  %v5867_v28 = vmul.f32 %v2282_v30, %v4621_v50  ;;  %s5890_s30 = sld [smem:[#allocation2 + $0x9c]] }
 0x212   : > { %8906 = vst [vmem:[#allocation142_spill] sm:$0xff] %v5834_v55  ;;  %8908 = vst [vmem:[#allocation143_spill] sm:$0xff] %v5846_v19  ;;  %v1270_v6 = vmul.f32 %v8909_v48, %v4589_v27  ;;  %v8910_v17 = vmov %v8909_v48  ;;  %v8916_v48 = vstv %s8902_s26  ;;  %v2270_v34 = vrot.slane %v2266_v5, 3  ;;  %s6376_s26 = sld [smem:[#allocation2 + $0xa8]] }
 0x213   : > { %v5854_v60 = vmul.f32 %v8910_v17, %v4597_v31  ;;  %8913 = vst [vmem:[#allocation145_spill] sm:$0xff] %v5859_v37  ;;  %v1218_v24 = vmul.f32 %v8916_v48, %v4566_v9  ;;  %v2255_v17 = vsel %vm1773_vm4, %v2253_v42, %v2254_v26  ;;  %v2271_v55 = vrot.slane %v5828_v16, 3  ;;  %2258 = vrot.lane.b32.xlu1 %v2254_v26, %s8836_s19 }
 0x214   : > { %v8917_v44 = vrot.slane %v5777_v18, 1  ;;  %v8918_v12 = vrot.slane %v5787_v4, 2  ;;  %v8920_v30 = vstv %s8904_s27  ;;  %2256 = vrot.lane.b32.xlu0 %v2255_v17, %s8836_s19  ;;  %v2299_v42 = vstv %s5795_s3  ;;  %s6335_s3 = sld [smem:[#allocation2 + $0x77]] }
 0x215   : > { %8911 = vst [vmem:[#allocation144_spill] sm:$0xff] %v5854_v60  ;;  %v1231_v62 = vmul.f32 %v8920_v30, %v4566_v9  ;;  %v8921_v5 = vrot.slane %v5815_v39, 2  ;;  %v8923_v48 = vstv %s5376_s20  ;;  %v2288_v30 = vrot.slane %v5867_v28, 3  ;;  %s6388_s27 = sld [smem:[#allocation2 + $0xa9]] }
 0x216   : > { %v5877_v43 = vsel %vm643_vm2, %v787_v3, %v8917_v44  ;;  %v5882_v7 = vsel %vm1208_vm3, %v1209_v52, %v8918_v12  ;;  %v1274_v12 = vrot.slane %v1270_v6, 2  ;;  %v1283_v17 = vmul.f32 %v8923_v48, %v4589_v27  ;;  %v5909_v44 = vpop.permute.xlu0 %1623 }
 0x217   : > { %8919 = vst [vmem:[#allocation148_spill] sm:$0xff] %v5882_v7  ;;  %v5895_v3 = vsel %vm1208_vm3, %v1261_v53, %v8921_v5  ;;  %v5907_v53 = vpop.permute.xlu1 %1608  ;;  %8925 = vst [vmem:[#allocation151_spill] sm:$0xff] %v5909_v44  ;;  %v2287_v6 = vrot.slane %v2283_v38, 3  ;;  %v1222_v5 = vrot.slane %v1218_v24, 2  ;;  %v2272_v52 = vsel %vm1773_vm4, %v2270_v34, %v2271_v55  ;;  %2275 = vrot.lane.b32.xlu1 %v2271_v55, %s8836_s19 }
 0x218   : > { %8922 = vst [vmem:[#allocation149_spill] sm:$0xff] %v5895_v3  ;;  %8924 = vst [vmem:[#allocation150_spill] sm:$0xff] %v5907_v53  ;;  %v2300_v8 = vmul.f32 %v2299_v42, %v4613_v45  ;;  %v5915_v16 = vmul.f32 %v2299_v42, %v4621_v50  ;;  %v1235_v48 = vrot.slane %v1231_v62, 2  ;;  %v8926_v39 = vstv %s5376_s20  ;;  %2273 = vrot.lane.b32.xlu0 %v2272_v52, %s8836_s19  ;;  %s6052_s20 = sld [smem:[#allocation2 + $0xa0]] }
 0x219   : > { %v5920_v4 = vmul.f32 %v8926_v39, %v4597_v31  ;;  %v8928_v53 = vstv %s5324_s8  ;;  %v2316_v24 = vstv %s5840_s2  ;;  %v8929_v28 = vrot.slane %v5846_v19, 2  ;;  %s5982_s8 = sld [smem:[#allocation2 + $0x9e]] }
 0x21a   : > { %v1244_v44 = vmul.f32 %v8928_v53, %v4566_v9  ;;  %v8931_v34 = vmov %v8928_v53  ;;  %v8932_v39 = vstv %s5392_s13  ;;  %v8935_v52 = vrot.slane %v5854_v60, 2  ;;  %v5958_v3 = vpop.permute.xlu0 %1640  ;;  %s5961_s13 = sld [smem:[#allocation2 + $0x9d]] }
 0x21b   : > { %8927 = vst [vmem:[#allocation152_spill] sm:$0xff] %v5920_v4  ;;  %v5931_v38 = vsel %vm1208_vm3, %v1222_v5, %v8929_v28  ;;  %v5936_v62 = vmul.f32 %v8931_v34, %v4572_v14  ;;  %v1296_v42 = vmul.f32 %v8932_v39, %v4589_v27  ;;  %v8933_v53 = vmov %v8932_v39  ;;  %8940 = vst [vmem:[#allocation158_spill] sm:$0xff] %v5958_v3  ;;  %s6411_s2 = sld [smem:[#allocation2 + $0xaa]] }
 0x21c   : > { %8930 = vst [vmem:[#allocation153_spill] sm:$0xff] %v5931_v38  ;;  %v5944_v26 = vmul.f32 %v8933_v53, %v4597_v31  ;;  %v5949_v19 = vsel %vm1208_vm3, %v1274_v12, %v8935_v52  ;;  %v8937_v5 = vrot.slane %v5859_v37, 2  ;;  %v1287_v34 = vrot.slane %v1283_v17, 2  ;;  %v5956_v38 = vpop.permute.xlu1 %1625  ;;  %2292 = vrot.lane.b32.xlu1 %v2288_v30, %s8836_s19 }
 0x21d   : > { %8936 = vst [vmem:[#allocation155_spill] sm:$0xff] %v5949_v19  ;;  %8939 = vst [vmem:[#allocation157_spill] sm:$0xff] %v5956_v38  ;;  %v2289_v39 = vsel %vm1773_vm4, %v2287_v6, %v2288_v30  ;;  %v2304_v53 = vrot.slane %v2300_v8, 3  ;;  %v2305_v12 = vrot.slane %v5915_v16, 3  ;;  %v2317_v52 = vmul.f32 %v2316_v24, %v4613_v45 }
 0x21e   : > { %8934 = vst [vmem:[#allocation154_spill] sm:$0xff] %v5944_v26  ;;  %v5954_v28 = vsel %vm1208_vm3, %v1235_v48, %v8937_v5  ;;  %v5966_v48 = vmul.f32 %v2316_v24, %v4621_v50  ;;  %v1248_v5 = vrot.slane %v1244_v44, 2  ;;  %v8941_v38 = vstv %s5433_s5  ;;  %2290 = vrot.lane.b32.xlu0 %v2289_v39, %s8836_s19  ;;  %v5995_v55 = vpop.permute.xlu0 %1657  ;;  %s6119_s5 = sld [smem:[#allocation2 + $0xa2]] }
 0x21f   : > { %8938 = vst [vmem:[#allocation156_spill] sm:$0xff] %v5954_v28  ;;  %v1309_v6 = vmul.f32 %v8941_v38, %v4613_v45  ;;  %v8942_v3 = vmov %v8941_v38  ;;  %v1300_v8 = vrot.slane %v1296_v42, 2  ;;  %v1334_v60 = vstv %s5899_s4  ;;  %8947 = vst [vmem:[#allocation161_spill] sm:$0xff] %v5995_v55  ;;  %s6462_s4 = sld [smem:[#allocation2 + $0xac]] }
 0x220   : > { %v5975_v37 = vmul.f32 %v8942_v3, %v4621_v50  ;;  %v8943_v44 = vstv %s5468_s7  ;;  %v1347_v3 = vstv %s5905_s10  ;;  %v5993_v28 = vpop.permute.xlu1 %1642  ;;  %v2490_v39 = vstv %s5890_s30  ;;  %2309 = vrot.lane.b32.xlu1 %v2305_v12, %s8836_s19  ;;  %s6147_s7 = sld [smem:[#allocation2 + $0x70]] }
 0x221   : > { %v1322_v17 = vmul.f32 %v8943_v44, %v4613_v45  ;;  %v8944_v38 = vmov %v8943_v44  ;;  %8946 = vst [vmem:[#allocation160_spill] sm:$0xff] %v5993_v28  ;;  %v2306_v42 = vsel %vm1773_vm4, %v2304_v53, %v2305_v12  ;;  %v2321_v16 = vrot.slane %v2317_v52, 3  ;;  %s6436_s30 = sld [smem:[#allocation2 + $0xab]] }
 0x222   : > { %v5990_v19 = vmul.f32 %v8944_v38, %v4621_v50  ;;  %v2322_v24 = vrot.slane %v5966_v48, 3  ;;  %v6001_v7 = vmul.f32 %v2490_v39, %v4572_v14  ;;  %v8948_v44 = vrot.slane %v5920_v4, 2  ;;  %2307 = vrot.lane.b32.xlu0 %v2306_v42, %s8836_s19  ;;  %s6478_s10 = sld [smem:[#allocation2 + $0xad]] }
 0x223   : > { %v1313_v18 = vrot.slane %v1309_v6, 2  ;;  %v1335_v55 = vmul.f32 %v1334_v60, %v4613_v45  ;;  %v8949_v53 = vrot.slane %v5936_v62, 2  ;;  %v8950_v48 = vrot.slane %v5944_v26, 2 }
 0x224   : > { %8945 = vst [vmem:[#allocation159_spill] sm:$0xff] %v5990_v19  ;;  %v6006_v38 = vsel %vm1208_vm3, %v1287_v34, %v8948_v44  ;;  %v6023_v34 = vmul.f32 %v1334_v60, %v4621_v50  ;;  %v2491_v6 = vmul.f32 %v2490_v39, %v4566_v9  ;;  %v1326_v44 = vrot.slane %v1322_v17, 2  ;;  %v6030_v28 = vpop.permute.xlu1 %1659  ;;  %2326 = vrot.lane.b32.xlu1 %v2322_v24, %s8836_s19 }
 0x225   : > { %v6015_v52 = vsel %vm1208_vm3, %v1248_v5, %v8949_v53  ;;  %v6020_v4 = vsel %vm1208_vm3, %v1300_v8, %v8950_v48  ;;  %v1348_v30 = vmul.f32 %v1347_v3, %v4613_v45  ;;  %v6028_v42 = vmul.f32 %v1347_v3, %v4621_v50  ;;  %8953 = vst [vmem:[#allocation164_spill] sm:$0xff] %v6030_v28  ;;  %v6032_v5 = vpop.permute.xlu0 %1674 }
 0x226   : > { %8951 = vst [vmem:[#allocation162_spill] sm:$0xff] %v6023_v34  ;;  %8954 = vst [vmem:[#allocation165_spill] sm:$0xff] %v6032_v5  ;;  %v2507_v53 = vstv %s5961_s13  ;;  %v8636_v8 = vrot.slane %v5990_v19, 2  ;;  %v2323_v60 = vsel %vm1773_vm4, %v2321_v16, %v2322_v24  ;;  %v2496_v39 = vrot.slane %v6001_v7, 4  ;;  %s6504_s13 = sld [smem:[#allocation2 + $0xae]] }
 0x227   : > { %8952 = vst [vmem:[#allocation163_spill] sm:$0xff] %v6028_v42  ;;  %v6041_v17 = vmul.f32 %v2507_v53, %v4572_v14  ;;  %v313_v3 = vadd.f32 %v4715_v15, %v5460_v13  ;;  %v8955_v48 = vrot.slane %v5975_v37, 2  ;;  %v1339_v5 = vrot.slane %v1335_v55, 2  ;;  %2324 = vrot.lane.b32.xlu0 %v2323_v60, %s8836_s19 }
 0x228   : > { %v2495_v16 = vrot.slane %v2491_v6, 4  ;;  %v2508_v15 = vmul.f32 %v2507_v53, %v4566_v9  ;;  %v2524_v13 = vstv %s5982_s8  ;;  %v6062_v12 = vpop.permute.xlu1 %1676  ;;  %v327_v6 = vadd.f32 %v4726_v23, %v5472_v56  ;;  %2500 = vrot.lane.b32.xlu1 %v2496_v39, %s8782_s1  ;;  %s6509_s8 = sld [smem:[#allocation2 + $0xaf]] }
 0x229   : > { %v6048_v28 = vsel %vm1208_vm3, %v1313_v18, %v8955_v48  ;;  %v314_v18 = vadd.f32 %v4724_v22, %v5462_v61  ;;  %v1352_v48 = vrot.slane %v1348_v30, 2  ;;  %8956 = vst [vmem:[#allocation166_spill] sm:$0xff] %v6062_v12  ;;  %v6064_v60 = vpop.permute.xlu0 %1691  ;;  %v6069_v7 = vmul.f32 %v2524_v13, %v4572_v14  ;;  %v8985_v12 = vld [vmem:[#allocation15_spill] sm:$0xff] }
 0x22a   : > { %v6076_v53 = vsel %vm1208_vm3, %v1326_v44, %v8636_v8  ;;  %v2497_v22 = vsel %vm2338_vm5, %v2495_v16, %v2496_v39  ;;  %v2513_v61 = vrot.slane %v6041_v17, 4  ;;  %v328_v30 = vadd.f32 %v4735_v32, %v5515_v54 }
 0x22b   : > { %v341_v55 = vadd.f32 %v4737_v33, %v5552_v29  ;;  %2498 = vrot.lane.b32.xlu0 %v2497_v22, %s8782_s1  ;;  %v2525_v23 = vmul.f32 %v2524_v13, %v4566_v9  ;;  %v342_v56 = vadd.f32 %v4745_v40, %v5560_v63  ;;  %v355_v44 = vadd.f32 %v4747_v41, %v5562_v25 }
 0x22c   : > { %v8957_v17 = vrot.slane %v6023_v34, 2  ;;  %v2512_v32 = vrot.slane %v2508_v15, 4  ;;  %v356_v33 = vadd.f32 %v4755_v49, %v5564_v0  ;;  %v8958_v54 = vrot.slane %v6028_v42, 2  ;;  %v6105_v24 = vpop.permute.xlu1 %1693  ;;  %2517 = vrot.lane.b32.xlu1 %v2513_v61, %s8782_s1 }
 0x22d   : > { %8959 = vst [vmem:[#allocation167_spill] sm:$0xff] %v6105_v24  ;;  %v6107_v40 = vpop.permute.xlu0 %1708  ;;  %v2530_v41 = vrot.slane %v6069_v7, 4  ;;  %v2541_v63 = vstv %s6035_s16  ;;  %v369_v25 = vadd.f32 %v4757_v51, %v313_v3  ;;  %v370_v49 = vadd.f32 %v4764_v57, %v314_v18  ;;  %s6553_s16 = sld [smem:[#allocation2 + $0xb0]] }
 0x22e   : > { %v6096_v16 = vsel %vm1208_vm3, %v1339_v5, %v8957_v17  ;;  %v6103_v29 = vsel %vm1208_vm3, %v1352_v48, %v8958_v54  ;;  %8960 = vst [vmem:[#allocation168_spill] sm:$0xff] %v6107_v40  ;;  %v2514_v0 = vsel %vm2338_vm5, %v2512_v32, %v2513_v61  ;;  %v6117_v5 = vmul.f32 %v2541_v63, %v4572_v14  ;;  %v9221_v40 = vld [vmem:[#allocation66_spill] sm:$0xff] }
 0x22f   : > { %v383_v15 = vadd.f32 %v4766_v58, %v327_v6  ;;  %v384_v7 = vadd.f32 %v4773_v1, %v328_v30  ;;  %2515 = vrot.lane.b32.xlu0 %v2514_v0, %s8782_s1  ;;  %v2529_v13 = vrot.slane %v2525_v23, 4  ;;  %v2558_v51 = vstv %s6052_s20  ;;  %s6571_s20 = sld [smem:[#allocation2 + $0xb1]] }
 0x230   : > { %v397_v57 = vadd.f32 %v4775_v2, %v341_v55  ;;  %v398_v3 = vadd.f32 %v4786_v10, %v342_v56  ;;  %v1768_v18 = vstv %s6055_s22  ;;  %v2542_v48 = vmul.f32 %v2541_v63, %v4566_v9  ;;  %v6134_v1 = vpop.permute.xlu1 %1710  ;;  %2534 = vrot.lane.b32.xlu1 %v2530_v41, %s8782_s1  ;;  %s6582_s22 = sld [smem:[#allocation2 + $0xb2]] }
 0x231   : > { %v411_v22 = vadd.f32 %v4788_v11, %v355_v44  ;;  %v6132_v58 = vadd.f32 %v4797_v20, %v356_v33  ;;  %8961 = vst [vmem:[#allocation169_spill] sm:$0xff] %v6134_v1  ;;  %v1782_v39 = vstv %s6066_s24  ;;  %v6137_v6 = vpop.permute.xlu0 %1725  ;;  %v2531_v30 = vsel %vm2338_vm5, %v2529_v13, %v2530_v41  ;;  %s6598_s24 = sld [smem:[#allocation2 + $0xb3]] }
 0x232   : > { %8962 = vst [vmem:[#allocation170_spill] sm:$0xff] %v6137_v6  ;;  %v2547_v2 = vrot.slane %v6117_v5, 4  ;;  %v2559_v10 = vmul.f32 %v2558_v51, %v4589_v27  ;;  %v6145_v55 = vmul.f32 %v2558_v51, %v4597_v31  ;;  %v2575_v11 = vstv %s6080_s28  ;;  %s6613_s28 = sld [smem:[#allocation2 + $0xc0]] }
 0x233   : > { %v6151_v20 = vadd.f32 %v4799_v21, %v369_v25  ;;  %v1769_v23 = vmul.f32 %v1768_v18, %v4566_v9  ;;  %v6155_v56 = vmul.f32 %v1768_v18, %v4572_v14  ;;  %2532 = vrot.lane.b32.xlu0 %v2531_v30, %s8782_s1  ;;  %v6162_v44 = vadd.f32 %v4810_v35, %v370_v49 }
 0x234   : > { %v6165_v17 = vadd.f32 %v4812_v36, %v383_v15  ;;  %v6168_v21 = vmul.f32 %v1782_v39, %v4566_v9  ;;  %v2546_v32 = vrot.slane %v2542_v48, 4  ;;  %v6173_v33 = vadd.f32 %v4822_v46, %v384_v7  ;;  %v6175_v61 = vpop.permute.xlu1 %1727  ;;  %2551 = vrot.lane.b32.xlu1 %v2547_v2, %s8782_s1 }
 0x235   : > { %8963 = vst [vmem:[#allocation171_spill] sm:$0xff] %v6155_v56  ;;  %8964 = vst [vmem:[#allocation172_spill] sm:$0xff] %v6175_v61  ;;  %v1795_v54 = vstv %s6110_s6  ;;  %v6178_v63 = vpop.permute.xlu0 %1742  ;;  %v2576_v35 = vmul.f32 %v2575_v11, %v4589_v27  ;;  %v6182_v25 = vmul.f32 %v2575_v11, %v4597_v31  ;;  %v2563_v49 = vrot.slane %v2559_v10, 4  ;;  %s6619_s6 = sld [smem:[#allocation2 + $0x90]] }
 0x236   : > { %8965 = vst [vmem:[#allocation173_spill] sm:$0xff] %v6178_v63  ;;  %v2548_v36 = vsel %vm2338_vm5, %v2546_v32, %v2547_v2  ;;  %v2564_v0 = vrot.slane %v6145_v55, 4  ;;  %v2592_v5 = vstv %s6119_s5  ;;  %v6190_v46 = vadd.f32 %v4824_v47, %v397_v57  ;;  %s6646_s5 = sld [smem:[#allocation2 + $0xc1]] }
 0x237   : > { %v1774_v15 = vrot.slane %v1769_v23, 3  ;;  %v8635_v7 = vrot.slane %v6155_v56, 3  ;;  %v6194_v13 = vmul.f32 %v1782_v39, %v4572_v14  ;;  %2549 = vrot.lane.b32.xlu0 %v2548_v36, %s8782_s1  ;;  %v6199_v51 = vadd.f32 %v4834_v59, %v398_v3  ;;  %v8969_v3 = vld [vmem:[#allocation11_spill] sm:$0xff] }
 0x238   : > { %v1787_v18 = vrot.slane %v6168_v21, 3  ;;  %v1796_v48 = vmul.f32 %v1795_v54, %v4566_v9  ;;  %v6204_v47 = vmul.f32 %v1795_v54, %v4572_v14  ;;  %v6206_v57 = vpop.permute.xlu1 %1744  ;;  %v1808_v39 = vstv %s6140_s29  ;;  %2568 = vrot.lane.b32.xlu1 %v2564_v0, %s8782_s1  ;;  %s6672_s29 = sld [smem:[#allocation2 + $0x91]] }
 0x239   : > { %8966 = vst [vmem:[#allocation174_spill] sm:$0xff] %v6194_v13  ;;  %8968 = vst [vmem:[#allocation176_spill] sm:$0xff] %v6206_v57  ;;  %v6209_v30 = vpop.permute.xlu0 %1759  ;;  %v2580_v10 = vrot.slane %v2576_v35, 4  ;;  %v2581_v41 = vrot.slane %v6182_v25, 4  ;;  %v2593_v59 = vmul.f32 %v2592_v5, %v4589_v27  ;;  %v6216_v55 = vadd.f32 %v8969_v3, %v411_v22 }
 0x23a   : > { %8967 = vst [vmem:[#allocation175_spill] sm:$0xff] %v6204_v47  ;;  %v2565_v11 = vsel %vm2338_vm5, %v2563_v49, %v2564_v0  ;;  %v1821_v23 = vstv %s6147_s7  ;;  %v6221_v21 = vmul.f32 %v2592_v5, %v4597_v31  ;;  %v6226_v32 = vsel %vm1773_vm4, %v1774_v15, %v8635_v7  ;;  %s6693_s7 = sld [smem:[#allocation2 + $0xc2]] }
 0x23b   : > { %8970 = vst [vmem:[#allocation11_spill] sm:$0xff] %v6226_v32  ;;  %v6230_v35 = vmul.f32 %v1808_v39, %v4572_v14  ;;  %2566 = vrot.lane.b32.xlu0 %v2565_v11, %s8782_s1  ;;  %v2609_v22 = vstv %s6159_s9  ;;  %v1800_v25 = vrot.slane %v1796_v48, 3  ;;  %v1809_v49 = vmul.f32 %v1808_v39, %v4566_v9  ;;  %s6711_s9 = sld [smem:[#allocation2 + $0x92]] }
 0x23c   : > { %v1873_v5 = vstv %s6170_s11  ;;  %v6242_v15 = vpop.permute.xlu1 %1761  ;;  %v1822_v3 = vmul.f32 %v1821_v23, %v4589_v27  ;;  %v6246_v2 = vmul.f32 %v1821_v23, %v4597_v31  ;;  %v2582_v7 = vsel %vm2338_vm5, %v2580_v10, %v2581_v41  ;;  %v8975_v23 = vld [vmem:[#allocation12_spill] sm:$0xff]  ;;  %v8976_v10 = vld [vmem:[#allocation13_spill] sm:$0xff]  ;;  %2585 = vrot.lane.b32.xlu1 %v2581_v41, %s8782_s1  ;;  %s6715_s11 = sld [smem:[#allocation2 + $0xc3]] }
 0x23d   : > { %8971 = vst [vmem:[#allocation177_spill] sm:$0xff] %v6230_v35  ;;  %8972 = vst [vmem:[#allocation178_spill] sm:$0xff] %v6242_v15  ;;  %v6248_v11 = vpop.permute.xlu0 %1933  ;;  %v2597_v48 = vrot.slane %v2593_v59, 4  ;;  %v2598_v8 = vrot.slane %v6221_v21, 4  ;;  %v2610_v39 = vmul.f32 %v2609_v22, %v4589_v27  ;;  %v6256_v36 = vmul.f32 %v2609_v22, %v4597_v31 }
 0x23e   : > { %8973 = vst [vmem:[#allocation179_spill] sm:$0xff] %v6246_v2  ;;  %8974 = vst [vmem:[#allocation180_spill] sm:$0xff] %v6248_v11  ;;  %v2626_v54 = vstv %s6187_s14  ;;  %v6263_v57 = vadd.f32 %v8975_v23, %v6132_v58  ;;  %v6267_v59 = vadd.f32 %v8976_v10, %v6151_v20  ;;  %v8977_v56 = vrot.slane %v6194_v13, 3  ;;  %s6724_s14 = sld [smem:[#allocation2 + $0xc4]] }
 0x23f   : > { %2583 = vrot.lane.b32.xlu0 %v2582_v7, %s8782_s1  ;;  %v8979_v58 = vrot.slane %v6204_v47, 3  ;;  %v1813_v20 = vrot.slane %v1809_v49, 3  ;;  %v1874_v10 = vmul.f32 %v1873_v5, %v4613_v45  ;;  %v6286_v13 = vmul.f32 %v1873_v5, %v4621_v50  ;;  %v8988_v49 = vld [vmem:[#allocation16_spill] sm:$0xff] }
 0x240   : > { %v6272_v21 = vsel %vm1773_vm4, %v1787_v18, %v8977_v56  ;;  %v1826_v56 = vrot.slane %v1822_v3, 3  ;;  %v6290_v0 = vpop.permute.xlu1 %1935  ;;  %v1834_v7 = vstv %s6212_s15  ;;  %v2627_v22 = vmul.f32 %v2626_v54, %v4613_v45  ;;  %2602 = vrot.lane.b32.xlu1 %v2598_v8, %s8782_s1  ;;  %s6733_s15 = sld [smem:[#allocation2 + $0x93]] }
 0x241   : > { %8978 = vst [vmem:[#allocation12_spill] sm:$0xff] %v6272_v21  ;;  %v6282_v23 = vsel %vm1773_vm4, %v1800_v25, %v8979_v58  ;;  %8981 = vst [vmem:[#allocation181_spill] sm:$0xff] %v6286_v13  ;;  %v6293_v18 = vpop.permute.xlu0 %1950  ;;  %v6297_v25 = vmul.f32 %v2626_v54, %v4621_v50  ;;  %v2599_v5 = vsel %vm2338_vm5, %v2597_v48, %v2598_v8  ;;  %v2614_v58 = vrot.slane %v2610_v39, 4 }
 0x242   : > { %8980 = vst [vmem:[#allocation13_spill] sm:$0xff] %v6282_v23  ;;  %8982 = vst [vmem:[#allocation182_spill] sm:$0xff] %v6290_v0  ;;  %v2615_v3 = vrot.slane %v6256_v36, 4  ;;  %v8984_v0 = vld [vmem:[#allocation14_spill] sm:$0xff]  ;;  %v6310_v61 = vadd.f32 %v8985_v12, %v6165_v17  ;;  %v8986_v54 = vrot.slane %v6230_v35, 3  ;;  %v2643_v48 = vstv %s6235_s18  ;;  %v8989_v17 = vld [vmem:[#allocation17_spill] sm:$0xff] }
 0x243   : > { %8983 = vst [vmem:[#allocation183_spill] sm:$0xff] %v6293_v18  ;;  %v6306_v47 = vadd.f32 %v8984_v0, %v6162_v44  ;;  %2600 = vrot.lane.b32.xlu0 %v2599_v5, %s8782_s1  ;;  %v1878_v39 = vrot.slane %v1874_v10, 3  ;;  %v1835_v44 = vmul.f32 %v1834_v7, %v4589_v27  ;;  %v1886_v0 = vstv %s6240_s21  ;;  %s6765_s18 = sld [smem:[#allocation2 + $0x94]] }
 0x244   : > { %v6315_v18 = vsel %vm1773_vm4, %v1813_v20, %v8986_v54  ;;  %v6325_v12 = vadd.f32 %v8988_v49, %v6173_v33  ;;  %v6329_v20 = vadd.f32 %v8989_v17, %v6190_v46  ;;  %v6331_v54 = vpop.permute.xlu1 %1952  ;;  %v2631_v10 = vrot.slane %v2627_v22, 4  ;;  %2619 = vrot.lane.b32.xlu1 %v2615_v3, %s8782_s1  ;;  %s6781_s21 = sld [smem:[#allocation2 + $0x98]] }
 0x245   : > { %8987 = vst [vmem:[#allocation14_spill] sm:$0xff] %v6315_v18  ;;  %8990 = vst [vmem:[#allocation15_spill] sm:$0xff] %v6331_v54  ;;  %v6333_v41 = vpop.permute.xlu0 %1967  ;;  %v2632_v5 = vrot.slane %v6297_v25, 4  ;;  %v8992_v36 = vrot.slane %v6246_v2, 3  ;;  %v2616_v46 = vsel %vm2338_vm5, %v2614_v58, %v2615_v3  ;;  %v2644_v49 = vmul.f32 %v2643_v48, %v4613_v45  ;;  %v8996_v58 = vld [vmem:[#allocation18_spill] sm:$0xff] }
 0x246   : > { %8991 = vst [vmem:[#allocation16_spill] sm:$0xff] %v6333_v41  ;;  %v6346_v17 = vmul.f32 %v2643_v48, %v4621_v50  ;;  %v6349_v54 = vmul.f32 %v1834_v7, %v4597_v31  ;;  %v1887_v22 = vmul.f32 %v1886_v0, %v4613_v45  ;;  %v6353_v25 = vmul.f32 %v1886_v0, %v4621_v50 }
 0x247   : > { %v6341_v33 = vsel %vm1773_vm4, %v1826_v56, %v8992_v36  ;;  %2617 = vrot.lane.b32.xlu0 %v2616_v46, %s8782_s1  ;;  %v2660_v56 = vstv %s6277_s23  ;;  %v6360_v36 = vadd.f32 %v8996_v58, %v6199_v51  ;;  %v8997_v48 = vrot.slane %v6286_v13, 3  ;;  %s6838_s23 = sld [smem:[#allocation2 + $0x99]] }
 0x248   : > { %8993 = vst [vmem:[#allocation17_spill] sm:$0xff] %v6341_v33  ;;  %8994 = vst [vmem:[#allocation184_spill] sm:$0xff] %v6349_v54  ;;  %v1839_v7 = vrot.slane %v1835_v44, 3  ;;  %v1847_v41 = vstv %s6251_s17  ;;  %v1899_v35 = vstv %s6288_s25  ;;  %v6369_v1 = vpop.permute.xlu1 %1969  ;;  %v1860_v0 = vstv %s6258_s0  ;;  %2636 = vrot.lane.b32.xlu1 %v2632_v5, %s8782_s1  ;;  %s6817_s17 = sld [smem:[#allocation2 + $0xc5]] }
 0x249   : > { %8995 = vst [vmem:[#allocation185_spill] sm:$0xff] %v6353_v25  ;;  %v6365_v2 = vsel %vm1773_vm4, %v1878_v39, %v8997_v48  ;;  %8999 = vst [vmem:[#allocation186_spill] sm:$0xff] %v6369_v1  ;;  %v6372_v15 = vpop.permute.xlu0 %1984  ;;  %v2633_v8 = vsel %vm2338_vm5, %v2631_v10, %v2632_v5  ;;  %v2677_v46 = vstv %s6299_s12  ;;  %v2648_v51 = vrot.slane %v2644_v49, 4  ;;  %s6824_s0 = sld [smem:[#allocation2 + $0x95]] }
 0x24a   : > { %8998 = vst [vmem:[#allocation18_spill] sm:$0xff] %v6365_v2  ;;  %9000 = vst [vmem:[#allocation187_spill] sm:$0xff] %v6372_v15  ;;  %v2649_v58 = vrot.slane %v6346_v17, 4  ;;  %v2661_v39 = vmul.f32 %v2660_v56, %v4613_v45  ;;  %v6381_v44 = vmul.f32 %v2660_v56, %v4621_v50  ;;  %v1891_v1 = vrot.slane %v1887_v22, 3  ;;  %v9003_v56 = vld [vmem:[#allocation19_spill] sm:$0xff]  ;;  %s6849_s25 = sld [smem:[#allocation2 + $0xc6]] }
 0x24b   : > { %v1848_v11 = vmul.f32 %v1847_v41, %v4589_v27  ;;  %2634 = vrot.lane.b32.xlu0 %v2633_v8, %s8782_s1  ;;  %v6391_v10 = vmul.f32 %v1847_v41, %v4597_v31  ;;  %v1900_v49 = vmul.f32 %v1899_v35, %v4613_v45  ;;  %v6395_v17 = vmul.f32 %v1899_v35, %v4621_v50  ;;  %s6863_s12 = sld [smem:[#allocation2 + $0x96]] }
 0x24c   : > { %v1861_v22 = vmul.f32 %v1860_v0, %v4589_v27  ;;  %v6400_v13 = vadd.f32 %v9003_v56, %v6216_v55  ;;  %v6403_v3 = vmul.f32 %v1860_v0, %v4597_v31  ;;  %v1912_v8 = vstv %s6335_s3  ;;  %v6406_v48 = vpop.permute.xlu1 %1986  ;;  %v9007_v0 = vld [vmem:[#allocation20_spill] sm:$0xff]  ;;  %2653 = vrot.lane.b32.xlu1 %v2649_v58, %s8782_s1  ;;  %s6899_s3 = sld [smem:[#allocation2 + $0x9a]] }
 0x24d   : > { %9001 = vst [vmem:[#allocation188_spill] sm:$0xff] %v6391_v10  ;;  %9002 = vst [vmem:[#allocation189_spill] sm:$0xff] %v6395_v17  ;;  %v6408_v24 = vpop.permute.xlu0 %2001  ;;  %v2678_v41 = vmul.f32 %v2677_v46, %v4613_v45  ;;  %v2650_v35 = vsel %vm2338_vm5, %v2648_v51, %v2649_v58  ;;  %v2665_v15 = vrot.slane %v2661_v39, 4  ;;  %v2666_v2 = vrot.slane %v6381_v44, 4 }
 0x24e   : > { %9004 = vst [vmem:[#allocation19_spill] sm:$0xff] %v6403_v3  ;;  %9005 = vst [vmem:[#allocation190_spill] sm:$0xff] %v6406_v48  ;;  %v6416_v55 = vmul.f32 %v2677_v46, %v4621_v50  ;;  %v6420_v56 = vadd.f32 %v9007_v0, %v6263_v57  ;;  %v9008_v48 = vrot.slane %v6349_v54, 3  ;;  %v9010_v23 = vrot.slane %v6353_v25, 3  ;;  %v9016_v25 = vld [vmem:[#allocation22_spill] sm:$0xff]  ;;  %v9017_v54 = vld [vmem:[#allocation23_spill] sm:$0xff] }
 0x24f   : > { %9006 = vst [vmem:[#allocation191_spill] sm:$0xff] %v6408_v24  ;;  %v1852_v39 = vrot.slane %v1848_v11, 3  ;;  %2651 = vrot.lane.b32.xlu0 %v2650_v35, %s8782_s1  ;;  %v1904_v57 = vrot.slane %v1900_v49, 3  ;;  %v1865_v0 = vrot.slane %v1861_v22, 3  ;;  %v2694_v5 = vstv %s6376_s26  ;;  %s6915_s26 = sld [smem:[#allocation2 + $0xc7]] }
 0x250   : > { %v6425_v24 = vsel %vm1773_vm4, %v1839_v7, %v9008_v48  ;;  %v6430_v51 = vsel %vm1773_vm4, %v1891_v1, %v9010_v23  ;;  %v1913_v48 = vmul.f32 %v1912_v8, %v4613_v45  ;;  %v6441_v1 = vmul.f32 %v1912_v8, %v4621_v50  ;;  %v6443_v11 = vpop.permute.xlu1 %2003  ;;  %v9015_v7 = vld [vmem:[#allocation21_spill] sm:$0xff]  ;;  %2670 = vrot.lane.b32.xlu1 %v2666_v2, %s8782_s1 }
 0x251   : > { %9009 = vst [vmem:[#allocation20_spill] sm:$0xff] %v6425_v24  ;;  %9011 = vst [vmem:[#allocation192_spill] sm:$0xff] %v6430_v51  ;;  %v6445_v23 = vpop.permute.xlu0 %2018  ;;  %v2667_v49 = vsel %vm2338_vm5, %v2665_v15, %v2666_v2  ;;  %v2682_v35 = vrot.slane %v2678_v41, 4  ;;  %v2683_v22 = vrot.slane %v6416_v55, 4  ;;  %v6451_v44 = vmul.f32 %v2694_v5, %v4572_v14  ;;  %v9030_v2 = vld [vmem:[#allocation30_spill] sm:$0xff]  ;;  %v9060_v24 = vld [vmem:[#allocation138_spill] sm:$0xff] }
 0x252   : > { %9012 = vst [vmem:[#allocation193_spill] sm:$0xff] %v6441_v1  ;;  %9013 = vst [vmem:[#allocation194_spill] sm:$0xff] %v6443_v11  ;;  %v537_v46 = vadd.f32 %v9015_v7, %v6267_v59  ;;  %v538_v8 = vadd.f32 %v9016_v25, %v6306_v47  ;;  %v551_v11 = vadd.f32 %v9017_v54, %v6310_v61  ;;  %v2711_v15 = vstv %s6388_s27  ;;  %s6956_s27 = sld [smem:[#allocation2 + $0x97]] }
 0x253   : > { %9014 = vst [vmem:[#allocation195_spill] sm:$0xff] %v6445_v23  ;;  %2668 = vrot.lane.b32.xlu0 %v2667_v49, %s8782_s1  ;;  %v9018_v41 = vrot.slane %v6391_v10, 3  ;;  %v9020_v59 = vrot.slane %v6395_v17, 3  ;;  %v2695_v25 = vmul.f32 %v2694_v5, %v4566_v9  ;;  %v6476_v61 = vmul.f32 %v2711_v15, %v4572_v14  ;;  %v9026_v5 = vld [vmem:[#allocation29_spill] sm:$0xff] }
 0x254   : > { %v9022_v54 = vrot.slane %v6403_v3, 3  ;;  %v1917_v7 = vrot.slane %v1913_v48, 3  ;;  %v6486_v49 = vpop.permute.xlu1 %2020  ;;  %v2684_v17 = vsel %vm2338_vm5, %v2682_v35, %v2683_v22  ;;  %v2700_v10 = vrot.slane %v6451_v44, 4  ;;  %v9028_v48 = vld [vmem:[#allocation25_spill] sm:$0xff]  ;;  %2687 = vrot.lane.b32.xlu1 %v2683_v22, %s8782_s1 }
 0x255   : > { %v6467_v55 = vsel %vm1773_vm4, %v1852_v39, %v9018_v41  ;;  %v6472_v47 = vsel %vm1773_vm4, %v1904_v57, %v9020_v59  ;;  %9024 = vst [vmem:[#allocation196_spill] sm:$0xff] %v6486_v49  ;;  %v6488_v57 = vpop.permute.xlu0 %2035  ;;  %v2728_v41 = vstv %s6411_s2  ;;  %v593_v59 = vadd.f32 %v9026_v5, %v537_v46  ;;  %v9043_v22 = vld [vmem:[#allocation33_spill] sm:$0xff]  ;;  %s6970_s2 = sld [smem:[#allocation2 + $0x9b]] }
 0x256   : > { %9019 = vst [vmem:[#allocation21_spill] sm:$0xff] %v6467_v55  ;;  %9021 = vst [vmem:[#allocation22_spill] sm:$0xff] %v6472_v47  ;;  %v6483_v58 = vsel %vm1773_vm4, %v1865_v0, %v9022_v54  ;;  %v2712_v3 = vmul.f32 %v2711_v15, %v4566_v9  ;;  %v9027_v0 = vld [vmem:[#allocation24_spill] sm:$0xff]  ;;  %v565_v39 = vadd.f32 %v9028_v48, %v6329_v20  ;;  %v2699_v46 = vrot.slane %v2695_v25, 4 }
 0x257   : > { %9023 = vst [vmem:[#allocation23_spill] sm:$0xff] %v6483_v58  ;;  %9025 = vst [vmem:[#allocation197_spill] sm:$0xff] %v6488_v57  ;;  %v552_v54 = vadd.f32 %v9027_v0, %v6325_v12  ;;  %2685 = vrot.lane.b32.xlu0 %v2684_v17, %s8782_s1  ;;  %v6502_v49 = vmul.f32 %v2728_v41, %v4572_v14  ;;  %v2717_v44 = vrot.slane %v6476_v61, 4  ;;  %v2745_v15 = vstv %s6436_s30  ;;  %v9029_v12 = vld [vmem:[#allocation26_spill] sm:$0xff]  ;;  %v9031_v17 = vld [vmem:[#allocation31_spill] sm:$0xff]  ;;  %s6984_s30 = sld [smem:[#allocation2 + $0xc8]] }
 0x258   : > { %v2729_v35 = vmul.f32 %v2728_v41, %v4566_v9  ;;  %v566_v20 = vadd.f32 %v9029_v12, %v6360_v36  ;;  %v594_v5 = vadd.f32 %v9030_v2, %v538_v8  ;;  %v607_v0 = vadd.f32 %v9031_v17, %v551_v11  ;;  %v6520_v25 = vpop.permute.xlu1 %2037  ;;  %v9036_v41 = vld [vmem:[#allocation27_spill] sm:$0xff]  ;;  %v9037_v47 = vld [vmem:[#allocation114_spill] sm:$0xff]  ;;  %2704 = vrot.lane.b32.xlu1 %v2700_v10, %s8836_s19 }
 0x259   : > { %v9032_v48 = vrot.slane %v6441_v1, 3  ;;  %9034 = vst [vmem:[#allocation24_spill] sm:$0xff] %v6520_v25  ;;  %v6522_v61 = vpop.permute.xlu0 %2052  ;;  %v579_v23 = vadd.f32 %v9036_v41, %v6400_v13  ;;  %v649_v55 = vadd.f32 %v9037_v47, %v593_v59  ;;  %v2701_v36 = vsel %vm2338_vm5, %v2699_v46, %v2700_v10  ;;  %v9038_v11 = vld [vmem:[#allocation28_spill] sm:$0xff]  ;;  %v9040_v46 = vld [vmem:[#allocation104_spill] sm:$0xff] }
 0x25a   : > { %9035 = vst [vmem:[#allocation25_spill] sm:$0xff] %v6522_v61  ;;  %v2716_v8 = vrot.slane %v2712_v3, 4  ;;  %v580_v12 = vadd.f32 %v9038_v11, %v6420_v56  ;;  %v2746_v2 = vmul.f32 %v2745_v15, %v4566_v9  ;;  %v2762_v17 = vstv %s6462_s4  ;;  %v9042_v1 = vld [vmem:[#allocation120_spill] sm:$0xff]  ;;  %v9048_v61 = vld [vmem:[#allocation35_spill] sm:$0xff]  ;;  %s7001_s4 = sld [smem:[#allocation2 + $0xc9]] }
 0x25b   : > { %v6518_v57 = vsel %vm1773_vm4, %v1917_v7, %v9032_v48  ;;  %2702 = vrot.lane.b32.xlu0 %v2701_v36, %s8836_s19  ;;  %v9039_v48 = vld [vmem:[#allocation32_spill] sm:$0xff]  ;;  %v2733_v47 = vrot.slane %v2729_v35, 4  ;;  %v2779_v59 = vstv %s6478_s10  ;;  %v9041_v3 = vrot.slane %v9040_v46, 1  ;;  %v9047_v35 = vld [vmem:[#allocation34_spill] sm:$0xff]  ;;  %s7006_s10 = sld [smem:[#allocation2 + $0xca]] }
 0x25c   : > { %9033 = vst [vmem:[#allocation29_spill] sm:$0xff] %v6518_v57  ;;  %v608_v25 = vadd.f32 %v9039_v48, %v552_v54  ;;  %v2718_v13 = vsel %vm2338_vm5, %v2716_v8, %v2717_v44  ;;  %v662_v56 = vadd.f32 %v9042_v1, %v607_v0  ;;  %v621_v11 = vadd.f32 %v9043_v22, %v565_v39  ;;  %v6542_v36 = vpop.permute.xlu1 %2054  ;;  %v9046_v54 = vld [vmem:[#allocation118_spill] sm:$0xff] }
 0x25d   : > { %v650_v41 = vadd.f32 %v9041_v3, %v594_v5  ;;  %9044 = vst [vmem:[#allocation26_spill] sm:$0xff] %v6542_v36  ;;  %v6544_v7 = vpop.permute.xlu0 %2069  ;;  %v6547_v51 = vmul.f32 %v2745_v15, %v4572_v14  ;;  %v701_v8 = vadd.f32 %v9046_v54, %v649_v55  ;;  %v622_v48 = vadd.f32 %v9047_v35, %v566_v20  ;;  %v9050_v20 = vld [vmem:[#allocation109_spill] sm:$0xff] }
 0x25e   : > { %9045 = vst [vmem:[#allocation30_spill] sm:$0xff] %v6544_v7  ;;  %v635_v46 = vadd.f32 %v9048_v61, %v579_v23  ;;  %v2763_v5 = vmul.f32 %v2762_v17, %v4589_v27  ;;  %v9049_v1 = vrot.slane %v6502_v49, 4  ;;  %v2750_v15 = vrot.slane %v2746_v2, 4  ;;  %2721 = vrot.lane.b32.xlu1 %v2717_v44, %s8836_s19  ;;  %v9064_v44 = vld [vmem:[#allocation119_spill] sm:$0xff] }
 0x25f   : > { %2719 = vrot.lane.b32.xlu0 %v2718_v13, %s8836_s19  ;;  %v6561_v0 = vmul.f32 %v2762_v17, %v4597_v31  ;;  %v2796_v55 = vstv %s6504_s13  ;;  %v9051_v3 = vrot.slane %v9050_v20, 1  ;;  %v2780_v61 = vmul.f32 %v2779_v59, %v4589_v27  ;;  %v9052_v13 = vld [vmem:[#allocation107_spill] sm:$0xff]  ;;  %s7020_s13 = sld [smem:[#allocation2 + $0xcb]] }
 0x260   : > { %v2735_v39 = vsel %vm2338_vm5, %v2733_v47, %v9049_v1  ;;  %v6568_v22 = vmul.f32 %v2779_v59, %v4597_v31  ;;  %v2813_v10 = vstv %s6509_s8  ;;  %v9053_v54 = vrot.slane %v9052_v13, 1  ;;  %v9054_v47 = vld [vmem:[#allocation121_spill] sm:$0xff]  ;;  %v9055_v1 = vld [vmem:[#allocation130_spill] sm:$0xff]  ;;  %v6577_v36 = vpop.permute.xlu1 %2071  ;;  %s7080_s8 = sld [smem:[#allocation2 + $0xcc]] }
 0x261   : > { %v663_v23 = vadd.f32 %v9051_v3, %v608_v25  ;;  %v714_v2 = vadd.f32 %v9054_v47, %v662_v56  ;;  %v675_v17 = vadd.f32 %v9055_v1, %v621_v11  ;;  %9056 = vst [vmem:[#allocation31_spill] sm:$0xff] %v6577_v36  ;;  %v6579_v7 = vpop.permute.xlu0 %2086  ;;  %v2751_v25 = vrot.slane %v6547_v51, 4  ;;  %v9058_v59 = vld [vmem:[#allocation117_spill] sm:$0xff]  ;;  %v9061_v56 = vld [vmem:[#allocation36_spill] sm:$0xff] }
 0x262   : > { %v702_v35 = vadd.f32 %v9053_v54, %v650_v41  ;;  %9057 = vst [vmem:[#allocation27_spill] sm:$0xff] %v6579_v7  ;;  %v9059_v20 = vrot.slane %v9058_v59, 1  ;;  %v688_v57 = vadd.f32 %v9060_v24, %v635_v46  ;;  %v2797_v13 = vmul.f32 %v2796_v55, %v4589_v27  ;;  %v9062_v24 = vld [vmem:[#allocation110_spill] sm:$0xff] }
 0x263   : > { %v6589_v41 = vmul.f32 %v2796_v55, %v4597_v31  ;;  %v636_v11 = vadd.f32 %v9061_v56, %v580_v12  ;;  %2736 = vrot.lane.b32.xlu0 %v2735_v39, %s8836_s19  ;;  %v2767_v54 = vrot.slane %v2763_v5, 4  ;;  %v2814_v51 = vmul.f32 %v2813_v10, %v4589_v27  ;;  %v9065_v39 = vld [vmem:[#allocation108_spill] sm:$0xff] }
 0x264   : > { %v676_v3 = vadd.f32 %v9059_v20, %v622_v48  ;;  %v6596_v47 = vmul.f32 %v2813_v10, %v4597_v31  ;;  %v9063_v48 = vrot.slane %v9062_v24, 1  ;;  %v2768_v55 = vrot.slane %v6561_v0, 4  ;;  %v9067_v56 = vld [vmem:[#allocation136_spill] sm:$0xff]  ;;  %v6608_v10 = vpop.permute.xlu1 %2088 }
 0x265   : > { %v2784_v1 = vrot.slane %v2780_v61, 4  ;;  %v753_v59 = vadd.f32 %v9064_v44, %v701_v8  ;;  %v9066_v5 = vrot.slane %v9065_v39, 1  ;;  %v727_v36 = vadd.f32 %v9067_v56, %v675_v17  ;;  %9068 = vst [vmem:[#allocation114_spill] sm:$0xff] %v6608_v10  ;;  %v6610_v7 = vpop.permute.xlu0 %2103  ;;  %v9073_v44 = vld [vmem:[#allocation127_spill] sm:$0xff]  ;;  %v9076_v56 = vld [vmem:[#allocation124_spill] sm:$0xff] }
 0x266   : > { %v715_v46 = vadd.f32 %v9063_v48, %v663_v23  ;;  %9069 = vst [vmem:[#allocation28_spill] sm:$0xff] %v6610_v7  ;;  %v2752_v33 = vsel %vm2338_vm5, %v2750_v15, %v2751_v25  ;;  %v9070_v23 = vld [vmem:[#allocation125_spill] sm:$0xff]  ;;  %v2801_v24 = vrot.slane %v2797_v13, 4  ;;  %v2830_v8 = vstv %s6553_s16  ;;  %v9087_v13 = vld [vmem:[#allocation131_spill] sm:$0xff]  ;;  %s7089_s16 = sld [smem:[#allocation2 + $0xcd]] }
 0x267   : > { %v754_v20 = vadd.f32 %v9066_v5, %v702_v35  ;;  %v9071_v0 = vrot.slane %v9070_v23, 1  ;;  %v9072_v35 = vld [vmem:[#allocation142_spill] sm:$0xff]  ;;  %v9074_v39 = vrot.slane %v9073_v44, 1  ;;  %v9075_v15 = vrot.slane %v6502_v49, 4  ;;  %2753 = vrot.lane.b32.xlu0 %v2752_v33, %s8836_s19 }
 0x268   : > { %v740_v17 = vadd.f32 %v9072_v35, %v688_v57  ;;  %v766_v23 = vadd.f32 %v9076_v56, %v714_v2  ;;  %v2769_v10 = vsel %vm2338_vm5, %v2767_v54, %v2768_v55  ;;  %v9079_v57 = vrot.slane %v6568_v22, 4  ;;  %v6636_v35 = vpop.permute.xlu1 %2105 }
 0x269   : > { %v728_v61 = vadd.f32 %v9071_v0, %v676_v3  ;;  %v689_v5 = vadd.f32 %v9074_v39, %v636_v11  ;;  %2738 = vrot.lane.b32.xlu1 %v9075_v15, %s8836_s19  ;;  %v2818_v3 = vrot.slane %v2814_v51, 4  ;;  %v9077_v0 = vld [vmem:[#allocation113_spill] sm:$0xff]  ;;  %9080 = vst [vmem:[#allocation32_spill] sm:$0xff] %v6636_v35  ;;  %v6638_v49 = vpop.permute.xlu0 %2120  ;;  %v2831_v33 = vmul.f32 %v2830_v8, %v4613_v45 }
 0x26a   : > { %v9078_v48 = vrot.slane %v9077_v0, 1  ;;  %v2786_v11 = vsel %vm2338_vm5, %v2784_v1, %v9079_v57  ;;  %9081 = vst [vmem:[#allocation104_spill] sm:$0xff] %v6638_v49  ;;  %v6642_v51 = vmul.f32 %v2830_v8, %v4621_v50  ;;  %v2847_v2 = vstv %s6571_s20  ;;  %v9085_v1 = vld [vmem:[#allocation37_spill] sm:$0xff]  ;;  %s7121_s20 = sld [smem:[#allocation2 + $0xce]] }
 0x26b   : > { %v2864_v44 = vstv %s6582_s22  ;;  %v6654_v56 = vadd.f32 %v9085_v1, %v753_v59  ;;  %v9086_v0 = vrot.slane %v6589_v41, 4  ;;  %v6660_v8 = vadd.f32 %v5877_v43, %v740_v17  ;;  %2770 = vrot.lane.b32.xlu0 %v2769_v10, %s8836_s19  ;;  %v9090_v10 = vld [vmem:[#allocation38_spill] sm:$0xff]  ;;  %s7136_s22 = sld [smem:[#allocation2 + $0xd0]] }
 0x26c   : > { %v767_v12 = vadd.f32 %v9078_v48, %v715_v46  ;;  %v9082_v46 = vld [vmem:[#allocation137_spill] sm:$0xff]  ;;  %v9083_v48 = vld [vmem:[#allocation126_spill] sm:$0xff]  ;;  %v9088_v35 = vrot.slane %v9087_v13, 1  ;;  %v2881_v59 = vstv %s6598_s24  ;;  %v2848_v43 = vmul.f32 %v2847_v2, %v4613_v45  ;;  %s7145_s24 = sld [smem:[#allocation2 + $0xd1]] }
 0x26d   : > { %v779_v54 = vadd.f32 %v9082_v46, %v727_v36  ;;  %v9084_v39 = vrot.slane %v9083_v48, 1  ;;  %v2803_v57 = vsel %vm2338_vm5, %v2801_v24, %v9086_v0  ;;  %2755 = vrot.lane.b32.xlu1 %v2751_v25, %s8836_s19  ;;  %v9089_v36 = vrot.slane %v6596_v47, 4  ;;  %v6690_v46 = vpop.permute.xlu0 %2137  ;;  %v9094_v0 = vld [vmem:[#allocation134_spill] sm:$0xff] }
 0x26e   : > { %v741_v7 = vadd.f32 %v9088_v35, %v689_v5  ;;  %v6676_v24 = vmul.f32 %v2847_v2, %v4621_v50  ;;  %v2865_v17 = vmul.f32 %v2864_v44, %v4613_v45  ;;  %v6680_v25 = vmul.f32 %v2864_v44, %v4621_v50  ;;  %v6688_v35 = vpop.permute.xlu1 %2122  ;;  %9093 = vst [vmem:[#allocation33_spill] sm:$0xff] %v6690_v46 }
 0x26f   : > { %v6651_v15 = vadd.f32 %v9084_v39, %v728_v61  ;;  %v6669_v61 = vsel %vm2338_vm5, %v2818_v3, %v9089_v36  ;;  %v6683_v5 = vadd.f32 %v9090_v10, %v754_v20  ;;  %v9091_v3 = vld [vmem:[#allocation39_spill] sm:$0xff]  ;;  %9092 = vst [vmem:[#allocation120_spill] sm:$0xff] %v6688_v35  ;;  %v2835_v48 = vrot.slane %v2831_v33, 4  ;;  %2787 = vrot.lane.b32.xlu0 %v2786_v11, %s8836_s19 }
 0x270   : > { %v6686_v13 = vadd.f32 %v9091_v3, %v766_v23  ;;  %v2882_v2 = vmul.f32 %v2881_v59, %v4613_v45  ;;  %v6697_v44 = vmul.f32 %v2881_v59, %v4621_v50  ;;  %v3055_v1 = vstv %s6613_s28  ;;  %s7160_s28 = sld [smem:[#allocation2 + $0xcf]] }
 0x271   : > { %v2333_v20 = vstv %s6619_s6  ;;  %v9095_v36 = vrot.slane %v9094_v0, 1  ;;  %2772 = vrot.lane.b32.xlu1 %v2768_v55, %s8836_s19  ;;  %v6706_v33 = vmul.f32 %v3055_v1, %v4572_v14  ;;  %v2852_v59 = vrot.slane %v2848_v43, 4  ;;  %v6719_v55 = vpop.permute.xlu0 %2154  ;;  %v9099_v43 = vld [vmem:[#allocation40_spill] sm:$0xff]  ;;  %s7165_s6 = sld [smem:[#allocation2 + $0xd2]] }
 0x272   : > { %v6709_v10 = vmul.f32 %v2333_v20, %v4572_v14  ;;  %v2869_v39 = vrot.slane %v2865_v17, 4  ;;  %9098 = vst [vmem:[#allocation35_spill] sm:$0xff] %v6719_v55  ;;  %v3056_v11 = vmul.f32 %v3055_v1, %v4566_v9  ;;  %v3072_v35 = vstv %s6646_s5  ;;  %v9101_v55 = vld [vmem:[#allocation41_spill] sm:$0xff]  ;;  %s7177_s5 = sld [smem:[#allocation2 + $0xd3]] }
 0x273   : > { %v793_v23 = vadd.f32 %v9095_v36, %v741_v7  ;;  %v6717_v7 = vpop.permute.xlu1 %2139  ;;  %v2334_v36 = vmul.f32 %v2333_v20, %v4566_v9  ;;  %v6727_v3 = vadd.f32 %v9099_v43, %v767_v12  ;;  %v9100_v17 = vrot.slane %v6642_v51, 4  ;;  %2804 = vrot.lane.b32.xlu0 %v2803_v57, %s8836_s19 }
 0x274   : > { %9096 = vst [vmem:[#allocation118_spill] sm:$0xff] %v6709_v10  ;;  %9097 = vst [vmem:[#allocation34_spill] sm:$0xff] %v6717_v7  ;;  %v2886_v46 = vrot.slane %v2882_v2, 4  ;;  %v6736_v1 = vadd.f32 %v9101_v55, %v779_v54  ;;  %v9102_v20 = vrot.slane %v6568_v22, 4  ;;  %v9103_v2 = vrot.slane %v6676_v24, 4 }
 0x275   : > { %v2837_v0 = vsel %vm2338_vm5, %v2835_v48, %v9100_v17  ;;  %v2347_v48 = vstv %s6672_s29  ;;  %v9104_v7 = vrot.slane %v6680_v25, 4  ;;  %v3073_v55 = vmul.f32 %v3072_v35, %v4566_v9  ;;  %s7219_s29 = sld [smem:[#allocation2 + $0xd4]] }
 0x276   : > { %2789 = vrot.lane.b32.xlu1 %v9102_v20, %s8836_s19  ;;  %v2854_v17 = vsel %vm2338_vm5, %v2852_v59, %v9103_v2  ;;  %v6755_v22 = vmul.f32 %v3072_v35, %v4572_v14  ;;  %v6759_v20 = vpop.permute.xlu0 %2171  ;;  %v3060_v43 = vrot.slane %v3056_v11, 5  ;;  %v2339_v12 = vrot.slane %v2334_v36, 4  ;;  %v9109_v35 = vld [vmem:[#allocation43_spill] sm:$0xff] }
 0x277   : > { %v6751_v54 = vsel %vm2338_vm5, %v2869_v39, %v9104_v7  ;;  %v6757_v57 = vpop.permute.xlu1 %2156  ;;  %9106 = vst [vmem:[#allocation107_spill] sm:$0xff] %v6759_v20  ;;  %v6762_v49 = vmul.f32 %v2347_v48, %v4572_v14  ;;  %v3089_v59 = vstv %s6693_s7  ;;  %v9108_v39 = vld [vmem:[#allocation42_spill] sm:$0xff]  ;;  %v6773_v2 = vadd.f32 %v9109_v35, %v6660_v8  ;;  %2821 = vrot.lane.b32.xlu0 %v6669_v61, %s8836_s19  ;;  %v9115_v35 = vld [vmem:[#allocation44_spill] sm:$0xff]  ;;  %s7264_s7 = sld [smem:[#allocation2 + $0xd5]] }
 0x278   : > { %9105 = vst [vmem:[#allocation109_spill] sm:$0xff] %v6757_v57  ;;  %v6769_v7 = vadd.f32 %v9108_v39, %v6651_v15  ;;  %v9110_v57 = vrot.slane %v6697_v44, 4  ;;  %v2348_v36 = vmul.f32 %v2347_v48, %v4566_v9  ;;  %v9111_v20 = vrot.slane %v6589_v41, 4 }
 0x279   : > { %9107 = vst [vmem:[#allocation121_spill] sm:$0xff] %v6762_v49  ;;  %v9112_v15 = vrot.slane %v6706_v33, 5  ;;  %v3077_v41 = vrot.slane %v3073_v55, 5  ;;  %v3090_v61 = vmul.f32 %v3089_v59, %v4566_v9  ;;  %v2360_v39 = vstv %s6711_s9  ;;  %s7278_s9 = sld [smem:[#allocation2 + $0xd6]] }
 0x27a   : > { %v6778_v11 = vsel %vm2338_vm5, %v2886_v46, %v9110_v57  ;;  %2806 = vrot.lane.b32.xlu1 %v9111_v20, %s8836_s19  ;;  %v9113_v46 = vrot.slane %v6709_v10, 4  ;;  %v6799_v57 = vmul.f32 %v3089_v59, %v4572_v14  ;;  %v6805_v63 = vadd.f32 %v9115_v35, %v793_v23 }
 0x27b   : > { %v6791_v8 = vsel %vm2903_vm6, %v3060_v43, %v9112_v15  ;;  %v9116_v43 = vld [vmem:[#allocation45_spill] sm:$0xff]  ;;  %v6811_v10 = vpop.permute.xlu1 %2173  ;;  %v2352_v55 = vrot.slane %v2348_v36, 4  ;;  %v6820_v59 = vmul.f32 %v2360_v39, %v4572_v14  ;;  %v3106_v20 = vstv %s6715_s11  ;;  %2838 = vrot.lane.b32.xlu0 %v2837_v0, %s8836_s19  ;;  %s7288_s11 = sld [smem:[#allocation2 + $0xd7]] }
 0x27c   : > { %v6796_v48 = vsel %vm2338_vm5, %v2339_v12, %v9113_v46  ;;  %v6809_v15 = vadd.f32 %v9116_v43, %v6654_v56  ;;  %9117 = vst [vmem:[#allocation117_spill] sm:$0xff] %v6811_v10  ;;  %v6813_v12 = vpop.permute.xlu0 %2188  ;;  %v2373_v23 = vstv %s6733_s15  ;;  %v9120_v56 = vrot.slane %v6596_v47, 4  ;;  %s7331_s15 = sld [smem:[#allocation2 + $0xb4]] }
 0x27d   : > { %9114 = vst [vmem:[#allocation130_spill] sm:$0xff] %v6796_v48  ;;  %9118 = vst [vmem:[#allocation138_spill] sm:$0xff] %v6813_v12  ;;  %v3123_v48 = vstv %s6724_s14  ;;  %v2361_v43 = vmul.f32 %v2360_v39, %v4566_v9  ;;  %v6833_v36 = vmul.f32 %v3106_v20, %v4572_v14  ;;  %v6836_v46 = vmul.f32 %v2373_v23, %v4572_v14  ;;  %s7315_s14 = sld [smem:[#allocation2 + $0xe4]] }
 0x27e   : > { %9119 = vst [vmem:[#allocation36_spill] sm:$0xff] %v6820_v59  ;;  %2823 = vrot.lane.b32.xlu1 %v9120_v56, %s8836_s19  ;;  %v9122_v10 = vrot.slane %v6755_v22, 5  ;;  %v3094_v0 = vrot.slane %v3090_v61, 5  ;;  %v3124_v56 = vmul.f32 %v3123_v48, %v4589_v27  ;;  %v6847_v35 = vmul.f32 %v3123_v48, %v4597_v31  ;;  %v9127_v48 = vld [vmem:[#allocation46_spill] sm:$0xff] }
 0x27f   : > { %9121 = vst [vmem:[#allocation110_spill] sm:$0xff] %v6836_v46  ;;  %v6851_v39 = vpop.permute.xlu1 %2190  ;;  %v9125_v21 = vrot.slane %v6762_v49, 4  ;;  %v2386_v61 = vstv %s6765_s18  ;;  %v6867_v34 = vadd.f32 %v9127_v48, %v6683_v5  ;;  %2855 = vrot.lane.b32.xlu0 %v2854_v17, %s8836_s19  ;;  %v2365_v5 = vrot.slane %v2361_v43, 4  ;;  %v9136_v48 = vld [vmem:[#allocation49_spill] sm:$0xff]  ;;  %s7344_s18 = sld [smem:[#allocation2 + $0xe5]] }
 0x280   : > { %v6843_v47 = vsel %vm2903_vm6, %v3077_v41, %v9122_v10  ;;  %9123 = vst [vmem:[#allocation119_spill] sm:$0xff] %v6851_v39  ;;  %v6853_v12 = vpop.permute.xlu0 %2205  ;;  %v3107_v10 = vmul.f32 %v3106_v20, %v4566_v9  ;;  %v2374_v41 = vmul.f32 %v2373_v23, %v4566_v9  ;;  %v9128_v39 = vld [vmem:[#allocation47_spill] sm:$0xff]  ;;  %v9130_v20 = vrot.slane %v6799_v57, 5 }
 0x281   : > { %9124 = vst [vmem:[#allocation108_spill] sm:$0xff] %v6853_v12  ;;  %v6858_v58 = vsel %vm2338_vm5, %v2352_v55, %v9125_v21  ;;  %v6871_v6 = vadd.f32 %v9128_v39, %v6686_v13  ;;  %v2438_v12 = vstv %s6781_s21  ;;  %v9129_v21 = vrot.slane %v6642_v51, 4  ;;  %s7404_s21 = sld [smem:[#allocation2 + $0xb5]] }
 0x282   : > { %9126 = vst [vmem:[#allocation136_spill] sm:$0xff] %v6858_v58  ;;  %v6882_v55 = vsel %vm2903_vm6, %v3094_v0, %v9130_v20  ;;  %v3128_v39 = vrot.slane %v3124_v56, 5  ;;  %v2387_v49 = vmul.f32 %v2386_v61, %v4589_v27  ;;  %v6889_v51 = vmul.f32 %v2386_v61, %v4597_v31  ;;  %v9135_v56 = vld [vmem:[#allocation48_spill] sm:$0xff] }
 0x283   : > { %2840 = vrot.lane.b32.xlu1 %v9129_v21, %s8836_s19  ;;  %v6891_v17 = vpop.permute.xlu1 %2207  ;;  %v3111_v43 = vrot.slane %v3107_v10, 5  ;;  %v2378_v0 = vrot.slane %v2374_v41, 4  ;;  %v2439_v20 = vmul.f32 %v2438_v12, %v4613_v45  ;;  %v6897_v13 = vmul.f32 %v2438_v12, %v4621_v50  ;;  %2872 = vrot.lane.b32.xlu0 %v6751_v54, %s8836_s19  ;;  %v9149_v54 = vld [vmem:[#allocation50_spill] sm:$0xff] }
 0x284   : > { %9131 = vst [vmem:[#allocation125_spill] sm:$0xff] %v6889_v51  ;;  %9132 = vst [vmem:[#allocation142_spill] sm:$0xff] %v6891_v17  ;;  %v6893_v21 = vpop.permute.xlu0 %2222  ;;  %v6903_v61 = vadd.f32 %v9135_v56, %v6727_v3  ;;  %v6907_v23 = vadd.f32 %v9136_v48, %v6736_v1  ;;  %v9137_v17 = vrot.slane %v6820_v59, 4  ;;  %v3140_v41 = vstv %s6817_s17  ;;  %s7427_s17 = sld [smem:[#allocation2 + $0xe6]] }
 0x285   : > { %9133 = vst [vmem:[#allocation127_spill] sm:$0xff] %v6893_v21  ;;  %9134 = vst [vmem:[#allocation124_spill] sm:$0xff] %v6897_v13  ;;  %v9139_v12 = vrot.slane %v6676_v24, 4  ;;  %v9140_v3 = vrot.slane %v6833_v36, 5  ;;  %v9141_v48 = vrot.slane %v6836_v46, 4  ;;  %v2451_v56 = vstv %s6838_s23  ;;  %s7450_s23 = sld [smem:[#allocation2 + $0xe7]] }
 0x286   : > { %v6912_v10 = vsel %vm2338_vm5, %v2365_v5, %v9137_v17  ;;  %v2399_v17 = vstv %s6824_s0  ;;  %v9143_v59 = vrot.slane %v6847_v35, 5  ;;  %v9154_v21 = vrot.slane %v6889_v51, 4  ;;  %s7439_s0 = sld [smem:[#allocation2 + $0xb6]] }
 0x287   : > { %9138 = vst [vmem:[#allocation113_spill] sm:$0xff] %v6912_v10  ;;  %2857 = vrot.lane.b32.xlu1 %v9139_v12, %s8836_s19  ;;  %v6925_v1 = vsel %vm2903_vm6, %v3111_v43, %v9140_v3  ;;  %v6930_v5 = vsel %vm2338_vm5, %v2378_v0, %v9141_v48  ;;  %v2391_v12 = vrot.slane %v2387_v49, 4  ;;  %v3157_v10 = vstv %s6849_s25  ;;  %v6941_v58 = vpop.permute.xlu1 %2224  ;;  %2889 = vrot.lane.b32.xlu0 %v6778_v11, %s8836_s19  ;;  %s7462_s25 = sld [smem:[#allocation2 + $0xb7]] }
 0x288   : > { %9142 = vst [vmem:[#allocation137_spill] sm:$0xff] %v6930_v5  ;;  %v6937_v24 = vsel %vm2903_vm6, %v3128_v39, %v9143_v59  ;;  %9144 = vst [vmem:[#allocation126_spill] sm:$0xff] %v6941_v58  ;;  %v6943_v43 = vpop.permute.xlu0 %2239  ;;  %v2443_v3 = vrot.slane %v2439_v20, 4  ;;  %v3141_v0 = vmul.f32 %v3140_v41, %v4589_v27  ;;  %v2412_v48 = vstv %s6863_s12  ;;  %s7484_s12 = sld [smem:[#allocation2 + $0xe8]] }
 0x289   : > { %9145 = vst [vmem:[#allocation37_spill] sm:$0xff] %v6943_v43  ;;  %v6949_v5 = vmul.f32 %v3140_v41, %v4597_v31  ;;  %v2400_v59 = vmul.f32 %v2399_v17, %v4589_v27  ;;  %v6953_v49 = vmul.f32 %v2399_v17, %v4597_v31  ;;  %v2452_v39 = vmul.f32 %v2451_v56, %v4613_v45 }
 0x28a   : > { %v9147_v20 = vrot.slane %v6680_v25, 4  ;;  %v6964_v41 = vmul.f32 %v2451_v56, %v4621_v50  ;;  %v3158_v46 = vmul.f32 %v3157_v10, %v4589_v27  ;;  %v6968_v17 = vmul.f32 %v3157_v10, %v4597_v31  ;;  %v9150_v25 = vld [vmem:[#allocation51_spill] sm:$0xff] }
 0x28b   : > { %9146 = vst [vmem:[#allocation131_spill] sm:$0xff] %v6953_v49  ;;  %v6974_v58 = vadd.f32 %v9149_v54, %v6769_v7  ;;  %v2413_v11 = vmul.f32 %v2412_v48, %v4589_v27  ;;  %v6982_v56 = vmul.f32 %v2412_v48, %v4597_v31  ;;  %v6986_v10 = vpop.permute.xlu1 %2241  ;;  %v6993_v7 = vsel %vm2338_vm5, %v2391_v12, %v9154_v21 }
 0x28c   : > { %2874 = vrot.lane.b32.xlu1 %v9147_v20, %s8836_s19  ;;  %9148 = vst [vmem:[#allocation38_spill] sm:$0xff] %v6964_v41  ;;  %v6978_v20 = vadd.f32 %v9150_v25, %v6773_v2  ;;  %9152 = vst [vmem:[#allocation134_spill] sm:$0xff] %v6986_v10  ;;  %v6988_v43 = vpop.permute.xlu0 %2256  ;;  %v9156_v54 = vrot.slane %v6897_v13, 4  ;;  %v3145_v25 = vrot.slane %v3141_v0, 5  ;;  %v2464_v32 = vstv %s6899_s3  ;;  %3063 = vrot.lane.b32.xlu0 %v6791_v8, %s8782_s1  ;;  %s7552_s3 = sld [smem:[#allocation2 + $0xb8]] }
 0x28d   : > { %9151 = vst [vmem:[#allocation39_spill] sm:$0xff] %v6982_v56  ;;  %9153 = vst [vmem:[#allocation40_spill] sm:$0xff] %v6988_v43  ;;  %v2404_v42 = vrot.slane %v2400_v59, 4  ;;  %v3174_v43 = vstv %s6915_s26  ;;  %v9158_v21 = vrot.slane %v6697_v44, 4  ;;  %v2456_v12 = vrot.slane %v2452_v39, 4  ;;  %v9160_v44 = vld [vmem:[#allocation52_spill] sm:$0xff] }
 0x28e   : > { %9155 = vst [vmem:[#allocation41_spill] sm:$0xff] %v6993_v7  ;;  %v6998_v2 = vsel %vm2338_vm5, %v2443_v3, %v9156_v54  ;;  %v3162_v0 = vrot.slane %v3158_v46, 5  ;;  %v2417_v59 = vrot.slane %v2413_v11, 4  ;;  %v2465_v48 = vmul.f32 %v2464_v32, %v4613_v45  ;;  %v9161_v46 = vld [vmem:[#allocation53_spill] sm:$0xff]  ;;  %v9164_v54 = vld [vmem:[#allocation54_spill] sm:$0xff]  ;;  %s7601_s26 = sld [smem:[#allocation2 + $0xbc]] }
 0x28f   : > { %9157 = vst [vmem:[#allocation42_spill] sm:$0xff] %v6998_v2  ;;  %v7018_v13 = vmul.f32 %v2464_v32, %v4621_v50  ;;  %v7024_v8 = vadd.f32 %v9160_v44, %v6805_v63  ;;  %v7028_v39 = vadd.f32 %v9161_v46, %v6809_v15  ;;  %v3175_v10 = vmul.f32 %v3174_v43, %v4589_v27 }
 0x290   : > { %2891 = vrot.lane.b32.xlu1 %v9158_v21, %s8836_s19  ;;  %v7030_v21 = vpop.permute.xlu1 %2258  ;;  %v7032_v11 = vpop.permute.xlu0 %2273  ;;  %v7036_v32 = vmul.f32 %v3174_v43, %v4597_v31  ;;  %v7040_v3 = vadd.f32 %v9164_v54, %v6867_v34  ;;  %v9165_v63 = vrot.slane %v6949_v5, 5  ;;  %v9166_v15 = vrot.slane %v6953_v49, 4  ;;  %3080 = vrot.lane.b32.xlu0 %v6843_v47, %s8782_s1 }
 0x291   : > { %9159 = vst [vmem:[#allocation43_spill] sm:$0xff] %v7018_v13  ;;  %9162 = vst [vmem:[#allocation44_spill] sm:$0xff] %v7030_v21  ;;  %v2425_v51 = vstv %s6956_s27  ;;  %v9168_v21 = vld [vmem:[#allocation55_spill] sm:$0xff]  ;;  %v9169_v43 = vrot.slane %v6706_v33, 5  ;;  %v9170_v34 = vrot.slane %v6964_v41, 4  ;;  %v3225_v47 = vstv %s7006_s10  ;;  %v9179_v41 = vld [vmem:[#allocation56_spill] sm:$0xff] }
 0x292   : > { %9163 = vst [vmem:[#allocation45_spill] sm:$0xff] %v7032_v11  ;;  %v7045_v44 = vsel %vm2903_vm6, %v3145_v25, %v9165_v63  ;;  %v7050_v46 = vsel %vm2338_vm5, %v2404_v42, %v9166_v15  ;;  %v7055_v2 = vadd.f32 %v9168_v21, %v6871_v6  ;;  %v9172_v42 = vrot.slane %v6968_v17, 5  ;;  %s7616_s27 = sld [smem:[#allocation2 + $0xe9]] }
 0x293   : > { %9167 = vst [vmem:[#allocation46_spill] sm:$0xff] %v7050_v46  ;;  %v7065_v25 = vsel %vm2338_vm5, %v2456_v12, %v9170_v34  ;;  %v2477_v6 = vstv %s6970_s2  ;;  %v9173_v21 = vrot.slane %v6982_v56, 4  ;;  %v2469_v63 = vrot.slane %v2465_v48, 4  ;;  %s7634_s2 = sld [smem:[#allocation2 + $0xb9]] }
 0x294   : > { %3065 = vrot.lane.b32.xlu1 %v9169_v43, %s8782_s1  ;;  %9171 = vst [vmem:[#allocation47_spill] sm:$0xff] %v7065_v25  ;;  %v7070_v54 = vsel %vm2903_vm6, %v3162_v0, %v9172_v42  ;;  %v3191_v15 = vstv %s6984_s30  ;;  %v7082_v12 = vpop.permute.xlu1 %2275  ;;  %v7084_v43 = vpop.permute.xlu0 %2290  ;;  %v3179_v34 = vrot.slane %v3175_v10, 5  ;;  %v2426_v42 = vmul.f32 %v2425_v51, %v4589_v27  ;;  %v9180_v0 = vld [vmem:[#allocation57_spill] sm:$0xff]  ;;  %3097 = vrot.lane.b32.xlu0 %v6882_v55, %s8782_s1  ;;  %s7696_s30 = sld [smem:[#allocation2 + $0xbd]] }
 0x295   : > { %v7076_v33 = vsel %vm2338_vm5, %v2417_v59, %v9173_v21  ;;  %9175 = vst [vmem:[#allocation49_spill] sm:$0xff] %v7082_v12  ;;  %9176 = vst [vmem:[#allocation50_spill] sm:$0xff] %v7084_v43  ;;  %v3208_v56 = vstv %s7001_s4  ;;  %v7092_v48 = vmul.f32 %v2425_v51, %v4597_v31  ;;  %v2478_v59 = vmul.f32 %v2477_v6, %v4613_v45  ;;  %s7729_s4 = sld [smem:[#allocation2 + $0xea]] }
 0x296   : > { %9174 = vst [vmem:[#allocation48_spill] sm:$0xff] %v7076_v33  ;;  %v7096_v21 = vmul.f32 %v2477_v6, %v4621_v50  ;;  %v7101_v10 = vadd.f32 %v9179_v41, %v6903_v61  ;;  %v7105_v49 = vadd.f32 %v9180_v0, %v6907_v23  ;;  %v9181_v12 = vrot.slane %v6755_v22, 5  ;;  %s7745_s10 = sld [smem:[#allocation2 + $0xba]] }
 0x297   : > { %9177 = vst [vmem:[#allocation51_spill] sm:$0xff] %v7092_v48  ;;  %v3192_v51 = vmul.f32 %v3191_v15, %v4613_v45  ;;  %v7114_v6 = vmul.f32 %v3191_v15, %v4621_v50  ;;  %v3209_v33 = vmul.f32 %v3208_v56, %v4613_v45  ;;  %v7118_v61 = vmul.f32 %v3208_v56, %v4621_v50 }
 0x298   : > { %9178 = vst [vmem:[#allocation52_spill] sm:$0xff] %v7096_v21  ;;  %3082 = vrot.lane.b32.xlu1 %v9181_v12, %s8782_s1  ;;  %v3242_v41 = vstv %s7020_s13  ;;  %v7123_v23 = vpop.permute.xlu1 %2292  ;;  %v7125_v22 = vpop.permute.xlu0 %2307  ;;  %v9184_v12 = vrot.slane %v7018_v13, 4  ;;  %v2430_v0 = vrot.slane %v2426_v42, 4  ;;  %v3226_v15 = vmul.f32 %v3225_v47, %v4613_v45  ;;  %v9187_v42 = vld [vmem:[#allocation58_spill] sm:$0xff]  ;;  %3114 = vrot.lane.b32.xlu0 %v6925_v1, %s8782_s1  ;;  %s7816_s13 = sld [smem:[#allocation2 + $0xbe]] }
 0x299   : > { %9182 = vst [vmem:[#allocation53_spill] sm:$0xff] %v7123_v23  ;;  %9183 = vst [vmem:[#allocation54_spill] sm:$0xff] %v7125_v22  ;;  %v7134_v25 = vmul.f32 %v3225_v47, %v4621_v50  ;;  %v9186_v56 = vrot.slane %v7036_v32, 5  ;;  %v2482_v13 = vrot.slane %v2478_v59, 4  ;;  %v9188_v47 = vrot.slane %v6799_v57, 5  ;;  %v9189_v57 = vld [vmem:[#allocation59_spill] sm:$0xff] }
 0x29a   : > { %v7130_v55 = vsel %vm2338_vm5, %v2469_v63, %v9184_v12  ;;  %v7149_v12 = vadd.f32 %v9187_v42, %v6974_v58  ;;  %v7158_v59 = vmul.f32 %v3242_v41, %v4621_v50  ;;  %v3213_v58 = vrot.slane %v3209_v33, 5  ;;  %v9192_v33 = vld [vmem:[#allocation60_spill] sm:$0xff] }
 0x29b   : > { %9185 = vst [vmem:[#allocation55_spill] sm:$0xff] %v7130_v55  ;;  %v7141_v23 = vsel %vm2903_vm6, %v3179_v34, %v9186_v56  ;;  %v3196_v34 = vrot.slane %v3192_v51, 5  ;;  %v3243_v56 = vmul.f32 %v3242_v41, %v4613_v45  ;;  %v3259_v46 = vstv %s7080_s8  ;;  %v9197_v55 = vld [vmem:[#allocation61_spill] sm:$0xff]  ;;  %s7849_s8 = sld [smem:[#allocation2 + $0xeb]] }
 0x29c   : > { %3099 = vrot.lane.b32.xlu1 %v9188_v47, %s8782_s1  ;;  %v7169_v47 = vadd.f32 %v9189_v57, %v6978_v20  ;;  %v7171_v1 = vpop.permute.xlu1 %2309  ;;  %v7173_v51 = vpop.permute.xlu0 %2324  ;;  %v3230_v41 = vrot.slane %v3226_v15, 5  ;;  %v3276_v7 = vstv %s7089_s16  ;;  %v7181_v42 = vadd.f32 %v9192_v33, %v7024_v8  ;;  %3131 = vrot.lane.b32.xlu0 %v6937_v24, %s8782_s1  ;;  %v9201_v24 = vld [vmem:[#allocation62_spill] sm:$0xff]  ;;  %s7913_s16 = sld [smem:[#allocation2 + $0xbb]] }
 0x29d   : > { %9190 = vst [vmem:[#allocation56_spill] sm:$0xff] %v7171_v1  ;;  %9191 = vst [vmem:[#allocation57_spill] sm:$0xff] %v7173_v51  ;;  %v9193_v63 = vrot.slane %v7092_v48, 4  ;;  %v9195_v57 = vrot.slane %v7096_v21, 4  ;;  %v7194_v15 = vmul.f32 %v3259_v46, %v4572_v14  ;;  %v7198_v22 = vadd.f32 %v9197_v55, %v7028_v39 }
 0x29e   : > { %v9198_v8 = vrot.slane %v6833_v36, 5  ;;  %v9199_v33 = vrot.slane %v7114_v6, 5  ;;  %v9200_v39 = vrot.slane %v7118_v61, 5  ;;  %v3277_v55 = vmul.f32 %v3276_v7, %v4566_v9 }
 0x29f   : > { %v7186_v20 = vsel %vm2338_vm5, %v2430_v0, %v9193_v63  ;;  %v7191_v1 = vsel %vm2338_vm5, %v2482_v13, %v9195_v57  ;;  %v3247_v0 = vrot.slane %v3243_v56, 5  ;;  %v3260_v13 = vmul.f32 %v3259_v46, %v4566_v9  ;;  %v9202_v46 = vld [vmem:[#allocation63_spill] sm:$0xff] }
 0x2a0   : > { %9194 = vst [vmem:[#allocation58_spill] sm:$0xff] %v7186_v20  ;;  %9196 = vst [vmem:[#allocation59_spill] sm:$0xff] %v7191_v1  ;;  %3116 = vrot.lane.b32.xlu1 %v9198_v8, %s8782_s1  ;;  %v7210_v57 = vsel %vm2903_vm6, %v3196_v34, %v9199_v33  ;;  %v7215_v36 = vsel %vm2903_vm6, %v3213_v58, %v9200_v39  ;;  %v3293_v8 = vstv %s7121_s20  ;;  %v7229_v34 = vpop.permute.xlu1 %2326  ;;  %v7231_v33 = vpop.permute.xlu0 %2498  ;;  %v9205_v58 = vrot.slane %v7134_v25, 5  ;;  %s7951_s20 = sld [smem:[#allocation2 + $0xbf]] }
 0x2a1   : > { %v7223_v56 = vadd.f32 %v9201_v24, %v7040_v3  ;;  %v7227_v63 = vadd.f32 %v9202_v46, %v7055_v2  ;;  %9203 = vst [vmem:[#allocation60_spill] sm:$0xff] %v7229_v34  ;;  %9204 = vst [vmem:[#allocation61_spill] sm:$0xff] %v7231_v33  ;;  %v3327_v21 = vstv %s7136_s22  ;;  %v7241_v3 = vmul.f32 %v3276_v7, %v4572_v14  ;;  %s8015_s22 = sld [smem:[#allocation2 + $0xec]] }
 0x2a2   : > { %v7236_v39 = vsel %vm2903_vm6, %v3230_v41, %v9205_v58  ;;  %v7244_v24 = vmul.f32 %v3293_v8, %v4572_v14  ;;  %v3344_v2 = vstv %s7145_s24  ;;  %v9206_v46 = vrot.slane %v6847_v35, 5  ;;  %3148 = vrot.lane.b32.xlu0 %v7045_v44, %s8782_s1  ;;  %s8078_s24 = sld [smem:[#allocation2 + $0xed]] }
 0x2a3   : > { %v9207_v41 = vrot.slane %v7158_v59, 5  ;;  %v3264_v48 = vrot.slane %v3260_v13, 5  ;;  %v3294_v7 = vmul.f32 %v3293_v8, %v4566_v9  ;;  %v3310_v34 = vstv %s7160_s28  ;;  %s8084_s28 = sld [smem:[#allocation2 + $0xee]] }
 0x2a4   : > { %3133 = vrot.lane.b32.xlu1 %v9206_v46, %s8782_s1  ;;  %v3281_v33 = vrot.slane %v3277_v55, 5  ;;  %v7260_v1 = vmul.f32 %v3310_v34, %v4572_v14  ;;  %v3328_v35 = vmul.f32 %v3327_v21, %v4589_v27  ;;  %v3361_v46 = vstv %s7165_s6  ;;  %v7266_v20 = vpop.permute.xlu1 %2500  ;;  %v7268_v44 = vpop.permute.xlu0 %2515  ;;  %s8107_s6 = sld [smem:[#allocation2 + $0xef]] }
 0x2a5   : > { %v7255_v58 = vsel %vm2903_vm6, %v3247_v0, %v9207_v41  ;;  %9208 = vst [vmem:[#allocation62_spill] sm:$0xff] %v7266_v20  ;;  %9209 = vst [vmem:[#allocation63_spill] sm:$0xff] %v7268_v44  ;;  %v7271_v0 = vmul.f32 %v3327_v21, %v4597_v31  ;;  %v3345_v13 = vmul.f32 %v3344_v2, %v4589_v27  ;;  %v3378_v55 = vstv %s7177_s5  ;;  %s8200_s5 = sld [smem:[#allocation2 + $0xf0]] }
 0x2a6   : > { %v7275_v8 = vmul.f32 %v3344_v2, %v4597_v31  ;;  %v9211_v41 = vrot.slane %v7194_v15, 5  ;;  %v3311_v21 = vmul.f32 %v3310_v34, %v4566_v9  ;;  %v9212_v2 = vld [vmem:[#allocation64_spill] sm:$0xff]  ;;  %v9213_v51 = vrot.slane %v6949_v5, 5  ;;  %3165 = vrot.lane.b32.xlu0 %v7070_v54, %s8782_s1 }
 0x2a7   : > { %v7292_v11 = vadd.f32 %v9212_v2, %v7101_v10  ;;  %v7301_v44 = vmul.f32 %v3361_v46, %v4597_v31  ;;  %v3379_v20 = vmul.f32 %v3378_v55, %v4589_v27  ;;  %v7306_v10 = vmul.f32 %v3378_v55, %v4597_v31 }
 0x2a8   : > { %9210 = vst [vmem:[#allocation198_spill] sm:$0xff] %v7275_v8  ;;  %v7283_v43 = vsel %vm2903_vm6, %v3264_v48, %v9211_v41  ;;  %3150 = vrot.lane.b32.xlu1 %v9213_v51, %s8782_s1  ;;  %v3298_v48 = vrot.slane %v3294_v7, 5  ;;  %v3362_v41 = vmul.f32 %v3361_v46, %v4589_v27  ;;  %v3395_v2 = vstv %s7219_s29  ;;  %v7309_v18 = vpop.permute.xlu1 %2517  ;;  %v7311_v5 = vpop.permute.xlu0 %2532  ;;  %v9218_v46 = vld [vmem:[#allocation65_spill] sm:$0xff]  ;;  %s8227_s29 = sld [smem:[#allocation2 + $0xf1]] }
 0x2a9   : > { %9214 = vst [vmem:[#allocation64_spill] sm:$0xff] %v7301_v44  ;;  %9215 = vst [vmem:[#allocation199_spill] sm:$0xff] %v7306_v10  ;;  %v3332_v51 = vrot.slane %v3328_v35, 5  ;;  %v3349_v7 = vrot.slane %v3345_v13, 5  ;;  %v7319_v34 = vadd.f32 %v9218_v46, %v7105_v49  ;;  %v9219_v55 = vrot.slane %v7241_v3, 5 }
 0x2aa   : > { %9216 = vst [vmem:[#allocation200_spill] sm:$0xff] %v7309_v18  ;;  %9217 = vst [vmem:[#allocation201_spill] sm:$0xff] %v7311_v5  ;;  %v9220_v18 = vrot.slane %v7244_v24, 5  ;;  %v3315_v13 = vrot.slane %v3311_v21, 5  ;;  %v7335_v54 = vadd.f32 %v9221_v40, %v7149_v12  ;;  %v9222_v49 = vrot.slane %v6968_v17, 5  ;;  %3182 = vrot.lane.b32.xlu0 %v7141_v23, %s8782_s1 }
 0x2ab   : > { %v7324_v19 = vsel %vm2903_vm6, %v3281_v33, %v9219_v55  ;;  %v3366_v33 = vrot.slane %v3362_v41, 5  ;;  %v3383_v21 = vrot.slane %v3379_v20, 5  ;;  %v7348_v12 = vmul.f32 %v3395_v2, %v4621_v50 }
 0x2ac   : > { %v7329_v35 = vsel %vm2903_vm6, %v3298_v48, %v9220_v18  ;;  %3167 = vrot.lane.b32.xlu1 %v9222_v49, %s8782_s1  ;;  %v3396_v18 = vmul.f32 %v3395_v2, %v4613_v45  ;;  %v3412_v17 = vstv %s7264_s7  ;;  %v9224_v48 = vld [vmem:[#allocation67_spill] sm:$0xff]  ;;  %v7353_v23 = vpop.permute.xlu1 %2534  ;;  %v7355_v41 = vpop.permute.xlu0 %2549  ;;  %v9227_v49 = vrot.slane %v7260_v1, 5  ;;  %s8261_s7 = sld [smem:[#allocation2 + $0xf2]] }
 0x2ad   : > { %9223 = vst [vmem:[#allocation65_spill] sm:$0xff] %v7348_v12  ;;  %v1064_v55 = vadd.f32 %v9224_v48, %v7169_v47  ;;  %9225 = vst [vmem:[#allocation66_spill] sm:$0xff] %v7353_v23  ;;  %v9228_v20 = vrot.slane %v7271_v0, 5  ;;  %v9229_v2 = vrot.slane %v7275_v8, 5  ;;  %v9230_v47 = vld [vmem:[#allocation69_spill] sm:$0xff]  ;;  %v9231_v23 = vld [vmem:[#allocation70_spill] sm:$0xff]  ;;  %v3429_v26 = vstv %s7278_s9 }
 0x2ae   : > { %9226 = vst [vmem:[#allocation67_spill] sm:$0xff] %v7355_v41  ;;  %v7360_v46 = vsel %vm2903_vm6, %v3315_v13, %v9227_v49  ;;  %v7374_v48 = vadd.f32 %v9230_v47, %v7181_v42  ;;  %v1081_v41 = vadd.f32 %v9231_v23, %v7198_v22  ;;  %v3446_v13 = vstv %s7288_s11  ;;  %3199 = vrot.lane.b32.xlu0 %v7210_v57, %s8782_s1  ;;  %v9235_v23 = vld [vmem:[#allocation71_spill] sm:$0xff]  ;;  %s8278_s9 = sld [smem:[#allocation2 + $0xf3]] }
 0x2af   : > { %v7365_v40 = vsel %vm2903_vm6, %v3332_v51, %v9228_v20  ;;  %v7370_v5 = vsel %vm2903_vm6, %v3349_v7, %v9229_v2  ;;  %v9232_v49 = vrot.slane %v7036_v32, 5  ;;  %v9233_v51 = vrot.slane %v7301_v44, 5  ;;  %s8294_s11 = sld [smem:[#allocation2 + $0xf4]] }
 0x2b0   : > { %v3413_v42 = vmul.f32 %v3412_v17, %v4613_v45  ;;  %v7392_v22 = vmul.f32 %v3412_v17, %v4621_v50  ;;  %v7396_v20 = vadd.f32 %v9235_v23, %v7223_v56  ;;  %v9236_v32 = vrot.slane %v7306_v10, 5 }
 0x2b1   : > { %3184 = vrot.lane.b32.xlu1 %v9232_v49, %s8782_s1  ;;  %v7388_v7 = vsel %vm2903_vm6, %v3366_v33, %v9233_v51  ;;  %v3400_v57 = vrot.slane %v3396_v18, 5  ;;  %v7406_v33 = vpop.permute.xlu1 %2551  ;;  %v7408_v49 = vpop.permute.xlu0 %2566  ;;  %v3430_v17 = vmul.f32 %v3429_v26, %v4613_v45  ;;  %v7412_v56 = vmul.f32 %v3429_v26, %v4621_v50 }
 0x2b2   : > { %9234 = vst [vmem:[#allocation69_spill] sm:$0xff] %v7388_v7  ;;  %v7401_v2 = vsel %vm2903_vm6, %v3383_v21, %v9236_v32  ;;  %9238 = vst [vmem:[#allocation71_spill] sm:$0xff] %v7406_v33  ;;  %v3447_v51 = vmul.f32 %v3446_v13, %v4613_v45  ;;  %v3620_v23 = vstv %s7315_s14  ;;  %v9240_v21 = vld [vmem:[#allocation72_spill] sm:$0xff]  ;;  %v7421_v32 = vmul.f32 %v3446_v13, %v4621_v50  ;;  %s8308_s14 = sld [smem:[#allocation2 + $0xf5]] }
 0x2b3   : > { %9237 = vst [vmem:[#allocation70_spill] sm:$0xff] %v7401_v2  ;;  %9239 = vst [vmem:[#allocation202_spill] sm:$0xff] %v7408_v49  ;;  %v7418_v18 = vadd.f32 %v9240_v21, %v7227_v63  ;;  %v7424_v47 = vmul.f32 %v3620_v23, %v4572_v14  ;;  %v2898_v33 = vstv %s7331_s15  ;;  %v9242_v26 = vrot.slane %v7114_v6, 5  ;;  %3216 = vrot.lane.b32.xlu0 %v7215_v36, %s8782_s1  ;;  %s8327_s15 = sld [smem:[#allocation2 + $0xf6]] }
 0x2b4   : > { %v3417_v49 = vrot.slane %v3413_v42, 5  ;;  %v7436_v21 = vmul.f32 %v2898_v33, %v4572_v14  ;;  %v3637_v13 = vstv %s7344_s18  ;;  %v9244_v10 = vrot.slane %v7348_v12, 5  ;;  %s8361_s18 = sld [smem:[#allocation2 + $0xf8]] }
 0x2b5   : > { %9241 = vst [vmem:[#allocation72_spill] sm:$0xff] %v7424_v47  ;;  %3201 = vrot.lane.b32.xlu1 %v9242_v26, %s8782_s1  ;;  %v3621_v6 = vmul.f32 %v3620_v23, %v4566_v9  ;;  %v7448_v26 = vmul.f32 %v3637_v13, %v4572_v14  ;;  %v7452_v36 = vpop.permute.xlu1 %2568  ;;  %v7454_v42 = vpop.permute.xlu0 %2583  ;;  %v3434_v63 = vrot.slane %v3430_v17, 5  ;;  %v8669_v44 = vrot.slane %v7412_v56, 5  ;;  %v9251_v17 = vld [vmem:[#allocation75_spill] sm:$0xff] }
 0x2b6   : > { %9243 = vst [vmem:[#allocation203_spill] sm:$0xff] %v7436_v21  ;;  %v7444_v2 = vsel %vm2903_vm6, %v3400_v57, %v9244_v10  ;;  %9247 = vst [vmem:[#allocation206_spill] sm:$0xff] %v7452_v36  ;;  %v3451_v7 = vrot.slane %v3447_v51, 5  ;;  %v2899_v10 = vmul.f32 %v2898_v33, %v4566_v9  ;;  %v9249_v57 = vld [vmem:[#allocation77_spill] sm:$0xff]  ;;  %v3638_v8 = vmul.f32 %v3637_v13, %v4566_v9  ;;  %v9250_v36 = vld [vmem:[#allocation74_spill] sm:$0xff] }
 0x2b7   : > { %9245 = vst [vmem:[#allocation204_spill] sm:$0xff] %v7444_v2  ;;  %9246 = vst [vmem:[#allocation205_spill] sm:$0xff] %v7448_v26  ;;  %v1132_v12 = vadd.f32 %v9249_v57, %v1064_v55  ;;  %v1115_v51 = vadd.f32 %v9251_v17, %v7319_v34  ;;  %v9252_v33 = vrot.slane %v7118_v61, 5  ;;  %3233 = vrot.lane.b32.xlu0 %v7236_v39, %s8782_s1  ;;  %v9253_v55 = vrot.slane %v7392_v22, 5  ;;  %v9255_v61 = vld [vmem:[#allocation80_spill] sm:$0xff] }
 0x2b8   : > { %9248 = vst [vmem:[#allocation207_spill] sm:$0xff] %v7454_v42  ;;  %v7466_v42 = vadd.f32 %v9250_v36, %v7292_v11  ;;  %v9254_v11 = vld [vmem:[#allocation87_spill] sm:$0xff]  ;;  %v3625_v2 = vrot.slane %v3621_v6, 6  ;;  %v2912_v17 = vstv %s7404_s21  ;;  %v3642_v34 = vrot.slane %v3638_v8, 6  ;;  %s8371_s21 = sld [smem:[#allocation2 + $0xf9]] }
 0x2b9   : > { %3218 = vrot.lane.b32.xlu1 %v9252_v33, %s8782_s1  ;;  %v7478_v13 = vsel %vm2903_vm6, %v3417_v49, %v9253_v55  ;;  %v1200_v36 = vadd.f32 %v9254_v11, %v1132_v12  ;;  %v1149_v33 = vadd.f32 %v9255_v61, %v1081_v41  ;;  %v7487_v23 = vpop.permute.xlu1 %2585  ;;  %v7489_v39 = vpop.permute.xlu0 %2600  ;;  %v7494_v49 = vsel %vm2903_vm6, %v3434_v63, %v8669_v44  ;;  %v9269_v44 = vld [vmem:[#allocation148_spill] sm:$0xff] }
 0x2ba   : > { %9256 = vst [vmem:[#allocation77_spill] sm:$0xff] %v7487_v23  ;;  %9257 = vst [vmem:[#allocation74_spill] sm:$0xff] %v7489_v39  ;;  %v2904_v12 = vrot.slane %v2899_v10, 5  ;;  %v7497_v6 = vmul.f32 %v2912_v17, %v4572_v14  ;;  %v9259_v55 = vrot.slane %v7421_v32, 5  ;;  %v9260_v41 = vrot.slane %v7424_v47, 6  ;;  %v9262_v23 = vld [vmem:[#allocation76_spill] sm:$0xff] }
 0x2bb   : > { %v3654_v57 = vstv %s7427_s17  ;;  %v7512_v63 = vadd.f32 %v9262_v23, %v7335_v54  ;;  %v9263_v10 = vrot.slane %v7134_v25, 5  ;;  %3250 = vrot.lane.b32.xlu0 %v7255_v58, %s8782_s1  ;;  %v2913_v8 = vmul.f32 %v2912_v17, %v4566_v9  ;;  %s8377_s17 = sld [smem:[#allocation2 + $0xfa]] }
 0x2bc   : > { %9258 = vst [vmem:[#allocation75_spill] sm:$0xff] %v7497_v6  ;;  %v7502_v11 = vsel %vm2903_vm6, %v3451_v7, %v9259_v55  ;;  %v7507_v61 = vsel %vm3468_vm7, %v3625_v2, %v9260_v41  ;;  %v9264_v7 = vrot.slane %v7436_v21, 5  ;;  %v1253_v2 = vadd.f32 %v6015_v52, %v1200_v36  ;;  %v9272_v36 = vld [vmem:[#allocation82_spill] sm:$0xff] }
 0x2bd   : > { %9261 = vst [vmem:[#allocation87_spill] sm:$0xff] %v7507_v61  ;;  %3235 = vrot.lane.b32.xlu1 %v9263_v10, %s8782_s1  ;;  %v9266_v54 = vrot.slane %v7448_v26, 6  ;;  %v2925_v25 = vstv %s7439_s0  ;;  %v3671_v41 = vstv %s7450_s23  ;;  %v9268_v10 = vld [vmem:[#allocation79_spill] sm:$0xff]  ;;  %v1214_v21 = vadd.f32 %v9269_v44, %v1149_v33  ;;  %v7538_v39 = vpop.permute.xlu1 %2602  ;;  %s8389_s0 = sld [smem:[#allocation2 + $0xfb]] }
 0x2be   : > { %v7522_v55 = vsel %vm2903_vm6, %v2904_v12, %v9264_v7  ;;  %v7535_v58 = vadd.f32 %v9268_v10, %v7374_v48  ;;  %9270 = vst [vmem:[#allocation79_spill] sm:$0xff] %v7538_v39  ;;  %v7540_v12 = vpop.permute.xlu0 %2617  ;;  %v3655_v52 = vmul.f32 %v3654_v57, %v4566_v9  ;;  %v9273_v7 = vld [vmem:[#allocation83_spill] sm:$0xff]  ;;  %v7549_v48 = vmul.f32 %v3654_v57, %v4572_v14  ;;  %s8404_s23 = sld [smem:[#allocation2 + $0xd8]] }
 0x2bf   : > { %9265 = vst [vmem:[#allocation80_spill] sm:$0xff] %v7522_v55  ;;  %v7529_v23 = vsel %vm3468_vm7, %v3642_v34, %v9266_v54  ;;  %9271 = vst [vmem:[#allocation148_spill] sm:$0xff] %v7540_v12  ;;  %v1150_v34 = vadd.f32 %v9272_v36, %v7396_v20  ;;  %v1166_v54 = vadd.f32 %v9273_v7, %v7418_v18  ;;  %v2938_v10 = vstv %s7462_s25  ;;  %s8408_s25 = sld [smem:[#allocation2 + $0xd9]] }
 0x2c0   : > { %9267 = vst [vmem:[#allocation76_spill] sm:$0xff] %v7529_v23  ;;  %v9274_v44 = vrot.slane %v7158_v59, 5  ;;  %3267 = vrot.lane.b32.xlu0 %v7283_v43, %s8836_s19  ;;  %v2917_v33 = vrot.slane %v2913_v8, 5  ;;  %v2926_v17 = vmul.f32 %v2925_v25, %v4566_v9  ;;  %v7561_v20 = vmul.f32 %v2925_v25, %v4572_v14  ;;  %v9278_v43 = vld [vmem:[#allocation85_spill] sm:$0xff]  ;;  %v9282_v23 = vld [vmem:[#allocation153_spill] sm:$0xff] }
 0x2c1   : > { %v3672_v18 = vmul.f32 %v3671_v41, %v4566_v9  ;;  %v1305_v57 = vadd.f32 %v6020_v4, %v1253_v2  ;;  %v7566_v36 = vmul.f32 %v3671_v41, %v4572_v14  ;;  %v7569_v7 = vmul.f32 %v2938_v10, %v4572_v14  ;;  %v7574_v55 = vpop.permute.xlu1 %2619  ;;  %v9280_v2 = vld [vmem:[#allocation135_spill] sm:$0xff] }
 0x2c2   : > { %3252 = vrot.lane.b32.xlu1 %v9274_v44, %s8782_s1  ;;  %9275 = vst [vmem:[#allocation82_spill] sm:$0xff] %v7561_v20  ;;  %v3688_v59 = vstv %s7484_s12  ;;  %v9277_v44 = vld [vmem:[#allocation149_spill] sm:$0xff]  ;;  %v1183_v8 = vadd.f32 %v9278_v43, %v1115_v51  ;;  %v7576_v12 = vpop.permute.xlu0 %2634  ;;  %v9279_v25 = vrot.slane %v7497_v6, 5  ;;  %v2939_v4 = vmul.f32 %v2938_v10, %v4566_v9  ;;  %v9285_v43 = vld [vmem:[#allocation156_spill] sm:$0xff]  ;;  %s8412_s12 = sld [smem:[#allocation2 + $0xda]] }
 0x2c3   : > { %9276 = vst [vmem:[#allocation83_spill] sm:$0xff] %v7569_v7  ;;  %v1266_v39 = vadd.f32 %v9277_v44, %v1214_v21  ;;  %v9281_v41 = vrot.slane %v9280_v2, 2  ;;  %v1227_v47 = vadd.f32 %v9282_v23, %v1166_v54  ;;  %v3659_v61 = vrot.slane %v3655_v52, 6  ;;  %v9289_v54 = vld [vmem:[#allocation155_spill] sm:$0xff] }
 0x2c4   : > { %v7581_v26 = vsel %vm2903_vm6, %v2917_v33, %v9279_v25  ;;  %v9283_v51 = vrot.slane %v7194_v15, 5  ;;  %3284 = vrot.lane.b32.xlu0 %v7324_v19, %s8836_s19  ;;  %v2930_v44 = vrot.slane %v2926_v17, 5  ;;  %v3689_v10 = vmul.f32 %v3688_v59, %v4589_v27  ;;  %v9284_v19 = vld [vmem:[#allocation84_spill] sm:$0xff]  ;;  %v9290_v15 = vld [vmem:[#allocation97_spill] sm:$0xff] }
 0x2c5   : > { %v1215_v14 = vadd.f32 %v9281_v41, %v1150_v34  ;;  %v7596_v34 = vmul.f32 %v3688_v59, %v4597_v31  ;;  %v1357_v23 = vadd.f32 %v6103_v29, %v1305_v57  ;;  %v3676_v52 = vrot.slane %v3672_v18, 6  ;;  %v7607_v41 = vpop.permute.xlu1 %2636  ;;  %v9287_v29 = vld [vmem:[#allocation139_spill] sm:$0xff] }
 0x2c6   : > { %3269 = vrot.lane.b32.xlu1 %v9283_v51, %s8836_s19  ;;  %v1167_v17 = vadd.f32 %v9284_v19, %v7466_v42  ;;  %v1240_v25 = vadd.f32 %v9285_v43, %v1183_v8  ;;  %v1318_v2 = vadd.f32 %v6048_v28, %v1266_v39  ;;  %9286 = vst [vmem:[#allocation149_spill] sm:$0xff] %v7607_v41  ;;  %v7609_v59 = vpop.permute.xlu0 %2651  ;;  %v2943_v51 = vrot.slane %v2939_v4, 5  ;;  %v9398_v41 = vld [vmem:[#allocation128_spill] sm:$0xff] }
 0x2c7   : > { %v9288_v18 = vrot.slane %v9287_v29, 2  ;;  %v1279_v33 = vadd.f32 %v9289_v54, %v1227_v47  ;;  %v1425_v21 = vadd.f32 %v9290_v15, %v1357_v23  ;;  %v2951_v6 = vstv %s7552_s3  ;;  %v9296_v54 = vld [vmem:[#allocation106_spill] sm:$0xff]  ;;  %s8417_s3 = sld [smem:[#allocation2 + $0xdc]] }
 0x2c8   : > { %v9291_v42 = vrot.slane %v7241_v3, 5  ;;  %3301 = vrot.lane.b32.xlu0 %v7329_v35, %s8836_s19  ;;  %v9292_v28 = vrot.slane %v7549_v48, 6  ;;  %v3693_v8 = vrot.slane %v3689_v10, 6  ;;  %v8676_v4 = vrot.slane %v7596_v34, 6  ;;  %v9295_v3 = vld [vmem:[#allocation91_spill] sm:$0xff] }
 0x2c9   : > { %v1267_v57 = vadd.f32 %v9288_v18, %v1215_v14  ;;  %v9293_v14 = vrot.slane %v7561_v20, 5  ;;  %v1374_v23 = vadd.f32 %v9295_v3, %v1318_v2  ;;  %v1493_v15 = vadd.f32 %v9296_v54, %v1425_v21  ;;  %v7653_v21 = vpop.permute.xlu1 %2653  ;;  %v9348_v20 = vld [vmem:[#allocation98_spill] sm:$0xff] }
 0x2ca   : > { %3286 = vrot.lane.b32.xlu1 %v9291_v42, %s8836_s19  ;;  %v7626_v39 = vsel %vm3468_vm7, %v3659_v61, %v9292_v28  ;;  %v9297_v35 = vrot.slane %v7566_v36, 6  ;;  %v9298_v61 = vrot.slane %v7569_v7, 5  ;;  %v1292_v18 = vadd.f32 %v6006_v38, %v1240_v25  ;;  %v9301_v42 = vld [vmem:[#allocation90_spill] sm:$0xff]  ;;  %9302 = vst [vmem:[#allocation135_spill] sm:$0xff] %v7653_v21  ;;  %v7655_v28 = vpop.permute.xlu0 %2668  ;;  %v9305_v38 = vld [vmem:[#allocation129_spill] sm:$0xff]  ;;  %v9366_v7 = vld [vmem:[#allocation132_spill] sm:$0xff] }
 0x2cb   : > { %v7631_v47 = vsel %vm2903_vm6, %v2930_v44, %v9293_v14  ;;  %v9299_v44 = vld [vmem:[#allocation143_spill] sm:$0xff]  ;;  %v1201_v2 = vadd.f32 %v9301_v42, %v7535_v58  ;;  %v9303_v14 = vrot.slane %v5975_v37, 2  ;;  %v1331_v3 = vadd.f32 %v6076_v53, %v1279_v33  ;;  %v9306_v58 = vld [vmem:[#allocation86_spill] sm:$0xff]  ;;  %v9309_v33 = vld [vmem:[#allocation93_spill] sm:$0xff] }
 0x2cc   : > { %9294 = vst [vmem:[#allocation85_spill] sm:$0xff] %v7631_v47  ;;  %v7641_v19 = vsel %vm3468_vm7, %v3676_v52, %v9297_v35  ;;  %v7646_v43 = vsel %vm2903_vm6, %v2943_v51, %v9298_v61  ;;  %v9300_v10 = vrot.slane %v9299_v44, 2  ;;  %v7658_v52 = vmul.f32 %v2951_v6, %v4589_v27  ;;  %3318 = vrot.lane.b32.xlu0 %v7360_v46, %s8836_s19 }
 0x2cd   : > { %v7662_v51 = vadd.f32 %v9303_v14, %v1267_v57  ;;  %v1561_v25 = vadd.f32 %v9305_v38, %v1493_v15  ;;  %v1184_v35 = vadd.f32 %v9306_v58, %v7512_v63  ;;  %v9307_v61 = vrot.slane %v7244_v24, 5  ;;  %v9311_v15 = vld [vmem:[#allocation151_spill] sm:$0xff]  ;;  %v7691_v38 = vpop.permute.xlu1 %2670  ;;  %v9317_v58 = vld [vmem:[#allocation133_spill] sm:$0xff] }
 0x2ce   : > { %v1228_v29 = vadd.f32 %v9300_v10, %v1167_v17  ;;  %v9304_v17 = vld [vmem:[#allocation99_spill] sm:$0xff]  ;;  %v7677_v37 = vsel %vm3468_vm7, %v3693_v8, %v8676_v4  ;;  %v7680_v53 = vmul.f32 %v2951_v6, %v4597_v31  ;;  %v1391_v57 = vadd.f32 %v9309_v33, %v1331_v3  ;;  %v9312_v10 = vld [vmem:[#allocation144_spill] sm:$0xff]  ;;  %9315 = vst [vmem:[#allocation84_spill] sm:$0xff] %v7691_v38  ;;  %v7693_v6 = vpop.permute.xlu0 %2685 }
 0x2cf   : > { %v1442_v54 = vadd.f32 %v9304_v17, %v1374_v23  ;;  %3303 = vrot.lane.b32.xlu1 %v9307_v61, %s8836_s19  ;;  %v9310_v23 = vld [vmem:[#allocation112_spill] sm:$0xff]  ;;  %v1629_v44 = vadd.f32 %v9311_v15, %v1561_v25  ;;  %v3003_v24 = vstv %s7601_s26  ;;  %v9313_v42 = vrot.slane %v9312_v10, 2  ;;  %v9324_v10 = vld [vmem:[#allocation158_spill] sm:$0xff]  ;;  %s8419_s26 = sld [smem:[#allocation2 + $0xe0]] }
 0x2d0   : > { %9308 = vst [vmem:[#allocation153_spill] sm:$0xff] %v7680_v53  ;;  %v9314_v46 = vrot.slane %v5936_v62, 2  ;;  %v1344_v8 = vadd.f32 %v6096_v16, %v1292_v18  ;;  %v2956_v3 = vrot.slane %v7658_v52, 5  ;;  %v3705_v33 = vstv %s7616_s27  ;;  %v9318_v62 = vld [vmem:[#allocation145_spill] sm:$0xff]  ;;  %3335 = vrot.lane.b32.xlu0 %v7365_v40, %s8836_s19  ;;  %s8422_s27 = sld [smem:[#allocation2 + $0xdb]] }
 0x2d1   : > { %v1510_v63 = vadd.f32 %v9310_v23, %v1442_v54  ;;  %v1280_v14 = vadd.f32 %v9313_v42, %v1228_v29  ;;  %v9316_v54 = vld [vmem:[#allocation101_spill] sm:$0xff]  ;;  %v1697_v29 = vadd.f32 %v6064_v60, %v1629_v44  ;;  %v9319_v23 = vrot.slane %v9318_v62, 2  ;;  %v9323_v60 = vld [vmem:[#allocation116_spill] sm:$0xff]  ;;  %v9342_v62 = vld [vmem:[#allocation147_spill] sm:$0xff] }
 0x2d2   : > { %v1254_v17 = vadd.f32 %v9314_v46, %v1201_v2  ;;  %v1459_v25 = vadd.f32 %v9316_v54, %v1391_v57  ;;  %v9320_v16 = vrot.slane %v7260_v1, 5  ;;  %v3004_v18 = vmul.f32 %v3003_v24, %v4613_v45  ;;  %v9325_v46 = vld [vmem:[#allocation154_spill] sm:$0xff]  ;;  %v7722_v40 = vpop.permute.xlu0 %2702 }
 0x2d3   : > { %v1578_v61 = vadd.f32 %v9317_v58, %v1510_v63  ;;  %v1241_v2 = vadd.f32 %v9319_v23, %v1184_v35  ;;  %v7711_v52 = vmul.f32 %v3003_v24, %v4621_v50  ;;  %v2964_v57 = vstv %s7634_s2  ;;  %v9322_v63 = vld [vmem:[#allocation95_spill] sm:$0xff]  ;;  %v7720_v58 = vpop.permute.xlu1 %2687  ;;  %s8430_s2 = sld [smem:[#allocation2 + $0xdd]] }
 0x2d4   : > { %3320 = vrot.lane.b32.xlu1 %v9320_v16, %s8836_s19  ;;  %v1408_v15 = vadd.f32 %v9322_v63, %v1344_v8  ;;  %v1527_v44 = vadd.f32 %v9323_v60, %v1459_v25  ;;  %v1765_v35 = vadd.f32 %v6209_v30, %v1697_v29  ;;  %v9326_v1 = vrot.slane %v9325_v46, 2  ;;  %v9327_v8 = vld [vmem:[#allocation159_spill] sm:$0xff]  ;;  %v9330_v16 = vld [vmem:[#allocation141_spill] sm:$0xff]  ;;  %v9331_v63 = vld [vmem:[#allocation168_spill] sm:$0xff]  ;;  %3352 = vrot.lane.b32.xlu0 %v7370_v5, %s8836_s19 }
 0x2d5   : > { %9321 = vst [vmem:[#allocation156_spill] sm:$0xff] %v7711_v52  ;;  %v1646_v42 = vadd.f32 %v9324_v10, %v1578_v61  ;;  %v3706_v24 = vmul.f32 %v3705_v33, %v4589_v27  ;;  %v7727_v23 = vmul.f32 %v3705_v33, %v4597_v31  ;;  %v9328_v25 = vrot.slane %v9327_v8, 2  ;;  %v9329_v30 = vld [vmem:[#allocation103_spill] sm:$0xff]  ;;  %v9332_v10 = vld [vmem:[#allocation152_spill] sm:$0xff]  ;;  %v9336_v8 = vld [vmem:[#allocation161_spill] sm:$0xff] }
 0x2d6   : > { %v1306_v54 = vadd.f32 %v9326_v1, %v1254_v17  ;;  %v1476_v29 = vadd.f32 %v9329_v30, %v1408_v15  ;;  %v1595_v17 = vadd.f32 %v9330_v16, %v1527_v44  ;;  %v9333_v46 = vrot.slane %v9332_v10, 2  ;;  %v9335_v44 = vld [vmem:[#allocation123_spill] sm:$0xff] }
 0x2d7   : > { %v1332_v61 = vadd.f32 %v9328_v25, %v1280_v14  ;;  %v1714_v60 = vadd.f32 %v9331_v63, %v1646_v42  ;;  %v9334_v4 = vrot.slane %v7271_v0, 5  ;;  %v3008_v33 = vrot.slane %v3004_v18, 5  ;;  %v7755_v5 = vpop.permute.xlu1 %2704  ;;  %v7757_v18 = vpop.permute.xlu0 %2719 }
 0x2d8   : > { %v1293_v1 = vadd.f32 %v9333_v46, %v1241_v2  ;;  %v2965_v15 = vmul.f32 %v2964_v57, %v4589_v27  ;;  %v1544_v42 = vadd.f32 %v9335_v44, %v1476_v29  ;;  %v1663_v25 = vadd.f32 %v9336_v8, %v1595_v17  ;;  %v9337_v2 = vld [vmem:[#allocation14_spill] sm:$0xff]  ;;  %9341 = vst [vmem:[#allocation155_spill] sm:$0xff] %v7755_v5  ;;  %v9343_v44 = vld [vmem:[#allocation11_spill] sm:$0xff]  ;;  %v9344_v8 = vld [vmem:[#allocation170_spill] sm:$0xff] }
 0x2d9   : > { %3337 = vrot.lane.b32.xlu1 %v9334_v4, %s8836_s19  ;;  %v1818_v30 = vadd.f32 %v9337_v2, %v1765_v35  ;;  %v7751_v0 = vmul.f32 %v2964_v57, %v4597_v31  ;;  %v9339_v4 = vld [vmem:[#allocation163_spill] sm:$0xff]  ;;  %v3710_v10 = vrot.slane %v3706_v24, 6  ;;  %v3016_v14 = vstv %s7696_s30  ;;  %v9349_v46 = vld [vmem:[#allocation198_spill] sm:$0xff]  ;;  %s8446_s30 = sld [smem:[#allocation2 + $0xe1]] }
 0x2da   : > { %v9340_v16 = vrot.slane %v9339_v4, 2  ;;  %v1612_v29 = vadd.f32 %v9342_v62, %v1544_v42  ;;  %v1779_v17 = vadd.f32 %v9343_v44, %v1714_v60  ;;  %v1731_v35 = vadd.f32 %v9344_v8, %v1663_v25  ;;  %v9351_v62 = vld [vmem:[#allocation69_spill] sm:$0xff]  ;;  %v9354_v25 = vld [vmem:[#allocation165_spill] sm:$0xff]  ;;  %v9381_v5 = vld [vmem:[#allocation187_spill] sm:$0xff] }
 0x2db   : > { %9338 = vst [vmem:[#allocation139_spill] sm:$0xff] %v7751_v0  ;;  %v9345_v57 = vrot.slane %v7680_v53, 5  ;;  %v9350_v9 = vrot.slane %v9349_v46, 5  ;;  %3369 = vrot.lane.b32.xlu0 %v9351_v62, %s8836_s19  ;;  %v9352_v60 = vrot.slane %v7711_v52, 5  ;;  %v9355_v8 = vld [vmem:[#allocation23_spill] sm:$0xff]  ;;  %v9357_v46 = vld [vmem:[#allocation111_spill] sm:$0xff] }
 0x2dc   : > { %v1358_v63 = vadd.f32 %v9340_v16, %v1306_v54  ;;  %v9346_v54 = vld [vmem:[#allocation162_spill] sm:$0xff]  ;;  %v1680_v44 = vadd.f32 %v9354_v25, %v1612_v29  ;;  %v9361_v25 = vld [vmem:[#allocation173_spill] sm:$0xff] }
 0x2dd   : > { %v7767_v2 = vsel %vm2903_vm6, %v2956_v3, %v9345_v57  ;;  %v9347_v4 = vrot.slane %v9346_v54, 2  ;;  %3354 = vrot.lane.b32.xlu1 %v9350_v9, %s8836_s19  ;;  %v7780_v42 = vsel %vm2903_vm6, %v3008_v33, %v9352_v60  ;;  %v2969_v3 = vrot.slane %v2965_v15, 5  ;;  %v9356_v9 = vld [vmem:[#allocation92_spill] sm:$0xff]  ;;  %v7793_v33 = vpop.permute.xlu0 %2736  ;;  %v9360_v62 = vld [vmem:[#allocation12_spill] sm:$0xff] }
 0x2de   : > { %v1426_v24 = vadd.f32 %v9348_v20, %v1358_v63  ;;  %9353 = vst [vmem:[#allocation97_spill] sm:$0xff] %v7780_v42  ;;  %v1870_v57 = vadd.f32 %v9355_v8, %v1818_v30  ;;  %v7786_v20 = vmul.f32 %v3016_v14, %v4613_v45  ;;  %v1375_v63 = vadd.f32 %v9356_v9, %v7662_v51  ;;  %v9382_v42 = vld [vmem:[#allocation122_spill] sm:$0xff] }
 0x2df   : > { %v1345_v16 = vadd.f32 %v9347_v4, %v1293_v1  ;;  %v7791_v4 = vpop.permute.xlu1 %2721  ;;  %v9359_v15 = vrot.slane %v7727_v23, 6  ;;  %v3722_v30 = vstv %s7729_s4  ;;  %v1792_v60 = vadd.f32 %v9360_v62, %v1731_v35  ;;  %v9362_v1 = vld [vmem:[#allocation17_spill] sm:$0xff]  ;;  %s8453_s4 = sld [smem:[#allocation2 + $0xde]] }
 0x2e0   : > { %v1494_v54 = vadd.f32 %v9357_v46, %v1426_v24  ;;  %9358 = vst [vmem:[#allocation91_spill] sm:$0xff] %v7791_v4  ;;  %v1748_v8 = vadd.f32 %v9361_v25, %v1680_v44  ;;  %v1831_v52 = vadd.f32 %v9362_v1, %v1779_v17  ;;  %v7805_v51 = vmul.f32 %v3016_v14, %v4621_v50  ;;  %v9364_v24 = vld [vmem:[#allocation94_spill] sm:$0xff]  ;;  %v9365_v46 = vld [vmem:[#allocation100_spill] sm:$0xff]  ;;  %v9370_v17 = vld [vmem:[#allocation29_spill] sm:$0xff] }
 0x2e1   : > { %v7798_v29 = vsel %vm3468_vm7, %v3710_v10, %v9359_v15  ;;  %v1392_v9 = vadd.f32 %v9364_v24, %v1332_v61  ;;  %v1443_v53 = vadd.f32 %v9365_v46, %v1375_v63  ;;  %v9367_v4 = vld [vmem:[#allocation64_spill] sm:$0xff]  ;;  %v9369_v15 = vld [vmem:[#allocation70_spill] sm:$0xff]  ;;  %v2977_v35 = vstv %s7745_s10  ;;  %v9373_v63 = vld [vmem:[#allocation96_spill] sm:$0xff]  ;;  %s8473_s10 = sld [smem:[#allocation2 + $0xdf]] }
 0x2e2   : > { %9363 = vst [vmem:[#allocation106_spill] sm:$0xff] %v7805_v51  ;;  %v1562_v38 = vadd.f32 %v9366_v7, %v1494_v54  ;;  %v9368_v10 = vrot.slane %v9367_v4, 5  ;;  %3386 = vrot.lane.b32.xlu0 %v9369_v15, %s8836_s19  ;;  %v1922_v44 = vadd.f32 %v9370_v17, %v1870_v57  ;;  %v9371_v14 = vrot.slane %v7751_v0, 5  ;;  %v9374_v4 = vld [vmem:[#allocation102_spill] sm:$0xff]  ;;  %v9375_v25 = vld [vmem:[#allocation115_spill] sm:$0xff]  ;;  %v9376_v46 = vld [vmem:[#allocation157_spill] sm:$0xff]  ;;  %v7834_v57 = vpop.permute.xlu0 %2753 }
 0x2e3   : > { %v3021_v1 = vrot.slane %v7786_v20, 5  ;;  %v7826_v7 = vmul.f32 %v3722_v30, %v4589_v27  ;;  %v1409_v54 = vadd.f32 %v9373_v63, %v1345_v16  ;;  %v1460_v62 = vadd.f32 %v9374_v4, %v1392_v9  ;;  %v7832_v15 = vpop.permute.xlu1 %2738  ;;  %v9378_v17 = vld [vmem:[#allocation13_spill] sm:$0xff]  ;;  %v9380_v20 = vld [vmem:[#allocation20_spill] sm:$0xff]  ;;  %v9383_v63 = vld [vmem:[#allocation140_spill] sm:$0xff] }
 0x2e4   : > { %3371 = vrot.lane.b32.xlu1 %v9368_v10, %s8836_s19  ;;  %v7822_v61 = vsel %vm2903_vm6, %v2969_v3, %v9371_v14  ;;  %v1511_v24 = vadd.f32 %v9375_v25, %v1443_v53  ;;  %v1630_v10 = vadd.f32 %v9376_v46, %v1562_v38  ;;  %9377 = vst [vmem:[#allocation90_spill] sm:$0xff] %v7832_v15  ;;  %v9379_v14 = vld [vmem:[#allocation18_spill] sm:$0xff]  ;;  %v9384_v4 = vld [vmem:[#allocation167_spill] sm:$0xff] }
 0x2e5   : > { %9372 = vst [vmem:[#allocation143_spill] sm:$0xff] %v7822_v61  ;;  %v1805_v3 = vadd.f32 %v9378_v17, %v1748_v8  ;;  %v1883_v0 = vadd.f32 %v9379_v14, %v1831_v52  ;;  %v1844_v21 = vadd.f32 %v9380_v20, %v1792_v60  ;;  %v1990_v61 = vadd.f32 %v9381_v5, %v1922_v44  ;;  %v9385_v38 = vld [vmem:[#allocation199_spill] sm:$0xff]  ;;  %v9387_v46 = vld [vmem:[#allocation204_spill] sm:$0xff]  ;;  %v9391_v17 = vld [vmem:[#allocation146_spill] sm:$0xff] }
 0x2e6   : > { %v1528_v16 = vadd.f32 %v9382_v42, %v1460_v62  ;;  %v1579_v9 = vadd.f32 %v9383_v63, %v1511_v24  ;;  %v1698_v53 = vadd.f32 %v9384_v4, %v1630_v10  ;;  %v9386_v25 = vrot.slane %v9385_v38, 5  ;;  %3403 = vrot.lane.b32.xlu0 %v9387_v46, %s8836_s19  ;;  %v9388_v52 = vld [vmem:[#allocation180_spill] sm:$0xff]  ;;  %v9389_v5 = vld [vmem:[#allocation25_spill] sm:$0xff]  ;;  %v9390_v24 = vld [vmem:[#allocation105_spill] sm:$0xff] }
 0x2e7   : > { %v1939_v60 = vadd.f32 %v9388_v52, %v1883_v0  ;;  %v2058_v44 = vadd.f32 %v9389_v5, %v1990_v61  ;;  %v7854_v42 = vmul.f32 %v3722_v30, %v4597_v31  ;;  %v7857_v62 = vmul.f32 %v2977_v35, %v4589_v27  ;;  %v9392_v20 = vld [vmem:[#allocation160_spill] sm:$0xff]  ;;  %v9393_v4 = vld [vmem:[#allocation178_spill] sm:$0xff]  ;;  %v7865_v0 = vpop.permute.xlu0 %2770  ;;  %v9395_v30 = vld [vmem:[#allocation21_spill] sm:$0xff] }
 0x2e8   : > { %3388 = vrot.lane.b32.xlu1 %v9386_v25, %s8836_s19  ;;  %v1477_v10 = vadd.f32 %v9390_v24, %v1409_v54  ;;  %v1596_v14 = vadd.f32 %v9391_v17, %v1528_v16  ;;  %v1647_v63 = vadd.f32 %v9392_v20, %v1579_v9  ;;  %v1766_v38 = vadd.f32 %v9393_v4, %v1698_v53  ;;  %v7863_v25 = vpop.permute.xlu1 %2755  ;;  %v9394_v61 = vld [vmem:[#allocation192_spill] sm:$0xff]  ;;  %v9396_v5 = vld [vmem:[#allocation191_spill] sm:$0xff]  ;;  %v9400_v17 = vld [vmem:[#allocation169_spill] sm:$0xff] }
 0x2e9   : > { %v1896_v46 = vadd.f32 %v9394_v61, %v1844_v21  ;;  %v1857_v52 = vadd.f32 %v9395_v30, %v1805_v3  ;;  %v2007_v8 = vadd.f32 %v9396_v5, %v1939_v60  ;;  %v9397_v15 = vld [vmem:[#allocation104_spill] sm:$0xff]  ;;  %v9401_v53 = vld [vmem:[#allocation65_spill] sm:$0xff]  ;;  %v3029_v21 = vstv %s7816_s13  ;;  %v9405_v30 = vld [vmem:[#allocation138_spill] sm:$0xff]  ;;  %s8491_s13 = sld [smem:[#allocation2 + $0xe3]] }
 0x2ea   : > { %v2126_v47 = vadd.f32 %v9397_v15, %v2058_v44  ;;  %v1545_v54 = vadd.f32 %v9398_v41, %v1477_v10  ;;  %v9399_v24 = vld [vmem:[#allocation164_spill] sm:$0xff]  ;;  %v1715_v9 = vadd.f32 %v9400_v17, %v1647_v63  ;;  %v9402_v20 = vrot.slane %v9401_v53, 5  ;;  %3420 = vrot.lane.b32.xlu0 %v7478_v13, %s8836_s19  ;;  %v9403_v4 = vld [vmem:[#allocation183_spill] sm:$0xff]  ;;  %v9408_v10 = vld [vmem:[#allocation150_spill] sm:$0xff] }
 0x2eb   : > { %v1664_v16 = vadd.f32 %v9399_v24, %v1596_v14  ;;  %v1956_v3 = vadd.f32 %v9403_v4, %v1896_v46  ;;  %v9404_v61 = vld [vmem:[#allocation30_spill] sm:$0xff]  ;;  %v9406_v41 = vrot.slane %v7805_v51, 5  ;;  %v9410_v24 = vld [vmem:[#allocation177_spill] sm:$0xff]  ;;  %v7894_v46 = vpop.permute.xlu0 %2787  ;;  %v9414_v4 = vld [vmem:[#allocation195_spill] sm:$0xff] }
 0x2ec   : > { %3405 = vrot.lane.b32.xlu1 %v9402_v20, %s8836_s19  ;;  %v2075_v60 = vadd.f32 %v9404_v61, %v2007_v8  ;;  %v2194_v15 = vadd.f32 %v9405_v30, %v2126_v47  ;;  %v1613_v14 = vadd.f32 %v9408_v10, %v1545_v54  ;;  %v9409_v63 = vld [vmem:[#allocation172_spill] sm:$0xff]  ;;  %v9411_v17 = vrot.slane %v9410_v24, 3  ;;  %v7892_v53 = vpop.permute.xlu1 %2772  ;;  %v9417_v54 = vld [vmem:[#allocation166_spill] sm:$0xff] }
 0x2ed   : > { %v7886_v44 = vsel %vm2903_vm6, %v3021_v1, %v9406_v41  ;;  %v1732_v5 = vadd.f32 %v9409_v63, %v1664_v16  ;;  %9412 = vst [vmem:[#allocation129_spill] sm:$0xff] %v7892_v53  ;;  %v3727_v8 = vrot.slane %v7826_v7, 6  ;;  %v9413_v47 = vld [vmem:[#allocation22_spill] sm:$0xff]  ;;  %v2024_v61 = vadd.f32 %v9414_v4, %v1956_v3  ;;  %v9415_v1 = vld [vmem:[#allocation33_spill] sm:$0xff]  ;;  %v9416_v41 = vld [vmem:[#allocation40_spill] sm:$0xff] }
 0x2ee   : > { %9407 = vst [vmem:[#allocation99_spill] sm:$0xff] %v7886_v44  ;;  %v1819_v13 = vadd.f32 %v9411_v17, %v1766_v38  ;;  %v1909_v20 = vadd.f32 %v9413_v47, %v1857_v52  ;;  %v2143_v30 = vadd.f32 %v9415_v1, %v2075_v60  ;;  %v2262_v51 = vadd.f32 %v9416_v41, %v2194_v15  ;;  %v9418_v16 = vld [vmem:[#allocation171_spill] sm:$0xff]  ;;  %v9422_v3 = vld [vmem:[#allocation16_spill] sm:$0xff]  ;;  %v9423_v15 = vld [vmem:[#allocation27_spill] sm:$0xff] }
 0x2ef   : > { %v1681_v10 = vadd.f32 %v9417_v54, %v1613_v14  ;;  %v9419_v63 = vrot.slane %v9418_v16, 3  ;;  %v9420_v38 = vrot.slane %v7392_v22, 5  ;;  %3437 = vrot.lane.b32.xlu0 %v7494_v49, %s8836_s19  ;;  %v7910_v7 = vmul.f32 %v2977_v35, %v4597_v31  ;;  %v9424_v17 = vld [vmem:[#allocation108_spill] sm:$0xff]  ;;  %v9426_v1 = vld [vmem:[#allocation174_spill] sm:$0xff]  ;;  %v9429_v49 = vld [vmem:[#allocation19_spill] sm:$0xff]  ;;  %v7926_v44 = vpop.permute.xlu0 %2804 }
 0x2f0   : > { %v3739_v52 = vstv %s7849_s8  ;;  %v1973_v60 = vadd.f32 %v9422_v3, %v1909_v20  ;;  %v2092_v14 = vadd.f32 %v9423_v15, %v2024_v61  ;;  %v2211_v47 = vadd.f32 %v9424_v17, %v2143_v30  ;;  %v9428_v54 = vld [vmem:[#allocation176_spill] sm:$0xff]  ;;  %v9432_v61 = vld [vmem:[#allocation197_spill] sm:$0xff]  ;;  %s9595_s8 = smov 1  }
 0x2f1   : > { %v1780_v24 = vadd.f32 %v9419_v63, %v1715_v9  ;;  %3422 = vrot.lane.b32.xlu1 %v9420_v38, %s8836_s19  ;;  %9421 = vst [vmem:[#allocation86_spill] sm:$0xff] %v7910_v7  ;;  %v9425_v9 = vld [vmem:[#allocation57_spill] sm:$0xff]  ;;  %v9427_v22 = vrot.slane %v9426_v1, 3  ;;  %v1749_v16 = vadd.f32 %v9428_v54, %v1681_v10  ;;  %v9430_v63 = vrot.slane %v9429_v49, 3  ;;  %v7924_v38 = vpop.permute.xlu1 %2789  ;;  %v9433_v30 = vld [vmem:[#allocation35_spill] sm:$0xff]  ;;  %v9438_v54 = vld [vmem:[#allocation28_spill] sm:$0xff] }
 0x2f2   : > { %v2330_v4 = vadd.f32 %v9425_v9, %v2262_v51  ;;  %9431 = vst [vmem:[#allocation93_spill] sm:$0xff] %v7924_v38  ;;  %v7929_v20 = vmul.f32 %v3029_v21, %v4613_v45  ;;  %v2041_v3 = vadd.f32 %v9432_v61, %v1973_v60  ;;  %v2160_v15 = vadd.f32 %v9433_v30, %v2092_v14  ;;  %v9434_v51 = vld [vmem:[#allocation45_spill] sm:$0xff]  ;;  %v9440_v61 = vld [vmem:[#allocation137_spill] sm:$0xff] }
 0x2f3   : > { %v1793_v41 = vadd.f32 %v9427_v22, %v1732_v5  ;;  %v1871_v35 = vadd.f32 %v9430_v63, %v1819_v13  ;;  %v2279_v17 = vadd.f32 %v9434_v51, %v2211_v47  ;;  %v9435_v9 = vld [vmem:[#allocation179_spill] sm:$0xff]  ;;  %v9437_v13 = vrot.slane %v7412_v56, 5  ;;  %3454 = vrot.lane.b32.xlu0 %v7502_v11, %s8836_s19 }
 0x2f4   : > { %v9436_v10 = vrot.slane %v9435_v9, 3  ;;  %v2982_v22 = vrot.slane %v7857_v62, 5  ;;  %v3740_v14 = vmul.f32 %v3739_v52, %v4589_v27  ;;  %v2109_v47 = vadd.f32 %v9438_v54, %v2041_v3  ;;  %v9439_v49 = vld [vmem:[#allocation127_spill] sm:$0xff]  ;;  %v9444_v62 = vld [vmem:[#allocation184_spill] sm:$0xff] }
 0x2f5   : > { %3439 = vrot.lane.b32.xlu1 %v9437_v13, %s8836_s19  ;;  %v2228_v63 = vadd.f32 %v9439_v49, %v2160_v15  ;;  %v2383_v30 = vadd.f32 %v9440_v61, %v2330_v4  ;;  %v9442_v56 = vld [vmem:[#allocation175_spill] sm:$0xff]  ;;  %v9445_v9 = vrot.slane %v9444_v62, 3  ;;  %v9446_v13 = vld [vmem:[#allocation193_spill] sm:$0xff]  ;;  %v7959_v3 = vpop.permute.xlu1 %2806  ;;  %v7961_v15 = vpop.permute.xlu0 %2821  ;;  %v7964_v4 = vmul.f32 %v3029_v21, %v4621_v50  ;;  %v9450_v49 = vld [vmem:[#allocation130_spill] sm:$0xff] }
 0x2f6   : > { %v1832_v1 = vadd.f32 %v9436_v10, %v1780_v24  ;;  %v7949_v24 = vmul.f32 %v3739_v52, %v4597_v31  ;;  %v9443_v51 = vrot.slane %v9442_v56, 3  ;;  %v9447_v60 = vrot.slane %v9446_v13, 3  ;;  %9448 = vst [vmem:[#allocation151_spill] sm:$0xff] %v7959_v3  ;;  %v9449_v52 = vld [vmem:[#allocation107_spill] sm:$0xff]  ;;  %v9451_v56 = vld [vmem:[#allocation50_spill] sm:$0xff]  ;;  %v9455_v62 = vld [vmem:[#allocation190_spill] sm:$0xff] }
 0x2f7   : > { %v1845_v10 = vadd.f32 %v9445_v9, %v1793_v41  ;;  %v2177_v54 = vadd.f32 %v9449_v52, %v2109_v47  ;;  %v2344_v61 = vadd.f32 %v9450_v49, %v2279_v17  ;;  %v2296_v38 = vadd.f32 %v9451_v56, %v2228_v63  ;;  %v9457_v47 = vld [vmem:[#allocation87_spill] sm:$0xff]  ;;  %v9461_v49 = vld [vmem:[#allocation58_spill] sm:$0xff] }
 0x2f8   : > { %9441 = vst [vmem:[#allocation112_spill] sm:$0xff] %v7949_v24  ;;  %v1806_v11 = vadd.f32 %v9443_v51, %v1749_v16  ;;  %v1923_v5 = vadd.f32 %v9447_v60, %v1871_v35  ;;  %v9452_v16 = vrot.slane %v7854_v42, 6  ;;  %v9453_v51 = vld [vmem:[#allocation181_spill] sm:$0xff]  ;;  %v9456_v21 = vrot.slane %v7421_v32, 5  ;;  %3628 = vrot.lane.b32.xlu0 %v9457_v47, %s8782_s1 }
 0x2f9   : > { %v9454_v35 = vrot.slane %v9453_v51, 3  ;;  %v9458_v17 = vrot.slane %v7910_v7, 5  ;;  %v2990_v13 = vstv %s7913_s16  ;;  %v2435_v56 = vadd.f32 %v9461_v49, %v2383_v30  ;;  %v9463_v32 = vld [vmem:[#allocation185_spill] sm:$0xff]  ;;  %v9467_v7 = vld [vmem:[#allocation26_spill] sm:$0xff]  ;;  %v9471_v49 = vld [vmem:[#allocation41_spill] sm:$0xff]  ;;  %s9596_s16 = sld [smem:[#allocation6_spill]] }
 0x2fa   : > { %v7972_v41 = vsel %vm3468_vm7, %v3727_v8, %v9452_v16  ;;  %v1991_v9 = vadd.f32 %v9455_v62, %v1923_v5  ;;  %3456 = vrot.lane.b32.xlu1 %v9456_v21, %s8836_s19  ;;  %v9460_v8 = vld [vmem:[#allocation37_spill] sm:$0xff]  ;;  %v9462_v16 = vld [vmem:[#allocation182_spill] sm:$0xff]  ;;  %v9465_v21 = vld [vmem:[#allocation188_spill] sm:$0xff]  ;;  %v2396_v5 = vadd.f32 %v9471_v49, %v2344_v61 }
 0x2fb   : > { %v1884_v60 = vadd.f32 %v9454_v35, %v1832_v1  ;;  %v7985_v63 = vsel %vm2903_vm6, %v2982_v22, %v9458_v17  ;;  %v2245_v52 = vadd.f32 %v9460_v8, %v2177_v54  ;;  %v3744_v1 = vrot.slane %v3740_v14, 6  ;;  %v7997_v22 = vpop.permute.xlu1 %2823  ;;  %v7999_v17 = vpop.permute.xlu0 %2838  ;;  %v9469_v54 = vld [vmem:[#allocation136_spill] sm:$0xff] }
 0x2fc   : > { %9459 = vst [vmem:[#allocation144_spill] sm:$0xff] %v7985_v63  ;;  %v9464_v35 = vrot.slane %v9463_v32, 3  ;;  %v9466_v47 = vrot.slane %v9465_v21, 3  ;;  %v2059_v53 = vadd.f32 %v9467_v7, %v1991_v9  ;;  %9468 = vst [vmem:[#allocation101_spill] sm:$0xff] %v7997_v22  ;;  %v2357_v30 = vadd.f32 %v9469_v54, %v2296_v38  ;;  %v9470_v14 = vld [vmem:[#allocation54_spill] sm:$0xff]  ;;  %v9473_v32 = vld [vmem:[#allocation194_spill] sm:$0xff] }
 0x2fd   : > { %v1940_v51 = vadd.f32 %v9462_v16, %v1884_v60  ;;  %v2313_v8 = vadd.f32 %v9470_v14, %v2245_v52  ;;  %v8005_v60 = vmul.f32 %v2990_v13, %v4589_v27  ;;  %v9475_v9 = vld [vmem:[#allocation72_spill] sm:$0xff]  ;;  %v9479_v52 = vrot.slane %v7949_v24, 6 }
 0x2fe   : > { %v1897_v62 = vadd.f32 %v9464_v35, %v1845_v10  ;;  %v1858_v3 = vadd.f32 %v9466_v47, %v1806_v11  ;;  %v9472_v10 = vld [vmem:[#allocation15_spill] sm:$0xff]  ;;  %v9474_v35 = vld [vmem:[#allocation120_spill] sm:$0xff]  ;;  %v9476_v21 = vrot.slane %v9475_v9, 6 }
 0x2ff   : > { %v2008_v11 = vadd.f32 %v9473_v32, %v1940_v51  ;;  %v2127_v7 = vadd.f32 %v9474_v35, %v2059_v53  ;;  %v9477_v47 = vld [vmem:[#allocation76_spill] sm:$0xff]  ;;  %v9478_v38 = vld [vmem:[#allocation59_spill] sm:$0xff]  ;;  %v8021_v54 = vsel %vm3468_vm7, %v3744_v1, %v9479_v52  ;;  %v8024_v51 = vmul.f32 %v2990_v13, %v4597_v31  ;;  %v8032_v27 = vpop.permute.xlu1 %2840 }
 0x300   : > { %v1957_v16 = vadd.f32 %v9472_v10, %v1897_v62  ;;  %3630 = vrot.lane.b32.xlu1 %v9476_v21, %s8782_s1  ;;  %3645 = vrot.lane.b32.xlu0 %v9477_v47, %s8782_s1  ;;  %v2487_v61 = vadd.f32 %v9478_v38, %v2435_v56  ;;  %v3042_v53 = vstv %s7951_s20  ;;  %v9480_v62 = vld [vmem:[#allocation189_spill] sm:$0xff]  ;;  %v9482_v10 = vld [vmem:[#allocation196_spill] sm:$0xff]  ;;  %v9484_v21 = vld [vmem:[#allocation119_spill] sm:$0xff]  ;;  %9485 = vst [vmem:[#allocation133_spill] sm:$0xff] %v8032_v27  ;;  %v8034_v56 = vpop.permute.xlu0 %2855  ;;  %s4455_s20 = sshll.u32 %s9596_s16, 6 }
 0x301   : > { %v9481_v14 = vrot.slane %v9480_v62, 3  ;;  %v9483_v35 = vld [vmem:[#allocation31_spill] sm:$0xff]  ;;  %v2195_v47 = vadd.f32 %v9484_v21, %v2127_v7  ;;  %v9487_v52 = vld [vmem:[#allocation42_spill] sm:$0xff]  ;;  %v9490_v62 = vld [vmem:[#allocation114_spill] sm:$0xff] }
 0x302   : > { %v2025_v32 = vadd.f32 %v9482_v10, %v1957_v16  ;;  %v2076_v9 = vadd.f32 %v9483_v35, %v2008_v11  ;;  %v9486_v38 = vld [vmem:[#allocation113_spill] sm:$0xff]  ;;  %v2448_v63 = vadd.f32 %v9487_v52, %v2396_v5  ;;  %v9488_v13 = vld [vmem:[#allocation46_spill] sm:$0xff]  ;;  %v9492_v10 = vld [vmem:[#allocation44_spill] sm:$0xff] }
 0x303   : > { %v1910_v49 = vadd.f32 %v9481_v14, %v1858_v3  ;;  %v2370_v1 = vadd.f32 %v9486_v38, %v2313_v8  ;;  %v2409_v31 = vadd.f32 %v9488_v13, %v2357_v30  ;;  %v9489_v22 = vld [vmem:[#allocation67_spill] sm:$0xff]  ;;  %v9491_v14 = vld [vmem:[#allocation34_spill] sm:$0xff]  ;;  %v2263_v11 = vadd.f32 %v9492_v10, %v2195_v47  ;;  %v9495_v5 = vld [vmem:[#allocation61_spill] sm:$0xff]  ;;  %v8061_v10 = vpop.permute.xlu1 %2857 }
 0x304   : > { %v2555_v24 = vadd.f32 %v9489_v22, %v2487_v61  ;;  %v2093_v3 = vadd.f32 %v9490_v62, %v2025_v32  ;;  %v2144_v16 = vadd.f32 %v9491_v14, %v2076_v9  ;;  %v9493_v7 = vld [vmem:[#allocation205_spill] sm:$0xff]  ;;  %3662 = vrot.lane.b32.xlu0 %v7626_v39, %s8782_s1  ;;  %v2504_v21 = vadd.f32 %v9495_v5, %v2448_v63  ;;  %v9496_v30 = vld [vmem:[#allocation148_spill] sm:$0xff]  ;;  %v9497_v32 = vld [vmem:[#allocation186_spill] sm:$0xff]  ;;  %v8063_v63 = vpop.permute.xlu0 %2872 }
 0x305   : > { %v9494_v35 = vrot.slane %v9493_v7, 6  ;;  %v8052_v22 = vmul.f32 %v3042_v53, %v4613_v45  ;;  %v8055_v61 = vmul.f32 %v3042_v53, %v4621_v50  ;;  %v1974_v9 = vadd.f32 %v9497_v32, %v1910_v49  ;;  %v9498_v47 = vld [vmem:[#allocation109_spill] sm:$0xff]  ;;  %v9499_v13 = vld [vmem:[#allocation142_spill] sm:$0xff] }
 0x306   : > { %v2623_v38 = vadd.f32 %v9496_v30, %v2555_v24  ;;  %v2161_v52 = vadd.f32 %v9498_v47, %v2093_v3  ;;  %v2212_v62 = vadd.f32 %v9499_v13, %v2144_v16  ;;  %v9500_v39 = vld [vmem:[#allocation60_spill] sm:$0xff]  ;;  %v9501_v24 = vld [vmem:[#allocation47_spill] sm:$0xff]  ;;  %v9506_v47 = vld [vmem:[#allocation49_spill] sm:$0xff] }
 0x307   : > { %3647 = vrot.lane.b32.xlu1 %v9494_v35, %s8782_s1  ;;  %v2331_v14 = vadd.f32 %v9500_v39, %v2263_v11  ;;  %v2461_v7 = vadd.f32 %v9501_v24, %v2409_v31  ;;  %v9502_v35 = vld [vmem:[#allocation48_spill] sm:$0xff]  ;;  %v9507_v11 = vrot.slane %v7549_v48, 6  ;;  %v3756_v31 = vstv %s8015_s22  ;;  %v9510_v48 = vld [vmem:[#allocation53_spill] sm:$0xff]  ;;  %v8090_v24 = vpop.permute.xlu1 %2874 }
 0x308   : > { %v2422_v5 = vadd.f32 %v9502_v35, %v2370_v1  ;;  %v9503_v30 = vld [vmem:[#allocation202_spill] sm:$0xff]  ;;  %v2691_v8 = vadd.f32 %v7693_v6, %v2623_v38  ;;  %v2280_v16 = vadd.f32 %v9506_v47, %v2212_v62  ;;  %3679 = vrot.lane.b32.xlu0 %v7641_v19, %s8782_s1  ;;  %v9508_v1 = vld [vmem:[#allocation63_spill] sm:$0xff]  ;;  %v2995_v38 = vrot.slane %v8005_v60, 5  ;;  %v2890_v35 = vpop.permute.xlu0 %2889 }
 0x309   : > { %v2572_v53 = vadd.f32 %v9503_v30, %v2504_v21  ;;  %v9504_v27 = vld [vmem:[#allocation24_spill] sm:$0xff]  ;;  %v2521_v21 = vadd.f32 %v9508_v1, %v2461_v7  ;;  %v2996_v7 = vrot.slane %v8024_v51, 5  ;;  %v9513_v30 = vld [vmem:[#allocation55_spill] sm:$0xff]  ;;  %v3048_v1 = vrot.slane %v8055_v61, 5 }
 0x30a   : > { %v2042_v49 = vadd.f32 %v9504_v27, %v1974_v9  ;;  %v9505_v32 = vld [vmem:[#allocation126_spill] sm:$0xff]  ;;  %v2759_v27 = vadd.f32 %v7834_v57, %v2691_v8 }
 0x30b   : > { %v2229_v3 = vadd.f32 %v9505_v32, %v2161_v52  ;;  %3664 = vrot.lane.b32.xlu1 %v9507_v11, %s8782_s1  ;;  %v2640_v6 = vadd.f32 %v7576_v12, %v2572_v53  ;;  %v9509_v9 = vld [vmem:[#allocation32_spill] sm:$0xff]  ;;  %v2474_v12 = vadd.f32 %v9513_v30, %v2422_v5  ;;  %v9514_v53 = vld [vmem:[#allocation207_spill] sm:$0xff]  ;;  %v9515_v32 = vld [vmem:[#allocation117_spill] sm:$0xff]  ;;  %v3047_v5 = vrot.slane %v8052_v22, 5 }
 0x30c   : > { %v2110_v52 = vadd.f32 %v9509_v9, %v2042_v49  ;;  %v9511_v62 = vld [vmem:[#allocation110_spill] sm:$0xff]  ;;  %v2589_v57 = vadd.f32 %v9514_v53, %v2521_v21  ;;  %v2827_v8 = vadd.f32 %v7961_v15, %v2759_v27  ;;  %3696 = vrot.lane.b32.xlu0 %v7677_v37, %s8782_s1  ;;  %v9521_v9 = vld [vmem:[#allocation51_spill] sm:$0xff]  ;;  %v8115_v37 = vpop.permute.xlu1 %2891  ;;  %v8117_v22 = vpop.permute.xlu0 %3063 }
 0x30d   : > { %v2297_v13 = vadd.f32 %v9510_v48, %v2229_v3  ;;  %v9512_v39 = vrot.slane %v9511_v62, 4  ;;  %v2708_v60 = vadd.f32 %v7722_v40, %v2640_v6  ;;  %v9516_v47 = vld [vmem:[#allocation118_spill] sm:$0xff]  ;;  %v9519_v40 = vld [vmem:[#allocation201_spill] sm:$0xff]  ;;  %v3757_v62 = vmul.f32 %v3756_v31, %v4613_v45 }
 0x30e   : > { %v2178_v49 = vadd.f32 %v9515_v32, %v2110_v52  ;;  %v9517_v3 = vrot.slane %v9516_v47, 4  ;;  %v2538_v15 = vadd.f32 %v9519_v40, %v2474_v12  ;;  %v2657_v21 = vadd.f32 %v7609_v59, %v2589_v57  ;;  %v9520_v27 = vld [vmem:[#allocation134_spill] sm:$0xff]  ;;  %v9523_v59 = vld [vmem:[#allocation121_spill] sm:$0xff] }
 0x30f   : > { %v2384_v19 = vadd.f32 %v9512_v39, %v2331_v14  ;;  %v9518_v14 = vrot.slane %v7566_v36, 6  ;;  %v2776_v6 = vadd.f32 %v7865_v0, %v2708_v60  ;;  %v9522_v52 = vrot.slane %v9521_v9, 4 }
 0x310   : > { %v2345_v11 = vadd.f32 %v9517_v3, %v2280_v16  ;;  %v2895_v16 = vadd.f32 %v2890_v35, %v2827_v8  ;;  %v2246_v36 = vadd.f32 %v9520_v27, %v2178_v49  ;;  %v8121_v39 = vmul.f32 %v3756_v31, %v4621_v50  ;;  %v9525_v35 = vld [vmem:[#allocation74_spill] sm:$0xff]  ;;  %v9527_v8 = vld [vmem:[#allocation125_spill] sm:$0xff]  ;;  %3713 = vrot.lane.b32.xlu0 %v7798_v29, %s8782_s1 }
 0x311   : > { %3681 = vrot.lane.b32.xlu1 %v9518_v14, %s8782_s1  ;;  %v2436_v48 = vadd.f32 %v9522_v52, %v2384_v19  ;;  %v9524_v30 = vrot.slane %v9523_v59, 4  ;;  %v2606_v12 = vadd.f32 %v9525_v35, %v2538_v15  ;;  %v2725_v53 = vadd.f32 %v7757_v18, %v2657_v21  ;;  %v9526_v19 = vld [vmem:[#allocation56_spill] sm:$0xff]  ;;  %v8146_v15 = vpop.permute.xlu1 %3065  ;;  %v8148_v21 = vpop.permute.xlu0 %3080 }
 0x312   : > { %v2844_v57 = vadd.f32 %v7999_v17, %v2776_v6  ;;  %v2314_v60 = vadd.f32 %v9526_v19, %v2246_v36  ;;  %v9528_v32 = vrot.slane %v9527_v8, 4  ;;  %v9529_v47 = vrot.slane %v7596_v34, 6  ;;  %v9532_v6 = vld [vmem:[#allocation131_spill] sm:$0xff]  ;;  %v9535_v52 = vld [vmem:[#allocation36_spill] sm:$0xff] }
 0x313   : > { %v2358_v0 = vadd.f32 %v9524_v30, %v2297_v13  ;;  %v2997_v31 = vsel %vm2903_vm6, %v2995_v38, %v2996_v7  ;;  %v3773_v13 = vstv %s8078_s24  ;;  %v2674_v18 = vadd.f32 %v7655_v28, %v2606_v12  ;;  %v9537_v30 = vld [vmem:[#allocation124_spill] sm:$0xff] }
 0x314   : > { %v2397_v49 = vadd.f32 %v9528_v32, %v2345_v11  ;;  %v2793_v17 = vadd.f32 %v7894_v46, %v2725_v53  ;;  %v2948_v3 = vadd.f32 %v7646_v43, %v2895_v16  ;;  %v3790_v14 = vstv %s8084_s28  ;;  %v9530_v11 = vld [vmem:[#allocation52_spill] sm:$0xff]  ;;  %v9534_v16 = vld [vmem:[#allocation80_spill] sm:$0xff]  ;;  %v9539_v53 = vld [vmem:[#allocation71_spill] sm:$0xff]  ;;  %3730 = vrot.lane.b32.xlu0 %v7972_v41, %s8782_s1  ;;  %s9597_s28 = sld [smem:[#allocation209_spill]] }
 0x315   : > { %3698 = vrot.lane.b32.xlu1 %v9529_v47, %s8782_s1  ;;  %v9531_v40 = vrot.slane %v9530_v11, 4  ;;  %v3049_v29 = vsel %vm2903_vm6, %v3047_v5, %v3048_v1  ;;  %v3761_v38 = vrot.slane %v3757_v62, 6  ;;  %v3762_v28 = vrot.slane %v8121_v39, 6  ;;  %v9542_v47 = vld [vmem:[#allocation38_spill] sm:$0xff] }
 0x316   : > { %v9533_v46 = vrot.slane %v9532_v6, 4  ;;  %v2742_v43 = vadd.f32 %v7793_v33, %v2674_v18  ;;  %v2909_v36 = vadd.f32 %v9534_v16, %v2844_v57  ;;  %v2861_v9 = vadd.f32 %v8034_v56, %v2793_v17 }
 0x317   : > { %v2488_v34 = vadd.f32 %v9531_v40, %v2436_v48  ;;  %v9536_v48 = vrot.slane %v9535_v52, 4  ;;  %v9538_v35 = vrot.slane %v9537_v30, 4  ;;  %v9540_v62 = vrot.slane %v7727_v23, 6  ;;  %v8179_v23 = vpop.permute.xlu0 %3097  ;;  %v9551_v30 = vld [vmem:[#allocation97_spill] sm:$0xff] }
 0x318   : > { %v2410_v27 = vadd.f32 %v9533_v46, %v2358_v0  ;;  %v3807_v33 = vstv %s8107_s6  ;;  %v2810_v0 = vadd.f32 %v7926_v44, %v2742_v43  ;;  %v3000_v57 = vadd.f32 %v2997_v31, %v2948_v3  ;;  %3747 = vrot.lane.b32.xlu0 %v8021_v54, %s8782_s1 }
 0x319   : > { %v2371_v59 = vadd.f32 %v9536_v48, %v2314_v60  ;;  %v2449_v12 = vadd.f32 %v9538_v35, %v2397_v49  ;;  %v2556_v5 = vadd.f32 %v9539_v53, %v2488_v34  ;;  %3715 = vrot.lane.b32.xlu1 %v9540_v62, %s8782_s1  ;;  %v3774_v56 = vmul.f32 %v3773_v13, %v4613_v45  ;;  %v9541_v60 = vld [vmem:[#allocation62_spill] sm:$0xff]  ;;  %v8177_v49 = vpop.permute.xlu1 %3082  ;;  %v9546_v34 = vld [vmem:[#allocation206_spill] sm:$0xff] }
 0x31a   : > { %v8173_v19 = vmul.f32 %v3773_v13, %v4621_v50  ;;  %v3763_v41 = vsel %vm3468_vm7, %v3761_v38, %v3762_v28  ;;  %v3791_v44 = vmul.f32 %v3790_v14, %v4613_v45  ;;  %v9543_v31 = vrot.slane %v9542_v47, 4  ;;  %v9559_v47 = vld [vmem:[#allocation101_spill] sm:$0xff] }
 0x31b   : > { %v2505_v8 = vadd.f32 %v9541_v60, %v2449_v12  ;;  %v2624_v32 = vadd.f32 %v7574_v55, %v2556_v5  ;;  %v2922_v13 = vadd.f32 %v7581_v26, %v2861_v9  ;;  %v2878_v17 = vadd.f32 %v8063_v63, %v2810_v0  ;;  %v9544_v55 = vld [vmem:[#allocation39_spill] sm:$0xff]  ;;  %v3115_v48 = vpop.permute.xlu0 %3114  ;;  %v9556_v60 = vld [vmem:[#allocation155_spill] sm:$0xff] }
 0x31c   : > { %v2462_v18 = vadd.f32 %v9543_v31, %v2410_v27  ;;  %v2961_v3 = vadd.f32 %v7767_v2, %v2909_v36  ;;  %v9545_v11 = vrot.slane %v9544_v55, 4  ;;  %v3035_v38 = vrot.slane %v7964_v4, 5  ;;  %v9549_v36 = vld [vmem:[#allocation149_spill] sm:$0xff]  ;;  %3764 = vrot.lane.b32.xlu0 %v3763_v41, %s8782_s1 }
 0x31d   : > { %v2573_v6 = vadd.f32 %v9546_v34, %v2505_v8  ;;  %v2692_v46 = vadd.f32 %v7720_v58, %v2624_v32  ;;  %v9547_v43 = vrot.slane %v7854_v42, 6  ;;  %v3052_v26 = vadd.f32 %v3049_v29, %v3000_v57  ;;  %v9548_v58 = vld [vmem:[#allocation200_spill] sm:$0xff]  ;;  %v8211_v52 = vpop.permute.xlu1 %3099  ;;  %v9553_v5 = vld [vmem:[#allocation43_spill] sm:$0xff] }
 0x31e   : > { %v2423_v40 = vadd.f32 %v9545_v11, %v2371_v59  ;;  %v3778_v2 = vrot.slane %v3774_v56, 6  ;;  %v8203_v63 = vmul.f32 %v3790_v14, %v4621_v50  ;;  %v8206_v27 = vmul.f32 %v3807_v33, %v4613_v45  ;;  %v9550_v59 = vld [vmem:[#allocation85_spill] sm:$0xff]  ;;  %v9555_v57 = vld [vmem:[#allocation77_spill] sm:$0xff]  ;;  %v9557_v8 = vld [vmem:[#allocation112_spill] sm:$0xff] }
 0x31f   : > { %3732 = vrot.lane.b32.xlu1 %v9547_v43, %s8782_s1  ;;  %v2522_v16 = vadd.f32 %v9548_v58, %v2462_v18  ;;  %v2641_v9 = vadd.f32 %v9549_v36, %v2573_v6  ;;  %v2760_v42 = vadd.f32 %v7863_v25, %v2692_v46  ;;  %v3779_v54 = vrot.slane %v8173_v19, 6  ;;  %v9552_v14 = vld [vmem:[#allocation143_spill] sm:$0xff]  ;;  %v9562_v34 = vld [vmem:[#allocation129_spill] sm:$0xff] }
 0x320   : > { %v2935_v29 = vadd.f32 %v9550_v59, %v2878_v17  ;;  %v3013_v35 = vadd.f32 %v9551_v30, %v2961_v3  ;;  %v2974_v12 = vadd.f32 %v9552_v14, %v2922_v13  ;;  %v8217_v53 = vadd.f32 %v3115_v48, %v3052_v26  ;;  %v9560_v3 = vld [vmem:[#allocation66_spill] sm:$0xff]  ;;  %v9561_v11 = vld [vmem:[#allocation135_spill] sm:$0xff]  ;;  %v9568_v59 = vld [vmem:[#allocation133_spill] sm:$0xff] }
 0x321   : > { %v9554_v62 = vrot.slane %v9553_v5, 4  ;;  %v2590_v56 = vadd.f32 %v9555_v57, %v2522_v16  ;;  %v2709_v25 = vadd.f32 %v9556_v60, %v2641_v9  ;;  %v9558_v32 = vrot.slane %v9557_v8, 6  ;;  %v8238_v41 = vpop.permute.xlu1 %3116  ;;  %v9571_v57 = vld [vmem:[#allocation93_spill] sm:$0xff] }
 0x322   : > { %v3795_v19 = vrot.slane %v3791_v44, 6  ;;  %v2828_v31 = vadd.f32 %v9559_v47, %v2760_v42  ;;  %v3069_v18 = vadd.f32 %v8117_v22, %v3013_v35  ;;  %v3796_v13 = vrot.slane %v8203_v63, 6  ;;  %v3132_v44 = vpop.permute.xlu0 %3131  ;;  %v9563_v22 = vld [vmem:[#allocation99_spill] sm:$0xff]  ;;  %v9564_v63 = vld [vmem:[#allocation144_spill] sm:$0xff]  ;;  %v9572_v60 = vld [vmem:[#allocation83_spill] sm:$0xff] }
 0x323   : > { %v2475_v0 = vadd.f32 %v9554_v62, %v2423_v40  ;;  %3749 = vrot.lane.b32.xlu1 %v9558_v32, %s8782_s1  ;;  %v8233_v17 = vmul.f32 %v3807_v33, %v4621_v50  ;;  %v2658_v40 = vadd.f32 %v9561_v11, %v2590_v56  ;;  %v2777_v6 = vadd.f32 %v9562_v34, %v2709_v25  ;;  %v9565_v33 = vld [vmem:[#allocation79_spill] sm:$0xff]  ;;  %v9574_v32 = vld [vmem:[#allocation7_spill] sm:$0xff] }
 0x324   : > { %v3780_v46 = vsel %vm3468_vm7, %v3778_v2, %v3779_v54  ;;  %v2896_v43 = vadd.f32 %v8115_v37, %v2828_v31  ;;  %v3026_v26 = vadd.f32 %v9563_v22, %v2974_v12  ;;  %v2987_v58 = vadd.f32 %v9564_v63, %v2935_v29  ;;  %v9567_v2 = vld [vmem:[#allocation91_spill] sm:$0xff]  ;;  %v9570_v62 = vld [vmem:[#allocation8_spill] sm:$0xff] }
 0x325   : > { %v2539_v55 = vadd.f32 %v9560_v3, %v2475_v0  ;;  %v8244_v16 = vadd.f32 %v3132_v44, %v3069_v18  ;;  %v9566_v9 = vrot.slane %v7929_v20, 5  ;;  %3781 = vrot.lane.b32.xlu0 %v3780_v46, %s8782_s1  ;;  %v3824_v37 = vstv %s8200_s5  ;;  %v9569_v20 = vld [vmem:[#allocation84_spill] sm:$0xff]  ;;  %v8264_v12 = vpop.permute.xlu1 %3133  ;;  %v9578_v46 = vld [vmem:[#allocation151_spill] sm:$0xff] }
 0x326   : > { %v2726_v48 = vadd.f32 %v9567_v2, %v2658_v40  ;;  %v2845_v29 = vadd.f32 %v9568_v59, %v2777_v6  ;;  %v3086_v30 = vadd.f32 %v8148_v21, %v3026_v26  ;;  %v3812_v35 = vrot.slane %v8206_v27, 6  ;;  %v3149_v39 = vpop.permute.xlu0 %3148 }
 0x327   : > { %v2607_v36 = vadd.f32 %v9565_v33, %v2539_v55  ;;  %v3036_v42 = vsel %vm2903_vm6, %v9566_v9, %v3035_v38  ;;  %3766 = vrot.lane.b32.xlu1 %v3762_v28, %s8782_s1  ;;  %v3797_v28 = vsel %vm3468_vm7, %v3795_v19, %v3796_v13  ;;  %v3813_v5 = vrot.slane %v8233_v17, 6  ;;  %v9575_v19 = vld [vmem:[#allocation90_spill] sm:$0xff]  ;;  %v9576_v17 = vld [vmem:[#allocation203_spill] sm:$0xff] }
 0x328   : > { %v3826_v0 = vmul.f32 %v3824_v37, %v9570_v62  ;;  %v2794_v56 = vadd.f32 %v9571_v57, %v2726_v48  ;;  %v9573_v21 = vrot.slane %v9572_v60, 5  ;;  %v3039_v8 = vadd.f32 %v3036_v42, %v2987_v58  ;;  %v9579_v58 = vld [vmem:[#allocation75_spill] sm:$0xff]  ;;  %v9585_v57 = vld [vmem:[#allocation156_spill] sm:$0xff] }
 0x329   : > { %v2675_v14 = vadd.f32 %v9569_v20, %v2607_v36  ;;  %v8272_v27 = vadd.f32 %v3149_v39, %v3086_v30  ;;  %3798 = vrot.lane.b32.xlu0 %v3797_v28, %s8782_s1  ;;  %v3825_v47 = vmul.f32 %v3824_v37, %v9574_v32  ;;  %v3841_v31 = vstv %s8227_s29  ;;  %v8285_v34 = vpop.permute.xlu1 %3150  ;;  %v9583_v39 = vld [vmem:[#allocation82_spill] sm:$0xff]  ;;  %s9598_s29 = sld [smem:[#allocation211_spill]] }
 0x32a   : > { %v2949_v25 = vadd.f32 %v9573_v21, %v2896_v43  ;;  %v9577_v3 = vrot.slane %v9576_v17, 5  ;;  %v2862_v11 = vadd.f32 %v8061_v10, %v2794_v56  ;;  %v3103_v40 = vadd.f32 %v8179_v23, %v3039_v8  ;;  %v9587_v56 = vld [vmem:[#allocation139_spill] sm:$0xff] }
 0x32b   : > { %3783 = vrot.lane.b32.xlu1 %v3779_v54, %s8782_s1  ;;  %v2743_v18 = vadd.f32 %v9575_v19, %v2675_v14  ;;  %v3166_v54 = vpop.permute.xlu0 %3165  ;;  %v3830_v6 = vrot.slane %v3826_v0, 6  ;;  %v3843_v44 = vmul.f32 %v3841_v31, %v9570_v62  ;;  %v3814_v63 = vsel %vm3468_vm7, %v3812_v35, %v3813_v5 }
 0x32c   : > { %v2910_v55 = vadd.f32 %v9577_v3, %v2845_v29  ;;  %v3001_v22 = vadd.f32 %v2996_v7, %v2949_v25  ;;  %v8291_v26 = vadd.f32 %v3166_v54, %v3103_v40  ;;  %v3829_v10 = vrot.slane %v3825_v47, 6  ;;  %v9581_v7 = vld [vmem:[#allocation153_spill] sm:$0xff] }
 0x32d   : > { %v2811_v43 = vadd.f32 %v9578_v46, %v2743_v18  ;;  %3815 = vrot.lane.b32.xlu0 %v3814_v63, %s8782_s1  ;;  %v3842_v23 = vmul.f32 %v3841_v31, %v9574_v32  ;;  %v9580_v33 = vrot.slane %v9579_v58, 5  ;;  %v9582_v9 = vrot.slane %v9581_v7, 5  ;;  %v8305_v2 = vpop.permute.xlu1 %3167  ;;  %v9594_v7 = vld [vmem:[#allocation10_spill] sm:$0xff] }
 0x32e   : > { %v3858_v37 = vstv %s8261_s7  ;;  %v3847_v59 = vrot.slane %v3843_v44, 6  ;;  %v3053_v29 = vadd.f32 %v3048_v1, %v3001_v22  ;;  %v3875_v14 = vstv %s8278_s9  ;;  %v9591_v44 = vld [vmem:[#allocation86_spill] sm:$0xff] }
 0x32f   : > { %3800 = vrot.lane.b32.xlu1 %v3796_v13, %s8782_s1  ;;  %v2923_v36 = vadd.f32 %v9580_v33, %v2862_v11  ;;  %v2879_v51 = vadd.f32 %v8090_v24, %v2811_v43  ;;  %v2962_v42 = vadd.f32 %v9582_v9, %v2910_v55  ;;  %v3183_v48 = vpop.permute.xlu0 %3182  ;;  %v3860_v13 = vmul.f32 %v3858_v37, %v9570_v62  ;;  %v9589_v11 = vld [vmem:[#allocation106_spill] sm:$0xff]  ;;  %s8547_s7 = scalar_lea.vmem %s9598_s29, %s4455_s20 }
 0x330   : > { %v8313_v30 = vadd.f32 %v3183_v48, %v8217_v53  ;;  %v3831_v24 = vsel %vm3468_vm7, %v3829_v10, %v3830_v6  ;;  %v3846_v35 = vrot.slane %v3842_v23, 6  ;;  %v3859_v20 = vmul.f32 %v3858_v37, %v9574_v32 }
 0x331   : > { %3832 = vrot.lane.b32.xlu0 %v3831_v24, %s8836_s19  ;;  %v9584_v28 = vrot.slane %v9583_v39, 5  ;;  %v9586_v61 = vrot.slane %v9585_v57, 5  ;;  %v9588_v53 = vrot.slane %v9587_v56, 5  ;;  %v3121_v21 = vadd.f32 %v8238_v41, %v3053_v29 }
 0x332   : > { %v3848_v8 = vsel %vm3468_vm7, %v3846_v35, %v3847_v59  ;;  %v3864_v47 = vrot.slane %v3860_v13, 6  ;;  %v3877_v31 = vmul.f32 %v3875_v14, %v9570_v62  ;;  %v3892_v3 = vstv %s8294_s11 }
 0x333   : > { %3817 = vrot.lane.b32.xlu1 %v3813_v5, %s8782_s1  ;;  %v2936_v0 = vadd.f32 %v9584_v28, %v2879_v51  ;;  %v3014_v1 = vadd.f32 %v9586_v61, %v2962_v42  ;;  %v2975_v60 = vadd.f32 %v9588_v53, %v2923_v36  ;;  %v3185_v5 = vpop.permute.xlu1 %3184  ;;  %v3200_v25 = vpop.permute.xlu0 %3199  ;;  %v3863_v41 = vrot.slane %v3859_v20, 6  ;;  %s8345_s1 = sld [smem:[#allocation2 + $0xf7]] }
 0x334   : > { %v3189_v18 = vadd.f32 %v3185_v5, %v3121_v21  ;;  %v3205_v17 = vadd.f32 %v3200_v25, %v8244_v16  ;;  %v3876_v55 = vmul.f32 %v3875_v14, %v9574_v32  ;;  %v9590_v40 = vrot.slane %v9589_v11, 5 }
 0x335   : > { %v3070_v19 = vadd.f32 %v8146_v15, %v3014_v1  ;;  %3849 = vrot.lane.b32.xlu0 %v3848_v8, %s8836_s19  ;;  %v9592_v46 = vrot.slane %v9591_v44, 5  ;;  %v3865_v16 = vsel %vm3468_vm7, %v3863_v41, %v3864_v47  ;;  %v3881_v10 = vrot.slane %v3877_v31, 6 }
 0x336   : > { %v3027_v54 = vadd.f32 %v9590_v40, %v2975_v60  ;;  %v3909_v58 = vstv %s8308_s14  ;;  %v3894_v9 = vmul.f32 %v3892_v3, %v9594_v7  ;;  %v3926_v48 = vstv %s8327_s15 }
 0x337   : > { %3834 = vrot.lane.b32.xlu1 %v3830_v6, %s8836_s19  ;;  %v2988_v43 = vadd.f32 %v9592_v46, %v2936_v0  ;;  %v3138_v15 = vadd.f32 %v8264_v12, %v3070_v19  ;;  %v3202_v22 = vpop.permute.xlu1 %3201  ;;  %v3217_v63 = vpop.permute.xlu0 %3216  ;;  %v9593_v6 = vld [vmem:[#allocation9_spill] sm:$0xff]  ;;  %v3880_v12 = vrot.slane %v3876_v55, 6  ;;  %v3911_v35 = vmul.f32 %v3909_v58, %v9594_v7 }
 0x338   : > { %v3893_v23 = vmul.f32 %v3892_v3, %v9593_v6  ;;  %v3087_v33 = vadd.f32 %v8177_v49, %v3027_v54  ;;  %v3222_v51 = vadd.f32 %v3217_v63, %v8272_v27  ;;  %v3910_v27 = vmul.f32 %v3909_v58, %v9593_v6 }
 0x339   : > { %v3206_v36 = vadd.f32 %v3202_v22, %v3138_v15  ;;  %3866 = vrot.lane.b32.xlu0 %v3865_v16, %s8836_s19  ;;  %v3040_v42 = vadd.f32 %v3035_v38, %v2988_v43  ;;  %v3882_v49 = vsel %vm3468_vm7, %v3880_v12, %v3881_v10  ;;  %v3898_v4 = vrot.slane %v3894_v9, 6 }
 0x33a   : > { %v3155_v37 = vadd.f32 %v8285_v34, %v3087_v33  ;;  %v3897_v24 = vrot.slane %v3893_v23, 6  ;;  %v3914_v28 = vrot.slane %v3910_v27, 6  ;;  %v3927_v0 = vmul.f32 %v3926_v48, %v9593_v6 }
 0x33b   : > { %3851 = vrot.lane.b32.xlu1 %v3847_v59, %s8836_s19  ;;  %v3219_v13 = vpop.permute.xlu1 %3218  ;;  %v3234_v29 = vpop.permute.xlu0 %3233  ;;  %v3104_v59 = vadd.f32 %v8211_v52, %v3040_v42  ;;  %v3928_v57 = vmul.f32 %v3926_v48, %v9594_v7  ;;  %v3943_v52 = vstv %s8345_s1  ;;  %v3915_v56 = vrot.slane %v3911_v35, 6 }
 0x33c   : > { %v3223_v20 = vadd.f32 %v3219_v13, %v3155_v37  ;;  %v3239_v14 = vadd.f32 %v3234_v29, %v8291_v26  ;;  %v3899_v1 = vsel %vm3468_vm7, %v3897_v24, %v3898_v4  ;;  %v3931_v60 = vrot.slane %v3927_v0, 6 }
 0x33d   : > { %3883 = vrot.lane.b32.xlu0 %v3882_v49, %s8836_s19  ;;  %v3172_v38 = vadd.f32 %v8305_v2, %v3104_v59  ;;  %v3932_v21 = vrot.slane %v3928_v57, 6  ;;  %v3944_v5 = vmul.f32 %v3943_v52, %v9593_v6  ;;  %v3945_v25 = vmul.f32 %v3943_v52, %v9594_v7 }
 0x33e   : > { %v3960_v31 = vstv %s8361_s18  ;;  %v3994_v16 = vstv %s8377_s17  ;;  %v4011_v49 = vstv %s8389_s0 }
 0x33f   : > { %3868 = vrot.lane.b32.xlu1 %v3864_v47, %s8836_s19  ;;  %v3236_v34 = vpop.permute.xlu1 %3235  ;;  %v3251_v39 = vpop.permute.xlu0 %3250  ;;  %v3916_v47 = vsel %vm3468_vm7, %v3914_v28, %v3915_v56  ;;  %v3933_v41 = vsel %vm3468_vm7, %v3931_v60, %v3932_v21  ;;  %v3948_v55 = vrot.slane %v3944_v5, 6  ;;  %v3949_v11 = vrot.slane %v3945_v25, 6 }
 0x340   : > { %v3240_v61 = vadd.f32 %v3236_v34, %v3172_v38  ;;  %v3256_v26 = vadd.f32 %v3251_v39, %v8313_v30  ;;  %v3961_v40 = vmul.f32 %v3960_v31, %v4613_v45  ;;  %v3995_v42 = vmul.f32 %v3994_v16, %v4613_v45 }
 0x341   : > { %3900 = vrot.lane.b32.xlu0 %v3899_v1, %s8836_s19  ;;  %v3950_v15 = vsel %vm3468_vm7, %v3948_v55, %v3949_v11  ;;  %v3996_v37 = vmul.f32 %v3994_v16, %v4621_v50  ;;  %v4012_v38 = vmul.f32 %v4011_v49, %v4613_v45  ;;  %v4013_v34 = vmul.f32 %v4011_v49, %v4621_v50 }
 0x342   : > { %v3965_v58 = vrot.slane %v3961_v40, 6  ;;  %v3999_v59 = vrot.slane %v3995_v42, 6  ;;  %v3477_v5 = vstv %s8408_s25  ;;  %v3490_v25 = vstv %s8412_s12 }
 0x343   : > { %3885 = vrot.lane.b32.xlu1 %v3881_v10, %s8836_s19  ;;  %v3253_v2 = vpop.permute.xlu1 %3252  ;;  %v3268_v53 = vpop.permute.xlu0 %3267  ;;  %v3491_v40 = vmul.f32 %v3490_v25, %v9574_v32  ;;  %v3503_v16 = vstv %s8422_s27 }
 0x344   : > { %v3257_v30 = vadd.f32 %v3253_v2, %v3189_v18  ;;  %v3273_v8 = vadd.f32 %v3268_v53, %v3205_v17  ;;  %v3962_v18 = vmul.f32 %v3960_v31, %v4621_v50  ;;  %v3977_v17 = vstv %s8371_s21 }
 0x345   : > { %3917 = vrot.lane.b32.xlu0 %v3916_v47, %s8836_s19  ;;  %v3978_v22 = vmul.f32 %v3977_v17, %v4613_v45  ;;  %v3979_v63 = vmul.f32 %v3977_v17, %v4621_v50  ;;  %v3463_v2 = vstv %s8404_s23  ;;  %v3568_v17 = vstv %s8419_s26 }
 0x346   : > { %v3966_v33 = vrot.slane %v3962_v18, 6  ;;  %v3516_v18 = vstv %s8417_s3 }
 0x347   : > { %3902 = vrot.lane.b32.xlu1 %v3898_v4, %s8836_s19  ;;  %v3270_v19 = vpop.permute.xlu1 %3269  ;;  %v3285_v3 = vpop.permute.xlu0 %3284  ;;  %v3982_v9 = vrot.slane %v3978_v22, 6  ;;  %v3983_v12 = vrot.slane %v3979_v63, 6 }
 0x348   : > { %v3274_v54 = vadd.f32 %v3270_v19, %v3206_v36  ;;  %v3290_v44 = vadd.f32 %v3285_v3, %v3222_v51  ;;  %v3967_v29 = vsel %vm3468_vm7, %v3965_v58, %v3966_v33  ;;  %v3464_v19 = vmul.f32 %v3463_v2, %v9574_v32 }
 0x349   : > { %3934 = vrot.lane.b32.xlu0 %v3933_v41, %s8836_s19  ;;  %v3984_v35 = vsel %vm3468_vm7, %v3982_v9, %v3983_v12  ;;  %v3478_v3 = vmul.f32 %v3477_v5, %v9574_v32  ;;  %v8444_v41 = vmul.f32 %v3490_v25, %v9570_v62  ;;  %v3495_v58 = vrot.slane %v3491_v40, 6 }
 0x34a   : > { %v3569_v9 = vmul.f32 %v3568_v17, %v4613_v45 }
 0x34b   : > { %3919 = vrot.lane.b32.xlu1 %v3915_v56, %s8836_s19  ;;  %v3287_v46 = vpop.permute.xlu1 %3286  ;;  %v3302_v43 = vpop.permute.xlu0 %3301  ;;  %v3482_v22 = vrot.slane %v3478_v3, 6  ;;  %v3496_v63 = vrot.slane %v8444_v41, 6  ;;  %v3555_v3 = vstv %s8473_s10 }
 0x34c   : > { %v3291_v10 = vadd.f32 %v3287_v46, %v3223_v20  ;;  %v3307_v23 = vadd.f32 %v3302_v43, %v3239_v14  ;;  %v4000_v20 = vrot.slane %v3996_v37, 6  ;;  %v3469_v43 = vrot.slane %v3464_v19, 6 }
 0x34d   : > { %3951 = vrot.lane.b32.xlu0 %v3950_v15, %s8836_s19  ;;  %v3497_v49 = vsel %vm3468_vm7, %v3495_v58, %v3496_v63 }
 0x34e   : > { %v4001_v0 = vsel %vm3468_vm7, %v3999_v59, %v4000_v20 }
 0x34f   : > { %3936 = vrot.lane.b32.xlu1 %v3932_v21, %s8836_s19  ;;  %v3304_v36 = vpop.permute.xlu1 %3303  ;;  %v3319_v51 = vpop.permute.xlu0 %3318 }
 0x350   : > { %v3308_v48 = vadd.f32 %v3304_v36, %v3240_v61  ;;  %v3324_v13 = vadd.f32 %v3319_v51, %v3256_v26  ;;  %v4016_v61 = vrot.slane %v4012_v38, 6  ;;  %v4017_v26 = vrot.slane %v4013_v34, 6 }
 0x351   : > { %3968 = vrot.lane.b32.xlu0 %v3967_v29, %s8836_s19  ;;  %v3517_v36 = vmul.f32 %v3516_v18, %v9593_v6  ;;  %v3518_v51 = vmul.f32 %v3516_v18, %v9594_v7 }
 0x352   : > { %v4018_v21 = vsel %vm3468_vm7, %v4016_v61, %v4017_v26 }
 0x353   : > { %3953 = vrot.lane.b32.xlu1 %v3949_v11, %s8836_s19  ;;  %v3321_v24 = vpop.permute.xlu1 %3320  ;;  %v3336_v27 = vpop.permute.xlu0 %3335  ;;  %v3521_v38 = vrot.slane %v3517_v36, 6  ;;  %v3522_v34 = vrot.slane %v3518_v51, 6 }
 0x354   : > { %v3325_v14 = vadd.f32 %v3321_v24, %v3257_v30  ;;  %v3341_v4 = vadd.f32 %v3336_v27, %v3273_v8  ;;  %v8436_v30 = vmul.f32 %v3463_v2, %v9570_v62  ;;  %v8439_v8 = vmul.f32 %v3477_v5, %v9570_v62 }
 0x355   : > { %3985 = vrot.lane.b32.xlu0 %v3984_v35, %s8836_s19  ;;  %v8484_v24 = vmul.f32 %v3503_v16, %v9570_v62  ;;  %v3581_v35 = vstv %s8446_s30 }
 0x356   : > { %v3582_v62 = vmul.f32 %v3581_v35, %v4613_v45  ;;  %v3583_v61 = vmul.f32 %v3581_v35, %v4621_v50 }
 0x357   : > { %3970 = vrot.lane.b32.xlu1 %v3966_v33, %s8836_s19  ;;  %v3338_v39 = vpop.permute.xlu1 %3337  ;;  %v3353_v28 = vpop.permute.xlu0 %3352  ;;  %v3529_v33 = vstv %s8430_s2 }
 0x358   : > { %v3342_v57 = vadd.f32 %v3338_v39, %v3274_v54  ;;  %v3358_v52 = vadd.f32 %v3353_v28, %v3290_v44  ;;  %v3470_v54 = vrot.slane %v8436_v30, 6  ;;  %v3483_v44 = vrot.slane %v8439_v8, 6 }
 0x359   : > { %4002 = vrot.lane.b32.xlu0 %v4001_v0, %s8836_s19  ;;  %v3530_v27 = vmul.f32 %v3529_v33, %v9593_v6 }
 0x35a   : > { %v3471_v42 = vsel %vm3468_vm7, %v3469_v43, %v3470_v54  ;;  %v3484_v37 = vsel %vm3468_vm7, %v3482_v22, %v3483_v44 }
 0x35b   : > { %3987 = vrot.lane.b32.xlu1 %v3983_v12, %s8836_s19  ;;  %v3355_v1 = vpop.permute.xlu1 %3354  ;;  %v3370_v56 = vpop.permute.xlu0 %3369  ;;  %v8471_v12 = vmul.f32 %v3568_v17, %v4621_v50  ;;  %v3586_v17 = vrot.slane %v3582_v62, 6 }
 0x35c   : > { %v8424_v53 = vadd.f32 %v3355_v1, %v3291_v10  ;;  %v8426_v60 = vadd.f32 %v3370_v56, %v3307_v23  ;;  %v3534_v1 = vrot.slane %v3530_v27, 6 }
 0x35d   : > { %4019 = vrot.lane.b32.xlu0 %v4018_v21, %s8836_s19  ;;  %v3574_v39 = vrot.slane %v8471_v12, 6  ;;  %v3607_v12 = vstv %s8491_s13 }
 0x35f   : > { %4004 = vrot.lane.b32.xlu1 %v4000_v20, %s8836_s19  ;;  %v3372_v47 = vpop.permute.xlu1 %3371  ;;  %v3387_v31 = vpop.permute.xlu0 %3386 }
 0x360   : > { %v8448_v55 = vadd.f32 %v3372_v47, %v3308_v48  ;;  %v8450_v11 = vadd.f32 %v3387_v31, %v3324_v13  ;;  %v3504_v48 = vmul.f32 %v3503_v16, %v9574_v32  ;;  %v3573_v32 = vrot.slane %v3569_v9, 6 }
 0x361   : > { %v3523_v31 = vsel %vm3468_vm7, %v3521_v38, %v3522_v34  ;;  %v3557_v9 = vmul.f32 %v3555_v3, %v9594_v7 }
 0x362   : > { %v3508_v0 = vrot.slane %v3504_v48, 6  ;;  %v3575_v19 = vsel %vm3468_vm7, %v3573_v32, %v3574_v39 }
 0x363   : > { %4021 = vrot.lane.b32.xlu1 %v4017_v26, %s8836_s19  ;;  %v3389_v46 = vpop.permute.xlu1 %3388  ;;  %v3404_v15 = vpop.permute.xlu0 %3403  ;;  %s8465_s19 = sld [smem:[#allocation2 + $0xe2]]  ;;  %v3509_v26 = vrot.slane %v8484_v24, 6 }
 0x364   : > { %v8462_v10 = vadd.f32 %v3389_v46, %v3325_v14  ;;  %v3409_v23 = vadd.f32 %v3404_v15, %v3341_v4  ;;  %v3531_v14 = vmul.f32 %v3529_v33, %v9594_v7  ;;  %v3542_v4 = vstv %s8453_s4 }
 0x365   : > { %v3543_v56 = vmul.f32 %v3542_v4, %v9593_v6  ;;  %v3544_v2 = vmul.f32 %v3542_v4, %v9594_v7  ;;  %v3587_v46 = vrot.slane %v3583_v61, 6  ;;  %v3556_v33 = vmul.f32 %v3555_v3, %v9593_v6 }
 0x366   : > { %v3474_v28 = vadd.f32 %v3471_v42, %v3409_v23  ;;  %v3535_v25 = vrot.slane %v3531_v14, 6  ;;  %v3608_v7 = vmul.f32 %v3607_v12, %v4613_v45  ;;  %v3561_v14 = vrot.slane %v3557_v9, 6 }
 0x367   : > { %v3406_v13 = vpop.permute.xlu1 %3405  ;;  %v3421_v29 = vpop.permute.xlu0 %3420  ;;  %v3547_v22 = vrot.slane %v3543_v56, 6  ;;  %v3548_v16 = vrot.slane %v3544_v2, 6 }
 0x368   : > { %v3410_v59 = vadd.f32 %v3406_v13, %v3342_v57  ;;  %v3426_v20 = vadd.f32 %v3421_v29, %v3358_v52  ;;  %v3526_v18 = vadd.f32 %v3523_v31, %v3474_v28  ;;  %v3536_v58 = vsel %vm3468_vm7, %v3534_v1, %v3535_v25 }
 0x369   : > { %v3594_v30 = vstv %s8465_s19  ;;  %v3549_v24 = vsel %vm3468_vm7, %v3547_v22, %v3548_v16 }
 0x36a   : > { %v3475_v47 = vadd.f32 %v3470_v54, %v3410_v59  ;;  %v3487_v40 = vadd.f32 %v3484_v37, %v3426_v20  ;;  %v3510_v37 = vsel %vm3468_vm7, %v3508_v0, %v3509_v26  ;;  %v3578_v48 = vadd.f32 %v3575_v19, %v3526_v18 }
 0x36b   : > { %v3423_v57 = vpop.permute.xlu1 %3422  ;;  %v3438_v52 = vpop.permute.xlu0 %3437  ;;  %v3560_v20 = vrot.slane %v3556_v33, 6 }
 0x36c   : > { %v3427_v21 = vadd.f32 %v3423_v57, %v8424_v53  ;;  %v3443_v5 = vadd.f32 %v3438_v52, %v8426_v60  ;;  %v3595_v53 = vmul.f32 %v3594_v30, %v4613_v45  ;;  %v3596_v60 = vmul.f32 %v3594_v30, %v4621_v50 }
 0x36d   : > { %v3527_v51 = vadd.f32 %v3522_v34, %v3475_v47  ;;  %v3539_v13 = vadd.f32 %v3536_v58, %v3487_v40  ;;  %v3562_v45 = vsel %vm3468_vm7, %v3560_v20, %v3561_v14 }
 0x36e   : > { %v3488_v36 = vadd.f32 %v3483_v44, %v3427_v21  ;;  %v3500_v42 = vadd.f32 %v3497_v49, %v3443_v5  ;;  %v3599_v27 = vrot.slane %v3595_v53, 6  ;;  %v3600_v6 = vrot.slane %v3596_v60, 6 }
 0x36f   : > { %v3440_v43 = vpop.permute.xlu1 %3439  ;;  %v3455_v15 = vpop.permute.xlu0 %3454  ;;  %v3609_v49 = vmul.f32 %v3607_v12, %v4621_v50  ;;  %v3579_v35 = vadd.f32 %v3574_v39, %v3527_v51  ;;  %v3612_v50 = vrot.slane %v3608_v7, 6 }
 0x370   : > { %v3444_v54 = vadd.f32 %v3440_v43, %v8448_v55  ;;  %v3460_v23 = vadd.f32 %v3455_v15, %v8450_v11  ;;  %v3588_v11 = vsel %vm3468_vm7, %v3586_v17, %v3587_v46  ;;  %v3540_v59 = vadd.f32 %v3535_v25, %v3488_v36 }
 0x371   : > { %v3591_v34 = vadd.f32 %v3588_v11, %v3539_v13  ;;  %v3552_v32 = vadd.f32 %v3549_v24, %v3500_v42  ;;  %v3601_v61 = vsel %vm3468_vm7, %v3599_v27, %v3600_v6  ;;  %v3613_v39 = vrot.slane %v3609_v49, 6 }
 0x372   : > { %v3501_v4 = vadd.f32 %v3496_v63, %v3444_v54  ;;  %v3513_v38 = vadd.f32 %v3510_v37, %v3460_v23  ;;  %v3592_v57 = vadd.f32 %v3587_v46, %v3540_v59 }
 0x373   : > { %v3457_v29 = vpop.permute.xlu1 %3456  ;;  %v3629_v55 = vpop.permute.xlu0 %3628  ;;  %v3604_v1 = vadd.f32 %v3601_v61, %v3552_v32  ;;  %v3614_v25 = vsel %vm3468_vm7, %v3612_v50, %v3613_v39 }
 0x374   : > { %v3461_v8 = vadd.f32 %v3457_v29, %v8462_v10  ;;  %v8518_v44 = vadd.f32 %v3629_v55, %v3578_v48  ;;  %v3553_v56 = vadd.f32 %v3548_v16, %v3501_v4  ;;  %v3565_v2 = vadd.f32 %v3562_v45, %v3513_v38 }
 0x376   : > { %v3514_v52 = vadd.f32 %v3509_v26, %v3461_v8  ;;  %v3605_v30 = vadd.f32 %v3600_v6, %v3553_v56  ;;  %v3617_v47 = vadd.f32 %v3614_v25, %v3565_v2 }
 0x377   : > { %v3631_v28 = vpop.permute.xlu1 %3630  ;;  %v3646_v0 = vpop.permute.xlu0 %3645 }
 0x378   : > { %v3635_v62 = vadd.f32 %v3631_v28, %v3579_v35  ;;  %v3651_v10 = vadd.f32 %v3646_v0, %v3591_v34  ;;  %v3566_v31 = vadd.f32 %v3561_v14, %v3514_v52 }
 0x37a   : > { %v3618_v17 = vadd.f32 %v3613_v39, %v3566_v31 }
 0x37b   : > { %v3648_v41 = vpop.permute.xlu1 %3647  ;;  %v3663_v63 = vpop.permute.xlu0 %3662 }
 0x37c   : > { %v3652_v21 = vadd.f32 %v3648_v41, %v3592_v57  ;;  %v3668_v5 = vadd.f32 %v3663_v63, %v3604_v1 }
 0x37f   : > { %v3665_v19 = vpop.permute.xlu1 %3664  ;;  %v3680_v3 = vpop.permute.xlu0 %3679 }
 0x380   : > { %v3669_v40 = vadd.f32 %v3665_v19, %v3605_v30  ;;  %v3685_v18 = vadd.f32 %v3680_v3, %v3617_v47 }
 0x383   : > { %v3682_v46 = vpop.permute.xlu1 %3681  ;;  %v3697_v43 = vpop.permute.xlu0 %3696 }
 0x384   : > { %v8527_v26 = vadd.f32 %v3682_v46, %v3618_v17  ;;  %v3702_v20 = vadd.f32 %v3697_v43, %v8518_v44 }
 0x387   : > { %v3699_v15 = vpop.permute.xlu1 %3698  ;;  %v3714_v22 = vpop.permute.xlu0 %3713 }
 0x388   : > { %v3703_v34 = vadd.f32 %v3699_v15, %v3635_v62  ;;  %v3719_v32 = vadd.f32 %v3714_v22, %v3651_v10 }
 0x38b   : > { %v3716_v16 = vpop.permute.xlu1 %3715  ;;  %v3731_v53 = vpop.permute.xlu0 %3730 }
 0x38c   : > { %v3720_v45 = vadd.f32 %v3716_v16, %v3652_v21  ;;  %v3736_v52 = vadd.f32 %v3731_v53, %v3668_v5 }
 0x38f   : > { %v3748_v54 = vpop.permute.xlu0 %3747 }
 0x390   : > { %v3753_v62 = vadd.f32 %v3748_v54, %v3685_v18 }
 0x391   : > { %v3733_v60 = vpop.permute.xlu1 %3732 }
 0x392   : > { %v3737_v30 = vadd.f32 %v3733_v60, %v3669_v40 }
 0x393   : > { %v3765_v58 = vpop.permute.xlu0 %3764 }
 0x394   : > { %v3770_v14 = vadd.f32 %v3765_v58, %v3702_v20 }
 0x395   : > { %v3750_v23 = vpop.permute.xlu1 %3749 }
 0x396   : > { %v3754_v15 = vadd.f32 %v3750_v23, %v8527_v26 }
 0x397   : > { %v3782_v36 = vpop.permute.xlu0 %3781 }
 0x398   : > { %v3787_v61 = vadd.f32 %v3782_v36, %v3719_v32 }
 0x399   : > { %v3767_v33 = vpop.permute.xlu1 %3766 }
 0x39a   : > { %v3771_v0 = vadd.f32 %v3767_v33, %v3703_v34 }
 0x39b   : > { %v3799_v9 = vpop.permute.xlu0 %3798 }
 0x39c   : > { %v3804_v63 = vadd.f32 %v3799_v9, %v3736_v52 }
 0x39d   : > { %v3784_v51 = vpop.permute.xlu1 %3783 }
 0x39e   : > { %v3788_v41 = vadd.f32 %v3784_v51, %v3720_v45 }
 0x39f   : > { %v3816_v42 = vpop.permute.xlu0 %3815 }
 0x3a0   : > { %v3821_v46 = vadd.f32 %v3816_v42, %v3753_v62 }
 0x3a1   : > { %v3801_v12 = vpop.permute.xlu1 %3800 }
 0x3a2   : > { %v3805_v17 = vadd.f32 %v3801_v12, %v3737_v30 }
 0x3a3   : > { %v3833_v48 = vpop.permute.xlu0 %3832 }
 0x3a4   : > { %v3838_v28 = vadd.f32 %v3833_v48, %v3770_v14 }
 0x3a5   : > { %v3818_v37 = vpop.permute.xlu1 %3817 }
 0x3a6   : > { %v3822_v54 = vadd.f32 %v3818_v37, %v3754_v15  ;;  %v4449_v37 = vld [vmem:[%s9597_s28] ss:$0 sm:$0xff] }
 0x3a7   : > { %v3850_v29 = vpop.permute.xlu0 %3849 }
 0x3a8   : > { %v3855_v56 = vadd.f32 %v3850_v29, %v3787_v61 }
 0x3a9   : > { %v3835_v13 = vpop.permute.xlu1 %3834 }
 0x3aa   : > { %v3839_v1 = vadd.f32 %v3835_v13, %v3771_v0 }
 0x3ab   : > { %v3867_v11 = vpop.permute.xlu0 %3866 }
 0x3ac   : > { %v3872_v19 = vadd.f32 %v3867_v11, %v3804_v63 }
 0x3ad   : > { %v3852_v55 = vpop.permute.xlu1 %3851 }
 0x3ae   : > { %v3856_v31 = vadd.f32 %v3852_v55, %v3788_v41 }
 0x3af   : > { %v3884_v27 = vpop.permute.xlu0 %3883 }
 0x3b0   : > { %v3889_v18 = vadd.f32 %v3884_v27, %v3821_v46  ;;  %v4450_v27 = vld [vmem:[%s9597_s28 + $0x1] ss:$0 sm:$0xff] }
 0x3b1   : > { %v3869_v24 = vpop.permute.xlu1 %3868 }
 0x3b2   : > { %v3873_v40 = vadd.f32 %v3869_v24, %v3805_v17 }
 0x3b3   : > { %v3901_v8 = vpop.permute.xlu0 %3900 }
 0x3b4   : > { %v3906_v57 = vadd.f32 %v3901_v8, %v3838_v28 }
 0x3b5   : > { %v3886_v6 = vpop.permute.xlu1 %3885 }
 0x3b6   : > { %v3890_v9 = vadd.f32 %v3886_v6, %v3822_v54 }
 0x3b7   : > { %v3918_v49 = vpop.permute.xlu0 %3917 }
 0x3b8   : > { %v3923_v44 = vadd.f32 %v3918_v49, %v3855_v56 }
 0x3b9   : > { %v3903_v7 = vpop.permute.xlu1 %3902 }
 0x3ba   : > { %v3907_v25 = vadd.f32 %v3903_v7, %v3839_v1 }
 0x3bb   : > { %v3935_v59 = vpop.permute.xlu0 %3934 }
 0x3bc   : > { %v3940_v43 = vadd.f32 %v3935_v59, %v3872_v19 }
 0x3bd   : > { %v3920_v35 = vpop.permute.xlu1 %3919 }
 0x3be   : > { %v3924_v5 = vadd.f32 %v3920_v35, %v3856_v31 }
 0x3bf   : > { %v3952_v38 = vpop.permute.xlu0 %3951 }
 0x3c0   : > { %v3957_v33 = vadd.f32 %v3952_v38, %v3889_v18 }
 0x3c1   : > { %v3937_v4 = vpop.permute.xlu1 %3936 }
 0x3c2   : > { %v3941_v58 = vadd.f32 %v3937_v4, %v3873_v40  ;;  %v4451_v4 = vld [vmem:[%s9597_s28 + $0x2] ss:$0 sm:$0xff] }
 0x3c3   : > { %v3969_v39 = vpop.permute.xlu0 %3968 }
 0x3c4   : > { %v3974_v2 = vadd.f32 %v3969_v39, %v3906_v57 }
 0x3c5   : > { %v3954_v50 = vpop.permute.xlu1 %3953 }
 0x3c6   : > { %4035 = vrot.lane.b32.xlu0 %v3974_v2, %s9595_s8  ;;  %v3958_v26 = vadd.f32 %v3954_v50, %v3890_v9  ;;  %v4452_v50 = vld [vmem:[%s9597_s28 + $0x3] ss:$0 sm:$0xff] }
 0x3c7   : > { %v3986_v47 = vpop.permute.xlu0 %3985 }
 0x3c8   : > { %v3991_v21 = vadd.f32 %v3986_v47, %v3923_v44 }
 0x3c9   : > { %v3971_v10 = vpop.permute.xlu1 %3970 }
 0x3ca   : > { %v3975_v3 = vadd.f32 %v3971_v10, %v3907_v25  ;;  %4039 = vrot.lane.b32.xlu0 %v3991_v21, %s9595_s8 }
 0x3cb   : > { %v4003_v16 = vpop.permute.xlu0 %4002 }
 0x3cc   : > { %4037 = vrot.lane.b32.xlu1 %v3975_v3, %s9595_s8  ;;  %v4008_v60 = vadd.f32 %v4003_v16, %v3940_v43 }
 0x3cd   : > { %v3988_v22 = vpop.permute.xlu1 %3987 }
 0x3ce   : > { %v3992_v53 = vadd.f32 %v3988_v22, %v3924_v5  ;;  %4043 = vrot.lane.b32.xlu0 %v4008_v60, %s9595_s8 }
 0x3cf   : > { %v4020_v51 = vpop.permute.xlu0 %4019 }
 0x3d0   : > { %4041 = vrot.lane.b32.xlu1 %v3992_v53, %s9595_s8  ;;  %v4025_v42 = vadd.f32 %v4020_v51, %v3957_v33 }
 0x3d1   : > { %v4005_v36 = vpop.permute.xlu1 %4004 }
 0x3d2   : > { %v4009_v12 = vadd.f32 %v4005_v36, %v3941_v58  ;;  %4047 = vrot.lane.b32.xlu0 %v4025_v42, %s9595_s8 }
 0x3d4   : > { %4045 = vrot.lane.b32.xlu1 %v4009_v12, %s9595_s8 }
 0x3d5   : > { %v4022_v23 = vpop.permute.xlu1 %4021 }
 0x3d6   : > { %v4026_v48 = vadd.f32 %v4022_v23, %v3958_v26 }
 0x3d8   : > { %4049 = vrot.lane.b32.xlu1 %v4026_v48, %s9595_s8 }
 0x438   : > { %v4036_v13 = vpop.permute.xlu0 %4035 }
 0x439   : > { %v4059_v29 = vsel %vm215_vm0, 0.0, %v4036_v13 }
 0x43a   : > { %v4067_v55 = vsel %vm222_vm1, %v4059_v29, 0.0 }
 0x43b   : > { %v4103_v11 = vadd.f32 %v4449_v37, %v4067_v55 }
 0x43c   : > { %v4040_v6 = vpop.permute.xlu0 %4039 }
 0x43d   : > { %4112 = vst.msk [vmem:[%s8547_s7] sm:$0xff] %vm4111_vm8, %v4103_v11  ;;  %v4061_v7 = vsel %vm215_vm0, 0.0, %v4040_v6 }
 0x43e   : > { %v4038_v24 = vpop.permute.xlu1 %4037  ;;  %v4069_v35 = vsel %vm222_vm1, %v4061_v7, 0.0 }
 0x43f   : > { %v4060_v8 = vsel %vm215_vm0, 0.0, %v4038_v24  ;;  %v4105_v20 = vadd.f32 %v4450_v27, %v4069_v35 }
 0x440   : > { %v4068_v49 = vsel %vm222_vm1, %v4060_v8, 0.0  ;;  %v4044_v38 = vpop.permute.xlu0 %4043 }
 0x441   : > { %v4104_v59 = vadd.f32 %v4449_v37, %v4068_v49  ;;  %4115 = vst.msk [vmem:[%s8547_s7 + $0x10] sm:$0xff] %vm4111_vm8, %v4105_v20  ;;  %v4063_v32 = vsel %vm215_vm0, 0.0, %v4044_v38 }
 0x442   : > { %v4042_v14 = vpop.permute.xlu1 %4041  ;;  %v4071_v0 = vsel %vm222_vm1, %v4063_v32, 0.0 }
 0x443   : > { %4114 = vst.msk [vmem:[%s8547_s7 + $0x8] sm:$0x3] %vm4113_vm9, %v4104_v59  ;;  %v4062_v34 = vsel %vm215_vm0, 0.0, %v4042_v14  ;;  %v4107_v57 = vadd.f32 %v4451_v4, %v4071_v0 }
 0x444   : > { %v4070_v28 = vsel %vm222_vm1, %v4062_v34, 0.0  ;;  %v4048_v39 = vpop.permute.xlu0 %4047 }
 0x445   : > { %v4106_v61 = vadd.f32 %v4450_v27, %v4070_v28  ;;  %4117 = vst.msk [vmem:[%s8547_s7 + $0x20] sm:$0xff] %vm4111_vm8, %v4107_v57  ;;  %v4065_v1 = vsel %vm215_vm0, 0.0, %v4048_v39 }
 0x446   : > { %v4046_v45 = vpop.permute.xlu1 %4045  ;;  %v4073_v2 = vsel %vm222_vm1, %v4065_v1, 0.0 }
 0x447   : > { %4116 = vst.msk [vmem:[%s8547_s7 + $0x18] sm:$0x3] %vm4113_vm9, %v4106_v61  ;;  %v4064_v52 = vsel %vm215_vm0, 0.0, %v4046_v45  ;;  %v4109_v63 = vadd.f32 %v4452_v50, %v4073_v2 }
 0x448   : > { %v4072_v56 = vsel %vm222_vm1, %v4064_v52, 0.0 }
 0x449   : > { %v4108_v41 = vadd.f32 %v4451_v4, %v4072_v56  ;;  %4119 = vst.msk [vmem:[%s8547_s7 + $0x30] sm:$0xff] %vm4111_vm8, %v4109_v63 }
 0x44a   : > { %v4050_v25 = vpop.permute.xlu1 %4049 }
 0x44b   : > { %4118 = vst.msk [vmem:[%s8547_s7 + $0x28] sm:$0x3] %vm4113_vm9, %v4108_v41  ;;  %v4066_v44 = vsel %vm215_vm0, 0.0, %v4050_v25 }
 0x44c   : > { %v4074_v30 = vsel %vm222_vm1, %v4066_v44, 0.0 }
 0x44d   : > { %v4110_v62 = vadd.f32 %v4452_v50, %v4074_v30 }
 0x44f   : > { %4120 = vst.msk [vmem:[%s8547_s7 + $0x38] sm:$0x3] %vm4113_vm9, %v4110_v62 }
 0x450 PF: > { %s9599_s21 = sld [smem:[#allocation5_spill]] }
 0x456   : > { %s14_s12 = sadd.s32 1, %s9599_s21  }
 0x457   : > { %p11_p1 = scmp.ge.s32.totalorder %s14_s12, 10  }
 0x459   :  { %13 = sbr.rel (!%p11_p1) target bundleno = 6 (0x6), region = 67 }
 0x45e   :  { %4142 = vsyncpa [#allocation3], 1 }
 0x45f   :  { %4144 = vsyncpa [#allocation3 + $0x1], 1 }

</bundles_post_ra>
